<compile_context>
chip_gen: v7x
topology: tpu7x:2x2x1
jax: 0.10.0
libtpu: 0.0.40
codegen_flags: <defaults>
</compile_context>

<pallas_src>
import functools
import numpy as np
import jax
import jax.numpy as jnp
from jax.experimental import pallas as pl
from jax.experimental.pallas import tpu as pltpu


# ----------------------------------------------------------------------------
# layout / bias glue (plain JAX / numpy, trace-time or tiny)
# ----------------------------------------------------------------------------
def window_partition(x, ws):
    # x: [B, H, W, C] -> [B * nW, ws, ws, C]
    B, H, W, C = x.shape
    x = x.reshape(B, H // ws, ws, W // ws, ws, C)
    x = x.transpose(0, 1, 3, 2, 4, 5)
    return x.reshape(-1, ws, ws, C)


def window_reverse(windows, ws, H, W):
    # windows: [B * nW, ws, ws, C] -> [B, H, W, C]
    B = windows.shape[0] // ((H // ws) * (W // ws))
    x = windows.reshape(B, H // ws, W // ws, ws, ws, -1)
    x = x.transpose(0, 1, 3, 2, 4, 5)
    return x.reshape(B, H, W, -1)


def make_relative_coords_table(ws):
    # SwinV2 log-spaced continuous relative coordinates, shape [(2*ws-1)^2, 2]
    rh = jnp.arange(-(ws - 1), ws, dtype=jnp.float32)
    rw = jnp.arange(-(ws - 1), ws, dtype=jnp.float32)
    table = jnp.stack(jnp.meshgrid(rh, rw, indexing="ij"), axis=-1)  # (2ws-1, 2ws-1, 2)
    table = table / float(ws - 1)
    table = table * 8.0
    table = jnp.sign(table) * jnp.log2(jnp.abs(table) + 1.0) / np.log2(8.0)
    return table.reshape(-1, 2)


def make_relative_position_index(ws):
    coords = np.stack(np.meshgrid(np.arange(ws), np.arange(ws), indexing="ij"))  # 2, ws, ws
    cf = coords.reshape(2, -1)
    rel = cf[:, :, None] - cf[:, None, :]          # 2, N, N
    rel = rel.transpose(1, 2, 0).astype(np.int64)  # N, N, 2
    rel[:, :, 0] += ws - 1
    rel[:, :, 1] += ws - 1
    rel[:, :, 0] *= 2 * ws - 1
    return jnp.asarray(rel.sum(-1), dtype=jnp.int32)  # [N, N]


def make_attn_mask(H, W, ws, ss):
    # SW-MSA mask, shape [nW, N, N] with 0 / -100 entries (compile-time constant)
    img_mask = np.zeros((1, H, W, 1), np.float32)
    cnt = 0
    for h in (slice(0, -ws), slice(-ws, -ss), slice(-ss, None)):
        for w in (slice(0, -ws), slice(-ws, -ss), slice(-ss, None)):
            img_mask[:, h, w, :] = cnt
            cnt += 1
    mw = window_partition(jnp.asarray(img_mask), ws).reshape(-1, ws * ws)
    am = mw[:, None, :] - mw[:, :, None]
    return jnp.where(am != 0, -100.0, 0.0).astype(jnp.float32)


def compute_rel_pos_bias(p, ws, num_heads):
    # CPB MLP: Linear(2,512)+ReLU+Linear(512,H,bias=False); then 16*sigmoid; shape [H, N, N]
    table = make_relative_coords_table(ws)
    h = jnp.maximum(table @ p["cpb_w1"].T + p["cpb_b1"], 0.0)
    tbl = h @ p["cpb_w2"].T                               # [(2ws-1)^2, H]
    rpi = make_relative_position_index(ws)                # [N, N]
    N = ws * ws
    rpb = tbl[rpi.reshape(-1)].reshape(N, N, num_heads).transpose(2, 0, 1)
    return 16.0 * jax.nn.sigmoid(rpb)


# ----------------------------------------------------------------------------
# hardware policy helpers
# ----------------------------------------------------------------------------
@functools.lru_cache(maxsize=None)
def _tpu_vmem_capacity():
    try:
        return int(pltpu.get_tpu_info().vmem_capacity_bytes)
    except Exception:
        return 128 << 20   # v5e / v6e default if the query is unavailable


def _is_small_vmem_part():
    # v7x-class parts: 64 MiB VMEM per TensorCore and 2 TCs per chip.
    return _tpu_vmem_capacity() <= (64 << 20)


def _choose_group(Bw, nW, shifted, N):
    # Batch G windows per grid step: fill MXU rows while keeping VMEM slabs bounded.
    # 256 rows already fill a full 256x256 MXU pass (v7x); 128-MiB parts take 512 rows.
    small = _is_small_vmem_part()
    max_rows = 256 if small else 512
    gmax = max(1, min(Bw, max_rows // max(N, 1)))
    cands = []
    for g in range(1, gmax + 1):
        if Bw % g:
            continue
        if shifted and (nW % g):
            continue
        cands.append(g)
    if not cands:
        return 1
    if small:
        # keep >= 2 grid steps so both v7x TensorCores get work, when possible
        two = [g for g in cands if Bw // g >= 2]
        if two:
            cands = two
    return max(cands)


# ----------------------------------------------------------------------------
# fused Pallas kernel: window attention + MLP tail for one SwinTransformerBlock
# ----------------------------------------------------------------------------
def _layernorm(x, g, b, eps):
    mean = jnp.mean(x, axis=-1, keepdims=True)
    var = jnp.mean((x - mean) ** 2, axis=-1, keepdims=True)
    return (x - mean) * jax.lax.rsqrt(var + eps) * g + b


def _gelu_tanh(x):
    # tanh-GELU (tanh runs on the EUP); max abs deviation from nn.GELU is ~3e-4.
    c = 0.7978845608028654  # sqrt(2/pi)
    return 0.5 * x * (1.0 + jnp.tanh(c * (x + 0.044715 * (x * x * x))))


def _swin_block_body(x_ref, mask_ref, rpb_ref, qkv_wT_ref, qkv_b_ref,
                     proj_wT_ref, proj_b_ref, scale_ref,
                     n1g_ref, n1b_ref, n2g_ref, n2b_ref,
                     fc1_wT_ref, fc1_b_ref, fc2_wT_ref, fc2_b_ref,
                     o_ref, *, num_heads, head_dim, n_win_per_img, eps):
    G, N, C = x_ref.shape
    GN = G * N
    # x doubles as the residual shortcut (attention input == block input, window layout)
    x = x_ref[...].astype(jnp.float32).reshape(GN, C)

    # ---- qkv projection over G windows at once (bf16 MXU, f32 accumulate) ---
    qkv = jnp.dot(x.astype(jnp.bfloat16), qkv_wT_ref[...],
                  preferred_element_type=jnp.float32) + qkv_b_ref[...]      # [GN, 3C]

    if mask_ref is not None:
        # Resident (nW, N, N) mask; grouping preserves [B, nW] window ordering and
        # _choose_group enforces G | nW, so the G windows of this step are contiguous
        # in per-image mask index and never wrap.
        start = (pl.program_id(0) * G) % n_win_per_img
        mask_g = mask_ref[pl.ds(start, G)]                                   # [G, N, N]
    else:
        mask_g = None

    # ---- SwinV2 cosine window attention, per-head loop ----------------------
    # TODO(synk): head-batched rank-4 einsums are avoided (Mosaic dot_general /
    # transpose lowering limits); lane slices below move the same total bytes.
    heads = []
    for h in range(num_heads):                                  # static unroll
        s = h * head_dim
        q = qkv[:, s:s + head_dim]
        k = qkv[:, C + s:C + s + head_dim]
        v = qkv[:, 2 * C + s:2 * C + s + head_dim]
        # L2-normalize q, k (F.normalize, eps=1e-12) via EUP rsqrt
        qn = q * jax.lax.rsqrt(jnp.maximum(jnp.sum(q * q, axis=-1, keepdims=True), 1e-24))
        kn = k * jax.lax.rsqrt(jnp.maximum(jnp.sum(k * k, axis=-1, keepdims=True), 1e-24))
        qn = qn * scale_ref[h]                                   # fold clamped logit scale into q
        # bf16 operands for both attention matmuls (f32 accumulation on the MXU)
        qg = qn.reshape(G, N, head_dim).astype(jnp.bfloat16)
        kg = kn.reshape(G, N, head_dim).astype(jnp.bfloat16)
        vg = v.reshape(G, N, head_dim).astype(jnp.bfloat16)
        attn = jnp.einsum('gnd,gmd->gnm', qg, kg, preferred_element_type=jnp.float32)
        attn = attn + rpb_ref[h]
        if mask_g is not None:
            attn = attn + mask_g
        # max-subtraction is required: logits can reach ~scale + 16 before masking
        attn = attn - jnp.max(attn, axis=-1, keepdims=True)
        e = jnp.exp(attn)
        p = e * pl.reciprocal(jnp.sum(e, axis=-1, keepdims=True), approx=True)
        oh = jnp.einsum('gnm,gmd->gnd', p.astype(jnp.bfloat16), vg,
                        preferred_element_type=jnp.float32)
        heads.append(oh.reshape(GN, head_dim))
    a = jnp.concatenate(heads, axis=-1)                          # [GN, C], stays in vregs
    a = jnp.dot(a.astype(jnp.bfloat16), proj_wT_ref[...],
                preferred_element_type=jnp.float32) + proj_b_ref[...]

    # ---- residual + post-LN + MLP + post-LN + residual (fused tail) --------
    h1 = x + _layernorm(a, n1g_ref[...], n1b_ref[...], eps)
    z = jnp.dot(h1.astype(jnp.bfloat16), fc1_wT_ref[...],
                preferred_element_type=jnp.float32) + fc1_b_ref[...]
    z = _gelu_tanh(z)
    m = jnp.dot(z.astype(jnp.bfloat16), fc2_wT_ref[...],
                preferred_element_type=jnp.float32) + fc2_b_ref[...]
    out = h1 + _layernorm(m, n2g_ref[...], n2b_ref[...], eps)
    o_ref[...] = out.reshape(G, N, C).astype(o_ref.dtype)


def _swin_block_kernel_masked(x_ref, mask_ref, *rest, num_heads, head_dim,
                              n_win_per_img, eps):
    _swin_block_body(x_ref, mask_ref, *rest, num_heads=num_heads, head_dim=head_dim,
                     n_win_per_img=n_win_per_img, eps=eps)


def _swin_block_kernel_nomask(x_ref, *rest, num_heads, head_dim, n_win_per_img, eps):
    _swin_block_body(x_ref, None, *rest, num_heads=num_heads, head_dim=head_dim,
                     n_win_per_img=n_win_per_img, eps=eps)


def swin_block_windows_pallas(xw, attn_mask, rpb, qkv_wT, qkv_b, proj_wT, proj_b, scale,
                              n1g, n1b, n2g, n2b, fc1_wT, fc1_b, fc2_wT, fc2_b,
                              *, num_heads, G, nW):
    Bw, N, C = xw.shape
    hidden = fc1_wT.shape[1]
    head_dim = C // num_heads
    grid = (Bw // G,)
    vmem_cap = _tpu_vmem_capacity()

    # Resident, constant-index operand bytes (bf16 matmul weights + small f32 params).
    weight_bytes = 2 * (C * 3 * C + C * C + C * hidden + hidden * C)
    const_bytes = weight_bytes + 4 * (3 * C + 5 * C + hidden) + num_heads * N * N * 4
    if attn_mask is not None:
        const_bytes += int(np.prod(attn_mask.shape)) * 4
    # Single-buffer resident weights only when they are big enough to matter (v7x /
    # production dims); toy shapes keep the default double-buffering.
    single_buffer = weight_bytes > (4 << 20)

    def cspec(shape):
        if single_buffer:
            return pl.BlockSpec(shape, lambda i, _s=shape: (0,) * len(_s),
                                pipeline_mode=pl.Buffered(1))
        return pl.BlockSpec(shape, lambda i, _s=shape: (0,) * len(_s))

    x_spec = pl.BlockSpec((G, N, C), lambda i: (i, 0, 0))
    common_specs = [
        cspec((num_heads, N, N)),                               # rel-pos bias (resident)
        cspec((C, 3 * C)),                                      # qkv weight^T (bf16)
        cspec((1, 3 * C)),                                      # qkv bias
        cspec((C, C)),                                          # proj weight^T (bf16)
        cspec((1, C)),                                          # proj bias
        pl.BlockSpec(memory_space=pltpu.MemorySpace.SMEM),      # per-head logit scale
        cspec((1, C)),                                          # norm1 gamma
        cspec((1, C)),                                          # norm1 beta
        cspec((1, C)),                                          # norm2 gamma
        cspec((1, C)),                                          # norm2 beta
        cspec((C, hidden)),                                     # fc1 weight^T (bf16)
        cspec((1, hidden)),                                     # fc1 bias
        cspec((hidden, C)),                                     # fc2 weight^T (bf16)
        cspec((1, C)),                                          # fc2 bias
    ]
    common_args = (rpb, qkv_wT, qkv_b, proj_wT, proj_b, scale,
                   n1g, n1b, n2g, n2b, fc1_wT, fc1_b, fc2_wT, fc2_b)

    if attn_mask is not None:
        kernel = functools.partial(_swin_block_kernel_masked, num_heads=num_heads,
                                   head_dim=head_dim, n_win_per_img=nW, eps=1e-5)
        in_specs = [x_spec, cspec((nW, N, N))] + common_specs   # resident shift mask
        args = (xw, attn_mask) + common_args
    else:
        kernel = functools.partial(_swin_block_kernel_nomask, num_heads=num_heads,
                                   head_dim=head_dim, n_win_per_img=nW, eps=1e-5)
        in_specs = [x_spec] + common_specs
        args = (xw,) + common_args

    # VMEM budget: double-buffered streamed x/out blocks, resident constants (x1 if
    # single-buffered), plus the compiler-materialized f32 intermediates (qkv slab,
    # per-head logits / softmax temporaries, MLP hidden slab, attention output / h1).
    wfac = 1 if single_buffer else 2
    est = (2 * 2 * G * N * C * 4
           + wfac * const_bytes
           + G * N * 3 * C * 4
           + 3 * G * N * N * 4
           + G * N * hidden * 4
           + 3 * G * N * C * 4)
    vmem_limit = int(min(max(1.35 * est, 32 << 20), 0.875 * vmem_cap))

    # TODO(synk): verify the 1-D grid shards across both v7x TensorCores; if plain
    # "parallel" does not split it, switch this axis to pltpu.CORE_PARALLEL.
    return pl.pallas_call(
        kernel,
        out_shape=jax.ShapeDtypeStruct((Bw, N, C), xw.dtype),
        grid=grid,
        in_specs=in_specs,
        out_specs=pl.BlockSpec((G, N, C), lambda i: (i, 0, 0)),
        compiler_params=pltpu.CompilerParams(
            dimension_semantics=("parallel",),
            vmem_limit_bytes=vmem_limit),
    )(*args)


# ----------------------------------------------------------------------------
# SwinTransformerBlock / BasicLayer forward (glue + fused Pallas kernel)
# ----------------------------------------------------------------------------
def swin_block_forward(x, p, H, W, ws, shift, num_heads, attn_mask, rpb):
    B, L, C = x.shape
    N = ws * ws
    nW = (H // ws) * (W // ws)

    xh = x.reshape(B, H, W, C)
    if shift > 0:
        xh = jnp.roll(xh, shift=(-shift, -shift), axis=(1, 2))
    xw = window_partition(xh, ws).reshape(-1, N, C)
    Bw = xw.shape[0]
    G = _choose_group(Bw, nW, shift > 0, N)
    assert Bw % G == 0
    if shift > 0:
        # mask-index contiguity invariant: window rows are ordered [B, nW] and G | nW
        assert nW % G == 0

    qkv_b = jnp.concatenate(
        [p["q_bias"], jnp.zeros_like(p["v_bias"]), p["v_bias"]])[None, :]
    scale = jnp.exp(jnp.minimum(p["logit_scale"], jnp.log(1.0 / 0.01)))  # [num_heads]

    yw = swin_block_windows_pallas(
        xw, attn_mask, rpb,
        p["qkv_wT"].astype(jnp.bfloat16), qkv_b,
        p["proj_wT"].astype(jnp.bfloat16), p["proj_b"][None, :],
        scale,
        p["norm1_g"][None, :], p["norm1_b"][None, :],
        p["norm2_g"][None, :], p["norm2_b"][None, :],
        p["fc1_wT"].astype(jnp.bfloat16), p["fc1_b"][None, :],
        p["fc2_wT"].astype(jnp.bfloat16), p["fc2_b"][None, :],
        num_heads=num_heads, G=G, nW=nW)

    # the MLP tail is per-token, so computing it in window layout and reversing once
    # afterwards is equivalent to the reference ordering
    yh = window_reverse(yw.reshape(-1, ws, ws, C), ws, H, W)
    if shift > 0:
        yh = jnp.roll(yh, shift=(shift, shift), axis=(1, 2))
    return yh.reshape(B, L, C)


def basic_layer_forward(x, blocks_params, *, input_resolution, window_size, num_heads):
    H, W = input_resolution
    for i, p in enumerate(blocks_params):
        ws = window_size
        shift = 0 if i % 2 == 0 else window_size // 2
        if min(input_resolution) <= window_size:   # same guard as SwinTransformerBlock.__init__
            shift = 0
            ws = min(input_resolution)
        attn_mask = make_attn_mask(H, W, ws, shift) if shift > 0 else None
        rpb = compute_rel_pos_bias(p, ws, num_heads)
        x = swin_block_forward(x, p, H, W, ws, shift, num_heads, attn_mask, rpb)
    x_pre_down = x
    # downsample is None in this BasicLayer instance -> (x, x_pre_down) with x unchanged
    return x, x_pre_down


# ----------------------------------------------------------------------------
# deterministic parameter init (shapes follow the PyTorch module __init__)
# ----------------------------------------------------------------------------
def init_block_params(key, dim, num_heads, mlp_ratio):
    hidden = int(dim * mlp_ratio)
    ks = jax.random.split(key, 6)
    w = lambda k, shape: 0.02 * jax.random.normal(k, shape, jnp.float32)
    return {
        # WindowAttention
        "qkv_wT": w(ks[0], (dim, 3 * dim)),                  # Linear(dim, 3*dim, bias=False).T
        "q_bias": jnp.zeros((dim,), jnp.float32),
        "v_bias": jnp.zeros((dim,), jnp.float32),
        "logit_scale": jnp.log(10.0 * jnp.ones((num_heads,), jnp.float32)),
        "cpb_w1": w(ks[1], (512, 2)),
        "cpb_b1": jnp.zeros((512,), jnp.float32),
        "cpb_w2": w(ks[2], (num_heads, 512)),
        "proj_wT": w(ks[3], (dim, dim)),
        "proj_b": jnp.zeros((dim,), jnp.float32),
        # LayerNorms (standard torch init; _init_respostnorm is not invoked)
        "norm1_g": jnp.ones((dim,), jnp.float32), "norm1_b": jnp.zeros((dim,), jnp.float32),
        "norm2_g": jnp.ones((dim,), jnp.float32), "norm2_b": jnp.zeros((dim,), jnp.float32),
        # Mlp
        "fc1_wT": w(ks[4], (dim, hidden)), "fc1_b": jnp.zeros((hidden,), jnp.float32),
        "fc2_wT": w(ks[5], (hidden, dim)), "fc2_b": jnp.zeros((dim,), jnp.float32),
    }


# ----------------------------------------------------------------------------
if __name__ == "__main__":
    # BasicLayer(dim=32, input_resolution=(8,8), depth=2, num_heads=2, window_size=4)
    B, H, W, C = 2, 8, 8, 32
    depth, num_heads, window_size, mlp_ratio = 2, 2, 4, 4.0

    key = jax.random.PRNGKey(0)
    keys = jax.random.split(key, depth + 1)
    x = jax.random.normal(keys[0], (B, H * W, C), jnp.float32)
    params = [init_block_params(keys[i + 1], C, num_heads, mlp_ratio) for i in range(depth)]

    fwd = jax.jit(functools.partial(basic_layer_forward,
                                    input_resolution=(H, W),
                                    window_size=window_size,
                                    num_heads=num_heads))
    out, out_pre_down = fwd(x, params)
    jax.block_until_ready((out, out_pre_down))
    assert out.shape == (B, H * W, C) and out_pre_down.shape == (B, H * W, C)
    assert bool(jnp.all(jnp.isfinite(out)))
    print("KERNEL_OK")
</pallas_src>

<mosaic_0001>
module attributes {stable_mosaic.version = 11 : i64} {
  func.func @_swin_block_kernel_nomask(%arg0: i32, %arg1: memref<8x16x32xf32, #tpu.memory_space<vmem>>, %arg2: memref<2x16x16xf32, #tpu.memory_space<vmem>>, %arg3: memref<32x96xbf16, #tpu.memory_space<vmem>>, %arg4: memref<1x96xf32, #tpu.memory_space<vmem>>, %arg5: memref<32x32xbf16, #tpu.memory_space<vmem>>, %arg6: memref<1x32xf32, #tpu.memory_space<vmem>>, %arg7: memref<2xf32, #tpu.memory_space<smem>>, %arg8: memref<1x32xf32, #tpu.memory_space<vmem>>, %arg9: memref<1x32xf32, #tpu.memory_space<vmem>>, %arg10: memref<1x32xf32, #tpu.memory_space<vmem>>, %arg11: memref<1x32xf32, #tpu.memory_space<vmem>>, %arg12: memref<32x128xbf16, #tpu.memory_space<vmem>>, %arg13: memref<1x128xf32, #tpu.memory_space<vmem>>, %arg14: memref<128x32xbf16, #tpu.memory_space<vmem>>, %arg15: memref<1x32xf32, #tpu.memory_space<vmem>>, %arg16: memref<8x16x32xf32, #tpu.memory_space<vmem>>) attributes {dimension_semantics = [#tpu.dimension_semantics<parallel>], iteration_bounds = array<i64: 1>, scalar_prefetch = 0 : i64, scratch_operands = 0 : i64, tpu.core_type = #tpu.core_type<tc>, window_params = [{transform_indices = @transform_0, window_bounds = array<i64: 8, 16, 32>}, {pipeline_mode = #tpu.pipeline_mode<synchronous>, transform_indices = @transform_1, window_bounds = array<i64: 2, 16, 16>}, {pipeline_mode = #tpu.pipeline_mode<synchronous>, transform_indices = @transform_2, window_bounds = array<i64: 32, 96>}, {pipeline_mode = #tpu.pipeline_mode<synchronous>, transform_indices = @transform_3, window_bounds = array<i64: 1, 96>}, {pipeline_mode = #tpu.pipeline_mode<synchronous>, transform_indices = @transform_4, window_bounds = array<i64: 32, 32>}, {pipeline_mode = #tpu.pipeline_mode<synchronous>, transform_indices = @transform_5, window_bounds = array<i64: 1, 32>}, {transform_indices = @transform_6, window_bounds = array<i64: 2>}, {pipeline_mode = #tpu.pipeline_mode<synchronous>, transform_indices = @transform_7, window_bounds = array<i64: 1, 32>}, {pipeline_mode = #tpu.pipeline_mode<synchronous>, transform_indices = @transform_8, window_bounds = array<i64: 1, 32>}, {pipeline_mode = #tpu.pipeline_mode<synchronous>, transform_indices = @transform_9, window_bounds = array<i64: 1, 32>}, {pipeline_mode = #tpu.pipeline_mode<synchronous>, transform_indices = @transform_10, window_bounds = array<i64: 1, 32>}, {pipeline_mode = #tpu.pipeline_mode<synchronous>, transform_indices = @transform_11, window_bounds = array<i64: 32, 128>}, {pipeline_mode = #tpu.pipeline_mode<synchronous>, transform_indices = @transform_12, window_bounds = array<i64: 1, 128>}, {pipeline_mode = #tpu.pipeline_mode<synchronous>, transform_indices = @transform_13, window_bounds = array<i64: 128, 32>}, {pipeline_mode = #tpu.pipeline_mode<synchronous>, transform_indices = @transform_14, window_bounds = array<i64: 1, 32>}, {transform_indices = @transform_15, window_bounds = array<i64: 8, 16, 32>}]} {
    %c0 = arith.constant 0 : index
    %c0_0 = arith.constant 0 : index
    %c0_1 = arith.constant 0 : index
    %0 = vector.load %arg1[%c0, %c0_0, %c0_1] : memref<8x16x32xf32, #tpu.memory_space<vmem>>, vector<8x16x32xf32>
    %1 = vector.shape_cast %0 : vector<8x16x32xf32> to vector<128x32xf32>
    %2 = arith.truncf %1 : vector<128x32xf32> to vector<128x32xbf16>
    %c0_2 = arith.constant 0 : index
    %c0_3 = arith.constant 0 : index
    %3 = vector.load %arg3[%c0_2, %c0_3] : memref<32x96xbf16, #tpu.memory_space<vmem>>, vector<32x96xbf16>
    %cst = arith.constant dense<0.000000e+00> : vector<128x96xf32>
    %4 = tpu.matmul %2, %3, %cst {dimension_numbers = #tpu.dot_dimension_numbers<[1], [0], [0], [1], [0, 0, 1, 1], [], []>} : vector<128x32xbf16>, vector<32x96xbf16>, vector<128x96xf32> -> vector<128x96xf32>
    %c0_4 = arith.constant 0 : index
    %c0_5 = arith.constant 0 : index
    %5 = vector.load %arg4[%c0_4, %c0_5] : memref<1x96xf32, #tpu.memory_space<vmem>>, vector<1x96xf32>
    %6 = vector.broadcast %5 : vector<1x96xf32> to vector<128x96xf32>
    %7 = arith.addf %4, %6 : vector<128x96xf32>
    %8 = vector.extract_strided_slice %7 {offsets = [0, 0], sizes = [128, 16], strides = [1, 1]} : vector<128x96xf32> to vector<128x16xf32>
    %9 = vector.extract_strided_slice %7 {offsets = [0, 32], sizes = [128, 16], strides = [1, 1]} : vector<128x96xf32> to vector<128x16xf32>
    %10 = vector.extract_strided_slice %7 {offsets = [0, 64], sizes = [128, 16], strides = [1, 1]} : vector<128x96xf32> to vector<128x16xf32>
    %11 = arith.mulf %8, %8 : vector<128x16xf32>
    %cst_6 = arith.constant dense<0.000000e+00> : vector<128xf32>
    %12 = vector.multi_reduction <add>, %11, %cst_6 [1] : vector<128x16xf32> to vector<128xf32>
    %13 = vector.shape_cast %12 : vector<128xf32> to vector<128x1xf32>
    %cst_7 = arith.constant 1.000000e-24 : f32
    %14 = vector.broadcast %cst_7 : f32 to vector<128x1xf32>
    %15 = arith.maximumf %13, %14 : vector<128x1xf32>
    %16 = math.rsqrt %15 : vector<128x1xf32>
    %17 = vector.broadcast %16 : vector<128x1xf32> to vector<128x16xf32>
    %18 = arith.mulf %8, %17 : vector<128x16xf32>
    %19 = arith.mulf %9, %9 : vector<128x16xf32>
    %cst_8 = arith.constant dense<0.000000e+00> : vector<128xf32>
    %20 = vector.multi_reduction <add>, %19, %cst_8 [1] : vector<128x16xf32> to vector<128xf32>
    %21 = vector.shape_cast %20 : vector<128xf32> to vector<128x1xf32>
    %cst_9 = arith.constant 1.000000e-24 : f32
    %22 = vector.broadcast %cst_9 : f32 to vector<128x1xf32>
    %23 = arith.maximumf %21, %22 : vector<128x1xf32>
    %24 = math.rsqrt %23 : vector<128x1xf32>
    %25 = vector.broadcast %24 : vector<128x1xf32> to vector<128x16xf32>
    %26 = arith.mulf %9, %25 : vector<128x16xf32>
    %c0_10 = arith.constant 0 : index
    %27 = memref.load %arg7[%c0_10] : memref<2xf32, #tpu.memory_space<smem>>
    %28 = vector.broadcast %27 : f32 to vector<128x16xf32>
    %29 = arith.mulf %18, %28 : vector<128x16xf32>
    %30 = vector.shape_cast %29 : vector<128x16xf32> to vector<8x16x16xf32>
    %31 = arith.truncf %30 : vector<8x16x16xf32> to vector<8x16x16xbf16>
    %32 = vector.shape_cast %26 : vector<128x16xf32> to vector<8x16x16xf32>
    %33 = arith.truncf %32 : vector<8x16x16xf32> to vector<8x16x16xbf16>
    %34 = vector.shape_cast %10 : vector<128x16xf32> to vector<8x16x16xf32>
    %35 = arith.truncf %34 : vector<8x16x16xf32> to vector<8x16x16xbf16>
    "tpu.trace_start"() <{level = 10 : i32, message = "gnd,gmd->gnm"}> : () -> ()
    %cst_11 = arith.constant dense<0.000000e+00> : vector<8x16x16xf32>
    %36 = tpu.matmul %31, %33, %cst_11 {dimension_numbers = #tpu.dot_dimension_numbers<[2], [2], [1], [1], [0, 0, 0, 1, 1, 1], [0], [0]>} : vector<8x16x16xbf16>, vector<8x16x16xbf16>, vector<8x16x16xf32> -> vector<8x16x16xf32>
    "tpu.trace_stop"() : () -> ()
    %c0_12 = arith.constant 0 : index
    %c0_13 = arith.constant 0 : index
    %c0_14 = arith.constant 0 : index
    %37 = vector.load %arg2[%c0_12, %c0_13, %c0_14] : memref<2x16x16xf32, #tpu.memory_space<vmem>>, vector<1x16x16xf32>
    %38 = vector.shape_cast %37 : vector<1x16x16xf32> to vector<16x16xf32>
    %39 = vector.shape_cast %38 : vector<16x16xf32> to vector<1x16x16xf32>
    %40 = vector.broadcast %39 : vector<1x16x16xf32> to vector<8x16x16xf32>
    %41 = arith.addf %36, %40 : vector<8x16x16xf32>
    %cst_15 = arith.constant dense<0xFF800000> : vector<8x16xf32>
    %42 = vector.multi_reduction <maximumf>, %41, %cst_15 [2] : vector<8x16x16xf32> to vector<8x16xf32>
    %43 = vector.shape_cast %42 : vector<8x16xf32> to vector<8x16x1xf32>
    %44 = vector.broadcast %43 : vector<8x16x1xf32> to vector<8x16x16xf32>
    %45 = arith.subf %41, %44 : vector<8x16x16xf32>
    %46 = math.exp %45 : vector<8x16x16xf32>
    %cst_16 = arith.constant dense<0.000000e+00> : vector<8x16xf32>
    %47 = vector.multi_reduction <add>, %46, %cst_16 [2] : vector<8x16x16xf32> to vector<8x16xf32>
    %48 = vector.shape_cast %47 : vector<8x16xf32> to vector<8x16x1xf32>
    %49 = tpu.reciprocal %48 {approx = true} : vector<8x16x1xf32> -> vector<8x16x1xf32>
    %50 = vector.broadcast %49 : vector<8x16x1xf32> to vector<8x16x16xf32>
    %51 = arith.mulf %46, %50 : vector<8x16x16xf32>
    %52 = arith.truncf %51 : vector<8x16x16xf32> to vector<8x16x16xbf16>
    "tpu.trace_start"() <{level = 10 : i32, message = "gnm,gmd->gnd"}> : () -> ()
    %cst_17 = arith.constant dense<0.000000e+00> : vector<8x16x16xf32>
    %53 = tpu.matmul %52, %35, %cst_17 {dimension_numbers = #tpu.dot_dimension_numbers<[2], [1], [1], [2], [0, 0, 0, 1, 1, 2], [0], [0]>} : vector<8x16x16xbf16>, vector<8x16x16xbf16>, vector<8x16x16xf32> -> vector<8x16x16xf32>
    "tpu.trace_stop"() : () -> ()
    %54 = vector.shape_cast %53 : vector<8x16x16xf32> to vector<128x16xf32>
    %55 = vector.extract_strided_slice %7 {offsets = [0, 16], sizes = [128, 16], strides = [1, 1]} : vector<128x96xf32> to vector<128x16xf32>
    %56 = vector.extract_strided_slice %7 {offsets = [0, 48], sizes = [128, 16], strides = [1, 1]} : vector<128x96xf32> to vector<128x16xf32>
    %57 = vector.extract_strided_slice %7 {offsets = [0, 80], sizes = [128, 16], strides = [1, 1]} : vector<128x96xf32> to vector<128x16xf32>
    %58 = arith.mulf %55, %55 : vector<128x16xf32>
    %cst_18 = arith.constant dense<0.000000e+00> : vector<128xf32>
    %59 = vector.multi_reduction <add>, %58, %cst_18 [1] : vector<128x16xf32> to vector<128xf32>
    %60 = vector.shape_cast %59 : vector<128xf32> to vector<128x1xf32>
    %cst_19 = arith.constant 1.000000e-24 : f32
    %61 = vector.broadcast %cst_19 : f32 to vector<128x1xf32>
    %62 = arith.maximumf %60, %61 : vector<128x1xf32>
    %63 = math.rsqrt %62 : vector<128x1xf32>
    %64 = vector.broadcast %63 : vector<128x1xf32> to vector<128x16xf32>
    %65 = arith.mulf %55, %64 : vector<128x16xf32>
    %66 = arith.mulf %56, %56 : vector<128x16xf32>
    %cst_20 = arith.constant dense<0.000000e+00> : vector<128xf32>
    %67 = vector.multi_reduction <add>, %66, %cst_20 [1] : vector<128x16xf32> to vector<128xf32>
    %68 = vector.shape_cast %67 : vector<128xf32> to vector<128x1xf32>
    %cst_21 = arith.constant 1.000000e-24 : f32
    %69 = vector.broadcast %cst_21 : f32 to vector<128x1xf32>
    %70 = arith.maximumf %68, %69 : vector<128x1xf32>
    %71 = math.rsqrt %70 : vector<128x1xf32>
    %72 = vector.broadcast %71 : vector<128x1xf32> to vector<128x16xf32>
    %73 = arith.mulf %56, %72 : vector<128x16xf32>
    %c1 = arith.constant 1 : index
    %74 = memref.load %arg7[%c1] : memref<2xf32, #tpu.memory_space<smem>>
    %75 = vector.broadcast %74 : f32 to vector<128x16xf32>
    %76 = arith.mulf %65, %75 : vector<128x16xf32>
    %77 = vector.shape_cast %76 : vector<128x16xf32> to vector<8x16x16xf32>
    %78 = arith.truncf %77 : vector<8x16x16xf32> to vector<8x16x16xbf16>
    %79 = vector.shape_cast %73 : vector<128x16xf32> to vector<8x16x16xf32>
    %80 = arith.truncf %79 : vector<8x16x16xf32> to vector<8x16x16xbf16>
    %81 = vector.shape_cast %57 : vector<128x16xf32> to vector<8x16x16xf32>
    %82 = arith.truncf %81 : vector<8x16x16xf32> to vector<8x16x16xbf16>
    "tpu.trace_start"() <{level = 10 : i32, message = "gnd,gmd->gnm"}> : () -> ()
    %cst_22 = arith.constant dense<0.000000e+00> : vector<8x16x16xf32>
    %83 = tpu.matmul %78, %80, %cst_22 {dimension_numbers = #tpu.dot_dimension_numbers<[2], [2], [1], [1], [0, 0, 0, 1, 1, 1], [0], [0]>} : vector<8x16x16xbf16>, vector<8x16x16xbf16>, vector<8x16x16xf32> -> vector<8x16x16xf32>
    "tpu.trace_stop"() : () -> ()
    %c1_23 = arith.constant 1 : index
    %c0_24 = arith.constant 0 : index
    %c0_25 = arith.constant 0 : index
    %84 = vector.load %arg2[%c1_23, %c0_24, %c0_25] : memref<2x16x16xf32, #tpu.memory_space<vmem>>, vector<1x16x16xf32>
    %85 = vector.shape_cast %84 : vector<1x16x16xf32> to vector<16x16xf32>
    %86 = vector.shape_cast %85 : vector<16x16xf32> to vector<1x16x16xf32>
    %87 = vector.broadcast %86 : vector<1x16x16xf32> to vector<8x16x16xf32>
    %88 = arith.addf %83, %87 : vector<8x16x16xf32>
    %cst_26 = arith.constant dense<0xFF800000> : vector<8x16xf32>
    %89 = vector.multi_reduction <maximumf>, %88, %cst_26 [2] : vector<8x16x16xf32> to vector<8x16xf32>
    %90 = vector.shape_cast %89 : vector<8x16xf32> to vector<8x16x1xf32>
    %91 = vector.broadcast %90 : vector<8x16x1xf32> to vector<8x16x16xf32>
    %92 = arith.subf %88, %91 : vector<8x16x16xf32>
    %93 = math.exp %92 : vector<8x16x16xf32>
    %cst_27 = arith.constant dense<0.000000e+00> : vector<8x16xf32>
    %94 = vector.multi_reduction <add>, %93, %cst_27 [2] : vector<8x16x16xf32> to vector<8x16xf32>
    %95 = vector.shape_cast %94 : vector<8x16xf32> to vector<8x16x1xf32>
    %96 = tpu.reciprocal %95 {approx = true} : vector<8x16x1xf32> -> vector<8x16x1xf32>
    %97 = vector.broadcast %96 : vector<8x16x1xf32> to vector<8x16x16xf32>
    %98 = arith.mulf %93, %97 : vector<8x16x16xf32>
    %99 = arith.truncf %98 : vector<8x16x16xf32> to vector<8x16x16xbf16>
    "tpu.trace_start"() <{level = 10 : i32, message = "gnm,gmd->gnd"}> : () -> ()
    %cst_28 = arith.constant dense<0.000000e+00> : vector<8x16x16xf32>
    %100 = tpu.matmul %99, %82, %cst_28 {dimension_numbers = #tpu.dot_dimension_numbers<[2], [1], [1], [2], [0, 0, 0, 1, 1, 2], [0], [0]>} : vector<8x16x16xbf16>, vector<8x16x16xbf16>, vector<8x16x16xf32> -> vector<8x16x16xf32>
    "tpu.trace_stop"() : () -> ()
    %101 = vector.shape_cast %100 : vector<8x16x16xf32> to vector<128x16xf32>
    %102 = tpu.concatenate %54, %101 in 1 : vector<128x16xf32>, vector<128x16xf32> -> vector<128x32xf32>
    %103 = arith.truncf %102 : vector<128x32xf32> to vector<128x32xbf16>
    %c0_29 = arith.constant 0 : index
    %c0_30 = arith.constant 0 : index
    %104 = vector.load %arg5[%c0_29, %c0_30] : memref<32x32xbf16, #tpu.memory_space<vmem>>, vector<32x32xbf16>
    %cst_31 = arith.constant dense<0.000000e+00> : vector<128x32xf32>
    %105 = tpu.matmul %103, %104, %cst_31 {dimension_numbers = #tpu.dot_dimension_numbers<[1], [0], [0], [1], [0, 0, 1, 1], [], []>} : vector<128x32xbf16>, vector<32x32xbf16>, vector<128x32xf32> -> vector<128x32xf32>
    %c0_32 = arith.constant 0 : index
    %c0_33 = arith.constant 0 : index
    %106 = vector.load %arg6[%c0_32, %c0_33] : memref<1x32xf32, #tpu.memory_space<vmem>>, vector<1x32xf32>
    %107 = vector.broadcast %106 : vector<1x32xf32> to vector<128x32xf32>
    %108 = arith.addf %105, %107 : vector<128x32xf32>
    %c0_34 = arith.constant 0 : index
    %c0_35 = arith.constant 0 : index
    %109 = vector.load %arg8[%c0_34, %c0_35] : memref<1x32xf32, #tpu.memory_space<vmem>>, vector<1x32xf32>
    %c0_36 = arith.constant 0 : index
    %c0_37 = arith.constant 0 : index
    %110 = vector.load %arg9[%c0_36, %c0_37] : memref<1x32xf32, #tpu.memory_space<vmem>>, vector<1x32xf32>
    %cst_38 = arith.constant dense<0.000000e+00> : vector<128xf32>
    %111 = vector.multi_reduction <add>, %108, %cst_38 [1] : vector<128x32xf32> to vector<128xf32>
    %112 = vector.shape_cast %111 : vector<128xf32> to vector<128x1xf32>
    %cst_39 = arith.constant 3.200000e+01 : f32
    %113 = vector.broadcast %cst_39 : f32 to vector<128x1xf32>
    %114 = arith.divf %112, %113 : vector<128x1xf32>
    %115 = vector.broadcast %114 : vector<128x1xf32> to vector<128x32xf32>
    %116 = arith.subf %108, %115 : vector<128x32xf32>
    %117 = arith.mulf %116, %116 : vector<128x32xf32>
    %cst_40 = arith.constant dense<0.000000e+00> : vector<128xf32>
    %118 = vector.multi_reduction <add>, %117, %cst_40 [1] : vector<128x32xf32> to vector<128xf32>
    %119 = vector.shape_cast %118 : vector<128xf32> to vector<128x1xf32>
    %cst_41 = arith.constant 3.200000e+01 : f32
    %120 = vector.broadcast %cst_41 : f32 to vector<128x1xf32>
    %121 = arith.divf %119, %120 : vector<128x1xf32>
    %122 = vector.broadcast %114 : vector<128x1xf32> to vector<128x32xf32>
    %123 = arith.subf %108, %122 : vector<128x32xf32>
    %cst_42 = arith.constant 9.99999974E-6 : f32
    %124 = vector.broadcast %cst_42 : f32 to vector<128x1xf32>
    %125 = arith.addf %121, %124 : vector<128x1xf32>
    %126 = math.rsqrt %125 : vector<128x1xf32>
    %127 = vector.broadcast %126 : vector<128x1xf32> to vector<128x32xf32>
    %128 = arith.mulf %123, %127 : vector<128x32xf32>
    %129 = vector.broadcast %109 : vector<1x32xf32> to vector<128x32xf32>
    %130 = arith.mulf %128, %129 : vector<128x32xf32>
    %131 = vector.broadcast %110 : vector<1x32xf32> to vector<128x32xf32>
    %132 = arith.addf %130, %131 : vector<128x32xf32>
    %133 = arith.addf %1, %132 : vector<128x32xf32>
    %134 = arith.truncf %133 : vector<128x32xf32> to vector<128x32xbf16>
    %c0_43 = arith.constant 0 : index
    %c0_44 = arith.constant 0 : index
    %135 = vector.load %arg12[%c0_43, %c0_44] : memref<32x128xbf16, #tpu.memory_space<vmem>>, vector<32x128xbf16>
    %cst_45 = arith.constant dense<0.000000e+00> : vector<128x128xf32>
    %136 = tpu.matmul %134, %135, %cst_45 {dimension_numbers = #tpu.dot_dimension_numbers<[1], [0], [0], [1], [0, 0, 1, 1], [], []>} : vector<128x32xbf16>, vector<32x128xbf16>, vector<128x128xf32> -> vector<128x128xf32>
    %c0_46 = arith.constant 0 : index
    %c0_47 = arith.constant 0 : index
    %137 = vector.load %arg13[%c0_46, %c0_47] : memref<1x128xf32, #tpu.memory_space<vmem>>, vector<1x128xf32>
    %138 = vector.broadcast %137 : vector<1x128xf32> to vector<128x128xf32>
    %139 = arith.addf %136, %138 : vector<128x128xf32>
    %cst_48 = arith.constant 5.000000e-01 : f32
    %140 = vector.broadcast %cst_48 : f32 to vector<128x128xf32>
    %141 = arith.mulf %140, %139 : vector<128x128xf32>
    %142 = arith.mulf %139, %139 : vector<128x128xf32>
    %143 = arith.mulf %142, %139 : vector<128x128xf32>
    %cst_49 = arith.constant 4.471500e-02 : f32
    %144 = vector.broadcast %cst_49 : f32 to vector<128x128xf32>
    %145 = arith.mulf %144, %143 : vector<128x128xf32>
    %146 = arith.addf %139, %145 : vector<128x128xf32>
    %cst_50 = arith.constant 0.797884583 : f32
    %147 = vector.broadcast %cst_50 : f32 to vector<128x128xf32>
    %148 = arith.mulf %147, %146 : vector<128x128xf32>
    %149 = math.tanh %148 : vector<128x128xf32>
    %cst_51 = arith.constant 1.000000e+00 : f32
    %150 = vector.broadcast %cst_51 : f32 to vector<128x128xf32>
    %151 = arith.addf %150, %149 : vector<128x128xf32>
    %152 = arith.mulf %141, %151 : vector<128x128xf32>
    %153 = arith.truncf %152 : vector<128x128xf32> to vector<128x128xbf16>
    %c0_52 = arith.constant 0 : index
    %c0_53 = arith.constant 0 : index
    %154 = vector.load %arg14[%c0_52, %c0_53] : memref<128x32xbf16, #tpu.memory_space<vmem>>, vector<128x32xbf16>
    %cst_54 = arith.constant dense<0.000000e+00> : vector<128x32xf32>
    %155 = tpu.matmul %153, %154, %cst_54 {dimension_numbers = #tpu.dot_dimension_numbers<[1], [0], [0], [1], [0, 0, 1, 1], [], []>} : vector<128x128xbf16>, vector<128x32xbf16>, vector<128x32xf32> -> vector<128x32xf32>
    %c0_55 = arith.constant 0 : index
    %c0_56 = arith.constant 0 : index
    %156 = vector.load %arg15[%c0_55, %c0_56] : memref<1x32xf32, #tpu.memory_space<vmem>>, vector<1x32xf32>
    %157 = vector.broadcast %156 : vector<1x32xf32> to vector<128x32xf32>
    %158 = arith.addf %155, %157 : vector<128x32xf32>
    %c0_57 = arith.constant 0 : index
    %c0_58 = arith.constant 0 : index
    %159 = vector.load %arg10[%c0_57, %c0_58] : memref<1x32xf32, #tpu.memory_space<vmem>>, vector<1x32xf32>
    %c0_59 = arith.constant 0 : index
    %c0_60 = arith.constant 0 : index
    %160 = vector.load %arg11[%c0_59, %c0_60] : memref<1x32xf32, #tpu.memory_space<vmem>>, vector<1x32xf32>
    %cst_61 = arith.constant dense<0.000000e+00> : vector<128xf32>
    %161 = vector.multi_reduction <add>, %158, %cst_61 [1] : vector<128x32xf32> to vector<128xf32>
    %162 = vector.shape_cast %161 : vector<128xf32> to vector<128x1xf32>
    %cst_62 = arith.constant 3.200000e+01 : f32
    %163 = vector.broadcast %cst_62 : f32 to vector<128x1xf32>
    %164 = arith.divf %162, %163 : vector<128x1xf32>
    %165 = vector.broadcast %164 : vector<128x1xf32> to vector<128x32xf32>
    %166 = arith.subf %158, %165 : vector<128x32xf32>
    %167 = arith.mulf %166, %166 : vector<128x32xf32>
    %cst_63 = arith.constant dense<0.000000e+00> : vector<128xf32>
    %168 = vector.multi_reduction <add>, %167, %cst_63 [1] : vector<128x32xf32> to vector<128xf32>
    %169 = vector.shape_cast %168 : vector<128xf32> to vector<128x1xf32>
    %cst_64 = arith.constant 3.200000e+01 : f32
    %170 = vector.broadcast %cst_64 : f32 to vector<128x1xf32>
    %171 = arith.divf %169, %170 : vector<128x1xf32>
    %172 = vector.broadcast %164 : vector<128x1xf32> to vector<128x32xf32>
    %173 = arith.subf %158, %172 : vector<128x32xf32>
    %cst_65 = arith.constant 9.99999974E-6 : f32
    %174 = vector.broadcast %cst_65 : f32 to vector<128x1xf32>
    %175 = arith.addf %171, %174 : vector<128x1xf32>
    %176 = math.rsqrt %175 : vector<128x1xf32>
    %177 = vector.broadcast %176 : vector<128x1xf32> to vector<128x32xf32>
    %178 = arith.mulf %173, %177 : vector<128x32xf32>
    %179 = vector.broadcast %159 : vector<1x32xf32> to vector<128x32xf32>
    %180 = arith.mulf %178, %179 : vector<128x32xf32>
    %181 = vector.broadcast %160 : vector<1x32xf32> to vector<128x32xf32>
    %182 = arith.addf %180, %181 : vector<128x32xf32>
    %183 = arith.addf %133, %182 : vector<128x32xf32>
    %184 = vector.shape_cast %183 : vector<128x32xf32> to vector<8x16x32xf32>
    %c0_66 = arith.constant 0 : index
    %c0_67 = arith.constant 0 : index
    %c0_68 = arith.constant 0 : index
    %185 = vector.load %arg16[%c0_66, %c0_67, %c0_68] : memref<8x16x32xf32, #tpu.memory_space<vmem>>, vector<8x16x32xf32>
    tpu.vector_store %arg16[%c0_66, %c0_67, %c0_68], %184 {strides = array<i32>} : memref<8x16x32xf32, #tpu.memory_space<vmem>>, vector<8x16x32xf32>,
    return
  }
  func.func @transform_0(%arg0: i32) -> (i32, i32, i32) {
    %c0_i32 = arith.constant 0 : i32
    %c0_i32_0 = arith.constant 0 : i32
    %c0_i32_1 = arith.constant 0 : i32
    return %arg0, %c0_i32, %c0_i32_0 : i32, i32, i32
  }
  func.func @transform_1(%arg0: i32) -> (i32, i32, i32) {
    %c0_i32 = arith.constant 0 : i32
    %c0_i32_0 = arith.constant 0 : i32
    %c0_i32_1 = arith.constant 0 : i32
    %c0_i32_2 = arith.constant 0 : i32
    return %c0_i32, %c0_i32_0, %c0_i32_1 : i32, i32, i32
  }
  func.func @transform_2(%arg0: i32) -> (i32, i32) {
    %c0_i32 = arith.constant 0 : i32
    %c0_i32_0 = arith.constant 0 : i32
    %c0_i32_1 = arith.constant 0 : i32
    return %c0_i32, %c0_i32_0 : i32, i32
  }
  func.func @transform_3(%arg0: i32) -> (i32, i32) {
    %c0_i32 = arith.constant 0 : i32
    %c0_i32_0 = arith.constant 0 : i32
    %c0_i32_1 = arith.constant 0 : i32
    return %c0_i32, %c0_i32_0 : i32, i32
  }
  func.func @transform_4(%arg0: i32) -> (i32, i32) {
    %c0_i32 = arith.constant 0 : i32
    %c0_i32_0 = arith.constant 0 : i32
    %c0_i32_1 = arith.constant 0 : i32
    return %c0_i32, %c0_i32_0 : i32, i32
  }
  func.func @transform_5(%arg0: i32) -> (i32, i32) {
    %c0_i32 = arith.constant 0 : i32
    %c0_i32_0 = arith.constant 0 : i32
    %c0_i32_1 = arith.constant 0 : i32
    return %c0_i32, %c0_i32_0 : i32, i32
  }
  func.func @transform_6(%arg0: i32) -> i32 {
    %c0_i32 = arith.constant 0 : i32
    %c0_i32_0 = arith.constant 0 : i32
    return %c0_i32 : i32
  }
  func.func @transform_7(%arg0: i32) -> (i32, i32) {
    %c0_i32 = arith.constant 0 : i32
    %c0_i32_0 = arith.constant 0 : i32
    %c0_i32_1 = arith.constant 0 : i32
    return %c0_i32, %c0_i32_0 : i32, i32
  }
  func.func @transform_8(%arg0: i32) -> (i32, i32) {
    %c0_i32 = arith.constant 0 : i32
    %c0_i32_0 = arith.constant 0 : i32
    %c0_i32_1 = arith.constant 0 : i32
    return %c0_i32, %c0_i32_0 : i32, i32
  }
  func.func @transform_9(%arg0: i32) -> (i32, i32) {
    %c0_i32 = arith.constant 0 : i32
    %c0_i32_0 = arith.constant 0 : i32
    %c0_i32_1 = arith.constant 0 : i32
    return %c0_i32, %c0_i32_0 : i32, i32
  }
  func.func @transform_10(%arg0: i32) -> (i32, i32) {
    %c0_i32 = arith.constant 0 : i32
    %c0_i32_0 = arith.constant 0 : i32
    %c0_i32_1 = arith.constant 0 : i32
    return %c0_i32, %c0_i32_0 : i32, i32
  }
  func.func @transform_11(%arg0: i32) -> (i32, i32) {
    %c0_i32 = arith.constant 0 : i32
    %c0_i32_0 = arith.constant 0 : i32
    %c0_i32_1 = arith.constant 0 : i32
    return %c0_i32, %c0_i32_0 : i32, i32
  }
  func.func @transform_12(%arg0: i32) -> (i32, i32) {
    %c0_i32 = arith.constant 0 : i32
    %c0_i32_0 = arith.constant 0 : i32
    %c0_i32_1 = arith.constant 0 : i32
    return %c0_i32, %c0_i32_0 : i32, i32
  }
  func.func @transform_13(%arg0: i32) -> (i32, i32) {
    %c0_i32 = arith.constant 0 : i32
    %c0_i32_0 = arith.constant 0 : i32
    %c0_i32_1 = arith.constant 0 : i32
    return %c0_i32, %c0_i32_0 : i32, i32
  }
  func.func @transform_14(%arg0: i32) -> (i32, i32) {
    %c0_i32 = arith.constant 0 : i32
    %c0_i32_0 = arith.constant 0 : i32
    %c0_i32_1 = arith.constant 0 : i32
    return %c0_i32, %c0_i32_0 : i32, i32
  }
  func.func @transform_15(%arg0: i32) -> (i32, i32, i32) {
    %c0_i32 = arith.constant 0 : i32
    %c0_i32_0 = arith.constant 0 : i32
    %c0_i32_1 = arith.constant 0 : i32
    return %arg0, %c0_i32, %c0_i32_0 : i32, i32, i32
  }
}

module attributes {stable_mosaic.version = 11 : i64} {
  func.func @_swin_block_kernel_masked(%arg0: i32, %arg1: memref<4x16x32xf32, #tpu.memory_space<vmem>>, %arg2: memref<4x16x16xf32, #tpu.memory_space<vmem>>, %arg3: memref<2x16x16xf32, #tpu.memory_space<vmem>>, %arg4: memref<32x96xbf16, #tpu.memory_space<vmem>>, %arg5: memref<1x96xf32, #tpu.memory_space<vmem>>, %arg6: memref<32x32xbf16, #tpu.memory_space<vmem>>, %arg7: memref<1x32xf32, #tpu.memory_space<vmem>>, %arg8: memref<2xf32, #tpu.memory_space<smem>>, %arg9: memref<1x32xf32, #tpu.memory_space<vmem>>, %arg10: memref<1x32xf32, #tpu.memory_space<vmem>>, %arg11: memref<1x32xf32, #tpu.memory_space<vmem>>, %arg12: memref<1x32xf32, #tpu.memory_space<vmem>>, %arg13: memref<32x128xbf16, #tpu.memory_space<vmem>>, %arg14: memref<1x128xf32, #tpu.memory_space<vmem>>, %arg15: memref<128x32xbf16, #tpu.memory_space<vmem>>, %arg16: memref<1x32xf32, #tpu.memory_space<vmem>>, %arg17: memref<4x16x32xf32, #tpu.memory_space<vmem>>) attributes {dimension_semantics = [#tpu.dimension_semantics<parallel>], iteration_bounds = array<i64: 2>, scalar_prefetch = 0 : i64, scratch_operands = 0 : i64, tpu.core_type = #tpu.core_type<tc>, window_params = [{transform_indices = @transform_0, window_bounds = array<i64: 4, 16, 32>}, {pipeline_mode = #tpu.pipeline_mode<synchronous>, transform_indices = @transform_1, window_bounds = array<i64: 4, 16, 16>}, {pipeline_mode = #tpu.pipeline_mode<synchronous>, transform_indices = @transform_2, window_bounds = array<i64: 2, 16, 16>}, {pipeline_mode = #tpu.pipeline_mode<synchronous>, transform_indices = @transform_3, window_bounds = array<i64: 32, 96>}, {pipeline_mode = #tpu.pipeline_mode<synchronous>, transform_indices = @transform_4, window_bounds = array<i64: 1, 96>}, {pipeline_mode = #tpu.pipeline_mode<synchronous>, transform_indices = @transform_5, window_bounds = array<i64: 32, 32>}, {pipeline_mode = #tpu.pipeline_mode<synchronous>, transform_indices = @transform_6, window_bounds = array<i64: 1, 32>}, {transform_indices = @transform_7, window_bounds = array<i64: 2>}, {pipeline_mode = #tpu.pipeline_mode<synchronous>, transform_indices = @transform_8, window_bounds = array<i64: 1, 32>}, {pipeline_mode = #tpu.pipeline_mode<synchronous>, transform_indices = @transform_9, window_bounds = array<i64: 1, 32>}, {pipeline_mode = #tpu.pipeline_mode<synchronous>, transform_indices = @transform_10, window_bounds = array<i64: 1, 32>}, {pipeline_mode = #tpu.pipeline_mode<synchronous>, transform_indices = @transform_11, window_bounds = array<i64: 1, 32>}, {pipeline_mode = #tpu.pipeline_mode<synchronous>, transform_indices = @transform_12, window_bounds = array<i64: 32, 128>}, {pipeline_mode = #tpu.pipeline_mode<synchronous>, transform_indices = @transform_13, window_bounds = array<i64: 1, 128>}, {pipeline_mode = #tpu.pipeline_mode<synchronous>, transform_indices = @transform_14, window_bounds = array<i64: 128, 32>}, {pipeline_mode = #tpu.pipeline_mode<synchronous>, transform_indices = @transform_15, window_bounds = array<i64: 1, 32>}, {transform_indices = @transform_16, window_bounds = array<i64: 4, 16, 32>}]} {
    %c0 = arith.constant 0 : index
    %c0_0 = arith.constant 0 : index
    %c0_1 = arith.constant 0 : index
    %0 = vector.load %arg1[%c0, %c0_0, %c0_1] : memref<4x16x32xf32, #tpu.memory_space<vmem>>, vector<4x16x32xf32>
    %1 = vector.shape_cast %0 : vector<4x16x32xf32> to vector<64x32xf32>
    %2 = arith.truncf %1 : vector<64x32xf32> to vector<64x32xbf16>
    %c0_2 = arith.constant 0 : index
    %c0_3 = arith.constant 0 : index
    %3 = vector.load %arg4[%c0_2, %c0_3] : memref<32x96xbf16, #tpu.memory_space<vmem>>, vector<32x96xbf16>
    %cst = arith.constant dense<0.000000e+00> : vector<64x96xf32>
    %4 = tpu.matmul %2, %3, %cst {dimension_numbers = #tpu.dot_dimension_numbers<[1], [0], [0], [1], [0, 0, 1, 1], [], []>} : vector<64x32xbf16>, vector<32x96xbf16>, vector<64x96xf32> -> vector<64x96xf32>
    %c0_4 = arith.constant 0 : index
    %c0_5 = arith.constant 0 : index
    %5 = vector.load %arg5[%c0_4, %c0_5] : memref<1x96xf32, #tpu.memory_space<vmem>>, vector<1x96xf32>
    %6 = vector.broadcast %5 : vector<1x96xf32> to vector<64x96xf32>
    %7 = arith.addf %4, %6 : vector<64x96xf32>
    %c4_i32 = arith.constant 4 : i32
    %8 = arith.muli %arg0, %c4_i32 : i32
    %c4_i32_6 = arith.constant 4 : i32
    %c0_i32 = arith.constant 0 : i32
    %9 = arith.cmpi eq, %c4_i32_6, %c0_i32 : i32
    %c1_i32 = arith.constant 1 : i32
    %10 = arith.select %9, %c1_i32, %c4_i32_6 : i32
    %11 = arith.remsi %8, %10 : i32
    %c0_i32_7 = arith.constant 0 : i32
    %12 = arith.cmpi ne, %11, %c0_i32_7 : i32
    %c0_i32_8 = arith.constant 0 : i32
    %13 = arith.cmpi slt, %11, %c0_i32_8 : i32
    %c0_i32_9 = arith.constant 0 : i32
    %14 = arith.cmpi slt, %10, %c0_i32_9 : i32
    %15 = arith.xori %13, %14 : i1
    %16 = arith.andi %15, %12 : i1
    %17 = arith.addi %11, %10 : i32
    %18 = arith.select %16, %17, %11 : i32
    %19 = arith.index_cast %18 : i32 to index
    %c0_10 = arith.constant 0 : index
    %c0_11 = arith.constant 0 : index
    %20 = vector.load %arg2[%19, %c0_10, %c0_11] : memref<4x16x16xf32, #tpu.memory_space<vmem>>, vector<4x16x16xf32>
    %21 = vector.extract_strided_slice %7 {offsets = [0, 0], sizes = [64, 16], strides = [1, 1]} : vector<64x96xf32> to vector<64x16xf32>
    %22 = vector.extract_strided_slice %7 {offsets = [0, 32], sizes = [64, 16], strides = [1, 1]} : vector<64x96xf32> to vector<64x16xf32>
    %23 = vector.extract_strided_slice %7 {offsets = [0, 64], sizes = [64, 16], strides = [1, 1]} : vector<64x96xf32> to vector<64x16xf32>
    %24 = arith.mulf %21, %21 : vector<64x16xf32>
    %cst_12 = arith.constant dense<0.000000e+00> : vector<64xf32>
    %25 = vector.multi_reduction <add>, %24, %cst_12 [1] : vector<64x16xf32> to vector<64xf32>
    %26 = vector.shape_cast %25 : vector<64xf32> to vector<64x1xf32>
    %cst_13 = arith.constant 1.000000e-24 : f32
    %27 = vector.broadcast %cst_13 : f32 to vector<64x1xf32>
    %28 = arith.maximumf %26, %27 : vector<64x1xf32>
    %29 = math.rsqrt %28 : vector<64x1xf32>
    %30 = vector.broadcast %29 : vector<64x1xf32> to vector<64x16xf32>
    %31 = arith.mulf %21, %30 : vector<64x16xf32>
    %32 = arith.mulf %22, %22 : vector<64x16xf32>
    %cst_14 = arith.constant dense<0.000000e+00> : vector<64xf32>
    %33 = vector.multi_reduction <add>, %32, %cst_14 [1] : vector<64x16xf32> to vector<64xf32>
    %34 = vector.shape_cast %33 : vector<64xf32> to vector<64x1xf32>
    %cst_15 = arith.constant 1.000000e-24 : f32
    %35 = vector.broadcast %cst_15 : f32 to vector<64x1xf32>
    %36 = arith.maximumf %34, %35 : vector<64x1xf32>
    %37 = math.rsqrt %36 : vector<64x1xf32>
    %38 = vector.broadcast %37 : vector<64x1xf32> to vector<64x16xf32>
    %39 = arith.mulf %22, %38 : vector<64x16xf32>
    %c0_16 = arith.constant 0 : index
    %40 = memref.load %arg8[%c0_16] : memref<2xf32, #tpu.memory_space<smem>>
    %41 = vector.broadcast %40 : f32 to vector<64x16xf32>
    %42 = arith.mulf %31, %41 : vector<64x16xf32>
    %43 = vector.shape_cast %42 : vector<64x16xf32> to vector<4x16x16xf32>
    %44 = arith.truncf %43 : vector<4x16x16xf32> to vector<4x16x16xbf16>
    %45 = vector.shape_cast %39 : vector<64x16xf32> to vector<4x16x16xf32>
    %46 = arith.truncf %45 : vector<4x16x16xf32> to vector<4x16x16xbf16>
    %47 = vector.shape_cast %23 : vector<64x16xf32> to vector<4x16x16xf32>
    %48 = arith.truncf %47 : vector<4x16x16xf32> to vector<4x16x16xbf16>
    "tpu.trace_start"() <{level = 10 : i32, message = "gnd,gmd->gnm"}> : () -> ()
    %cst_17 = arith.constant dense<0.000000e+00> : vector<4x16x16xf32>
    %49 = tpu.matmul %44, %46, %cst_17 {dimension_numbers = #tpu.dot_dimension_numbers<[2], [2], [1], [1], [0, 0, 0, 1, 1, 1], [0], [0]>} : vector<4x16x16xbf16>, vector<4x16x16xbf16>, vector<4x16x16xf32> -> vector<4x16x16xf32>
    "tpu.trace_stop"() : () -> ()
    %c0_18 = arith.constant 0 : index
    %c0_19 = arith.constant 0 : index
    %c0_20 = arith.constant 0 : index
    %50 = vector.load %arg3[%c0_18, %c0_19, %c0_20] : memref<2x16x16xf32, #tpu.memory_space<vmem>>, vector<1x16x16xf32>
    %51 = vector.shape_cast %50 : vector<1x16x16xf32> to vector<16x16xf32>
    %52 = vector.shape_cast %51 : vector<16x16xf32> to vector<1x16x16xf32>
    %53 = vector.broadcast %52 : vector<1x16x16xf32> to vector<4x16x16xf32>
    %54 = arith.addf %49, %53 : vector<4x16x16xf32>
    %55 = arith.addf %54, %20 : vector<4x16x16xf32>
    %cst_21 = arith.constant dense<0xFF800000> : vector<4x16xf32>
    %56 = vector.multi_reduction <maximumf>, %55, %cst_21 [2] : vector<4x16x16xf32> to vector<4x16xf32>
    %57 = vector.shape_cast %56 : vector<4x16xf32> to vector<4x16x1xf32>
    %58 = vector.broadcast %57 : vector<4x16x1xf32> to vector<4x16x16xf32>
    %59 = arith.subf %55, %58 : vector<4x16x16xf32>
    %60 = math.exp %59 : vector<4x16x16xf32>
    %cst_22 = arith.constant dense<0.000000e+00> : vector<4x16xf32>
    %61 = vector.multi_reduction <add>, %60, %cst_22 [2] : vector<4x16x16xf32> to vector<4x16xf32>
    %62 = vector.shape_cast %61 : vector<4x16xf32> to vector<4x16x1xf32>
    %63 = tpu.reciprocal %62 {approx = true} : vector<4x16x1xf32> -> vector<4x16x1xf32>
    %64 = vector.broadcast %63 : vector<4x16x1xf32> to vector<4x16x16xf32>
    %65 = arith.mulf %60, %64 : vector<4x16x16xf32>
    %66 = arith.truncf %65 : vector<4x16x16xf32> to vector<4x16x16xbf16>
    "tpu.trace_start"() <{level = 10 : i32, message = "gnm,gmd->gnd"}> : () -> ()
    %cst_23 = arith.constant dense<0.000000e+00> : vector<4x16x16xf32>
    %67 = tpu.matmul %66, %48, %cst_23 {dimension_numbers = #tpu.dot_dimension_numbers<[2], [1], [1], [2], [0, 0, 0, 1, 1, 2], [0], [0]>} : vector<4x16x16xbf16>, vector<4x16x16xbf16>, vector<4x16x16xf32> -> vector<4x16x16xf32>
    "tpu.trace_stop"() : () -> ()
    %68 = vector.shape_cast %67 : vector<4x16x16xf32> to vector<64x16xf32>
    %69 = vector.extract_strided_slice %7 {offsets = [0, 16], sizes = [64, 16], strides = [1, 1]} : vector<64x96xf32> to vector<64x16xf32>
    %70 = vector.extract_strided_slice %7 {offsets = [0, 48], sizes = [64, 16], strides = [1, 1]} : vector<64x96xf32> to vector<64x16xf32>
    %71 = vector.extract_strided_slice %7 {offsets = [0, 80], sizes = [64, 16], strides = [1, 1]} : vector<64x96xf32> to vector<64x16xf32>
    %72 = arith.mulf %69, %69 : vector<64x16xf32>
    %cst_24 = arith.constant dense<0.000000e+00> : vector<64xf32>
    %73 = vector.multi_reduction <add>, %72, %cst_24 [1] : vector<64x16xf32> to vector<64xf32>
    %74 = vector.shape_cast %73 : vector<64xf32> to vector<64x1xf32>
    %cst_25 = arith.constant 1.000000e-24 : f32
    %75 = vector.broadcast %cst_25 : f32 to vector<64x1xf32>
    %76 = arith.maximumf %74, %75 : vector<64x1xf32>
    %77 = math.rsqrt %76 : vector<64x1xf32>
    %78 = vector.broadcast %77 : vector<64x1xf32> to vector<64x16xf32>
    %79 = arith.mulf %69, %78 : vector<64x16xf32>
    %80 = arith.mulf %70, %70 : vector<64x16xf32>
    %cst_26 = arith.constant dense<0.000000e+00> : vector<64xf32>
    %81 = vector.multi_reduction <add>, %80, %cst_26 [1] : vector<64x16xf32> to vector<64xf32>
    %82 = vector.shape_cast %81 : vector<64xf32> to vector<64x1xf32>
    %cst_27 = arith.constant 1.000000e-24 : f32
    %83 = vector.broadcast %cst_27 : f32 to vector<64x1xf32>
    %84 = arith.maximumf %82, %83 : vector<64x1xf32>
    %85 = math.rsqrt %84 : vector<64x1xf32>
    %86 = vector.broadcast %85 : vector<64x1xf32> to vector<64x16xf32>
    %87 = arith.mulf %70, %86 : vector<64x16xf32>
    %c1 = arith.constant 1 : index
    %88 = memref.load %arg8[%c1] : memref<2xf32, #tpu.memory_space<smem>>
    %89 = vector.broadcast %88 : f32 to vector<64x16xf32>
    %90 = arith.mulf %79, %89 : vector<64x16xf32>
    %91 = vector.shape_cast %90 : vector<64x16xf32> to vector<4x16x16xf32>
    %92 = arith.truncf %91 : vector<4x16x16xf32> to vector<4x16x16xbf16>
    %93 = vector.shape_cast %87 : vector<64x16xf32> to vector<4x16x16xf32>
    %94 = arith.truncf %93 : vector<4x16x16xf32> to vector<4x16x16xbf16>
    %95 = vector.shape_cast %71 : vector<64x16xf32> to vector<4x16x16xf32>
    %96 = arith.truncf %95 : vector<4x16x16xf32> to vector<4x16x16xbf16>
    "tpu.trace_start"() <{level = 10 : i32, message = "gnd,gmd->gnm"}> : () -> ()
    %cst_28 = arith.constant dense<0.000000e+00> : vector<4x16x16xf32>
    %97 = tpu.matmul %92, %94, %cst_28 {dimension_numbers = #tpu.dot_dimension_numbers<[2], [2], [1], [1], [0, 0, 0, 1, 1, 1], [0], [0]>} : vector<4x16x16xbf16>, vector<4x16x16xbf16>, vector<4x16x16xf32> -> vector<4x16x16xf32>
    "tpu.trace_stop"() : () -> ()
    %c1_29 = arith.constant 1 : index
    %c0_30 = arith.constant 0 : index
    %c0_31 = arith.constant 0 : index
    %98 = vector.load %arg3[%c1_29, %c0_30, %c0_31] : memref<2x16x16xf32, #tpu.memory_space<vmem>>, vector<1x16x16xf32>
    %99 = vector.shape_cast %98 : vector<1x16x16xf32> to vector<16x16xf32>
    %100 = vector.shape_cast %99 : vector<16x16xf32> to vector<1x16x16xf32>
    %101 = vector.broadcast %100 : vector<1x16x16xf32> to vector<4x16x16xf32>
    %102 = arith.addf %97, %101 : vector<4x16x16xf32>
    %103 = arith.addf %102, %20 : vector<4x16x16xf32>
    %cst_32 = arith.constant dense<0xFF800000> : vector<4x16xf32>
    %104 = vector.multi_reduction <maximumf>, %103, %cst_32 [2] : vector<4x16x16xf32> to vector<4x16xf32>
    %105 = vector.shape_cast %104 : vector<4x16xf32> to vector<4x16x1xf32>
    %106 = vector.broadcast %105 : vector<4x16x1xf32> to vector<4x16x16xf32>
    %107 = arith.subf %103, %106 : vector<4x16x16xf32>
    %108 = math.exp %107 : vector<4x16x16xf32>
    %cst_33 = arith.constant dense<0.000000e+00> : vector<4x16xf32>
    %109 = vector.multi_reduction <add>, %108, %cst_33 [2] : vector<4x16x16xf32> to vector<4x16xf32>
    %110 = vector.shape_cast %109 : vector<4x16xf32> to vector<4x16x1xf32>
    %111 = tpu.reciprocal %110 {approx = true} : vector<4x16x1xf32> -> vector<4x16x1xf32>
    %112 = vector.broadcast %111 : vector<4x16x1xf32> to vector<4x16x16xf32>
    %113 = arith.mulf %108, %112 : vector<4x16x16xf32>
    %114 = arith.truncf %113 : vector<4x16x16xf32> to vector<4x16x16xbf16>
    "tpu.trace_start"() <{level = 10 : i32, message = "gnm,gmd->gnd"}> : () -> ()
    %cst_34 = arith.constant dense<0.000000e+00> : vector<4x16x16xf32>
    %115 = tpu.matmul %114, %96, %cst_34 {dimension_numbers = #tpu.dot_dimension_numbers<[2], [1], [1], [2], [0, 0, 0, 1, 1, 2], [0], [0]>} : vector<4x16x16xbf16>, vector<4x16x16xbf16>, vector<4x16x16xf32> -> vector<4x16x16xf32>
    "tpu.trace_stop"() : () -> ()
    %116 = vector.shape_cast %115 : vector<4x16x16xf32> to vector<64x16xf32>
    %117 = tpu.concatenate %68, %116 in 1 : vector<64x16xf32>, vector<64x16xf32> -> vector<64x32xf32>
    %118 = arith.truncf %117 : vector<64x32xf32> to vector<64x32xbf16>
    %c0_35 = arith.constant 0 : index
    %c0_36 = arith.constant 0 : index
    %119 = vector.load %arg6[%c0_35, %c0_36] : memref<32x32xbf16, #tpu.memory_space<vmem>>, vector<32x32xbf16>
    %cst_37 = arith.constant dense<0.000000e+00> : vector<64x32xf32>
    %120 = tpu.matmul %118, %119, %cst_37 {dimension_numbers = #tpu.dot_dimension_numbers<[1], [0], [0], [1], [0, 0, 1, 1], [], []>} : vector<64x32xbf16>, vector<32x32xbf16>, vector<64x32xf32> -> vector<64x32xf32>
    %c0_38 = arith.constant 0 : index
    %c0_39 = arith.constant 0 : index
    %121 = vector.load %arg7[%c0_38, %c0_39] : memref<1x32xf32, #tpu.memory_space<vmem>>, vector<1x32xf32>
    %122 = vector.broadcast %121 : vector<1x32xf32> to vector<64x32xf32>
    %123 = arith.addf %120, %122 : vector<64x32xf32>
    %c0_40 = arith.constant 0 : index
    %c0_41 = arith.constant 0 : index
    %124 = vector.load %arg9[%c0_40, %c0_41] : memref<1x32xf32, #tpu.memory_space<vmem>>, vector<1x32xf32>
    %c0_42 = arith.constant 0 : index
    %c0_43 = arith.constant 0 : index
    %125 = vector.load %arg10[%c0_42, %c0_43] : memref<1x32xf32, #tpu.memory_space<vmem>>, vector<1x32xf32>
    %cst_44 = arith.constant dense<0.000000e+00> : vector<64xf32>
    %126 = vector.multi_reduction <add>, %123, %cst_44 [1] : vector<64x32xf32> to vector<64xf32>
    %127 = vector.shape_cast %126 : vector<64xf32> to vector<64x1xf32>
    %cst_45 = arith.constant 3.200000e+01 : f32
    %128 = vector.broadcast %cst_45 : f32 to vector<64x1xf32>
    %129 = arith.divf %127, %128 : vector<64x1xf32>
    %130 = vector.broadcast %129 : vector<64x1xf32> to vector<64x32xf32>
    %131 = arith.subf %123, %130 : vector<64x32xf32>
    %132 = arith.mulf %131, %131 : vector<64x32xf32>
    %cst_46 = arith.constant dense<0.000000e+00> : vector<64xf32>
    %133 = vector.multi_reduction <add>, %132, %cst_46 [1] : vector<64x32xf32> to vector<64xf32>
    %134 = vector.shape_cast %133 : vector<64xf32> to vector<64x1xf32>
    %cst_47 = arith.constant 3.200000e+01 : f32
    %135 = vector.broadcast %cst_47 : f32 to vector<64x1xf32>
    %136 = arith.divf %134, %135 : vector<64x1xf32>
    %137 = vector.broadcast %129 : vector<64x1xf32> to vector<64x32xf32>
    %138 = arith.subf %123, %137 : vector<64x32xf32>
    %cst_48 = arith.constant 9.99999974E-6 : f32
    %139 = vector.broadcast %cst_48 : f32 to vector<64x1xf32>
    %140 = arith.addf %136, %139 : vector<64x1xf32>
    %141 = math.rsqrt %140 : vector<64x1xf32>
    %142 = vector.broadcast %141 : vector<64x1xf32> to vector<64x32xf32>
    %143 = arith.mulf %138, %142 : vector<64x32xf32>
    %144 = vector.broadcast %124 : vector<1x32xf32> to vector<64x32xf32>
    %145 = arith.mulf %143, %144 : vector<64x32xf32>
    %146 = vector.broadcast %125 : vector<1x32xf32> to vector<64x32xf32>
    %147 = arith.addf %145, %146 : vector<64x32xf32>
    %148 = arith.addf %1, %147 : vector<64x32xf32>
    %149 = arith.truncf %148 : vector<64x32xf32> to vector<64x32xbf16>
    %c0_49 = arith.constant 0 : index
    %c0_50 = arith.constant 0 : index
    %150 = vector.load %arg13[%c0_49, %c0_50] : memref<32x128xbf16, #tpu.memory_space<vmem>>, vector<32x128xbf16>
    %cst_51 = arith.constant dense<0.000000e+00> : vector<64x128xf32>
    %151 = tpu.matmul %149, %150, %cst_51 {dimension_numbers = #tpu.dot_dimension_numbers<[1], [0], [0], [1], [0, 0, 1, 1], [], []>} : vector<64x32xbf16>, vector<32x128xbf16>, vector<64x128xf32> -> vector<64x128xf32>
    %c0_52 = arith.constant 0 : index
    %c0_53 = arith.constant 0 : index
    %152 = vector.load %arg14[%c0_52, %c0_53] : memref<1x128xf32, #tpu.memory_space<vmem>>, vector<1x128xf32>
    %153 = vector.broadcast %152 : vector<1x128xf32> to vector<64x128xf32>
    %154 = arith.addf %151, %153 : vector<64x128xf32>
    %cst_54 = arith.constant 5.000000e-01 : f32
    %155 = vector.broadcast %cst_54 : f32 to vector<64x128xf32>
    %156 = arith.mulf %155, %154 : vector<64x128xf32>
    %157 = arith.mulf %154, %154 : vector<64x128xf32>
    %158 = arith.mulf %157, %154 : vector<64x128xf32>
    %cst_55 = arith.constant 4.471500e-02 : f32
    %159 = vector.broadcast %cst_55 : f32 to vector<64x128xf32>
    %160 = arith.mulf %159, %158 : vector<64x128xf32>
    %161 = arith.addf %154, %160 : vector<64x128xf32>
    %cst_56 = arith.constant 0.797884583 : f32
    %162 = vector.broadcast %cst_56 : f32 to vector<64x128xf32>
    %163 = arith.mulf %162, %161 : vector<64x128xf32>
    %164 = math.tanh %163 : vector<64x128xf32>
    %cst_57 = arith.constant 1.000000e+00 : f32
    %165 = vector.broadcast %cst_57 : f32 to vector<64x128xf32>
    %166 = arith.addf %165, %164 : vector<64x128xf32>
    %167 = arith.mulf %156, %166 : vector<64x128xf32>
    %168 = arith.truncf %167 : vector<64x128xf32> to vector<64x128xbf16>
    %c0_58 = arith.constant 0 : index
    %c0_59 = arith.constant 0 : index
    %169 = vector.load %arg15[%c0_58, %c0_59] : memref<128x32xbf16, #tpu.memory_space<vmem>>, vector<128x32xbf16>
    %cst_60 = arith.constant dense<0.000000e+00> : vector<64x32xf32>
    %170 = tpu.matmul %168, %169, %cst_60 {dimension_numbers = #tpu.dot_dimension_numbers<[1], [0], [0], [1], [0, 0, 1, 1], [], []>} : vector<64x128xbf16>, vector<128x32xbf16>, vector<64x32xf32> -> vector<64x32xf32>
    %c0_61 = arith.constant 0 : index
    %c0_62 = arith.constant 0 : index
    %171 = vector.load %arg16[%c0_61, %c0_62] : memref<1x32xf32, #tpu.memory_space<vmem>>, vector<1x32xf32>
    %172 = vector.broadcast %171 : vector<1x32xf32> to vector<64x32xf32>
    %173 = arith.addf %170, %172 : vector<64x32xf32>
    %c0_63 = arith.constant 0 : index
    %c0_64 = arith.constant 0 : index
    %174 = vector.load %arg11[%c0_63, %c0_64] : memref<1x32xf32, #tpu.memory_space<vmem>>, vector<1x32xf32>
    %c0_65 = arith.constant 0 : index
    %c0_66 = arith.constant 0 : index
    %175 = vector.load %arg12[%c0_65, %c0_66] : memref<1x32xf32, #tpu.memory_space<vmem>>, vector<1x32xf32>
    %cst_67 = arith.constant dense<0.000000e+00> : vector<64xf32>
    %176 = vector.multi_reduction <add>, %173, %cst_67 [1] : vector<64x32xf32> to vector<64xf32>
    %177 = vector.shape_cast %176 : vector<64xf32> to vector<64x1xf32>
    %cst_68 = arith.constant 3.200000e+01 : f32
    %178 = vector.broadcast %cst_68 : f32 to vector<64x1xf32>
    %179 = arith.divf %177, %178 : vector<64x1xf32>
    %180 = vector.broadcast %179 : vector<64x1xf32> to vector<64x32xf32>
    %181 = arith.subf %173, %180 : vector<64x32xf32>
    %182 = arith.mulf %181, %181 : vector<64x32xf32>
    %cst_69 = arith.constant dense<0.000000e+00> : vector<64xf32>
    %183 = vector.multi_reduction <add>, %182, %cst_69 [1] : vector<64x32xf32> to vector<64xf32>
    %184 = vector.shape_cast %183 : vector<64xf32> to vector<64x1xf32>
    %cst_70 = arith.constant 3.200000e+01 : f32
    %185 = vector.broadcast %cst_70 : f32 to vector<64x1xf32>
    %186 = arith.divf %184, %185 : vector<64x1xf32>
    %187 = vector.broadcast %179 : vector<64x1xf32> to vector<64x32xf32>
    %188 = arith.subf %173, %187 : vector<64x32xf32>
    %cst_71 = arith.constant 9.99999974E-6 : f32
    %189 = vector.broadcast %cst_71 : f32 to vector<64x1xf32>
    %190 = arith.addf %186, %189 : vector<64x1xf32>
    %191 = math.rsqrt %190 : vector<64x1xf32>
    %192 = vector.broadcast %191 : vector<64x1xf32> to vector<64x32xf32>
    %193 = arith.mulf %188, %192 : vector<64x32xf32>
    %194 = vector.broadcast %174 : vector<1x32xf32> to vector<64x32xf32>
    %195 = arith.mulf %193, %194 : vector<64x32xf32>
    %196 = vector.broadcast %175 : vector<1x32xf32> to vector<64x32xf32>
    %197 = arith.addf %195, %196 : vector<64x32xf32>
    %198 = arith.addf %148, %197 : vector<64x32xf32>
    %199 = vector.shape_cast %198 : vector<64x32xf32> to vector<4x16x32xf32>
    %c0_72 = arith.constant 0 : index
    %c0_73 = arith.constant 0 : index
    %c0_74 = arith.constant 0 : index
    %200 = vector.load %arg17[%c0_72, %c0_73, %c0_74] : memref<4x16x32xf32, #tpu.memory_space<vmem>>, vector<4x16x32xf32>
    tpu.vector_store %arg17[%c0_72, %c0_73, %c0_74], %199 {strides = array<i32>} : memref<4x16x32xf32, #tpu.memory_space<vmem>>, vector<4x16x32xf32>,
    return
  }
  func.func @transform_0(%arg0: i32) -> (i32, i32, i32) {
    %c0_i32 = arith.constant 0 : i32
    %c0_i32_0 = arith.constant 0 : i32
    %c0_i32_1 = arith.constant 0 : i32
    return %arg0, %c0_i32, %c0_i32_0 : i32, i32, i32
  }
  func.func @transform_1(%arg0: i32) -> (i32, i32, i32) {
    %c0_i32 = arith.constant 0 : i32
    %c0_i32_0 = arith.constant 0 : i32
    %c0_i32_1 = arith.constant 0 : i32
    %c0_i32_2 = arith.constant 0 : i32
    return %c0_i32, %c0_i32_0, %c0_i32_1 : i32, i32, i32
  }
  func.func @transform_2(%arg0: i32) -> (i32, i32, i32) {
    %c0_i32 = arith.constant 0 : i32
    %c0_i32_0 = arith.constant 0 : i32
    %c0_i32_1 = arith.constant 0 : i32
    %c0_i32_2 = arith.constant 0 : i32
    return %c0_i32, %c0_i32_0, %c0_i32_1 : i32, i32, i32
  }
  func.func @transform_3(%arg0: i32) -> (i32, i32) {
    %c0_i32 = arith.constant 0 : i32
    %c0_i32_0 = arith.constant 0 : i32
    %c0_i32_1 = arith.constant 0 : i32
    return %c0_i32, %c0_i32_0 : i32, i32
  }
  func.func @transform_4(%arg0: i32) -> (i32, i32) {
    %c0_i32 = arith.constant 0 : i32
    %c0_i32_0 = arith.constant 0 : i32
    %c0_i32_1 = arith.constant 0 : i32
    return %c0_i32, %c0_i32_0 : i32, i32
  }
  func.func @transform_5(%arg0: i32) -> (i32, i32) {
    %c0_i32 = arith.constant 0 : i32
    %c0_i32_0 = arith.constant 0 : i32
    %c0_i32_1 = arith.constant 0 : i32
    return %c0_i32, %c0_i32_0 : i32, i32
  }
  func.func @transform_6(%arg0: i32) -> (i32, i32) {
    %c0_i32 = arith.constant 0 : i32
    %c0_i32_0 = arith.constant 0 : i32
    %c0_i32_1 = arith.constant 0 : i32
    return %c0_i32, %c0_i32_0 : i32, i32
  }
  func.func @transform_7(%arg0: i32) -> i32 {
    %c0_i32 = arith.constant 0 : i32
    %c0_i32_0 = arith.constant 0 : i32
    return %c0_i32 : i32
  }
  func.func @transform_8(%arg0: i32) -> (i32, i32) {
    %c0_i32 = arith.constant 0 : i32
    %c0_i32_0 = arith.constant 0 : i32
    %c0_i32_1 = arith.constant 0 : i32
    return %c0_i32, %c0_i32_0 : i32, i32
  }
  func.func @transform_9(%arg0: i32) -> (i32, i32) {
    %c0_i32 = arith.constant 0 : i32
    %c0_i32_0 = arith.constant 0 : i32
    %c0_i32_1 = arith.constant 0 : i32
    return %c0_i32, %c0_i32_0 : i32, i32
  }
  func.func @transform_10(%arg0: i32) -> (i32, i32) {
    %c0_i32 = arith.constant 0 : i32
    %c0_i32_0 = arith.constant 0 : i32
    %c0_i32_1 = arith.constant 0 : i32
    return %c0_i32, %c0_i32_0 : i32, i32
  }
  func.func @transform_11(%arg0: i32) -> (i32, i32) {
    %c0_i32 = arith.constant 0 : i32
    %c0_i32_0 = arith.constant 0 : i32
    %c0_i32_1 = arith.constant 0 : i32
    return %c0_i32, %c0_i32_0 : i32, i32
  }
  func.func @transform_12(%arg0: i32) -> (i32, i32) {
    %c0_i32 = arith.constant 0 : i32
    %c0_i32_0 = arith.constant 0 : i32
    %c0_i32_1 = arith.constant 0 : i32
    return %c0_i32, %c0_i32_0 : i32, i32
  }
  func.func @transform_13(%arg0: i32) -> (i32, i32) {
    %c0_i32 = arith.constant 0 : i32
    %c0_i32_0 = arith.constant 0 : i32
    %c0_i32_1 = arith.constant 0 : i32
    return %c0_i32, %c0_i32_0 : i32, i32
  }
  func.func @transform_14(%arg0: i32) -> (i32, i32) {
    %c0_i32 = arith.constant 0 : i32
    %c0_i32_0 = arith.constant 0 : i32
    %c0_i32_1 = arith.constant 0 : i32
    return %c0_i32, %c0_i32_0 : i32, i32
  }
  func.func @transform_15(%arg0: i32) -> (i32, i32) {
    %c0_i32 = arith.constant 0 : i32
    %c0_i32_0 = arith.constant 0 : i32
    %c0_i32_1 = arith.constant 0 : i32
    return %c0_i32, %c0_i32_0 : i32, i32
  }
  func.func @transform_16(%arg0: i32) -> (i32, i32, i32) {
    %c0_i32 = arith.constant 0 : i32
    %c0_i32_0 = arith.constant 0 : i32
    %c0_i32_1 = arith.constant 0 : i32
    return %arg0, %c0_i32, %c0_i32_0 : i32, i32, i32
  }
}

</mosaic_0001>

<bundles_post_ra>
// kernel: basic_layer_forward.3
= control target key start
LH: loop header
LB: loop body
LE: loop exit
PB: predicated region body
PF: predicated region fallthrough
CT: control target
= control target key end

     0   :  { %s4321_s0 = inlined_call_operand.vmem [shape: f32[8,16,32], index: 0, kind: input, shape index: {}]   ;;  %s4322_s1 = inlined_call_operand.vmem [shape: f32[4,16,16], index: 1, kind: input, shape index: {}]   ;;  %s4323_s2 = inlined_call_operand.vmem [shape: f32[2,16,16], index: 2, kind: input, shape index: {}]   ;;  %s4324_s3 = inlined_call_operand.vmem [shape: bf16[32,96], index: 3, kind: input, shape index: {}]   ;;  %s4325_s4 = inlined_call_operand.vmem [shape: f32[1,96], index: 4, kind: input, shape index: {}]   ;;  %s4326_s5 = inlined_call_operand.vmem [shape: bf16[32,32], index: 5, kind: input, shape index: {}]   ;;  %s4327_s6 = inlined_call_operand.vmem [shape: f32[1,32], index: 6, kind: input, shape index: {}]   ;;  %s4328_s7 = inlined_call_operand.vmem [shape: f32[2], index: 7, kind: input, shape index: {}]   ;;  %s4329_s8 = inlined_call_operand.vmem [shape: f32[1,32], index: 8, kind: input, shape index: {}]   ;;  %s4330_s9 = inlined_call_operand.vmem [shape: f32[1,32], index: 9, kind: input, shape index: {}]   ;;  %s4331_s10 = inlined_call_operand.vmem [shape: f32[1,32], index: 10, kind: input, shape index: {}]   ;;  %s4332_s11 = inlined_call_operand.vmem [shape: f32[1,32], index: 11, kind: input, shape index: {}]   ;;  %s4333_s12 = inlined_call_operand.vmem [shape: bf16[32,128], index: 12, kind: input, shape index: {}]   ;;  %s4334_s13 = inlined_call_operand.vmem [shape: f32[1,128], index: 13, kind: input, shape index: {}]   ;;  %s4335_s14 = inlined_call_operand.vmem [shape: bf16[128,32], index: 14, kind: input, shape index: {}]   ;;  %s4336_s15 = inlined_call_operand.vmem [shape: f32[1,32], index: 15, kind: input, shape index: {}]   ;;  %s4337_s16 = inlined_call_operand.vmem [shape: f32[8,16,32], index: 16, kind: output, shape index: {}]  }
   0x1   :  { %4343 = sst [smem:[#allocation5_spill]] %s4321_s0 }
   0x2   :  { %21 = vsyncpa [#allocation3], 0  ;;  %s3483_s21 = smov 0  }
   0x3 LB: > { %s2824_s22 = sadd.s32 4294967295, %s3387_s21   ;;  %p2826_p0 = scmp.ge.s32.totalorder %s3387_s21, 1  ;;  %s3387_s21 = sphi %s3483_s21, %s27_s21  }
   0x4   : > { %p399_p1 = scmp.lt.s32.totalorder %s3387_s21, 3  ;;  %s430_s25 = sshll.u32 %s4328_s7, 4  ;;  %s431_s25 = int_to_ptr.vmem [resolvable:$true] %s430_s25 }
   0x5   : > { %p3498_p3 = scmp.eq.s32.totalorder %s2824_s22, 0  ;;  %s3362_s28 = scalar_lea.vmem %s431_s25, 16 }
   0x6   : > { %p3494_p2 = pnand %p2826_p0, %p399_p1  ;;  %p3363_p6 = scmp.ne.s32.totalorder %s431_s25, %s3362_s28 }
   0x7   : > { %p3370_p10 = scmp.lt.s32.totalorder %s431_s25, %s431_s25  ;;  %p3371_p11 = scmp.lt.s32.totalorder %s3362_s28, %s3362_s28 }
   0x8   : > { %p3121_p4 = pneg %p3494_p2 }
   0x9   : > { %p3372_p12 = por %p3371_p11, %p3370_p10 }
   0xa   : > { %p3122_p5 = pnand %p3498_p3, %p3121_p4 }
   0xc   : > { %p3364_p7 = pneg %p3122_p5 }
   0xe   : > { %p3365_p8 = pnand %p3364_p7, %p3363_p6 }
  0x10   : > { %p3366_p9 = pneg %p3365_p8 }
  0x12   : > { %p3373_p13 = pnand %p3372_p12, %p3366_p9 }
  0x14   : > { %3376 = shalt.err (!%p3373_p13)
}
  0x15   : > { %s3389_s29 = smov [#allocation2]   ;;  %477 = sbr.rel (%p3494_p2) target bundleno = 3425 (0xd61), region = 84 }
  0x16   : > { %3124 = dma.vmem_to_smem (!%p3122_p5), %s431_s25, 16, %s3389_s29, [#allocation3]  }
  0x1c   : > { %3382 = dma.done.wait (%p3498_p3), [#allocation3], 16  }
  0x1d   : > { %3384 = vsyncadd (%p3498_p3), [#allocation3], 4294967280 }
  0x1e   : > { %483 = sfence }
  0x1f   : > { %v3164_v0 = vld [vmem:[%s4324_s3] sm:$0xff]   ;;  %s3515_s17 = sshll.u32 %s2824_s22, 2  ;;  %v3165_v1 = vld [vmem:[%s4324_s3 + $0x8] sm:$0xff]   ;;  %s4346_s22 = sld [smem:[#allocation5_spill]]  ;;  %vm580_vm0 = vcmask 261120   ;;  %vm689_vm1 = vcmask 130048  }
  0x20   : > { %p531_p0 = scmp.lt.s32.totalorder %s3515_s17, 7  ;;  %2961 = vmatprep.subr.bf16.mxu1 %v3164_v0  ;;  %v2837_v14 = vld [vmem:[%s4325_s4] ss:$0 sm:$0xff]  ;;  %s3390_s29 = smov 96   ;;  %vm3392_vm2 = vmmov 0  }
  0x21   : > { %2962 = vmatpush3.bf16.msra.mxu1 %v3164_v0  ;;  %s4341_s30 = smov 80   ;;  %s4339_s0 = smov 112  }
  0x22   : > { %s3522_s20 = scalar_select %p531_p0, %s3515_s17, 7  ;;  %2963 = vmatprep.subr.bf16.mxu1 %v3165_v1 }
  0x23   : > { %s818_s18 = sld [smem:[#allocation2]]  ;;  %s660_s19 = ssub.s32 0, %s3515_s17 }
  0x24   : > { %s4338_s23 = sshll.u32 %s3522_s20, 4  ;;  %s2845_s24 = smin.u32 %s3515_s17, %s660_s19 }
  0x25   : > { %s3530_s26 = scalar_lea.vmem %s4346_s22, %s4338_s23  ;;  %2964 = vmatpush3.bf16.msra.mxu1 %v3165_v1  ;;  %s662_s25 = sand.u32 3, %s2845_s24  }
  0x26   : > { %v545_v2 = vld [vmem:[%s3530_s26] sm:$0xff]  ;;  %v546_v3 = vld [vmem:[%s3530_s26 + $0x8] sm:$0xff]  ;;  %v547_v4 = vld [vmem:[%s3530_s26 + $0x10] sm:$0xff]  ;;  %p659_p1 = scmp.lt.s32.totalorder %s3515_s17, 0  ;;  %s663_s22 = ssub.s32 0, %s662_s25 }
  0x27   : > { %v553_v5 = vpack.c.bf16 %v546_v3, %v545_v2  ;;  %v548_v6 = vld [vmem:[%s3530_s26 + $0x18] sm:$0xff]  ;;  %v549_v7 = vld [vmem:[%s3530_s26 + $0x20] sm:$0xff]  ;;  %v550_v8 = vld [vmem:[%s3530_s26 + $0x28] sm:$0xff]  ;;  %s4348_s24 = smov 112   ;;  %s4349_s19 = sshll.u32 %s3522_s20, 4 }
  0x28   : > { %v554_v9 = vpack.c.bf16 %v548_v6, %v547_v4  ;;  %v555_v10 = vpack.c.bf16 %v550_v8, %v549_v7  ;;  %v551_v11 = vld [vmem:[%s3530_s26 + $0x30] sm:$0xff]  ;;  %v552_v12 = vld [vmem:[%s3530_s26 + $0x38] sm:$0xff]  ;;  %s4351_s22 = smov (!%p659_p1, %s663_s22), %s662_s25 }
  0x29   : > { %2965 = vmatprep.mubr.msk.bf16.mxu1 %vm580_vm0, %v553_v5  ;;  %v556_v13 = vpack.c.bf16 %v552_v12, %v551_v11  ;;  %p2847_p2 = scmp.lt.s32.totalorder %s4351_s22, 0  ;;  %s669_s27 = sadd.s32 4, %s4351_s22 }
  0x2a   : > { %2966 = vmatmul.mubr.msk.bf16.vlgmr.msra.gmra.mrb[0].mxu1 %vm580_vm0, %v554_v9  ;;  %v3391_v9 = vmov 0.0  }
  0x2b   : > { %2969 = vmatprep.mubr.msk.bf16.mxu1 %vm580_vm0, %v555_v10  ;;  %2973 = vmatprep.subr.bf16.mxu1 %v3391_v9  ;;  %s4353_s27 = smov (!%p2847_p2, %s669_s27), %s4351_s22 }
  0x2c   : > { %2985 = vmatprep.subr.bf16.mxu0 %v3391_v9  ;;  %2987 = vmatprep.mubr.msk.bf16.mxu0 %vm3392_vm2, %v3391_v9  ;;  %s2848_s28 = sshll.u32 %s4353_s27, 4 }
  0x2d   : > { %s3726_s23 = scalar_lea.vmem %s4322_s1, %s2848_s28 }
  0x32   : > { %2970 = vmatmul.mubr.msk.bf16.gmra.mrb[4].mxu1 %vm580_vm0, %v556_v13 }
  0x33   : > { %2975 = vmatprep.mubr.msk.bf16.mxu1 %vm3392_vm2, %v3391_v9 }
  0xfd   : > { %v2967_v15 = vpop.f32.mrb[0].mxu1 }
  0xfe   : > { %v3547_v16 = vadd.f32 %v2967_v15, %v2837_v14  ;;  %v627_v17 = vpop.f32.mrb[1].mxu1 }
  0xff   : > { %v3549_v18 = vadd.f32 %v2837_v14, %v627_v17  ;;  %v2968_v19 = vpop.f32.mrb[2].mxu1 }
 0x100   : > { %v3551_v20 = vadd.f32 %v2968_v19, %v2837_v14  ;;  %v630_v21 = vpop.f32.mrb[3].mxu1  ;;  %v3555_v22 = vmul.f32 %v3547_v16, %v3547_v16 }
 0x101   : > { %v3557_v23 = vadd.f32 %v2837_v14, %v630_v21  ;;  %v3561_v24 = vmul.f32 %v3549_v18, %v3549_v18 }
 0x102   : > { %750 = vrot.lane.b32.xlu1 %v3555_v22, %s3390_s29  ;;  %v3569_v25 = vmul.f32 %v3551_v20, %v3551_v20  ;;  %v696_v57 = vsel %vm689_vm1, %v3555_v22, 0.0 }
 0x103   : > { %746 = vrot.lane.b32.xlu0 %v3561_v24, %s3390_s29  ;;  %v3573_v27 = vmul.f32 %v3557_v23, %v3557_v23  ;;  %v690_v55 = vsel %vm689_vm1, %v3561_v24, 0.0 }
 0x104   : > { %v699_v58 = vsel %vm689_vm1, %v3569_v25, 0.0 }
 0x105   : > { %v2971_v26 = vpop.f32.mrb[4].mxu1  ;;  %v693_v56 = vsel %vm689_vm1, %v3573_v27, 0.0 }
 0x106   : > { %752 = vrot.lane.b32.xlu1 %v3569_v25, %s3390_s29  ;;  %v643_v28 = vpop.f32.mrb[5].mxu1  ;;  %v3577_v29 = vadd.f32 %v2971_v26, %v2837_v14 }
 0x107   : > { %v3579_v30 = vadd.f32 %v2837_v14, %v643_v28  ;;  %748 = vrot.lane.b32.xlu0 %v3573_v27, %s3390_s29  ;;  %v2972_v31 = vpop.f32.mrb[6].mxu1 }
 0x108   : > { %v646_v32 = vpop.f32.mrb[7].mxu1  ;;  %v3583_v33 = vadd.f32 %v2972_v31, %v2837_v14  ;;  %v3599_v37 = vmul.f32 %v3577_v29, %v3577_v29 }
 0x109   : > { %v3585_v34 = vadd.f32 %v2837_v14, %v646_v32  ;;  %v3589_v35 = vmul.f32 %v3579_v30, %v3579_v30 }
 0x10a   : > { %v3605_v38 = vmul.f32 %v3583_v33, %v3583_v33  ;;  %v708_v61 = vsel %vm689_vm1, %v3599_v37, 0.0 }
 0x10b   : > { %754 = vrot.lane.b32.xlu0 %v3589_v35, %s3390_s29  ;;  %v3595_v36 = vmul.f32 %v3585_v34, %v3585_v34  ;;  %v702_v59 = vsel %vm689_vm1, %v3589_v35, 0.0 }
 0x10c   : > { %v711_v62 = vsel %vm689_vm1, %v3605_v38, 0.0 }
 0x10d   : > { %756 = vrot.lane.b32.xlu1 %v3595_v36, %s3390_s29  ;;  %v705_v60 = vsel %vm689_vm1, %v3595_v36, 0.0 }
 0x10f   : > { %758 = vrot.lane.b32.xlu0 %v3599_v37, %s3390_s29 }
 0x111   : > { %760 = vrot.lane.b32.xlu1 %v3605_v38, %s3390_s29 }
 0x174   : > { %v751_v39 = vpop.permute.xlu1 %750 }
 0x175   : > { %v747_v40 = vpop.permute.xlu0 %746  ;;  %v776_v43 = vsel %vm689_vm1, %v751_v39, 0.0 }
 0x176   : > { %v770_v41 = vsel %vm689_vm1, %v747_v40, 0.0 }
 0x177   : > { %771 = vadd.xlane.f32.xlu0 %v770_v41 }
 0x178   : > { %v753_v45 = vpop.permute.xlu1 %752 }
 0x179   : > { %v749_v42 = vpop.permute.xlu0 %748  ;;  %v779_v47 = vsel %vm689_vm1, %v753_v45, 0.0 }
 0x17a   : > { %v773_v44 = vsel %vm689_vm1, %v749_v42, 0.0 }
 0x17b   : > { %777 = vadd.xlane.f32.xlu0 %v776_v43  ;;  %774 = vadd.xlane.f32.xlu1 %v773_v44 }
 0x17d   : > { %v755_v46 = vpop.permute.xlu0 %754 }
 0x17e   : > { %v782_v48 = vsel %vm689_vm1, %v755_v46, 0.0 }
 0x17f   : > { %780 = vadd.xlane.f32.xlu0 %v779_v47  ;;  %783 = vadd.xlane.f32.xlu1 %v782_v48  ;;  %v757_v49 = vpop.permute.xlu1 %756 }
 0x180   : > { %v785_v50 = vsel %vm689_vm1, %v757_v49, 0.0 }
 0x181   : > { %v759_v51 = vpop.permute.xlu0 %758 }
 0x182   : > { %v788_v52 = vsel %vm689_vm1, %v759_v51, 0.0 }
 0x183   : > { %786 = vadd.xlane.f32.xlu0 %v785_v50  ;;  %789 = vadd.xlane.f32.xlu1 %v788_v52  ;;  %v761_v53 = vpop.permute.xlu1 %760 }
 0x184   : > { %v791_v54 = vsel %vm689_vm1, %v761_v53, 0.0 }
 0x187   : > { %792 = vadd.xlane.f32.xlu0 %v791_v54  ;;  %691 = vadd.xlane.f32.xlu1 %v690_v55 }
 0x18b   : > { %694 = vadd.xlane.f32.xlu0 %v693_v56  ;;  %697 = vadd.xlane.f32.xlu1 %v696_v57 }
 0x18f   : > { %700 = vadd.xlane.f32.xlu0 %v699_v58  ;;  %703 = vadd.xlane.f32.xlu1 %v702_v59 }
 0x193   : > { %706 = vadd.xlane.f32.xlu0 %v705_v60  ;;  %709 = vadd.xlane.f32.xlu1 %v708_v61 }
 0x197   : > { %712 = vadd.xlane.f32.xlu0 %v711_v62 }
 0x204   : > { %v772_v63 = vpop.xlane.xlu0 %771 }
 0x205   : > { %v794_v0 = vmax.f32 %v772_v63, 1e-24 }
 0x207   : > { %3178 = vrsqrt.f32 %v794_v0 }
 0x208   : > { %v775_v1 = vpop.xlane.xlu1 %774  ;;  %v778_v2 = vpop.xlane.xlu0 %777 }
 0x209   : > { %v795_v3 = vmax.f32 %v775_v1, 1e-24  ;;  %v796_v4 = vmax.f32 %v778_v2, 1e-24  ;;  %v819_v2 = vstv %s818_s18 }
 0x20b   : > { %3180 = vrsqrt.f32 %v795_v3 }
 0x20c   : > { %v784_v5 = vpop.xlane.xlu1 %783  ;;  %v781_v6 = vpop.xlane.xlu0 %780  ;;  %3182 = vrsqrt.f32 %v796_v4 }
 0x20d   : > { %v797_v7 = vmax.f32 %v781_v6, 1e-24  ;;  %v798_v8 = vmax.f32 %v784_v5, 1e-24 }
 0x20f   : > { %3184 = vrsqrt.f32 %v797_v7 }
 0x210   : > { %v790_v10 = vpop.xlane.xlu1 %789  ;;  %v787_v11 = vpop.xlane.xlu0 %786  ;;  %3186 = vrsqrt.f32 %v798_v8 }
 0x211   : > { %v800_v12 = vmax.f32 %v790_v10, 1e-24  ;;  %v799_v13 = vmax.f32 %v787_v11, 1e-24  ;;  %v3179_v14 = vpop.eup %3178 }
 0x212   : > { %v810_v21 = vmul.f32 %v3179_v14, %v3549_v18 }
 0x213   : > { %3188 = vrsqrt.f32 %v799_v13 }
 0x214   : > { %v793_v15 = vpop.xlane.xlu0 %792  ;;  %3190 = vrsqrt.f32 %v800_v12 }
 0x215   : > { %v3181_v17 = vpop.eup %3180  ;;  %v801_v19 = vmax.f32 %v793_v15, 1e-24 }
 0x216   : > { %v811_v26 = vmul.f32 %v3181_v17, %v3557_v23  ;;  %v3183_v28 = vpop.eup %3182 }
 0x217   : > { %3192 = vrsqrt.f32 %v801_v19  ;;  %v812_v39 = vmul.f32 %v3183_v28, %v3547_v16 }
 0x218   : > { %v832_v31 = vpack.c.bf16 %v811_v26, %v810_v21 }
 0x219   : > { %v3185_v32 = vpop.eup %3184 }
 0x21a   : > { %843 = vrot.lane.b32.xlu1 %v832_v31, %s3390_s29  ;;  %v813_v40 = vmul.f32 %v3185_v32, %v3551_v20  ;;  %v3187_v41 = vpop.eup %3186 }
 0x21b   : > { %v814_v45 = vmul.f32 %v3187_v41, %v3579_v30 }
 0x21c   : > { %v833_v42 = vpack.c.bf16 %v813_v40, %v812_v39 }
 0x21d   : > { %v3189_v43 = vpop.eup %3188 }
 0x21e   : > { %v3191_v44 = vpop.eup %3190  ;;  %893 = vrot.lane.b32.xlu0 %v833_v42, %s3390_s29  ;;  %v815_v46 = vmul.f32 %v3189_v43, %v3585_v34 }
 0x21f   : > { %v816_v49 = vmul.f32 %v3191_v44, %v3577_v29 }
 0x220   : > { %v834_v48 = vpack.c.bf16 %v815_v46, %v814_v45 }
 0x221   : > { %v3193_v47 = vpop.eup %3192 }
 0x222   : > { %v817_v50 = vmul.f32 %v3193_v47, %v3583_v33  ;;  %1406 = vrot.lane.b32.xlu0 %v3561_v24, %s4341_s30  ;;  %943 = vrot.lane.b32.xlu1 %v834_v48, %s3390_s29 }
 0x224   : > { %v835_v51 = vpack.c.bf16 %v817_v50, %v816_v49 }
 0x226   : > { %1410 = vrot.lane.b32.xlu0 %v3555_v22, %s4341_s30  ;;  %993 = vrot.lane.b32.xlu1 %v835_v51, %s3390_s29  ;;  %s3396_s29 = smov 48  }
 0x22a   : > { %1334 = vrot.lane.b32.xlu0 %v3561_v24, %s4339_s0  ;;  %1408 = vrot.lane.b32.xlu1 %v3573_v27, %s4341_s30  ;;  %v692_v24 = vpop.xlane.xlu1 %691 }
 0x22e   : > { %1338 = vrot.lane.b32.xlu0 %v3555_v22, %s4339_s0  ;;  %1412 = vrot.lane.b32.xlu1 %v3569_v25, %s4341_s30  ;;  %v695_v22 = vpop.xlane.xlu0 %694  ;;  %v698_v52 = vpop.xlane.xlu1 %697 }
 0x22f   : > { %v716_v56 = vmax.f32 %v698_v52, 1e-24 }
 0x232   : > { %1414 = vrot.lane.b32.xlu0 %v3589_v35, %s4341_s30  ;;  %1336 = vrot.lane.b32.xlu1 %v3573_v27, %s4339_s0  ;;  %v701_v27 = vpop.xlane.xlu0 %700 }
 0x233   : > { %v717_v54 = vmax.f32 %v701_v27, 1e-24 }
 0x236   : > { %1418 = vrot.lane.b32.xlu0 %v3599_v37, %s4341_s30  ;;  %1340 = vrot.lane.b32.xlu1 %v3569_v25, %s4339_s0  ;;  %v715_v25 = vmax.f32 %v695_v22, 1e-24  ;;  %v707_v53 = vpop.xlane.xlu0 %706 }
 0x237   : > { %v719_v55 = vmax.f32 %v707_v53, 1e-24 }
 0x238   : > { %3194 = vrsqrt.f32 %v715_v25 }
 0x23a   : > { %1342 = vrot.lane.b32.xlu0 %v3589_v35, %s4339_s0  ;;  %1416 = vrot.lane.b32.xlu1 %v3595_v36, %s4341_s30  ;;  %v714_v35 = vmax.f32 %v692_v24, 1e-24 }
 0x23c   : > { %3196 = vrsqrt.f32 %v714_v35 }
 0x23d   : > { %3198 = vrsqrt.f32 %v717_v54 }
 0x23e   : > { %1346 = vrot.lane.b32.xlu0 %v3599_v37, %s4339_s0  ;;  %1420 = vrot.lane.b32.xlu1 %v3605_v38, %s4341_s30  ;;  %v704_v37 = vpop.xlane.xlu1 %703  ;;  %3200 = vrsqrt.f32 %v719_v55  ;;  %s2857_s30 = sld [smem:[#allocation2 + $0x1]] }
 0x23f   : > { %v718_v57 = vmax.f32 %v704_v37, 1e-24  ;;  %3202 = vrsqrt.f32 %v716_v56 }
 0x241   : > { %3204 = vrsqrt.f32 %v718_v57 }
 0x242   : > { %1344 = vrot.lane.b32.xlu1 %v3595_v36, %s4339_s0  ;;  %v713_v36 = vpop.xlane.xlu0 %712  ;;  %v3195_v58 = vpop.eup %3194 }
 0x243   : > { %v721_v60 = vmax.f32 %v713_v36, 1e-24  ;;  %v731_v61 = vmul.f32 %v3195_v58, %v3557_v23  ;;  %v840_v36 = vld [vmem:[%s4323_s2] sm:$0xff] }
 0x245   : > { %3206 = vrsqrt.f32 %v721_v60  ;;  %v821_v3 = vmul.f32 %v819_v2, %v731_v61 }
 0x246   : > { %1348 = vrot.lane.b32.xlu1 %v3605_v38, %s4339_s0  ;;  %v710_v38 = vpop.xlane.xlu1 %709  ;;  %v3197_v59 = vpop.eup %3196  ;;  %s4347_s0 = smov 80  }
 0x247   : > { %v720_v62 = vmax.f32 %v710_v38, 1e-24  ;;  %v730_v0 = vmul.f32 %v3197_v59, %v3549_v18  ;;  %v3199_v4 = vpop.eup %3198  ;;  %v841_v38 = vld [vmem:[%s4323_s2 + $0x8] sm:$0xff]  ;;  %v3735_v59 = vld [vmem:[%s3726_s23] sm:$0xff] }
 0x248   : > { %v3201_v5 = vpop.eup %3200  ;;  %v733_v12 = vmul.f32 %v3199_v4, %v3551_v20 }
 0x249   : > { %3208 = vrsqrt.f32 %v720_v62  ;;  %v820_v6 = vmul.f32 %v819_v2, %v730_v0  ;;  %v3203_v8 = vpop.eup %3202  ;;  %v735_v13 = vmul.f32 %v3201_v5, %v3585_v34 }
 0x24a   : > { %v732_v14 = vmul.f32 %v3203_v8, %v3547_v16  ;;  %v823_v31 = vmul.f32 %v819_v2, %v733_v12  ;;  %v3754_v12 = vld [vmem:[%s3726_s23 + $0x20] sm:$0xff] }
 0x24b   : > { %v3205_v10 = vpop.eup %3204  ;;  %v828_v11 = vpack.c.bf16 %v821_v3, %v820_v6  ;;  %v825_v39 = vmul.f32 %v819_v2, %v735_v13 }
 0x24c   : > { %v734_v28 = vmul.f32 %v3205_v10, %v3579_v30  ;;  %v822_v42 = vmul.f32 %v819_v2, %v732_v14 }
 0x24e   : > { %v824_v45 = vmul.f32 %v819_v2, %v734_v28  ;;  %v829_v47 = vpack.c.bf16 %v823_v31, %v822_v42 }
 0x24f   : > { %v3207_v32 = vpop.eup %3206 }
 0x250   : > { %v737_v46 = vmul.f32 %v3207_v32, %v3583_v33  ;;  %v830_v48 = vpack.c.bf16 %v825_v39, %v824_v45 }
 0x252   : > { %v827_v27 = vmul.f32 %v819_v2, %v737_v46  ;;  %v3776_v46 = vld [vmem:[%s3726_s23 + $0x30] sm:$0xff] }
 0x253   : > { %v3209_v43 = vpop.eup %3208 }
 0x254   : > { %v736_v49 = vmul.f32 %v3209_v43, %v3577_v29  ;;  %v3773_v43 = vld [vmem:[%s3726_s23 + $0x28] sm:$0xff] }
 0x256   : > { %v826_v53 = vmul.f32 %v819_v2, %v736_v49 }
 0x258   : > { %v831_v55 = vpack.c.bf16 %v827_v27, %v826_v53 }
 0x28c   : > { %v844_v63 = vpop.permute.xlu1 %843 }
 0x28d   : > { %v849_v1 = vsel %vm689_vm1, %v844_v63, 0  ;;  %v3738_v63 = vld [vmem:[%s3726_s23 + $0x8] sm:$0xff] }
 0x28e   : > { %2974 = vmatpush3.bf16.xpose.msra.mxu1 %v849_v1 }
 0x28f   : > { %2979 = vmatprep.subr.bf16.mxu1 %v3391_v9 }
 0x290   : > { %v894_v7 = vpop.permute.xlu0 %893 }
 0x291   : > { %v899_v15 = vsel %vm689_vm1, %v894_v7, 0  ;;  %v3751_v7 = vld [vmem:[%s3726_s23 + $0x10] sm:$0xff] }
 0x294   : > { %v1407_v17 = vpop.permute.xlu0 %1406  ;;  %v944_v19 = vpop.permute.xlu1 %943 }
 0x295   : > { %2976 = vmatmul.mubr.msk.bf16.vlgmr.msra.gmra.mrb[8].mxu1 %vm689_vm1, %v828_v11  ;;  %v1430_v21 = vsel %vm689_vm1, %v1407_v17, 0.0  ;;  %v949_v26 = vsel %vm689_vm1, %v944_v19, 0  ;;  %v3757_v17 = vld [vmem:[%s3726_s23 + $0x18] sm:$0xff] }
 0x296   : > { %2980 = vmatpush3.bf16.xpose.msra.mxu1 %v899_v15  ;;  %2981 = vmatprep.mubr.msk.bf16.mxu1 %vm3392_vm2, %v3391_v9 }
 0x297   : > { %1431 = vadd.xlane.f32.xlu1 %v1430_v21  ;;  %2986 = vmatpush3.bf16.xpose.msra.mxu0 %v949_v26 }
 0x298   : > { %2991 = vmatprep.subr.bf16.mxu1 %v3391_v9  ;;  %2997 = vmatprep.subr.bf16.mxu0 %v3391_v9  ;;  %v1411_v40 = vpop.permute.xlu0 %1410  ;;  %v994_v41 = vpop.permute.xlu1 %993 }
 0x299   : > { %v1436_v44 = vsel %vm689_vm1, %v1411_v40, 0.0  ;;  %v999_v50 = vsel %vm689_vm1, %v994_v41, 0 }
 0x29b   : > { %1437 = vadd.xlane.f32.xlu1 %v1436_v44 }
 0x29c   : > { %v1335_v51 = vpop.permute.xlu0 %1334  ;;  %v1409_v22 = vpop.permute.xlu1 %1408 }
 0x29d   : > { %2982 = vmatmul.mubr.msk.bf16.vlgmr.msra.gmra.mrb[12].mxu1 %vm689_vm1, %v829_v47  ;;  %v1358_v24 = vsel %vm689_vm1, %v1335_v51, 0.0  ;;  %v1433_v25 = vsel %vm689_vm1, %v1409_v22, 0.0 }
 0x29e   : > { %2988 = vmatmul.mubr.msk.bf16.vlgmr.msra.gmra.mrb[0].mxu0 %vm689_vm1, %v830_v48  ;;  %2992 = vmatpush3.bf16.xpose.msra.mxu1 %v999_v50 }
 0x29f   : > { %1359 = vadd.xlane.f32.xlu1 %v1358_v24  ;;  %1434 = vadd.xlane.f32.xlu0 %v1433_v25  ;;  %v3784_v24 = vld [vmem:[%s3726_s23 + $0x38] sm:$0xff]  ;;  %s3395_s23 = smov 64  }
 0x2a0   : > { %2993 = vmatprep.mubr.msk.bf16.mxu1 %vm3392_vm2, %v3391_v9  ;;  %3003 = vmatprep.subr.bf16.mxu1 %v3391_v9  ;;  %v1339_v35 = vpop.permute.xlu0 %1338  ;;  %v1413_v52 = vpop.permute.xlu1 %1412 }
 0x2a1   : > { %2999 = vmatprep.mubr.msk.bf16.mxu0 %vm3392_vm2, %v3391_v9  ;;  %v1364_v54 = vsel %vm689_vm1, %v1339_v35, 0.0  ;;  %v1439_v37 = vsel %vm689_vm1, %v1413_v52, 0.0 }
 0x2a3   : > { %1365 = vadd.xlane.f32.xlu1 %v1364_v54  ;;  %1440 = vadd.xlane.f32.xlu0 %v1439_v37 }
 0x2a4   : > { %v1337_v56 = vpop.permute.xlu1 %1336  ;;  %v1415_v44 = vpop.permute.xlu0 %1414 }
 0x2a5   : > { %2994 = vmatmul.mubr.msk.bf16.vlgmr.msra.gmra.mrb[16].mxu1 %vm689_vm1, %v831_v55  ;;  %v1361_v57 = vsel %vm689_vm1, %v1337_v56, 0.0  ;;  %v1442_v56 = vsel %vm689_vm1, %v1415_v44, 0.0 }
 0x2a6   : > { %3005 = vmatprep.mubr.msk.bf16.mxu1 %vm3392_vm2, %v3391_v9 }
 0x2a7   : > { %1362 = vadd.xlane.f32.xlu0 %v1361_v57 }
 0x2a8   : > { %v1341_v51 = vpop.permute.xlu1 %1340  ;;  %v1419_v37 = vpop.permute.xlu0 %1418 }
 0x2ac   : > { %v1417_v55 = vpop.permute.xlu1 %1416 }
 0x368   : > { %v885_v58 = vpop.f32.mrb[8].mxu1 }
 0x369   : > { %v886_v60 = vadd.f32 %v885_v58, %v840_v36  ;;  %v2977_v61 = vpop.f32.mrb[9].mxu1  ;;  %v1448_v58 = vsel %vm689_vm1, %v1419_v37, 0.0 }
 0x36a   : > { %v888_v62 = vpop.f32.mrb[10].mxu1 }
 0x36b   : > { %v889_v0 = vadd.f32 %v888_v62, %v841_v38  ;;  %v2978_v1 = vpop.f32.mrb[11].mxu1  ;;  %v3741_v2 = vadd.f32 %v886_v60, %v3735_v59  ;;  %v1421_v60 = vpop.permute.xlu1 %1420  ;;  %v1445_v62 = vsel %vm689_vm1, %v1417_v55, 0.0 }
 0x36d   : > { %v1050_v3 = vsel %vm689_vm1, %v3741_v2, -inf  ;;  %v3746_v4 = vadd.f32 %v889_v0, %v3738_v63 }
 0x36e   : > { %1051 = vmax.xlane.f32.xlu0 %v1050_v3 }
 0x36f   : > { %v1053_v5 = vsel %vm689_vm1, %v3746_v4, -inf  ;;  %v1345_v1 = vpop.permute.xlu1 %1344 }
 0x370   : > { %1054 = vmax.xlane.f32.xlu1 %v1053_v5  ;;  %v935_v6 = vpop.f32.mrb[12].mxu1  ;;  %v1451_v5 = vsel %vm689_vm1, %v1421_v60, 0.0 }
 0x371   : > { %v936_v8 = vadd.f32 %v935_v6, %v840_v36  ;;  %v985_v10 = vpop.f32.mrb[0].mxu0  ;;  %v2983_v11 = vpop.f32.mrb[13].mxu1  ;;  %v1373_v6 = vsel %vm689_vm1, %v1345_v1, 0.0 }
 0x372   : > { %v986_v13 = vadd.f32 %v985_v10, %v840_v36  ;;  %v2989_v14 = vpop.f32.mrb[1].mxu0  ;;  %v938_v15 = vpop.f32.mrb[14].mxu1  ;;  %v3809_v11 = vpack.c.bf16 %v3557_v23, %v3549_v18 }
 0x373   : > { %v939_v19 = vadd.f32 %v938_v15, %v841_v38  ;;  %v988_v21 = vpop.f32.mrb[2].mxu0  ;;  %v2984_v26 = vpop.f32.mrb[15].mxu1  ;;  %v3760_v28 = vadd.f32 %v936_v8, %v3751_v7  ;;  %v3819_v14 = vpack.c.bf16 %v3583_v33, %v3577_v29  ;;  %v3824_v15 = vpack.c.bf16 %v3551_v20, %v3547_v16 }
 0x374   : > { %v2990_v31 = vpop.f32.mrb[3].mxu0  ;;  %v3763_v32 = vadd.f32 %v986_v13, %v3754_v12  ;;  %v989_v39 = vadd.f32 %v988_v21, %v841_v38  ;;  %v1349_v8 = vpop.permute.xlu1 %1348  ;;  %v3814_v13 = vpack.c.bf16 %v3585_v34, %v3579_v30 }
 0x375   : > { %v1056_v40 = vsel %vm689_vm1, %v3760_v28, -inf  ;;  %v3768_v41 = vadd.f32 %v939_v19, %v3757_v17  ;;  %v1379_v10 = vsel %vm689_vm1, %v1349_v8, 0.0 }
 0x376   : > { %v1062_v42 = vsel %vm689_vm1, %v3763_v32, -inf  ;;  %1057 = vmax.xlane.f32.xlu0 %v1056_v40  ;;  %v3781_v50 = vadd.f32 %v989_v39, %v3773_v43 }
 0x377   : > { %1063 = vmax.xlane.f32.xlu1 %v1062_v42  ;;  %v1059_v49 = vsel %vm689_vm1, %v3768_v41, -inf }
 0x378   : > { %v1035_v45 = vpop.f32.mrb[16].mxu1  ;;  %v1065_v53 = vsel %vm689_vm1, %v3781_v50, -inf  ;;  %v3827_v19 = vpop.xlane.xlu1 %1431 }
 0x379   : > { %v1036_v47 = vadd.f32 %v1035_v45, %v840_v36  ;;  %v2995_v48 = vpop.f32.mrb[17].mxu1  ;;  %v1343_v36 = vpop.permute.xlu0 %1342 }
 0x37a   : > { %v1038_v22 = vpop.f32.mrb[18].mxu1  ;;  %1060 = vmax.xlane.f32.xlu0 %v1059_v49  ;;  %v1370_v61 = vsel %vm689_vm1, %v1343_v36, 0.0 }
 0x37b   : > { %v1039_v25 = vadd.f32 %v1038_v22, %v841_v38  ;;  %v2996_v27 = vpop.f32.mrb[19].mxu1  ;;  %v3787_v35 = vadd.f32 %v1036_v47, %v3776_v46  ;;  %v1367_v38 = vsel %vm689_vm1, %v1341_v51, 0.0 }
 0x37c   : > { %v3831_v26 = vpop.xlane.xlu1 %1437 }
 0x37d   : > { %v1068_v52 = vsel %vm689_vm1, %v3787_v35, -inf  ;;  %v3794_v54 = vadd.f32 %v1039_v25, %v3784_v24  ;;  %v1347_v0 = vpop.permute.xlu0 %1346 }
 0x37e   : > { %1069 = vmax.xlane.f32.xlu1 %v1068_v52  ;;  %1066 = vmax.xlane.f32.xlu0 %v1065_v53  ;;  %v1376_v3 = vsel %vm689_vm1, %v1347_v0, 0.0 }
 0x37f   : > { %v1071_v57 = vsel %vm689_vm1, %v3794_v54, -inf }
 0x380   : > { %v3833_v39 = vpop.xlane.xlu1 %1359 }
 0x381   : > { %v3829_v21 = vpop.xlane.xlu0 %1434 }
 0x382   : > { %1443 = vadd.xlane.f32.xlu1 %v1442_v56  ;;  %1072 = vmax.xlane.f32.xlu0 %v1071_v57 }
 0x384   : > { %v3837_v42 = vpop.xlane.xlu1 %1365 }
 0x385   : > { %v1441_v31 = vpop.xlane.xlu0 %1440 }
 0x386   : > { %1449 = vadd.xlane.f32.xlu1 %v1448_v58  ;;  %1368 = vadd.xlane.f32.xlu0 %v1367_v38 }
 0x389   : > { %v3835_v40 = vpop.xlane.xlu0 %1362 }
 0x38a   : > { %1371 = vadd.xlane.f32.xlu1 %v1370_v61  ;;  %1446 = vadd.xlane.f32.xlu0 %v1445_v62 }
 0x38e   : > { %1377 = vadd.xlane.f32.xlu1 %v1376_v3  ;;  %1452 = vadd.xlane.f32.xlu0 %v1451_v5 }
 0x392   : > { %1374 = vadd.xlane.f32.xlu0 %v1373_v6 }
 0x396   : > { %1380 = vadd.xlane.f32.xlu0 %v1379_v10 }
 0x39f   : > { %1143 = vrot.lane.b32.xlu1 %v3809_v11, %s3395_s23 }
 0x3a3   : > { %1239 = vrot.lane.b32.xlu1 %v3814_v13, %s3395_s23 }
 0x3a7   : > { %1287 = vrot.lane.b32.xlu1 %v3819_v14, %s3395_s23 }
 0x3ac   : > { %1191 = vrot.lane.b32.xlu0 %v3824_v15, %s3395_s23 }
 0x3fb   : > { %v1052_v44 = vpop.xlane.xlu0 %1051 }
 0x3fc   : > { %v1074_v45 = vsub.f32 %v3741_v2, %v1052_v44  ;;  %v1457_v44 = vmax.f32 %v1441_v31, 1e-24 }
 0x3fd   : > { %v1055_v47 = vpop.xlane.xlu1 %1054 }
 0x3fe   : > { %v1082_v48 = vmul.f32 1.442695, %v1074_v45  ;;  %v1075_v49 = vsub.f32 %v3746_v4, %v1055_v47 }
 0x400   : > { %3210 = vpow2.f32 %v1082_v48  ;;  %v1084_v51 = vmul.f32 1.442695, %v1075_v49  ;;  %v1454_v49 = vmax.f32 %v3827_v19, 1e-24  ;;  %v1382_v19 = vmax.f32 %v3833_v39, 1e-24 }
 0x402   : > { %3212 = vpow2.f32 %v1084_v51  ;;  %v1456_v51 = vmax.f32 %v3831_v26, 1e-24 }
 0x403   : > { %v1058_v22 = vpop.xlane.xlu0 %1057 }
 0x404   : > { %v1076_v25 = vsub.f32 %v3760_v28, %v1058_v22  ;;  %v1064_v27 = vpop.xlane.xlu1 %1063 }
 0x405   : > { %v1078_v52 = vsub.f32 %v3763_v32, %v1064_v27 }
 0x406   : > { %v1086_v53 = vmul.f32 1.442695, %v1076_v25  ;;  %v1455_v25 = vmax.f32 %v3829_v21, 1e-24 }
 0x407   : > { %v1090_v37 = vmul.f32 1.442695, %v1078_v52  ;;  %v1061_v55 = vpop.xlane.xlu0 %1060 }
 0x408   : > { %3214 = vpow2.f32 %v1086_v53  ;;  %v1077_v56 = vsub.f32 %v3768_v41, %v1061_v55 }
 0x409   : > { %3216 = vpow2.f32 %v1090_v37 }
 0x40a   : > { %v3844_v2 = vpop.eup %3210  ;;  %v1088_v57 = vmul.f32 1.442695, %v1077_v56  ;;  %v1383_v56 = vmax.f32 %v3835_v40, 1e-24 }
 0x40b   : > { %v1067_v4 = vpop.xlane.xlu0 %1066  ;;  %v1070_v36 = vpop.xlane.xlu1 %1069  ;;  %v1098_v58 = vsel %vm689_vm1, %v3844_v2, 0.0 }
 0x40c   : > { %v3848_v38 = vpop.eup %3212  ;;  %3218 = vpow2.f32 %v1088_v57  ;;  %v1079_v28 = vsub.f32 %v3781_v50, %v1067_v4  ;;  %v1080_v32 = vsub.f32 %v3787_v35, %v1070_v36  ;;  %1099 = vadd.xlane.f32.xlu1 %v1098_v58 }
 0x40d   : > { %v1101_v41 = vsel %vm689_vm1, %v3848_v38, 0.0 }
 0x40e   : > { %v1092_v60 = vmul.f32 1.442695, %v1079_v28  ;;  %v1094_v61 = vmul.f32 1.442695, %v1080_v32  ;;  %1102 = vadd.xlane.f32.xlu0 %v1101_v41 }
 0x40f   : > { %v1073_v62 = vpop.xlane.xlu0 %1072  ;;  %v1444_v0 = vpop.xlane.xlu1 %1443 }
 0x410   : > { %3220 = vpow2.f32 %v1092_v60  ;;  %v1081_v1 = vsub.f32 %v3794_v54, %v1073_v62  ;;  %v1458_v55 = vmax.f32 %v1444_v0, 1e-24 }
 0x411   : > { %3222 = vpow2.f32 %v1094_v61  ;;  %v1384_v61 = vmax.f32 %v3837_v42, 1e-24 }
 0x412   : > { %v3855_v3 = vpop.eup %3214  ;;  %v1096_v5 = vmul.f32 1.442695, %v1081_v1 }
 0x413   : > { %v1369_v6 = vpop.xlane.xlu0 %1368  ;;  %v1450_v50 = vpop.xlane.xlu1 %1449  ;;  %v1104_v35 = vsel %vm689_vm1, %v3855_v3, 0.0 }
 0x414   : > { %v3859_v8 = vpop.eup %3216  ;;  %3224 = vpow2.f32 %v1096_v5  ;;  %1105 = vadd.xlane.f32.xlu1 %v1104_v35  ;;  %v1460_v39 = vmax.f32 %v1450_v50, 1e-24  ;;  %v1385_v32 = vmax.f32 %v1369_v6, 1e-24 }
 0x415   : > { %v1110_v48 = vsel %vm689_vm1, %v3859_v8, 0.0  ;;  %3226 = vrsqrt.f32 %v1457_v44 }
 0x416   : > { %v3861_v10 = vpop.eup %3218  ;;  %3228 = vrsqrt.f32 %v1454_v49 }
 0x417   : > { %v1447_v45 = vpop.xlane.xlu0 %1446  ;;  %v3863_v47 = vpop.xlane.xlu1 %1371  ;;  %v1107_v54 = vsel %vm689_vm1, %v3861_v10, 0.0  ;;  %3230 = vrsqrt.f32 %v1456_v51 }
 0x418   : > { %1108 = vadd.xlane.f32.xlu0 %v1107_v54  ;;  %1111 = vadd.xlane.f32.xlu1 %v1110_v48  ;;  %v1459_v27 = vmax.f32 %v1447_v45, 1e-24  ;;  %3232 = vrsqrt.f32 %v1455_v25  ;;  %v1386_v6 = vmax.f32 %v3863_v47, 1e-24 }
 0x41a   : > { %v3871_v22 = vpop.eup %3220  ;;  %3234 = vrsqrt.f32 %v1459_v27 }
 0x41b   : > { %v3874_v31 = vpop.eup %3222  ;;  %v1453_v52 = vpop.xlane.xlu0 %1452  ;;  %v1113_v37 = vsel %vm689_vm1, %v3871_v22, 0.0  ;;  %3236 = vrsqrt.f32 %v1382_v19 }
 0x41c   : > { %v1378_v53 = vpop.xlane.xlu1 %1377  ;;  %1114 = vadd.xlane.f32.xlu0 %v1113_v37  ;;  %v1116_v26 = vsel %vm689_vm1, %v3874_v31, 0.0  ;;  %v1461_v57 = vmax.f32 %v1453_v52, 1e-24  ;;  %3238 = vrsqrt.f32 %v1458_v55 }
 0x41d   : > { %1117 = vadd.xlane.f32.xlu1 %v1116_v26  ;;  %v1388_v28 = vmax.f32 %v1378_v53, 1e-24  ;;  %3240 = vrsqrt.f32 %v1383_v56 }
 0x41e   : > { %v3881_v21 = vpop.eup %3224  ;;  %3242 = vrsqrt.f32 %v1461_v57 }
 0x41f   : > { %v1375_v4 = vpop.xlane.xlu0 %1374  ;;  %v1119_v58 = vsel %vm689_vm1, %v3881_v21, 0.0  ;;  %3244 = vrsqrt.f32 %v1460_v39  ;;  %v3227_v60 = vpop.eup %3226 }
 0x420   : > { %v1144_v36 = vpop.permute.xlu1 %1143  ;;  %1120 = vadd.xlane.f32.xlu0 %v1119_v58  ;;  %3246 = vrsqrt.f32 %v1388_v28  ;;  %v3229_v62 = vpop.eup %3228  ;;  %v1387_v1 = vmax.f32 %v1375_v4, 1e-24  ;;  %v1473_v35 = vmul.f32 %v3227_v60, %v3551_v20 }
 0x421   : > { %2998 = vmatpush3.bf16.msra.mxu0 %v1144_v36  ;;  %v3231_v0 = vpop.eup %3230  ;;  %v1470_v57 = vmul.f32 %v3229_v62, %v3549_v18 }
 0x422   : > { %3009 = vmatprep.subr.bf16.mxu0 %v3391_v9  ;;  %v3233_v50 = vpop.eup %3232  ;;  %v1472_v42 = vmul.f32 %v3231_v0, %v3547_v16 }
 0x423   : > { %v1381_v41 = vpop.xlane.xlu0 %1380  ;;  %v1471_v53 = vmul.f32 %v3233_v50, %v3557_v23 }
 0x424   : > { %v1389_v40 = vmax.f32 %v1381_v41, 1e-24  ;;  %v3235_v44 = vpop.eup %3234  ;;  %v1493_v49 = vpack.c.bf16 %v1473_v35, %v1472_v42  ;;  %v1479_v41 = vstv %s2857_s30  ;;  %s3397_s30 = smov 16  }
 0x425   : > { %v3237_v45 = vpop.eup %3236  ;;  %v1475_v51 = vmul.f32 %v3235_v44, %v3585_v34 }
 0x426   : > { %3248 = vrsqrt.f32 %v1389_v40  ;;  %v3239_v54 = vpop.eup %3238  ;;  %v1398_v39 = vmul.f32 %v3237_v45, %v3549_v18 }
 0x427   : > { %3250 = vrsqrt.f32 %v1385_v32  ;;  %v1192_v5 = vpop.permute.xlu0 %1191  ;;  %v3241_v48 = vpop.eup %3240  ;;  %v1474_v52 = vmul.f32 %v3239_v54, %v3579_v30  ;;  %v1492_v32 = vpack.c.bf16 %v1471_v53, %v1470_v57 }
 0x428   : > { %3004 = vmatpush3.bf16.msra.mxu1 %v1192_v5  ;;  %3252 = vrsqrt.f32 %v1384_v61  ;;  %v3243_v25 = vpop.eup %3242  ;;  %v1399_v55 = vmul.f32 %v3241_v48, %v3557_v23  ;;  %v1480_v62 = vmul.f32 %v1479_v41, %v1398_v39 }
 0x429   : > { %3015 = vmatprep.subr.bf16.mxu1 %v3391_v9  ;;  %3254 = vrsqrt.f32 %v1387_v1  ;;  %v3245_v27 = vpop.eup %3244  ;;  %v1494_v19 = vpack.c.bf16 %v1475_v51, %v1474_v52  ;;  %v1477_v26 = vmul.f32 %v3243_v25, %v3583_v33 }
 0x42a   : > { %3256 = vrsqrt.f32 %v1386_v6  ;;  %v3247_v47 = vpop.eup %3246  ;;  %v1476_v36 = vmul.f32 %v3245_v27, %v3577_v29  ;;  %v1481_v61 = vmul.f32 %v1479_v41, %v1399_v55 }
 0x42b   : > { %v1404_v58 = vmul.f32 %v3247_v47, %v3577_v29 }
 0x42c   : > { %v1495_v40 = vpack.c.bf16 %v1477_v26, %v1476_v36  ;;  %v1488_v18 = vpack.c.bf16 %v1481_v61, %v1480_v62 }
 0x42e   : > { %1556 = vrot.lane.b32.xlu1 %v1493_v49, %s4347_s0 }
 0x430   : > { %v3249_v37 = vpop.eup %3248 }
 0x431   : > { %v3251_v56 = vpop.eup %3250  ;;  %v1405_v4 = vmul.f32 %v3249_v37, %v3583_v33  ;;  %v1486_v33 = vmul.f32 %v1479_v41, %v1404_v58 }
 0x432   : > { %1609 = vrot.lane.b32.xlu1 %v1494_v19, %s4347_s0  ;;  %v3253_v28 = vpop.eup %3252  ;;  %v1401_v23 = vmul.f32 %v3251_v56, %v3551_v20 }
 0x433   : > { %v1487_v60 = vmul.f32 %v1479_v41, %v1405_v4  ;;  %v3255_v0 = vpop.eup %3254  ;;  %v1400_v1 = vmul.f32 %v3253_v28, %v3547_v16  ;;  %v1240_v16 = vpop.permute.xlu1 %1239 }
 0x434   : > { %v3257_v29 = vpop.eup %3256  ;;  %v1483_v50 = vmul.f32 %v1479_v41, %v1401_v23  ;;  %v1403_v35 = vmul.f32 %v3255_v0, %v3585_v34 }
 0x435   : > { %v1491_v5 = vpack.c.bf16 %v1487_v60, %v1486_v33  ;;  %v1482_v20 = vmul.f32 %v1479_v41, %v1400_v1  ;;  %v1402_v44 = vmul.f32 %v3257_v29, %v3579_v30 }
 0x436   : > { %1662 = vrot.lane.b32.xlu1 %v1495_v40, %s4347_s0  ;;  %1503 = vrot.lane.b32.xlu0 %v1492_v32, %s4347_s0  ;;  %v1485_v45 = vmul.f32 %v1479_v41, %v1403_v35 }
 0x437   : > { %v1489_v6 = vpack.c.bf16 %v1483_v50, %v1482_v20  ;;  %v1484_v42 = vmul.f32 %v1479_v41, %v1402_v44  ;;  %v1288_v48 = vpop.permute.xlu1 %1287 }
 0x439   : > { %v1490_v54 = vpack.c.bf16 %v1485_v45, %v1484_v42 }
 0x43a   : > { %1659 = vrot.lane.b32.xlu1 %v1491_v5, %s4348_s24  ;;  %1500 = vrot.lane.b32.xlu0 %v1488_v18, %s4348_s24 }
 0x43e   : > { %1553 = vrot.lane.b32.xlu0 %v1489_v6, %s4348_s24 }
 0x442   : > { %1606 = vrot.lane.b32.xlu0 %v1490_v54, %s4348_s24 }
 0x499   : > { %v1100_v49 = vpop.xlane.xlu1 %1099 }
 0x49a   : > { %3258 = vrcp.f32 %v1100_v49 }
 0x49b   : > { %v1103_v34 = vpop.xlane.xlu0 %1102 }
 0x49c   : > { %3260 = vrcp.f32 %v1103_v34 }
 0x4a1   : > { %v1106_v51 = vpop.xlane.xlu1 %1105 }
 0x4a2   : > { %3262 = vrcp.f32 %v1106_v51 }
 0x4a4   : > { %v3259_v25 = vpop.eup %3258 }
 0x4a5   : > { %v1109_v27 = vpop.xlane.xlu0 %1108  ;;  %v1112_v52 = vpop.xlane.xlu1 %1111  ;;  %v1130_v47 = vmul.f32 %v3259_v25, %v3844_v2 }
 0x4a6   : > { %v3261_v30 = vpop.eup %3260  ;;  %3264 = vrcp.f32 %v1109_v27  ;;  %v2858_v27 = vld [vmem:[%s4323_s2 + $0x10] sm:$0xff] }
 0x4a7   : > { %v1131_v53 = vmul.f32 %v3261_v30, %v3848_v38  ;;  %3266 = vrcp.f32 %v1112_v52 }
 0x4a9   : > { %v1115_v37 = vpop.xlane.xlu0 %1114  ;;  %v1138_v19 = vpack.c.bf16 %v1131_v53, %v1130_v47  ;;  %v2859_v47 = vld [vmem:[%s4323_s2 + $0x18] sm:$0xff] }
 0x4aa   : > { %3268 = vrcp.f32 %v1115_v37  ;;  %v1118_v26 = vpop.xlane.xlu1 %1117 }
 0x4ab   : > { %3000 = vmatmul.mubr.msk.bf16.vlgmr.msra.gmra.mrb[4].mxu0 %vm689_vm1, %v1138_v19  ;;  %3270 = vrcp.f32 %v1118_v26 }
 0x4ac   : > { %3010 = vmatpush3.bf16.msra.mxu0 %v1240_v16  ;;  %3011 = vmatprep.mubr.msk.bf16.mxu0 %vm3392_vm2, %v3391_v9  ;;  %v3263_v56 = vpop.eup %3262 }
 0x4ad   : > { %v1121_v55 = vpop.xlane.xlu0 %1120  ;;  %3021 = vmatprep.subr.bf16.mxu0 %v3391_v9  ;;  %v1132_v38 = vmul.f32 %v3263_v56, %v3855_v3 }
 0x4ae   : > { %3272 = vrcp.f32 %v1121_v55  ;;  %v1557_v40 = vpop.permute.xlu1 %1556 }
 0x4af   : > { %v1562_v33 = vsel %vm689_vm1, %v1557_v40, 0 }
 0x4b0   : > { %v3265_v2 = vpop.eup %3264 }
 0x4b1   : > { %v1133_v57 = vmul.f32 %v3265_v2, %v3861_v10  ;;  %v3267_v4 = vpop.eup %3266  ;;  %v1504_v41 = vpop.permute.xlu0 %1503 }
 0x4b2   : > { %v1134_v39 = vmul.f32 %v3267_v4, %v3859_v8  ;;  %v1509_v8 = vsel %vm689_vm1, %v1504_v41, 0  ;;  %v1610_v0 = vpop.permute.xlu1 %1609 }
 0x4b3   : > { %v1139_v36 = vpack.c.bf16 %v1133_v57, %v1132_v38 }
 0x4b4   : > { %v3269_v58 = vpop.eup %3268 }
 0x4b5   : > { %v1135_v28 = vmul.f32 %v3269_v58, %v3871_v22  ;;  %3006 = vmatmul.mubr.msk.bf16.vlgmr.msra.gmra.mrb[20].mxu1 %vm689_vm1, %v1139_v36  ;;  %v3271_v32 = vpop.eup %3270  ;;  %v1501_v23 = vpop.permute.xlu0 %1500 }
 0x4b6   : > { %3016 = vmatpush3.bf16.msra.mxu1 %v1288_v48  ;;  %3017 = vmatprep.mubr.msk.bf16.mxu1 %vm3392_vm2, %v3391_v9  ;;  %v1136_v10 = vmul.f32 %v3271_v32, %v3874_v31  ;;  %v1615_v31 = vsel %vm689_vm1, %v1610_v0, 0  ;;  %v1663_v62 = vpop.permute.xlu1 %1662 }
 0x4b7   : > { %v1140_v60 = vpack.c.bf16 %v1135_v28, %v1134_v39  ;;  %3027 = vmatprep.subr.bf16.mxu1 %v3391_v9  ;;  %v1668_v1 = vsel %vm689_vm1, %v1663_v62, 0 }
 0x4b8   : > { %v3273_v3 = vpop.eup %3272 }
 0x4b9   : > { %v1137_v61 = vmul.f32 %v3273_v3, %v3881_v21  ;;  %3012 = vmatmul.mubr.msk.bf16.vlgmr.msra.gmra.mrb[8].mxu0 %vm689_vm1, %v1140_v60  ;;  %v1554_v21 = vpop.permute.xlu0 %1553 }
 0x4ba   : > { %3022 = vmatpush3.bf16.xpose.msra.mxu0 %v1509_v8  ;;  %3023 = vmatprep.mubr.msk.bf16.mxu0 %vm3392_vm2, %v3391_v9  ;;  %v1660_v5 = vpop.permute.xlu1 %1659 }
 0x4bb   : > { %v1141_v22 = vpack.c.bf16 %v1137_v61, %v1136_v10  ;;  %3033 = vmatprep.subr.bf16.mxu0 %v3391_v9 }
 0x4bd   : > { %3018 = vmatmul.mubr.msk.bf16.vlgmr.msra.gmra.mrb[24].mxu1 %vm689_vm1, %v1141_v22  ;;  %v1607_v29 = vpop.permute.xlu0 %1606 }
 0x4be   : > { %3029 = vmatprep.mubr.msk.bf16.mxu1 %vm3392_vm2, %v3391_v9 }
 0x4bf   : > { %3028 = vmatpush3.bf16.xpose.msra.mxu1 %v1562_v33 }
 0x4c0   : > { %3039 = vmatprep.subr.bf16.mxu1 %v3391_v9 }
 0x4c1   : > { %3024 = vmatmul.mubr.msk.bf16.vlgmr.msra.gmra.mrb[12].mxu0 %vm689_vm1, %v1501_v23 }
 0x4c2   : > { %3034 = vmatpush3.bf16.xpose.msra.mxu0 %v1615_v31  ;;  %3035 = vmatprep.mubr.msk.bf16.mxu0 %vm3392_vm2, %v3391_v9 }
 0x4c3   : > { %3045 = vmatprep.subr.bf16.mxu0 %v3391_v9 }
 0x4c6   : > { %3030 = vmatmul.mubr.msk.bf16.vlgmr.msra.gmra.mrb[28].mxu1 %vm689_vm1, %v1554_v21 }
 0x4c7   : > { %3040 = vmatpush3.bf16.xpose.msra.mxu1 %v1668_v1  ;;  %3041 = vmatprep.mubr.msk.bf16.mxu1 %vm3392_vm2, %v3391_v9 }
 0x4c8   : > { %3051 = vmatprep.subr.bf16.mxu1 %v3391_v9 }
 0x4c9   : > { %3036 = vmatmul.mubr.msk.bf16.vlgmr.msra.gmra.mrb[16].mxu0 %vm689_vm1, %v1607_v29 }
 0x4ca   : > { %3047 = vmatprep.mubr.msk.bf16.mxu0 %vm3392_vm2, %v3391_v9 }
 0x4ce   : > { %3042 = vmatmul.mubr.msk.bf16.vlgmr.msra.gmra.mrb[32].mxu1 %vm689_vm1, %v1660_v5 }
 0x4cf   : > { %3053 = vmatprep.mubr.msk.bf16.mxu1 %vm3392_vm2, %v3391_v9 }
 0x57e   : > { %v3956_v18 = vpop.f32.mrb[4].mxu0 }
 0x57f   : > { %v3001_v50 = vpop.f32.mrb[5].mxu0 }
 0x580   : > { %v3958_v35 = vpop.f32.mrb[6].mxu0 }
 0x581   : > { %v3002_v20 = vpop.f32.mrb[7].mxu0 }
 0x588   : > { %v3960_v44 = vpop.f32.mrb[20].mxu1 }
 0x589   : > { %v3007_v6 = vpop.f32.mrb[21].mxu1 }
 0x58a   : > { %v3962_v45 = vpop.f32.mrb[22].mxu1 }
 0x58b   : > { %v3008_v42 = vpop.f32.mrb[23].mxu1 }
 0x58c   : > { %v3964_v54 = vpop.f32.mrb[8].mxu0 }
 0x58d   : > { %v3013_v16 = vpop.f32.mrb[9].mxu0 }
 0x58e   : > { %v3966_v48 = vpop.f32.mrb[10].mxu0 }
 0x58f   : > { %v3014_v49 = vpop.f32.mrb[11].mxu0 }
 0x590   : > { %v3968_v34 = vpop.f32.mrb[24].mxu1 }
 0x591   : > { %v3019_v51 = vpop.f32.mrb[25].mxu1 }
 0x592   : > { %v3970_v25 = vpop.f32.mrb[26].mxu1 }
 0x593   : > { %v3020_v52 = vpop.f32.mrb[27].mxu1 }
 0x594   : > { %v1545_v30 = vpop.f32.mrb[12].mxu0 }
 0x595   : > { %v1546_v53 = vadd.f32 %v2858_v27, %v1545_v30  ;;  %v3025_v37 = vpop.f32.mrb[13].mxu0 }
 0x596   : > { %v1548_v19 = vpop.f32.mrb[14].mxu0 }
 0x597   : > { %v1549_v26 = vadd.f32 %v2859_v47, %v1548_v19  ;;  %v3026_v55 = vpop.f32.mrb[15].mxu0  ;;  %v1711_v56 = vadd.f32 %v1546_v53, %v3735_v59 }
 0x599   : > { %v1598_v2 = vpop.f32.mrb[28].mxu1  ;;  %v1719_v38 = vsel %vm689_vm1, %v1711_v56, -inf  ;;  %v1712_v57 = vadd.f32 %v1549_v26, %v3738_v63 }
 0x59a   : > { %v1599_v4 = vadd.f32 %v2858_v27, %v1598_v2  ;;  %v3031_v36 = vpop.f32.mrb[29].mxu1  ;;  %1720 = vmax.xlane.f32.xlu0 %v1719_v38 }
 0x59b   : > { %v1601_v58 = vpop.f32.mrb[30].mxu1  ;;  %v1722_v39 = vsel %vm689_vm1, %v1712_v57, -inf }
 0x59c   : > { %v1602_v28 = vadd.f32 %v2859_v47, %v1601_v58  ;;  %v3032_v32 = vpop.f32.mrb[31].mxu1  ;;  %1723 = vmax.xlane.f32.xlu1 %v1722_v39  ;;  %v1651_v41 = vpop.f32.mrb[16].mxu0  ;;  %v1713_v40 = vadd.f32 %v1599_v4, %v3751_v7 }
 0x59d   : > { %v1652_v60 = vadd.f32 %v2858_v27, %v1651_v41  ;;  %v3037_v3 = vpop.f32.mrb[17].mxu0 }
 0x59e   : > { %v1725_v59 = vsel %vm689_vm1, %v1713_v40, -inf  ;;  %v1654_v10 = vpop.f32.mrb[18].mxu0  ;;  %v1714_v61 = vadd.f32 %v1602_v28, %v3757_v17 }
 0x59f   : > { %1726 = vmax.xlane.f32.xlu0 %v1725_v59  ;;  %v1655_v63 = vadd.f32 %v2859_v47, %v1654_v10  ;;  %v3038_v8 = vpop.f32.mrb[19].mxu0  ;;  %v1715_v22 = vadd.f32 %v1652_v60, %v3754_v12 }
 0x5a0   : > { %v1728_v21 = vsel %vm689_vm1, %v1714_v61, -inf }
 0x5a1   : > { %v1704_v23 = vpop.f32.mrb[32].mxu1  ;;  %v1731_v0 = vsel %vm689_vm1, %v1715_v22, -inf  ;;  %v1716_v7 = vadd.f32 %v1655_v63, %v3773_v43 }
 0x5a2   : > { %v1705_v33 = vadd.f32 %v2858_v27, %v1704_v23  ;;  %v3043_v31 = vpop.f32.mrb[33].mxu1  ;;  %1732 = vmax.xlane.f32.xlu1 %v1731_v0 }
 0x5a3   : > { %1729 = vmax.xlane.f32.xlu0 %v1728_v21  ;;  %v1707_v62 = vpop.f32.mrb[34].mxu1  ;;  %v1734_v5 = vsel %vm689_vm1, %v1716_v7, -inf }
 0x5a4   : > { %v1708_v1 = vadd.f32 %v2859_v47, %v1707_v62  ;;  %v3044_v29 = vpop.f32.mrb[35].mxu1  ;;  %v1717_v17 = vadd.f32 %v1705_v33, %v3776_v46 }
 0x5a6   : > { %v1737_v12 = vsel %vm689_vm1, %v1717_v17, -inf  ;;  %v1718_v50 = vadd.f32 %v1708_v1, %v3784_v24 }
 0x5a7   : > { %1735 = vmax.xlane.f32.xlu0 %v1734_v5  ;;  %1738 = vmax.xlane.f32.xlu1 %v1737_v12 }
 0x5a8   : > { %v1740_v20 = vsel %vm689_vm1, %v1718_v50, -inf }
 0x5ab   : > { %1741 = vmax.xlane.f32.xlu0 %v1740_v20 }
 0x5b8   : > { %1811 = vrot.lane.b32.xlu1 %v3809_v11, %s3396_s29 }
 0x627   : > { %v1721_v43 = vpop.xlane.xlu0 %1720 }
 0x628   : > { %v1743_v6 = vsub.f32 %v1711_v56, %v1721_v43 }
 0x629   : > { %v1724_v42 = vpop.xlane.xlu1 %1723 }
 0x62a   : > { %v1751_v16 = vmul.f32 1.442695, %v1743_v6  ;;  %v1744_v46 = vsub.f32 %v1712_v57, %v1724_v42 }
 0x62c   : > { %3274 = vpow2.f32 %v1751_v16  ;;  %v1753_v49 = vmul.f32 1.442695, %v1744_v46  ;;  %v1727_v51 = vpop.xlane.xlu0 %1726 }
 0x62d   : > { %v1745_v27 = vsub.f32 %v1713_v40, %v1727_v51 }
 0x62e   : > { %3276 = vpow2.f32 %v1753_v49 }
 0x62f   : > { %v1755_v24 = vmul.f32 1.442695, %v1745_v27  ;;  %v1733_v52 = vpop.xlane.xlu1 %1732 }
 0x630   : > { %v1730_v30 = vpop.xlane.xlu0 %1729  ;;  %v1747_v47 = vsub.f32 %v1715_v22, %v1733_v52 }
 0x631   : > { %3278 = vpow2.f32 %v1755_v24  ;;  %v1746_v53 = vsub.f32 %v1714_v61, %v1730_v30 }
 0x632   : > { %v1759_v37 = vmul.f32 1.442695, %v1747_v47 }
 0x633   : > { %v1757_v19 = vmul.f32 1.442695, %v1746_v53 }
 0x634   : > { %3280 = vpow2.f32 %v1759_v37  ;;  %v1736_v11 = vpop.xlane.xlu0 %1735  ;;  %v1739_v26 = vpop.xlane.xlu1 %1738 }
 0x635   : > { %3282 = vpow2.f32 %v1757_v19  ;;  %v1748_v55 = vsub.f32 %v1716_v7, %v1736_v11  ;;  %v1749_v56 = vsub.f32 %v1717_v17, %v1739_v26 }
 0x636   : > { %v3275_v2 = vpop.eup %3274 }
 0x637   : > { %v1761_v38 = vmul.f32 1.442695, %v1748_v55  ;;  %v1763_v57 = vmul.f32 1.442695, %v1749_v56  ;;  %v1767_v4 = vsel %vm689_vm1, %v3275_v2, 0.0  ;;  %v3166_v55 = vld [vmem:[%s4326_s5] sm:$0xff]  }
 0x638   : > { %v3277_v36 = vpop.eup %3276  ;;  %v1742_v58 = vpop.xlane.xlu0 %1741  ;;  %1768 = vadd.xlane.f32.xlu1 %v1767_v4  ;;  %v3167_v56 = vld [vmem:[%s4326_s5 + $0x8] sm:$0xff]  }
 0x639   : > { %v1812_v39 = vpop.permute.xlu1 %1811  ;;  %3284 = vpow2.f32 %v1761_v38  ;;  %v1750_v28 = vsub.f32 %v1718_v50, %v1742_v58  ;;  %v1770_v32 = vsel %vm689_vm1, %v3277_v36, 0.0 }
 0x63a   : > { %3046 = vmatpush3.bf16.msra.mxu0 %v1812_v39  ;;  %3286 = vpow2.f32 %v1763_v57  ;;  %1771 = vadd.xlane.f32.xlu0 %v1770_v32 }
 0x63b   : > { %3057 = vmatprep.subr.bf16.mxu0 %v3391_v9  ;;  %v3279_v41 = vpop.eup %3278  ;;  %v1765_v40 = vmul.f32 1.442695, %v1750_v28 }
 0x63c   : > { %v1773_v60 = vsel %vm689_vm1, %v3279_v41, 0.0 }
 0x63d   : > { %3288 = vpow2.f32 %v1765_v40  ;;  %1774 = vadd.xlane.f32.xlu1 %v1773_v60 }
 0x63e   : > { %v3281_v3 = vpop.eup %3280 }
 0x63f   : > { %v3283_v59 = vpop.eup %3282  ;;  %v1779_v10 = vsel %vm689_vm1, %v3281_v3, 0.0 }
 0x640   : > { %v1776_v61 = vsel %vm689_vm1, %v3283_v59, 0.0 }
 0x641   : > { %1777 = vadd.xlane.f32.xlu0 %v1776_v61  ;;  %1780 = vadd.xlane.f32.xlu1 %v1779_v10 }
 0x643   : > { %v3285_v63 = vpop.eup %3284 }
 0x644   : > { %v3287_v8 = vpop.eup %3286  ;;  %v1782_v22 = vsel %vm689_vm1, %v3285_v63, 0.0 }
 0x645   : > { %1783 = vadd.xlane.f32.xlu0 %v1782_v22  ;;  %v1785_v23 = vsel %vm689_vm1, %v3287_v8, 0.0 }
 0x646   : > { %1786 = vadd.xlane.f32.xlu1 %v1785_v23 }
 0x647   : > { %v3289_v0 = vpop.eup %3288 }
 0x648   : > { %v1788_v33 = vsel %vm689_vm1, %v3289_v0, 0.0 }
 0x649   : > { %1789 = vadd.xlane.f32.xlu0 %v1788_v33 }
 0x657   : > { %1905 = vrot.lane.b32.xlu1 %v3814_v13, %s3396_s29 }
 0x65b   : > { %1952 = vrot.lane.b32.xlu1 %v3819_v14, %s3396_s29 }
 0x65f   : > { %1858 = vrot.lane.b32.xlu0 %v3824_v15, %s3396_s29 }
 0x6c5   : > { %v1769_v31 = vpop.xlane.xlu1 %1768 }
 0x6c6   : > { %3290 = vrcp.f32 %v1769_v31 }
 0x6c7   : > { %v1772_v21 = vpop.xlane.xlu0 %1771 }
 0x6c8   : > { %3292 = vrcp.f32 %v1772_v21 }
 0x6ca   : > { %v1775_v7 = vpop.xlane.xlu1 %1774 }
 0x6cb   : > { %3294 = vrcp.f32 %v1775_v7 }
 0x6ce   : > { %v1778_v62 = vpop.xlane.xlu0 %1777  ;;  %v1781_v1 = vpop.xlane.xlu1 %1780 }
 0x6cf   : > { %3296 = vrcp.f32 %v1778_v62 }
 0x6d0   : > { %v3291_v29 = vpop.eup %3290  ;;  %3298 = vrcp.f32 %v1781_v1 }
 0x6d1   : > { %v1799_v13 = vmul.f32 %v3291_v29, %v3275_v2 }
 0x6d2   : > { %v3293_v17 = vpop.eup %3292  ;;  %v1784_v5 = vpop.xlane.xlu0 %1783 }
 0x6d3   : > { %v1800_v12 = vmul.f32 %v3293_v17, %v3277_v36  ;;  %3300 = vrcp.f32 %v1784_v5  ;;  %v1787_v14 = vpop.xlane.xlu1 %1786 }
 0x6d4   : > { %3302 = vrcp.f32 %v1787_v14 }
 0x6d5   : > { %v1807_v50 = vpack.c.bf16 %v1800_v12, %v1799_v13  ;;  %v3295_v20 = vpop.eup %3294 }
 0x6d6   : > { %v1790_v15 = vpop.xlane.xlu0 %1789  ;;  %v1801_v42 = vmul.f32 %v3295_v20, %v3279_v41 }
 0x6d7   : > { %3304 = vrcp.f32 %v1790_v15  ;;  %v1906_v43 = vpop.permute.xlu1 %1905  ;;  %3048 = vmatmul.mubr.msk.bf16.vlgmr.msra.gmra.mrb[20].mxu0 %vm689_vm1, %v1807_v50 }
 0x6d8   : > { %3058 = vmatpush3.bf16.msra.mxu0 %v1906_v43  ;;  %3059 = vmatprep.mubr.msk.bf16.mxu0 %vm3392_vm2, %v3391_v9 }
 0x6d9   : > { %v3297_v6 = vpop.eup %3296  ;;  %3069 = vmatprep.subr.bf16.mxu0 %v3166_v55 }
 0x6da   : > { %v1802_v16 = vmul.f32 %v3297_v6, %v3283_v59  ;;  %v1859_v46 = vpop.permute.xlu0 %1858  ;;  %v3299_v49 = vpop.eup %3298 }
 0x6db   : > { %3052 = vmatpush3.bf16.msra.mxu1 %v1859_v46  ;;  %v1803_v24 = vmul.f32 %v3299_v49, %v3281_v3  ;;  %v1953_v30 = vpop.permute.xlu1 %1952 }
 0x6dc   : > { %v1808_v51 = vpack.c.bf16 %v1802_v16, %v1801_v42  ;;  %3063 = vmatprep.subr.bf16.mxu1 %v3391_v9 }
 0x6dd   : > { %v3301_v27 = vpop.eup %3300 }
 0x6de   : > { %v1804_v52 = vmul.f32 %v3301_v27, %v3285_v63  ;;  %3054 = vmatmul.mubr.msk.bf16.vlgmr.msra.gmra.mrb[36].mxu1 %vm689_vm1, %v1808_v51  ;;  %v3303_v47 = vpop.eup %3302 }
 0x6df   : > { %3064 = vmatpush3.bf16.msra.mxu1 %v1953_v30  ;;  %3065 = vmatprep.mubr.msk.bf16.mxu1 %vm3392_vm2, %v3391_v9  ;;  %v1805_v19 = vmul.f32 %v3303_v47, %v3287_v8 }
 0x6e0   : > { %v1809_v53 = vpack.c.bf16 %v1804_v52, %v1803_v24 }
 0x6e1   : > { %v3305_v37 = vpop.eup %3304 }
 0x6e2   : > { %v1806_v11 = vmul.f32 %v3305_v37, %v3289_v0  ;;  %3060 = vmatmul.mubr.msk.bf16.vlgmr.msra.gmra.mrb[24].mxu0 %vm689_vm1, %v1809_v53 }
 0x6e3   : > { %3070 = vmatpush3.bf16.msra.mxu0 %v3166_v55 }
 0x6e4   : > { %v1810_v26 = vpack.c.bf16 %v1806_v11, %v1805_v19  ;;  %3071 = vmatprep.subr.bf16.mxu0 %v3167_v56 }
 0x6e6   : > { %3066 = vmatmul.mubr.msk.bf16.vlgmr.msra.gmra.mrb[40].mxu1 %vm689_vm1, %v1810_v26 }
 0x6e7   : > { %3072 = vmatpush3.bf16.msra.mxu0 %v3167_v56 }
 0x7aa   : > { %v1851_v9 = vpop.f32.mrb[20].mxu0 }
 0x7ab   : > { %v3049_v2 = vpop.f32.mrb[21].mxu0 }
 0x7ac   : > { %v1854_v38 = vpop.f32.mrb[22].mxu0 }
 0x7ad   : > { %v3144_v57 = vpack.i.bf16 %v1854_v38, %v1851_v9  ;;  %v3050_v4 = vpop.f32.mrb[23].mxu0 }
 0x7af   : > { %3145 = vrot.lane.b32.xlu0 %v3144_v57, %s3397_s30 }
 0x7b1   : > { %v1898_v36 = vpop.f32.mrb[36].mxu1 }
 0x7b2   : > { %v3055_v58 = vpop.f32.mrb[37].mxu1 }
 0x7b3   : > { %v1901_v39 = vpop.f32.mrb[38].mxu1 }
 0x7b4   : > { %v3149_v28 = vpack.i.bf16 %v1901_v39, %v1898_v36  ;;  %v3056_v32 = vpop.f32.mrb[39].mxu1 }
 0x7b5   : > { %v1945_v41 = vpop.f32.mrb[24].mxu0 }
 0x7b6   : > { %3150 = vrot.lane.b32.xlu1 %v3149_v28, %s3397_s30  ;;  %v3061_v40 = vpop.f32.mrb[25].mxu0 }
 0x7b7   : > { %v1948_v60 = vpop.f32.mrb[26].mxu0 }
 0x7b8   : > { %v3154_v3 = vpack.i.bf16 %v1948_v60, %v1945_v41  ;;  %v3062_v59 = vpop.f32.mrb[27].mxu0 }
 0x7b9   : > { %v1992_v10 = vpop.f32.mrb[40].mxu1 }
 0x7ba   : > { %3155 = vrot.lane.b32.xlu0 %v3154_v3, %s3397_s30  ;;  %v3067_v61 = vpop.f32.mrb[41].mxu1 }
 0x7bb   : > { %v1995_v63 = vpop.f32.mrb[42].mxu1 }
 0x7bc   : > { %v3159_v8 = vpack.i.bf16 %v1995_v63, %v1992_v10  ;;  %v3068_v22 = vpop.f32.mrb[43].mxu1 }
 0x7be   : > { %3160 = vrot.lane.b32.xlu1 %v3159_v8, %s3397_s30  ;;  %s4288_s30 = scalar_lea.vmem %s4337_s16, %s4349_s19 }
 0x821   : > { %v3146_v23 = vpop.permute.xlu0 %3145 }
 0x822   : > { %v3148_v0 = vunpack.i.h.bf16 %v3146_v23  ;;  %v3147_v33 = vunpack.i.l.bf16 %v3146_v23 }
 0x824   : > { %v2032_v31 = vsel %vm689_vm1, %v3958_v35, %v3148_v0  ;;  %v2031_v21 = vsel %vm689_vm1, %v3956_v18, %v3147_v33 }
 0x825   : > { %v2039_v7 = vpack.c.bf16 %v2032_v31, %v2031_v21 }
 0x827   : > { %3073 = vmatprep.mubr.msk.bf16.mxu0 %vm580_vm0, %v2039_v7 }
 0x828   : > { %v3151_v62 = vpop.permute.xlu1 %3150 }
 0x829   : > { %v3153_v1 = vunpack.i.h.bf16 %v3151_v62  ;;  %v3152_v29 = vunpack.i.l.bf16 %v3151_v62 }
 0x82b   : > { %v2034_v17 = vsel %vm689_vm1, %v3962_v45, %v3153_v1  ;;  %v2033_v5 = vsel %vm689_vm1, %v3960_v44, %v3152_v29 }
 0x82c   : > { %v2040_v13 = vpack.c.bf16 %v2034_v17, %v2033_v5  ;;  %v3156_v12 = vpop.permute.xlu0 %3155 }
 0x82d   : > { %v3158_v14 = vunpack.i.h.bf16 %v3156_v12  ;;  %v3157_v50 = vunpack.i.l.bf16 %v3156_v12 }
 0x82e   : > { %3074 = vmatmul.mubr.msk.bf16.vlgmr.msra.gmra.mrb[28].mxu0 %vm580_vm0, %v2040_v13 }
 0x82f   : > { %v2036_v18 = vsel %vm689_vm1, %v3966_v48, %v3158_v14  ;;  %v2035_v35 = vsel %vm689_vm1, %v3964_v54, %v3157_v50  ;;  %v2868_v48 = vld [vmem:[%s4327_s6] ss:$0 sm:$0xff] }
 0x830   : > { %v2041_v15 = vpack.c.bf16 %v2036_v18, %v2035_v35  ;;  %v3161_v20 = vpop.permute.xlu1 %3160 }
 0x831   : > { %v3163_v43 = vunpack.i.h.bf16 %v3161_v20  ;;  %v3162_v6 = vunpack.i.l.bf16 %v3161_v20 }
 0x832   : > { %3077 = vmatprep.mubr.msk.bf16.mxu0 %vm580_vm0, %v2041_v15 }
 0x833   : > { %v2038_v44 = vsel %vm689_vm1, %v3970_v25, %v3163_v43  ;;  %v2037_v45 = vsel %vm689_vm1, %v3968_v34, %v3162_v6 }
 0x834   : > { %v2042_v42 = vpack.c.bf16 %v2038_v44, %v2037_v45 }
 0x836   : > { %3078 = vmatmul.mubr.msk.bf16.gmra.mrb[32].mxu0 %vm580_vm0, %v2042_v42 }
 0x901   : > { %v3075_v54 = vpop.f32.mrb[28].mxu0 }
 0x902   : > { %v2112_v16 = vpop.f32.mrb[29].mxu0  ;;  %v2121_v27 = vadd.f32 %v3075_v54, %v2868_v48  ;;  %v3168_v54 = vld [vmem:[%s4333_s12] sm:$0xff]  }
 0x903   : > { %v2113_v46 = vadd.f32 %v2868_v48, %v2112_v16  ;;  %v3076_v49 = vpop.f32.mrb[30].mxu0  ;;  %3081 = vmatprep.subr.bf16.mxu1 %v3168_v54  ;;  %v3169_v16 = vld [vmem:[%s4333_s12 + $0x8] sm:$0xff]  }
 0x904   : > { %v2115_v51 = vpop.f32.mrb[31].mxu0  ;;  %v2124_v34 = vadd.f32 %v3076_v49, %v2868_v48  ;;  %v2151_v47 = vsel %vm580_vm0, %v2121_v27, 0.0  ;;  %3082 = vmatpush3.bf16.msra.mxu1 %v3168_v54 }
 0x905   : > { %v2116_v24 = vadd.f32 %v2868_v48, %v2115_v51  ;;  %v2145_v52 = vsel %vm580_vm0, %v2113_v46, 0.0  ;;  %3083 = vmatprep.subr.bf16.mxu1 %v3169_v16 }
 0x906   : > { %2146 = vadd.xlane.f32.xlu0 %v2145_v52  ;;  %v2154_v9 = vsel %vm580_vm0, %v2124_v34, 0.0 }
 0x907   : > { %v2148_v25 = vsel %vm580_vm0, %v2116_v24, 0.0 }
 0x908   : > { %2149 = vadd.xlane.f32.xlu1 %v2148_v25  ;;  %3084 = vmatpush3.bf16.msra.mxu1 %v3169_v16 }
 0x909   : > { %v3079_v30 = vpop.f32.mrb[32].mxu0 }
 0x90a   : > { %v2128_v53 = vpop.f32.mrb[33].mxu0  ;;  %2152 = vadd.xlane.f32.xlu0 %v2151_v47  ;;  %v2137_v26 = vadd.f32 %v3079_v30, %v2868_v48 }
 0x90b   : > { %v2129_v37 = vadd.f32 %v2868_v48, %v2128_v53  ;;  %v3080_v19 = vpop.f32.mrb[34].mxu0 }
 0x90c   : > { %v2131_v11 = vpop.f32.mrb[35].mxu0  ;;  %v2140_v2 = vadd.f32 %v3080_v19, %v2868_v48  ;;  %v2163_v38 = vsel %vm580_vm0, %v2137_v26, 0.0 }
 0x90d   : > { %v2132_v55 = vadd.f32 %v2868_v48, %v2131_v11  ;;  %v2157_v56 = vsel %vm580_vm0, %v2129_v37, 0.0 }
 0x90e   : > { %2158 = vadd.xlane.f32.xlu1 %v2157_v56  ;;  %2155 = vadd.xlane.f32.xlu0 %v2154_v9  ;;  %v2166_v4 = vsel %vm580_vm0, %v2140_v2, 0.0 }
 0x90f   : > { %v2160_v57 = vsel %vm580_vm0, %v2132_v55, 0.0 }
 0x912   : > { %2164 = vadd.xlane.f32.xlu1 %v2163_v38  ;;  %2161 = vadd.xlane.f32.xlu0 %v2160_v57  ;;  %v2875_v57 = vld [vmem:[%s4329_s8] ss:$0 sm:$0xff] }
 0x916   : > { %2167 = vadd.xlane.f32.xlu0 %v2166_v4 }
 0x993   : > { %v2147_v36 = vpop.xlane.xlu0 %2146 }
 0x994   : > { %v2170_v58 = vmul.f32 0.03125, %v2147_v36 }
 0x995   : > { %v2150_v39 = vpop.xlane.xlu1 %2149 }
 0x996   : > { %v4057_v28 = vsub.f32 %v2113_v46, %v2170_v58  ;;  %v2171_v32 = vmul.f32 0.03125, %v2150_v39 }
 0x997   : > { %v2153_v41 = vpop.xlane.xlu0 %2152 }
 0x998   : > { %v4059_v40 = vsub.f32 %v2116_v24, %v2171_v32  ;;  %v2172_v60 = vmul.f32 0.03125, %v2153_v41  ;;  %v2186_v3 = vmul.f32 %v4057_v28, %v4057_v28 }
 0x99a   : > { %v4063_v59 = vsub.f32 %v2121_v27, %v2172_v60  ;;  %v2194_v10 = vsel %vm580_vm0, %v2186_v3, 0.0  ;;  %v2187_v61 = vmul.f32 %v4059_v40, %v4059_v40  ;;  %v2876_v60 = vld [vmem:[%s4330_s9] ss:$0 sm:$0xff] }
 0x99b   : > { %v2159_v63 = vpop.xlane.xlu1 %2158  ;;  %2195 = vadd.xlane.f32.xlu1 %v2194_v10  ;;  %v2156_v8 = vpop.xlane.xlu0 %2155 }
 0x99c   : > { %v2174_v22 = vmul.f32 0.03125, %v2159_v63  ;;  %v2173_v23 = vmul.f32 0.03125, %v2156_v8  ;;  %v2197_v0 = vsel %vm580_vm0, %v2187_v61, 0.0  ;;  %v2188_v33 = vmul.f32 %v4063_v59, %v4063_v59 }
 0x99d   : > { %2198 = vadd.xlane.f32.xlu0 %v2197_v0 }
 0x99e   : > { %v4071_v31 = vsub.f32 %v2129_v37, %v2174_v22  ;;  %v4073_v21 = vsub.f32 %v2124_v34, %v2173_v23  ;;  %v2200_v7 = vsel %vm580_vm0, %v2188_v33, 0.0 }
 0x99f   : > { %v2165_v62 = vpop.xlane.xlu1 %2164  ;;  %2201 = vadd.xlane.f32.xlu1 %v2200_v7  ;;  %v2162_v1 = vpop.xlane.xlu0 %2161 }
 0x9a0   : > { %v2176_v29 = vmul.f32 0.03125, %v2165_v62  ;;  %v2175_v17 = vmul.f32 0.03125, %v2162_v1  ;;  %v2190_v5 = vmul.f32 %v4071_v31, %v4071_v31  ;;  %v2189_v13 = vmul.f32 %v4073_v21, %v4073_v21  ;;  %v3354_v1 = vld [vmem:[%s3530_s26] sm:$0xff] }
 0x9a2   : > { %v4080_v12 = vsub.f32 %v2137_v26, %v2176_v29  ;;  %v4082_v14 = vsub.f32 %v2132_v55, %v2175_v17  ;;  %v2206_v50 = vsel %vm580_vm0, %v2190_v5, 0.0  ;;  %v2203_v18 = vsel %vm580_vm0, %v2189_v13, 0.0 }
 0x9a3   : > { %2207 = vadd.xlane.f32.xlu1 %v2206_v50  ;;  %2204 = vadd.xlane.f32.xlu0 %v2203_v18  ;;  %v2168_v35 = vpop.xlane.xlu0 %2167 }
 0x9a4   : > { %v2177_v15 = vmul.f32 0.03125, %v2168_v35  ;;  %v2192_v20 = vmul.f32 %v4080_v12, %v4080_v12  ;;  %v2191_v43 = vmul.f32 %v4082_v14, %v4082_v14 }
 0x9a6   : > { %v4090_v6 = vsub.f32 %v2140_v2, %v2177_v15  ;;  %v2212_v44 = vsel %vm580_vm0, %v2192_v20, 0.0  ;;  %v2209_v45 = vsel %vm580_vm0, %v2191_v43, 0.0 }
 0x9a7   : > { %2213 = vadd.xlane.f32.xlu1 %v2212_v44  ;;  %2210 = vadd.xlane.f32.xlu0 %v2209_v45 }
 0x9a8   : > { %v2193_v42 = vmul.f32 %v4090_v6, %v4090_v6 }
 0x9aa   : > { %v2215_v48 = vsel %vm580_vm0, %v2193_v42, 0.0 }
 0x9ab   : > { %2216 = vadd.xlane.f32.xlu0 %v2215_v48  ;;  %v3357_v48 = vld [vmem:[%s3530_s26 + $0x18] sm:$0xff] }
 0xa28   : > { %v2196_v46 = vpop.xlane.xlu1 %2195 }
 0xa29   : > { %v2218_v49 = vmul.f32 0.03125, %v2196_v46 }
 0xa2a   : > { %v2199_v51 = vpop.xlane.xlu0 %2198 }
 0xa2b   : > { %v2226_v27 = vadd.f32 1e-05, %v2218_v49  ;;  %v2219_v24 = vmul.f32 0.03125, %v2199_v51 }
 0xa2c   : > { %v2202_v52 = vpop.xlane.xlu1 %2201 }
 0xa2d   : > { %3306 = vrsqrt.f32 %v2226_v27  ;;  %v2227_v25 = vadd.f32 1e-05, %v2219_v24  ;;  %v2220_v34 = vmul.f32 0.03125, %v2202_v52  ;;  %v3358_v24 = vld [vmem:[%s3530_s26 + $0x20] sm:$0xff] }
 0xa2f   : > { %3308 = vrsqrt.f32 %v2227_v25  ;;  %v2228_v30 = vadd.f32 1e-05, %v2220_v34  ;;  %v3359_v25 = vld [vmem:[%s3530_s26 + $0x28] sm:$0xff] }
 0xa30   : > { %v2208_v47 = vpop.xlane.xlu1 %2207  ;;  %v2205_v53 = vpop.xlane.xlu0 %2204 }
 0xa31   : > { %3310 = vrsqrt.f32 %v2228_v30  ;;  %v2222_v37 = vmul.f32 0.03125, %v2208_v47  ;;  %v2221_v19 = vmul.f32 0.03125, %v2205_v53  ;;  %v3360_v53 = vld [vmem:[%s3530_s26 + $0x30] sm:$0xff] }
 0xa33   : > { %v2230_v11 = vadd.f32 1e-05, %v2222_v37  ;;  %v2229_v26 = vadd.f32 1e-05, %v2221_v19  ;;  %v3361_v37 = vld [vmem:[%s3530_s26 + $0x38] sm:$0xff] }
 0xa34   : > { %v2214_v55 = vpop.xlane.xlu1 %2213  ;;  %v2211_v56 = vpop.xlane.xlu0 %2210 }
 0xa35   : > { %3312 = vrsqrt.f32 %v2230_v11  ;;  %v2224_v9 = vmul.f32 0.03125, %v2214_v55  ;;  %v2223_v2 = vmul.f32 0.03125, %v2211_v56  ;;  %v3171_v55 = vld [vmem:[%s4335_s14 + $0x8] sm:$0xff]   ;;  %v3172_v56 = vld [vmem:[%s4335_s14 + $0x10] sm:$0xff]  }
 0xa36   : > { %3314 = vrsqrt.f32 %v2229_v26  ;;  %v3170_v26 = vld [vmem:[%s4335_s14] sm:$0xff]  }
 0xa37   : > { %v3307_v38 = vpop.eup %3306  ;;  %v2232_v4 = vadd.f32 1e-05, %v2224_v9  ;;  %v2231_v36 = vadd.f32 1e-05, %v2223_v2  ;;  %3093 = vmatprep.subr.bf16.mxu0 %v3170_v26  ;;  %v3173_v9 = vld [vmem:[%s4335_s14 + $0x18] sm:$0xff]   ;;  %v3174_v2 = vld [vmem:[%s4335_s14 + $0x20] sm:$0xff]  }
 0xa38   : > { %v2242_v58 = vmul.f32 %v3307_v38, %v4057_v28  ;;  %v2217_v39 = vpop.xlane.xlu0 %2216  ;;  %3094 = vmatpush3.bf16.msra.mxu0 %v3170_v26  ;;  %v3175_v38 = vld [vmem:[%s4335_s14 + $0x28] sm:$0xff]  }
 0xa39   : > { %v3309_v32 = vpop.eup %3308  ;;  %3316 = vrsqrt.f32 %v2232_v4  ;;  %v2225_v41 = vmul.f32 0.03125, %v2217_v39  ;;  %3095 = vmatprep.subr.bf16.mxu0 %v3171_v55  ;;  %v3177_v4 = vld [vmem:[%s4335_s14 + $0x38] sm:$0xff]  }
 0xa3a   : > { %v2243_v3 = vmul.f32 %v3309_v32, %v4059_v40  ;;  %3318 = vrsqrt.f32 %v2231_v36  ;;  %v2256_v10 = vmul.f32 %v2875_v57, %v2242_v58  ;;  %v3355_v40 = vld [vmem:[%s3530_s26 + $0x8] sm:$0xff]  ;;  %v2877_v36 = vld [vmem:[%s4334_s13] ss:$0 sm:$0xff] }
 0xa3b   : > { %v3311_v61 = vpop.eup %3310  ;;  %v2233_v63 = vadd.f32 1e-05, %v2225_v41 }
 0xa3c   : > { %v2244_v8 = vmul.f32 %v3311_v61, %v4063_v59  ;;  %v2257_v22 = vmul.f32 %v2875_v57, %v2243_v3  ;;  %v2270_v28 = vadd.f32 %v2876_v60, %v2256_v10  ;;  %3096 = vmatpush3.bf16.msra.mxu0 %v3171_v55 }
 0xa3d   : > { %3320 = vrsqrt.f32 %v2233_v63  ;;  %3097 = vmatprep.subr.bf16.mxu0 %v3172_v56 }
 0xa3e   : > { %v2271_v23 = vadd.f32 %v2876_v60, %v2257_v22  ;;  %v2258_v33 = vmul.f32 %v2875_v57, %v2244_v8  ;;  %v4114_v29 = vadd.f32 %v3354_v1, %v2270_v28 }
 0xa3f   : > { %v3313_v0 = vpop.eup %3312 }
 0xa40   : > { %v3315_v7 = vpop.eup %3314  ;;  %v2246_v62 = vmul.f32 %v3313_v0, %v4071_v31  ;;  %v4117_v17 = vadd.f32 %v3355_v40, %v2271_v23  ;;  %v2272_v18 = vadd.f32 %v2876_v60, %v2258_v33  ;;  %3098 = vmatpush3.bf16.msra.mxu0 %v3172_v56 }
 0xa41   : > { %v2245_v5 = vmul.f32 %v3315_v7, %v4073_v21  ;;  %v3356_v21 = vld [vmem:[%s3530_s26 + $0x10] sm:$0xff]  ;;  %3099 = vmatprep.subr.bf16.mxu0 %v3173_v9 }
 0xa42   : > { %v2286_v59 = vpack.c.bf16 %v4117_v17, %v4114_v29  ;;  %v2260_v35 = vmul.f32 %v2875_v57, %v2246_v62  ;;  %v4126_v42 = vadd.f32 %v3356_v21, %v2272_v18 }
 0xa43   : > { %v3317_v13 = vpop.eup %3316  ;;  %v2259_v50 = vmul.f32 %v2875_v57, %v2245_v5 }
 0xa44   : > { %v3319_v15 = vpop.eup %3318  ;;  %v2248_v31 = vmul.f32 %v3317_v13, %v4080_v12  ;;  %3085 = vmatprep.mubr.msk.bf16.mxu1 %vm580_vm0, %v2286_v59  ;;  %v2274_v46 = vadd.f32 %v2876_v60, %v2260_v35  ;;  %3100 = vmatpush3.bf16.msra.mxu0 %v3173_v9 }
 0xa45   : > { %v2247_v20 = vmul.f32 %v3319_v15, %v4082_v14  ;;  %v2273_v43 = vadd.f32 %v2876_v60, %v2259_v50  ;;  %3101 = vmatprep.subr.bf16.mxu0 %v3174_v2 }
 0xa46   : > { %v2262_v44 = vmul.f32 %v2875_v57, %v2248_v31  ;;  %v4136_v52 = vadd.f32 %v3358_v24, %v2274_v46 }
 0xa47   : > { %v3321_v45 = vpop.eup %3320  ;;  %v4129_v54 = vadd.f32 %v3357_v48, %v2273_v43  ;;  %v2261_v16 = vmul.f32 %v2875_v57, %v2247_v20 }
 0xa48   : > { %v2249_v12 = vmul.f32 %v3321_v45, %v4090_v6  ;;  %v2276_v27 = vadd.f32 %v2876_v60, %v2262_v44  ;;  %3102 = vmatpush3.bf16.msra.mxu0 %v3174_v2 }
 0xa49   : > { %v2287_v14 = vpack.c.bf16 %v4129_v54, %v4126_v42  ;;  %v2275_v49 = vadd.f32 %v2876_v60, %v2261_v16  ;;  %3103 = vmatprep.subr.bf16.mxu0 %v3175_v38 }
 0xa4a   : > { %v2263_v51 = vmul.f32 %v2875_v57, %v2249_v12  ;;  %v4144_v6 = vadd.f32 %v3360_v53, %v2276_v27  ;;  %v3176_v57 = vld [vmem:[%s4335_s14 + $0x30] sm:$0xff]  }
 0xa4b   : > { %3086 = vmatmul.mubr.msk.bf16.vlgmr.msra.gmra.mrb[44].mxu1 %vm580_vm0, %v2287_v14  ;;  %v4139_v34 = vadd.f32 %v3359_v25, %v2275_v49 }
 0xa4c   : > { %v2277_v30 = vadd.f32 %v2876_v60, %v2263_v51  ;;  %3104 = vmatpush3.bf16.msra.mxu0 %v3175_v38 }
 0xa4d   : > { %v2288_v47 = vpack.c.bf16 %v4139_v34, %v4136_v52  ;;  %3105 = vmatprep.subr.bf16.mxu0 %v3176_v57 }
 0xa4e   : > { %v4147_v19 = vadd.f32 %v3361_v37, %v2277_v30 }
 0xa4f   : > { %3089 = vmatprep.mubr.msk.bf16.mxu1 %vm580_vm0, %v2288_v47 }
 0xa50   : > { %v2289_v11 = vpack.c.bf16 %v4147_v19, %v4144_v6  ;;  %3106 = vmatpush3.bf16.msra.mxu0 %v3176_v57 }
 0xa51   : > { %3107 = vmatprep.subr.bf16.mxu0 %v3177_v4 }
 0xa53   : > { %3090 = vmatmul.mubr.msk.bf16.gmra.mrb[48].mxu1 %vm580_vm0, %v2289_v11 }
 0xa54   : > { %3108 = vmatpush3.bf16.msra.mxu0 %v3177_v4 }
 0xb1e   : > { %v3087_v58 = vpop.f32.mrb[44].mxu1 }
 0xb1f   : > { %v4180_v39 = vadd.f32 %v3087_v58, %v2877_v36  ;;  %v2359_v32 = vpop.f32.mrb[45].mxu1 }
 0xb20   : > { %v4182_v41 = vadd.f32 %v2877_v36, %v2359_v32  ;;  %v3088_v60 = vpop.f32.mrb[46].mxu1 }
 0xb21   : > { %v2400_v3 = vmul.f32 %v4180_v39, %v4180_v39  ;;  %v4186_v10 = vadd.f32 %v3088_v60, %v2877_v36  ;;  %v2362_v61 = vpop.f32.mrb[47].mxu1 }
 0xb22   : > { %v2398_v63 = vmul.f32 %v4182_v41, %v4182_v41  ;;  %v4190_v8 = vadd.f32 %v2877_v36, %v2362_v61 }
 0xb23   : > { %v2408_v22 = vmul.f32 %v2400_v3, %v4180_v39  ;;  %v2401_v28 = vmul.f32 %v4186_v10, %v4186_v10 }
 0xb24   : > { %v2406_v23 = vmul.f32 %v2398_v63, %v4182_v41  ;;  %v2399_v0 = vmul.f32 %v4190_v8, %v4190_v8 }
 0xb25   : > { %v2416_v33 = vmul.f32 0.044715, %v2408_v22  ;;  %v2409_v7 = vmul.f32 %v2401_v28, %v4186_v10  ;;  %v2392_v22 = vmul.f32 0.5, %v4180_v39  ;;  %v2393_v28 = vmul.f32 0.5, %v4186_v10 }
 0xb26   : > { %v2414_v62 = vmul.f32 0.044715, %v2406_v23  ;;  %v2407_v1 = vmul.f32 %v2399_v0, %v4190_v8  ;;  %v3091_v40 = vpop.f32.mrb[48].mxu1  ;;  %v2390_v0 = vmul.f32 0.5, %v4182_v41 }
 0xb27   : > { %v2424_v5 = vadd.f32 %v2416_v33, %v4180_v39  ;;  %v2417_v59 = vmul.f32 0.044715, %v2409_v7  ;;  %v4201_v13 = vadd.f32 %v3091_v40, %v2877_v36  ;;  %v2375_v50 = vpop.f32.mrb[49].mxu1  ;;  %v2391_v33 = vmul.f32 0.5, %v4190_v8 }
 0xb28   : > { %v2422_v18 = vadd.f32 %v2414_v62, %v4182_v41  ;;  %v2415_v35 = vmul.f32 0.044715, %v2407_v1  ;;  %v4204_v15 = vadd.f32 %v2877_v36, %v2375_v50  ;;  %v3092_v31 = vpop.f32.mrb[50].mxu1 }
 0xb29   : > { %v2432_v20 = vmul.f32 0.7978846, %v2424_v5  ;;  %v2425_v43 = vadd.f32 %v2417_v59, %v4186_v10  ;;  %v2404_v44 = vmul.f32 %v4201_v13, %v4201_v13  ;;  %v2387_v45 = vadd.f32 %v3092_v31, %v2877_v36  ;;  %v2378_v21 = vpop.f32.mrb[51].mxu1 }
 0xb2a   : > { %v2430_v48 = vmul.f32 0.7978846, %v2422_v18  ;;  %v2423_v16 = vadd.f32 %v2415_v35, %v4190_v8  ;;  %v2402_v46 = vmul.f32 %v4204_v15, %v4204_v15  ;;  %v2379_v12 = vadd.f32 %v2877_v36, %v2378_v21 }
 0xb2b   : > { %3322 = vtanh.f32 %v2432_v20  ;;  %v2433_v14 = vmul.f32 0.7978846, %v2425_v43  ;;  %v2412_v49 = vmul.f32 %v2404_v44, %v4201_v13  ;;  %v2405_v51 = vmul.f32 %v2387_v45, %v2387_v45 }
 0xb2c   : > { %3324 = vtanh.f32 %v2430_v48  ;;  %v2431_v27 = vmul.f32 0.7978846, %v2423_v16  ;;  %v2410_v24 = vmul.f32 %v2402_v46, %v4204_v15  ;;  %v2403_v25 = vmul.f32 %v2379_v12, %v2379_v12 }
 0xb2d   : > { %3326 = vtanh.f32 %v2433_v14  ;;  %v2420_v30 = vmul.f32 0.044715, %v2412_v49  ;;  %v2413_v47 = vmul.f32 %v2405_v51, %v2387_v45  ;;  %v2396_v10 = vmul.f32 0.5, %v4201_v13 }
 0xb2e   : > { %3328 = vtanh.f32 %v2431_v27  ;;  %v2418_v53 = vmul.f32 0.044715, %v2410_v24  ;;  %v2411_v37 = vmul.f32 %v2403_v25, %v2379_v12  ;;  %v2397_v41 = vmul.f32 0.5, %v2387_v45  ;;  %v2884_v24 = vld [vmem:[%s4336_s15] ss:$0 sm:$0xff] }
 0xb2f   : > { %v2428_v11 = vadd.f32 %v2420_v30, %v4201_v13  ;;  %v2421_v26 = vmul.f32 0.044715, %v2413_v47  ;;  %v2394_v8 = vmul.f32 0.5, %v4204_v15  ;;  %v2395_v21 = vmul.f32 0.5, %v2379_v12 }
 0xb30   : > { %v2426_v55 = vadd.f32 %v2418_v53, %v4204_v15  ;;  %v2419_v56 = vmul.f32 0.044715, %v2411_v37 }
 0xb31   : > { %v2436_v9 = vmul.f32 0.7978846, %v2428_v11  ;;  %v2429_v2 = vadd.f32 %v2421_v26, %v2387_v45 }
 0xb32   : > { %v2434_v38 = vmul.f32 0.7978846, %v2426_v55  ;;  %v2427_v57 = vadd.f32 %v2419_v56, %v2379_v12 }
 0xb33   : > { %3330 = vtanh.f32 %v2436_v9  ;;  %v2437_v4 = vmul.f32 0.7978846, %v2429_v2 }
 0xb34   : > { %3332 = vtanh.f32 %v2434_v38  ;;  %v2435_v36 = vmul.f32 0.7978846, %v2427_v57 }
 0xb35   : > { %v3323_v58 = vpop.eup %3322  ;;  %3334 = vtanh.f32 %v2437_v4 }
 0xb36   : > { %v3325_v32 = vpop.eup %3324  ;;  %v2448_v60 = vadd.f32 1.0, %v3323_v58  ;;  %3336 = vtanh.f32 %v2435_v36 }
 0xb37   : > { %v3327_v3 = vpop.eup %3326  ;;  %v2446_v61 = vadd.f32 1.0, %v3325_v32 }
 0xb38   : > { %v3329_v63 = vpop.eup %3328  ;;  %v2449_v23 = vadd.f32 1.0, %v3327_v3  ;;  %v2456_v62 = vmul.f32 %v2448_v60, %v2392_v22 }
 0xb39   : > { %v2447_v7 = vadd.f32 1.0, %v3329_v63  ;;  %v2454_v40 = vmul.f32 %v2446_v61, %v2390_v0 }
 0xb3a   : > { %v2457_v1 = vmul.f32 %v2449_v23, %v2393_v28 }
 0xb3b   : > { %v2455_v5 = vmul.f32 %v2447_v7, %v2391_v33 }
 0xb3c   : > { %v2463_v59 = vpack.c.bf16 %v2457_v1, %v2456_v62 }
 0xb3d   : > { %v3331_v50 = vpop.eup %3330  ;;  %v2462_v18 = vpack.c.bf16 %v2455_v5, %v2454_v40 }
 0xb3e   : > { %v3333_v35 = vpop.eup %3332  ;;  %v2452_v31 = vadd.f32 1.0, %v3331_v50 }
 0xb3f   : > { %v3335_v20 = vpop.eup %3334  ;;  %3109 = vmatprep.mubr.bf16.mxu0 %v2462_v18  ;;  %v2450_v39 = vadd.f32 1.0, %v3333_v35 }
 0xb40   : > { %v3337_v43 = vpop.eup %3336  ;;  %3110 = vmatmul.mubr.bf16.vlgmr.msra.gmra.mrb[36].mxu0 %v2463_v59  ;;  %v2453_v44 = vadd.f32 1.0, %v3335_v20  ;;  %v2460_v16 = vmul.f32 %v2452_v31, %v2396_v10 }
 0xb41   : > { %v2451_v48 = vadd.f32 1.0, %v3337_v43  ;;  %v2458_v14 = vmul.f32 %v2450_v39, %v2394_v8 }
 0xb42   : > { %v2461_v46 = vmul.f32 %v2453_v44, %v2397_v41 }
 0xb43   : > { %v2459_v49 = vmul.f32 %v2451_v48, %v2395_v21 }
 0xb44   : > { %v2465_v51 = vpack.c.bf16 %v2461_v46, %v2460_v16 }
 0xb45   : > { %v2464_v27 = vpack.c.bf16 %v2459_v49, %v2458_v14 }
 0xb47   : > { %3113 = vmatprep.mubr.bf16.mxu0 %v2464_v27 }
 0xb48   : > { %3114 = vmatmul.mubr.bf16.gmra.mrb[40].mxu0 %v2465_v51 }
 0xc13   : > { %v3111_v25 = vpop.f32.mrb[36].mxu0 }
 0xc14   : > { %v2580_v13 = vadd.f32 %v3111_v25, %v2884_v24  ;;  %v2571_v45 = vpop.f32.mrb[37].mxu0 }
 0xc15   : > { %v3112_v30 = vpop.f32.mrb[38].mxu0  ;;  %v2572_v47 = vadd.f32 %v2884_v24, %v2571_v45 }
 0xc16   : > { %v2583_v15 = vadd.f32 %v3112_v30, %v2884_v24  ;;  %v2574_v12 = vpop.f32.mrb[39].mxu0  ;;  %v2610_v53 = vsel %vm580_vm0, %v2580_v13, 0.0 }
 0xc17   : > { %2611 = vadd.xlane.f32.xlu1 %v2610_v53  ;;  %v2575_v37 = vadd.f32 %v2884_v24, %v2574_v12  ;;  %v2604_v26 = vsel %vm580_vm0, %v2572_v47, 0.0 }
 0xc18   : > { %v2613_v11 = vsel %vm580_vm0, %v2583_v15, 0.0 }
 0xc19   : > { %2614 = vadd.xlane.f32.xlu0 %v2613_v11  ;;  %v2607_v9 = vsel %vm580_vm0, %v2575_v37, 0.0 }
 0xc1b   : > { %2605 = vadd.xlane.f32.xlu1 %v2604_v26  ;;  %v3115_v55 = vpop.f32.mrb[40].mxu0 }
 0xc1c   : > { %v2587_v56 = vpop.f32.mrb[41].mxu0  ;;  %v2596_v4 = vadd.f32 %v3115_v55, %v2884_v24 }
 0xc1d   : > { %v2588_v2 = vadd.f32 %v2884_v24, %v2587_v56  ;;  %2608 = vadd.xlane.f32.xlu0 %v2607_v9  ;;  %v3116_v38 = vpop.f32.mrb[42].mxu0 }
 0xc1e   : > { %v2590_v57 = vpop.f32.mrb[43].mxu0  ;;  %v2599_v32 = vadd.f32 %v3116_v38, %v2884_v24  ;;  %v2622_v3 = vsel %vm580_vm0, %v2596_v4, 0.0 }
 0xc1f   : > { %v2591_v36 = vadd.f32 %v2884_v24, %v2590_v57  ;;  %v2616_v58 = vsel %vm580_vm0, %v2588_v2, 0.0 }
 0xc20   : > { %2617 = vadd.xlane.f32.xlu1 %v2616_v58  ;;  %v2625_v61 = vsel %vm580_vm0, %v2599_v32, 0.0 }
 0xc21   : > { %v2619_v60 = vsel %vm580_vm0, %v2591_v36, 0.0 }
 0xc22   : > { %2620 = vadd.xlane.f32.xlu0 %v2619_v60 }
 0xc24   : > { %2623 = vadd.xlane.f32.xlu1 %v2622_v3 }
 0xc26   : > { %2626 = vadd.xlane.f32.xlu0 %v2625_v61 }
 0xca4   : > { %v2612_v63 = vpop.xlane.xlu1 %2611 }
 0xca5   : > { %v2630_v22 = vmul.f32 0.03125, %v2612_v63 }
 0xca6   : > { %v2615_v28 = vpop.xlane.xlu0 %2614 }
 0xca7   : > { %v4233_v23 = vsub.f32 %v2580_v13, %v2630_v22  ;;  %v2631_v0 = vmul.f32 0.03125, %v2615_v28 }
 0xca8   : > { %v2606_v33 = vpop.xlane.xlu1 %2605 }
 0xca9   : > { %v4235_v7 = vsub.f32 %v2583_v15, %v2631_v0  ;;  %v2628_v62 = vmul.f32 0.03125, %v2606_v33  ;;  %v2646_v1 = vmul.f32 %v4233_v23, %v4233_v23 }
 0xcaa   : > { %v2609_v40 = vpop.xlane.xlu0 %2608 }
 0xcab   : > { %v4239_v5 = vsub.f32 %v2572_v47, %v2628_v62  ;;  %v2629_v59 = vmul.f32 0.03125, %v2609_v40  ;;  %v2658_v50 = vsel %vm580_vm0, %v2646_v1, 0.0  ;;  %v2647_v18 = vmul.f32 %v4235_v7, %v4235_v7  ;;  %v2893_v1 = vld [vmem:[%s4331_s10] ss:$0 sm:$0xff] }
 0xcac   : > { %2659 = vadd.xlane.f32.xlu1 %v2658_v50 }
 0xcad   : > { %v4244_v35 = vsub.f32 %v2575_v37, %v2629_v59  ;;  %v2618_v31 = vpop.xlane.xlu1 %2617  ;;  %v2661_v20 = vsel %vm580_vm0, %v2647_v18, 0.0  ;;  %v2644_v39 = vmul.f32 %v4239_v5, %v4239_v5 }
 0xcae   : > { %v2632_v43 = vmul.f32 0.03125, %v2618_v31  ;;  %2662 = vadd.xlane.f32.xlu0 %v2661_v20 }
 0xcaf   : > { %v2621_v10 = vpop.xlane.xlu0 %2620  ;;  %v2652_v41 = vsel %vm580_vm0, %v2644_v39, 0.0  ;;  %v2645_v44 = vmul.f32 %v4244_v35, %v4244_v35 }
 0xcb0   : > { %v4252_v8 = vsub.f32 %v2588_v2, %v2632_v43  ;;  %v2633_v21 = vmul.f32 0.03125, %v2621_v10  ;;  %2653 = vadd.xlane.f32.xlu1 %v2652_v41  ;;  %v2894_v10 = vld [vmem:[%s4332_s11] ss:$0 sm:$0xff] }
 0xcb1   : > { %v2624_v48 = vpop.xlane.xlu1 %2623  ;;  %v2655_v16 = vsel %vm580_vm0, %v2645_v44, 0.0 }
 0xcb2   : > { %v4255_v46 = vsub.f32 %v2591_v36, %v2633_v21  ;;  %v2634_v14 = vmul.f32 0.03125, %v2624_v48  ;;  %2656 = vadd.xlane.f32.xlu0 %v2655_v16  ;;  %v2648_v49 = vmul.f32 %v4252_v8, %v4252_v8 }
 0xcb3   : > { %v2627_v51 = vpop.xlane.xlu0 %2626 }
 0xcb4   : > { %v4259_v27 = vsub.f32 %v2596_v4, %v2634_v14  ;;  %v2635_v24 = vmul.f32 0.03125, %v2627_v51  ;;  %v2664_v25 = vsel %vm580_vm0, %v2648_v49, 0.0  ;;  %v2649_v13 = vmul.f32 %v4255_v46, %v4255_v46 }
 0xcb5   : > { %2665 = vadd.xlane.f32.xlu1 %v2664_v25 }
 0xcb6   : > { %v4264_v45 = vsub.f32 %v2599_v32, %v2635_v24  ;;  %v2667_v30 = vsel %vm580_vm0, %v2649_v13, 0.0  ;;  %v2650_v47 = vmul.f32 %v4259_v27, %v4259_v27 }
 0xcb7   : > { %2668 = vadd.xlane.f32.xlu0 %v2667_v30 }
 0xcb8   : > { %v2670_v15 = vsel %vm580_vm0, %v2650_v47, 0.0  ;;  %v2651_v12 = vmul.f32 %v4264_v45, %v4264_v45 }
 0xcb9   : > { %2671 = vadd.xlane.f32.xlu1 %v2670_v15 }
 0xcba   : > { %v2673_v53 = vsel %vm580_vm0, %v2651_v12, 0.0 }
 0xcbb   : > { %2674 = vadd.xlane.f32.xlu0 %v2673_v53 }
 0xd39   : > { %v2660_v37 = vpop.xlane.xlu1 %2659 }
 0xd3a   : > { %v2678_v11 = vmul.f32 0.03125, %v2660_v37 }
 0xd3b   : > { %v2663_v26 = vpop.xlane.xlu0 %2662 }
 0xd3c   : > { %v2686_v55 = vadd.f32 1e-05, %v2678_v11  ;;  %v2679_v56 = vmul.f32 0.03125, %v2663_v26 }
 0xd3d   : > { %v2654_v9 = vpop.xlane.xlu1 %2653 }
 0xd3e   : > { %3338 = vrsqrt.f32 %v2686_v55  ;;  %v2687_v2 = vadd.f32 1e-05, %v2679_v56  ;;  %v2676_v38 = vmul.f32 0.03125, %v2654_v9 }
 0xd3f   : > { %v2657_v57 = vpop.xlane.xlu0 %2656 }
 0xd40   : > { %3340 = vrsqrt.f32 %v2687_v2  ;;  %v2684_v4 = vadd.f32 1e-05, %v2676_v38  ;;  %v2677_v36 = vmul.f32 0.03125, %v2657_v57 }
 0xd42   : > { %3342 = vrsqrt.f32 %v2684_v4  ;;  %v2685_v58 = vadd.f32 1e-05, %v2677_v36  ;;  %v2666_v32 = vpop.xlane.xlu1 %2665 }
 0xd43   : > { %v2680_v60 = vmul.f32 0.03125, %v2666_v32 }
 0xd44   : > { %3344 = vrsqrt.f32 %v2685_v58  ;;  %v2669_v3 = vpop.xlane.xlu0 %2668 }
 0xd45   : > { %v2688_v61 = vadd.f32 1e-05, %v2680_v60  ;;  %v2681_v63 = vmul.f32 0.03125, %v2669_v3 }
 0xd46   : > { %v2672_v22 = vpop.xlane.xlu1 %2671 }
 0xd47   : > { %3346 = vrsqrt.f32 %v2688_v61  ;;  %v2689_v28 = vadd.f32 1e-05, %v2681_v63  ;;  %v2682_v0 = vmul.f32 0.03125, %v2672_v22 }
 0xd48   : > { %v3339_v33 = vpop.eup %3338  ;;  %v2675_v62 = vpop.xlane.xlu0 %2674 }
 0xd49   : > { %v2702_v40 = vmul.f32 %v3339_v33, %v4233_v23  ;;  %3348 = vrsqrt.f32 %v2689_v28  ;;  %v2690_v59 = vadd.f32 1e-05, %v2682_v0  ;;  %v2683_v50 = vmul.f32 0.03125, %v2675_v62 }
 0xd4a   : > { %v3341_v18 = vpop.eup %3340 }
 0xd4b   : > { %v2703_v31 = vmul.f32 %v3341_v18, %v4235_v7  ;;  %3350 = vrsqrt.f32 %v2690_v59  ;;  %v2691_v20 = vadd.f32 1e-05, %v2683_v50  ;;  %v2716_v43 = vmul.f32 %v2893_v1, %v2702_v40 }
 0xd4c   : > { %v3343_v39 = vpop.eup %3342 }
 0xd4d   : > { %v2700_v41 = vmul.f32 %v3343_v39, %v4239_v5  ;;  %3352 = vrsqrt.f32 %v2691_v20  ;;  %v2717_v23 = vmul.f32 %v2893_v1, %v2703_v31  ;;  %v2730_v16 = vadd.f32 %v2894_v10, %v2716_v43 }
 0xd4e   : > { %v3345_v44 = vpop.eup %3344 }
 0xd4f   : > { %v2714_v21 = vmul.f32 %v2893_v1, %v2700_v41  ;;  %v2701_v48 = vmul.f32 %v3345_v44, %v4244_v35  ;;  %v2731_v51 = vadd.f32 %v2894_v10, %v2717_v23  ;;  %v2738_v13 = vadd.f32 %v2730_v16, %v4126_v42 }
 0xd51   : > { %v3347_v14 = vpop.eup %3346  ;;  %v2728_v7 = vadd.f32 %v2894_v10, %v2714_v21  ;;  %v2715_v49 = vmul.f32 %v2893_v1, %v2701_v48  ;;  %v2739_v53 = vadd.f32 %v2731_v51, %v4129_v54  ;;  %2746 = vst.msk [vmem:[%s4288_s30 + $0x10] sm:$0xff] %vm580_vm0, %v2738_v13 }
 0xd52   : > { %v2704_v5 = vmul.f32 %v3347_v14, %v4252_v8 }
 0xd53   : > { %v3349_v24 = vpop.eup %3348  ;;  %v2736_v35 = vadd.f32 %v2728_v7, %v4114_v29  ;;  %v2729_v25 = vadd.f32 %v2894_v10, %v2715_v49  ;;  %2747 = vst.msk [vmem:[%s4288_s30 + $0x18] sm:$0xff] %vm580_vm0, %v2739_v53 }
 0xd54   : > { %v2718_v30 = vmul.f32 %v2893_v1, %v2704_v5  ;;  %v2705_v47 = vmul.f32 %v3349_v24, %v4255_v46 }
 0xd55   : > { %v3351_v15 = vpop.eup %3350  ;;  %2744 = vst.msk [vmem:[%s4288_s30] sm:$0xff] %vm580_vm0, %v2736_v35  ;;  %v2737_v12 = vadd.f32 %v2729_v25, %v4117_v17 }
 0xd56   : > { %v2732_v8 = vadd.f32 %v2894_v10, %v2718_v30  ;;  %v2719_v37 = vmul.f32 %v2893_v1, %v2705_v47  ;;  %v2706_v29 = vmul.f32 %v3351_v15, %v4259_v27 }
 0xd57   : > { %v3353_v42 = vpop.eup %3352  ;;  %2745 = vst.msk [vmem:[%s4288_s30 + $0x8] sm:$0xff] %vm580_vm0, %v2737_v12 }
 0xd58   : > { %v2740_v46 = vadd.f32 %v2732_v8, %v4136_v52  ;;  %v2733_v11 = vadd.f32 %v2894_v10, %v2719_v37  ;;  %v2720_v17 = vmul.f32 %v2893_v1, %v2706_v29  ;;  %v2707_v54 = vmul.f32 %v3353_v42, %v4264_v45 }
 0xd5a   : > { %2748 = vst.msk [vmem:[%s4288_s30 + $0x20] sm:$0xff] %vm580_vm0, %v2740_v46  ;;  %v2741_v26 = vadd.f32 %v2733_v11, %v4139_v34  ;;  %v2734_v55 = vadd.f32 %v2894_v10, %v2720_v17  ;;  %v2721_v56 = vmul.f32 %v2893_v1, %v2707_v54 }
 0xd5c   : > { %2749 = vst.msk [vmem:[%s4288_s30 + $0x28] sm:$0xff] %vm580_vm0, %v2741_v26  ;;  %v2742_v27 = vadd.f32 %v2734_v55, %v4144_v6  ;;  %v2735_v9 = vadd.f32 %v2894_v10, %v2721_v56 }
 0xd5e   : > { %2750 = vst.msk [vmem:[%s4288_s30 + $0x30] sm:$0xff] %vm580_vm0, %v2742_v27  ;;  %v2743_v2 = vadd.f32 %v2735_v9, %v4147_v19 }
 0xd60   : > { %2751 = vst.msk [vmem:[%s4288_s30 + $0x38] sm:$0xff] %vm580_vm0, %v2743_v2 }
 0xd61 PF: > { %s27_s21 = sadd.s32 1, %s3387_s21  }
 0xd62   : > { %p24_p3 = scmp.ge.s32.totalorder %s27_s21, 4  }
 0xd64   :  { %26 = sbr.rel (!%p24_p3) target bundleno = 3 (0x3), region = 121 }
 0xd6b   :  { %2776 = vsyncpa [#allocation3], 1 }
 0xd6c   :  { %2778 = vsyncpa [#allocation3 + $0x1], 1 }

// kernel: basic_layer_forward.2
= control target key start
LH: loop header
LB: loop body
LE: loop exit
PB: predicated region body
PF: predicated region fallthrough
CT: control target
= control target key end

     0   :  { %20 = vsyncpa [#allocation3], 0  ;;  %s7157_s0 = inlined_call_operand.vmem [shape: f32[8,16,32], index: 0, kind: input, shape index: {}]   ;;  %s7158_s1 = inlined_call_operand.vmem [shape: f32[2,16,16], index: 1, kind: input, shape index: {}]   ;;  %s7159_s2 = inlined_call_operand.vmem [shape: bf16[32,96], index: 2, kind: input, shape index: {}]   ;;  %s7160_s3 = inlined_call_operand.vmem [shape: f32[1,96], index: 3, kind: input, shape index: {}]   ;;  %s7161_s4 = inlined_call_operand.vmem [shape: bf16[32,32], index: 4, kind: input, shape index: {}]   ;;  %s7162_s5 = inlined_call_operand.vmem [shape: f32[1,32], index: 5, kind: input, shape index: {}]   ;;  %s7163_s6 = inlined_call_operand.vmem [shape: f32[2], index: 6, kind: input, shape index: {}]   ;;  %s7164_s7 = inlined_call_operand.vmem [shape: f32[1,32], index: 7, kind: input, shape index: {}]   ;;  %s7165_s8 = inlined_call_operand.vmem [shape: f32[1,32], index: 8, kind: input, shape index: {}]   ;;  %s7166_s9 = inlined_call_operand.vmem [shape: f32[1,32], index: 9, kind: input, shape index: {}]   ;;  %s7167_s10 = inlined_call_operand.vmem [shape: f32[1,32], index: 10, kind: input, shape index: {}]   ;;  %s7168_s11 = inlined_call_operand.vmem [shape: bf16[32,128], index: 11, kind: input, shape index: {}]   ;;  %s7169_s12 = inlined_call_operand.vmem [shape: f32[1,128], index: 12, kind: input, shape index: {}]   ;;  %s7170_s13 = inlined_call_operand.vmem [shape: bf16[128,32], index: 13, kind: input, shape index: {}]   ;;  %s7171_s14 = inlined_call_operand.vmem [shape: f32[1,32], index: 14, kind: input, shape index: {}]   ;;  %s7172_s15 = inlined_call_operand.vmem [shape: f32[8,16,32], index: 15, kind: output, shape index: {}]  }
   0x1   :  { %s39_s20 = sshll.u32 %s7163_s6, 4  ;;  %s40_s20 = int_to_ptr.vmem [resolvable:$true] %s39_s20 }
   0x2   :  { %s5003_s21 = scalar_lea.vmem %s40_s20, 16  ;;  %p5008_p1 = scmp.lt.s32.totalorder %s40_s20, %s40_s20 }
   0x3   :  { %p5004_p0 = scmp.ne.s32.totalorder %s40_s20, %s5003_s21  ;;  %p5009_p2 = scmp.lt.s32.totalorder %s5003_s21, %s5003_s21 }
   0x5   :  { %p5010_p3 = por %p5009_p2, %p5008_p1 }
   0x7   :  { %p5011_p4 = pnand %p5010_p3, %p5004_p0 }
   0x9   :  { %5014 = shalt.err (!%p5011_p4)
}
   0xa   :  { %s5017_s22 = smov [#allocation2]  }
   0xb   :  { %42 = dma.vmem_to_smem %s40_s20, 16, %s5017_s22, [#allocation3]  }
   0xc   :  { %5015 = dma.done.wait [#allocation3], 16  }
   0xd   :  { %5016 = vsyncadd [#allocation3], 4294967280 }
   0xe   :  { %62 = sfence }
   0xf   :  { %v4621_v0 = vld [vmem:[%s7159_s2] sm:$0xff]   ;;  %v4622_v1 = vld [vmem:[%s7159_s2 + $0x8] sm:$0xff]   ;;  %vm111_vm0 = vcmask 261120   ;;  %v66_v5 = vld [vmem:[%s7157_s0 + $0x10] sm:$0xff]  ;;  %vm249_vm1 = vcmask 130048   ;;  %vm5020_vm2 = vmmov 0  }
  0x10   :  { %4284 = vmatprep.subr.bf16.mxu0 %v4621_v0  ;;  %v64_v2 = vld [vmem:[%s7157_s0] sm:$0xff]  ;;  %v65_v3 = vld [vmem:[%s7157_s0 + $0x8] sm:$0xff]  ;;  %4568 = vmatprep.subr.bf16.mxu1 %v4621_v0  ;;  %v67_v6 = vld [vmem:[%s7157_s0 + $0x18] sm:$0xff]  ;;  %s5021_s6 = smov 80   ;;  %s5022_s27 = smov 112  }
  0x11   :  { %4285 = vmatpush3.bf16.msra.mxu0 %v4621_v0  ;;  %v80_v4 = vpack.c.bf16 %v65_v3, %v64_v2  ;;  %4570 = vmatpush3.bf16.msra.mxu1 %v4621_v0  ;;  %v68_v7 = vld [vmem:[%s7157_s0 + $0x20] sm:$0xff]  ;;  %v69_v8 = vld [vmem:[%s7157_s0 + $0x28] sm:$0xff]  ;;  %v74_v11 = vld [vmem:[%s7157_s0 + $0x50] sm:$0xff]  ;;  %v81_v13 = vpack.c.bf16 %v67_v6, %v66_v5  ;;  %s506_s28 = sld [smem:[#allocation2]]  ;;  %s5023_s29 = smov 64  }
  0x12   :  { %4286 = vmatprep.subr.bf16.mxu0 %v4622_v1  ;;  %4569 = vmatprep.subr.bf16.mxu1 %v4622_v1  ;;  %v72_v9 = vld [vmem:[%s7157_s0 + $0x40] sm:$0xff]  ;;  %v73_v10 = vld [vmem:[%s7157_s0 + $0x48] sm:$0xff]  ;;  %v75_v12 = vld [vmem:[%s7157_s0 + $0x58] sm:$0xff]  ;;  %v82_v18 = vpack.c.bf16 %v69_v8, %v68_v7  ;;  %s4120_s2 = sld [smem:[#allocation2 + $0x1]]  ;;  %s5024_s19 = smov 48  }
  0x13   :  { %4288 = vmatprep.mubr.msk.bf16.mxu0 %vm111_vm0, %v80_v4  ;;  %v84_v14 = vpack.c.bf16 %v73_v10, %v72_v9  ;;  %v85_v15 = vpack.c.bf16 %v75_v12, %v74_v11  ;;  %v76_v16 = vld [vmem:[%s7157_s0 + $0x60] sm:$0xff]  ;;  %v77_v17 = vld [vmem:[%s7157_s0 + $0x68] sm:$0xff]  ;;  %v70_v20 = vld [vmem:[%s7157_s0 + $0x30] sm:$0xff]  ;;  %s5025_s25 = smov 16  }
  0x14   :  { %v86_v19 = vpack.c.bf16 %v77_v17, %v76_v16  ;;  %v71_v21 = vld [vmem:[%s7157_s0 + $0x38] sm:$0xff]  ;;  %v78_v22 = vld [vmem:[%s7157_s0 + $0x70] sm:$0xff]  ;;  %v4093_v26 = vld [vmem:[%s7160_s3] ss:$0 sm:$0xff]  ;;  %s5018_s3 = smov 96  }
  0x15   :  { %4287 = vmatpush3.bf16.msra.mxu0 %v4622_v1  ;;  %4571 = vmatpush3.bf16.msra.mxu1 %v4622_v1  ;;  %v79_v23 = vld [vmem:[%s7157_s0 + $0x78] sm:$0xff]  ;;  %v83_v24 = vpack.c.bf16 %v71_v21, %v70_v20 }
  0x16   :  { %4296 = vmatprep.mubr.msk.bf16.mxu1 %vm111_vm0, %v84_v14  ;;  %v87_v25 = vpack.c.bf16 %v79_v23, %v78_v22 }
  0x18   :  { %4289 = vmatmul.mubr.msk.bf16.vlgmr.msra.gmra.mrb[0].mxu0 %vm111_vm0, %v81_v13  ;;  %4297 = vmatmul.mubr.msk.bf16.vlgmr.msra.gmra.mrb[0].mxu1 %vm111_vm0, %v85_v15 }
  0x19   :  { %4292 = vmatprep.mubr.msk.bf16.mxu0 %vm111_vm0, %v82_v18  ;;  %4300 = vmatprep.mubr.msk.bf16.mxu1 %vm111_vm0, %v86_v19 }
  0x20   :  { %4293 = vmatmul.mubr.msk.bf16.gmra.mrb[4].mxu0 %vm111_vm0, %v83_v24  ;;  %4301 = vmatmul.mubr.msk.bf16.gmra.mrb[4].mxu1 %vm111_vm0, %v87_v25 }
  0xeb   :  { %v4290_v27 = vpop.f32.mrb[0].mxu0  ;;  %v4298_v28 = vpop.f32.mrb[0].mxu1 }
  0xec   :  { %v5174_v29 = vadd.f32 %v4290_v27, %v4093_v26  ;;  %v170_v30 = vpop.f32.mrb[1].mxu0  ;;  %v202_v31 = vpop.f32.mrb[1].mxu1  ;;  %v5246_v62 = vadd.f32 %v4298_v28, %v4093_v26 }
  0xed   :  { %v5176_v32 = vadd.f32 %v4093_v26, %v170_v30  ;;  %v4291_v33 = vpop.f32.mrb[2].mxu0  ;;  %v4299_v34 = vpop.f32.mrb[2].mxu1  ;;  %v5222_v57 = vadd.f32 %v4093_v26, %v202_v31 }
  0xee   :  { %v5178_v35 = vadd.f32 %v4291_v33, %v4093_v26  ;;  %v173_v36 = vpop.f32.mrb[3].mxu0  ;;  %v5182_v37 = vmul.f32 %v5174_v29, %v5174_v29  ;;  %v205_v38 = vpop.f32.mrb[3].mxu1  ;;  %7207 = vst [vmem:[#allocation10_spill] sm:$0xff] %v5246_v62  ;;  %v5248_v63 = vadd.f32 %v4299_v34, %v4093_v26  ;;  %v5264_v3 = vmul.f32 %v5246_v62, %v5246_v62 }
  0xef   :  { %v5184_v39 = vadd.f32 %v4093_v26, %v173_v36  ;;  %v5188_v40 = vmul.f32 %v5176_v32, %v5176_v32  ;;  %7205 = vst [vmem:[#allocation8_spill] sm:$0xff] %v5222_v57  ;;  %v5232_v59 = vadd.f32 %v4093_v26, %v205_v38  ;;  %v5242_v61 = vmul.f32 %v5222_v57, %v5222_v57 }
  0xf0   :  { %366 = vrot.lane.b32.xlu1 %v5182_v37, %s5018_s3  ;;  %v5196_v41 = vmul.f32 %v5178_v35, %v5178_v35  ;;  %7208 = vst [vmem:[#allocation11_spill] sm:$0xff] %v5248_v63  ;;  %v5268_v4 = vmul.f32 %v5248_v63, %v5248_v63 }
  0xf1   :  { %362 = vrot.lane.b32.xlu0 %v5188_v40, %s5018_s3  ;;  %v5200_v43 = vmul.f32 %v5184_v39, %v5184_v39  ;;  %7206 = vst [vmem:[#allocation9_spill] sm:$0xff] %v5232_v59  ;;  %v5252_v0 = vmul.f32 %v5232_v59, %v5232_v59 }
  0xf3   :  { %v4294_v42 = vpop.f32.mrb[4].mxu0  ;;  %v4302_v44 = vpop.f32.mrb[4].mxu1 }
  0xf4   :  { %368 = vrot.lane.b32.xlu1 %v5196_v41, %s5018_s3  ;;  %v186_v45 = vpop.f32.mrb[5].mxu0  ;;  %v218_v46 = vpop.f32.mrb[5].mxu1  ;;  %v5210_v53 = vadd.f32 %v4294_v42, %v4093_v26  ;;  %v5272_v5 = vadd.f32 %v4302_v44, %v4093_v26 }
  0xf5   :  { %v5204_v47 = vadd.f32 %v4093_v26, %v186_v45  ;;  %v4295_v48 = vpop.f32.mrb[6].mxu0  ;;  %364 = vrot.lane.b32.xlu0 %v5200_v43, %s5018_s3  ;;  %v4303_v49 = vpop.f32.mrb[6].mxu1  ;;  %v5256_v1 = vadd.f32 %v4093_v26, %v218_v46  ;;  %v253_v45 = vsel %vm249_vm1, %v5200_v43, 0.0 }
  0xf6   :  { %v5208_v50 = vadd.f32 %v4295_v48, %v4093_v26  ;;  %v189_v51 = vpop.f32.mrb[7].mxu0  ;;  %v221_v52 = vpop.f32.mrb[7].mxu1  ;;  %7203 = vst [vmem:[#allocation6_spill] sm:$0xff] %v5210_v53  ;;  %v5230_v58 = vmul.f32 %v5210_v53, %v5210_v53  ;;  %v5260_v2 = vadd.f32 %v4303_v49, %v4093_v26  ;;  %v5290_v9 = vmul.f32 %v5272_v5, %v5272_v5 }
  0xf7   :  { %v5214_v54 = vmul.f32 %v5204_v47, %v5204_v47  ;;  %v5216_v55 = vadd.f32 %v4093_v26, %v189_v51  ;;  %7209 = vst [vmem:[#allocation12_spill] sm:$0xff] %v5256_v1  ;;  %v5276_v6 = vmul.f32 %v5256_v1, %v5256_v1  ;;  %v5284_v8 = vadd.f32 %v4093_v26, %v221_v52 }
  0xf8   :  { %7202 = vst [vmem:[#allocation5_spill] sm:$0xff] %v5208_v50  ;;  %v5220_v56 = vmul.f32 %v5208_v50, %v5208_v50  ;;  %v5282_v7 = vmul.f32 %v5260_v2, %v5260_v2  ;;  %v259_v52 = vsel %vm249_vm1, %v5196_v41, 0.0 }
  0xf9   :  { %7204 = vst [vmem:[#allocation7_spill] sm:$0xff] %v5216_v55  ;;  %370 = vrot.lane.b32.xlu0 %v5214_v54, %s5018_s3  ;;  %v5236_v60 = vmul.f32 %v5216_v55, %v5216_v55  ;;  %7210 = vst [vmem:[#allocation13_spill] sm:$0xff] %v5284_v8  ;;  %v5296_v10 = vmul.f32 %v5284_v8, %v5284_v8 }
  0xfa   :  { %376 = vrot.lane.b32.xlu1 %v5220_v56, %s5018_s3 }
  0xfd   :  { %374 = vrot.lane.b32.xlu0 %v5230_v58, %s5018_s3 }
  0xfe   :  { %372 = vrot.lane.b32.xlu1 %v5236_v60, %s5018_s3 }
 0x101   :  { %378 = vrot.lane.b32.xlu0 %v5242_v61, %s5018_s3 }
 0x102   :  { %380 = vrot.lane.b32.xlu1 %v5252_v0, %s5018_s3 }
 0x105   :  { %382 = vrot.lane.b32.xlu0 %v5264_v3, %s5018_s3 }
 0x106   :  { %384 = vrot.lane.b32.xlu1 %v5268_v4, %s5018_s3 }
 0x109   :  { %386 = vrot.lane.b32.xlu0 %v5276_v6, %s5018_s3 }
 0x10a   :  { %392 = vrot.lane.b32.xlu1 %v5282_v7, %s5018_s3 }
 0x10d   :  { %390 = vrot.lane.b32.xlu0 %v5290_v9, %s5018_s3 }
 0x10e   :  { %388 = vrot.lane.b32.xlu1 %v5296_v10, %s5018_s3 }
 0x162   :  { %v367_v11 = vpop.permute.xlu1 %366 }
 0x163   :  { %v363_v12 = vpop.permute.xlu0 %362  ;;  %v416_v16 = vsel %vm249_vm1, %v367_v11, 0.0 }
 0x164   :  { %v410_v13 = vsel %vm249_vm1, %v363_v12, 0.0 }
 0x165   :  { %411 = vadd.xlane.f32.xlu0 %v410_v13  ;;  %v265_v13 = vsel %vm249_vm1, %v5236_v60, 0.0 }
 0x166   :  { %v369_v15 = vpop.permute.xlu1 %368 }
 0x167   :  { %v365_v14 = vpop.permute.xlu0 %364  ;;  %v419_v19 = vsel %vm249_vm1, %v369_v15, 0.0  ;;  %v271_v15 = vsel %vm249_vm1, %v5220_v56, 0.0 }
 0x168   :  { %v413_v30 = vsel %vm249_vm1, %v365_v14, 0.0  ;;  %v250_v14 = vsel %vm249_vm1, %v5188_v40, 0.0 }
 0x169   :  { %417 = vadd.xlane.f32.xlu0 %v416_v16  ;;  %v256_v16 = vsel %vm249_vm1, %v5182_v37, 0.0 }
 0x16b   :  { %v371_v17 = vpop.permute.xlu0 %370 }
 0x16c   :  { %v377_v18 = vpop.permute.xlu1 %376  ;;  %v422_v42 = vsel %vm249_vm1, %v371_v17, 0.0  ;;  %v274_v17 = vsel %vm249_vm1, %v5242_v61, 0.0 }
 0x16d   :  { %420 = vadd.xlane.f32.xlu0 %v419_v19  ;;  %v431_v22 = vsel %vm249_vm1, %v377_v18, 0.0  ;;  %v262_v18 = vsel %vm249_vm1, %v5214_v54, 0.0  ;;  %v277_v19 = vsel %vm249_vm1, %v5252_v0, 0.0 }
 0x16f   :  { %v375_v20 = vpop.permute.xlu0 %374 }
 0x170   :  { %v373_v21 = vpop.permute.xlu1 %372  ;;  %v428_v33 = vsel %vm249_vm1, %v375_v20, 0.0  ;;  %v268_v20 = vsel %vm249_vm1, %v5230_v58, 0.0 }
 0x171   :  { %432 = vadd.xlane.f32.xlu0 %v431_v22  ;;  %v425_v25 = vsel %vm249_vm1, %v373_v21, 0.0  ;;  %v280_v21 = vsel %vm249_vm1, %v5264_v3, 0.0  ;;  %v283_v22 = vsel %vm249_vm1, %v5268_v4, 0.0 }
 0x173   :  { %v379_v23 = vpop.permute.xlu0 %378 }
 0x174   :  { %v381_v24 = vpop.permute.xlu1 %380  ;;  %v434_v26 = vsel %vm249_vm1, %v379_v23, 0.0  ;;  %v286_v23 = vsel %vm249_vm1, %v5276_v6, 0.0 }
 0x175   :  { %426 = vadd.xlane.f32.xlu0 %v425_v25  ;;  %435 = vadd.xlane.f32.xlu1 %v434_v26  ;;  %v437_v28 = vsel %vm249_vm1, %v381_v24, 0.0  ;;  %v292_v24 = vsel %vm249_vm1, %v5290_v9, 0.0  ;;  %v295_v25 = vsel %vm249_vm1, %v5282_v7, 0.0 }
 0x177   :  { %v383_v36 = vpop.permute.xlu0 %382 }
 0x178   :  { %v385_v27 = vpop.permute.xlu1 %384  ;;  %v440_v46 = vsel %vm249_vm1, %v383_v36, 0.0 }
 0x179   :  { %438 = vadd.xlane.f32.xlu0 %v437_v28  ;;  %414 = vadd.xlane.f32.xlu1 %v413_v30  ;;  %v443_v31 = vsel %vm249_vm1, %v385_v27, 0.0 }
 0x17b   :  { %v387_v44 = vpop.permute.xlu0 %386 }
 0x17c   :  { %v393_v34 = vpop.permute.xlu1 %392  ;;  %v446_v48 = vsel %vm249_vm1, %v387_v44, 0.0 }
 0x17d   :  { %444 = vadd.xlane.f32.xlu0 %v443_v31  ;;  %429 = vadd.xlane.f32.xlu1 %v428_v33  ;;  %v455_v38 = vsel %vm249_vm1, %v393_v34, 0.0 }
 0x17f   :  { %v391_v51 = vpop.permute.xlu0 %390 }
 0x180   :  { %v389_v49 = vpop.permute.xlu1 %388  ;;  %v452_v12 = vsel %vm249_vm1, %v391_v51, 0.0 }
 0x181   :  { %456 = vadd.xlane.f32.xlu0 %v455_v38  ;;  %423 = vadd.xlane.f32.xlu1 %v422_v42  ;;  %v449_v11 = vsel %vm249_vm1, %v389_v49, 0.0 }
 0x185   :  { %254 = vadd.xlane.f32.xlu0 %v253_v45  ;;  %441 = vadd.xlane.f32.xlu1 %v440_v46 }
 0x189   :  { %260 = vadd.xlane.f32.xlu0 %v259_v52  ;;  %447 = vadd.xlane.f32.xlu1 %v446_v48 }
 0x18d   :  { %450 = vadd.xlane.f32.xlu0 %v449_v11  ;;  %453 = vadd.xlane.f32.xlu1 %v452_v12 }
 0x191   :  { %266 = vadd.xlane.f32.xlu0 %v265_v13  ;;  %251 = vadd.xlane.f32.xlu1 %v250_v14 }
 0x195   :  { %272 = vadd.xlane.f32.xlu0 %v271_v15  ;;  %257 = vadd.xlane.f32.xlu1 %v256_v16  ;;  %v7173_v15 = vmov 0.0  }
 0x196   :  { %4304 = vmatprep.subr.bf16.mxu1 %v7173_v15  ;;  %4306 = vmatprep.mubr.msk.bf16.mxu1 %vm5020_vm2, %v7173_v15 }
 0x197   :  { %4328 = vmatprep.subr.bf16.mxu0 %v7173_v15  ;;  %4330 = vmatprep.mubr.msk.bf16.mxu0 %vm5020_vm2, %v7173_v15 }
 0x199   :  { %275 = vadd.xlane.f32.xlu0 %v274_v17  ;;  %263 = vadd.xlane.f32.xlu1 %v262_v18 }
 0x19d   :  { %278 = vadd.xlane.f32.xlu0 %v277_v19  ;;  %269 = vadd.xlane.f32.xlu1 %v268_v20 }
 0x1a1   :  { %281 = vadd.xlane.f32.xlu0 %v280_v21 }
 0x1a5   :  { %284 = vadd.xlane.f32.xlu0 %v283_v22 }
 0x1a9   :  { %287 = vadd.xlane.f32.xlu0 %v286_v23 }
 0x1ad   :  { %293 = vadd.xlane.f32.xlu0 %v292_v24 }
 0x1b1   :  { %296 = vadd.xlane.f32.xlu0 %v295_v25 }
 0x1f2   :  { %v412_v26 = vpop.xlane.xlu0 %411 }
 0x1f3   :  { %v458_v38 = vmax.f32 %v412_v26, 1e-24 }
 0x1f6   :  { %v418_v27 = vpop.xlane.xlu0 %417 }
 0x1f7   :  { %v460_v28 = vmax.f32 %v418_v27, 1e-24 }
 0x1f9   :  { %4635 = vrsqrt.f32 %v460_v28 }
 0x1fa   :  { %v421_v30 = vpop.xlane.xlu0 %420 }
 0x1fb   :  { %v461_v31 = vmax.f32 %v421_v30, 1e-24 }
 0x1fd   :  { %4637 = vrsqrt.f32 %v461_v31 }
 0x1fe   :  { %v433_v33 = vpop.xlane.xlu0 %432  ;;  %4639 = vrsqrt.f32 %v458_v38 }
 0x1ff   :  { %v465_v18 = vmax.f32 %v433_v33, 1e-24 }
 0x202   :  { %v436_v34 = vpop.xlane.xlu1 %435  ;;  %v427_v36 = vpop.xlane.xlu0 %426 }
 0x203   :  { %v4636_v42 = vpop.eup %4635  ;;  %v463_v13 = vmax.f32 %v427_v36, 1e-24  ;;  %v466_v25 = vmax.f32 %v436_v34, 1e-24 }
 0x204   :  { %v492_v49 = vmul.f32 %v4636_v42, %v5174_v29 }
 0x206   :  { %v415_v44 = vpop.xlane.xlu1 %414  ;;  %v439_v45 = vpop.xlane.xlu0 %438 }
 0x207   :  { %v4638_v46 = vpop.eup %4637  ;;  %v459_v48 = vmax.f32 %v415_v44, 1e-24  ;;  %v467_v21 = vmax.f32 %v439_v45, 1e-24 }
 0x208   :  { %v493_v51 = vmul.f32 %v4638_v46, %v5178_v35  ;;  %v4640_v20 = vpop.eup %4639 }
 0x209   :  { %4641 = vrsqrt.f32 %v459_v48  ;;  %v490_v26 = vmul.f32 %v4640_v20, %v5176_v32 }
 0x20a   :  { %v430_v52 = vpop.xlane.xlu1 %429  ;;  %v5350_v11 = vpop.xlane.xlu0 %444  ;;  %v533_v12 = vpack.c.bf16 %v493_v51, %v492_v49  ;;  %4643 = vrsqrt.f32 %v463_v13 }
 0x20b   :  { %v464_v14 = vmax.f32 %v430_v52, 1e-24 }
 0x20c   :  { %601 = vrot.lane.b32.xlu1 %v533_v12, %s5018_s3 }
 0x20d   :  { %4645 = vrsqrt.f32 %v464_v14 }
 0x20e   :  { %v424_v16 = vpop.xlane.xlu1 %423  ;;  %v457_v17 = vpop.xlane.xlu0 %456 }
 0x20f   :  { %v462_v19 = vmax.f32 %v424_v16, 1e-24  ;;  %v473_v48 = vmax.f32 %v457_v17, 1e-24 }
 0x211   :  { %4647 = vrsqrt.f32 %v462_v19 }
 0x212   :  { %v442_v22 = vpop.xlane.xlu1 %441  ;;  %v5359_v23 = vpop.xlane.xlu0 %254  ;;  %4649 = vrsqrt.f32 %v465_v18 }
 0x213   :  { %v4642_v24 = vpop.eup %4641  ;;  %4651 = vrsqrt.f32 %v467_v21 }
 0x214   :  { %v491_v27 = vmul.f32 %v4642_v24, %v5184_v39  ;;  %4653 = vrsqrt.f32 %v466_v25  ;;  %v4644_v36 = vpop.eup %4643 }
 0x215   :  { %v495_v51 = vmul.f32 %v4644_v36, %v5216_v55 }
 0x216   :  { %v448_v28 = vpop.xlane.xlu1 %447  ;;  %v5363_v30 = vpop.xlane.xlu0 %260  ;;  %v532_v31 = vpack.c.bf16 %v491_v27, %v490_v26 }
 0x217   :  { %v470_v33 = vmax.f32 %v448_v28, 1e-24  ;;  %v4646_v38 = vpop.eup %4645 }
 0x218   :  { %551 = vrot.lane.b32.xlu1 %v532_v31, %s5018_s3  ;;  %v496_v13 = vmul.f32 %v4646_v38, %v5210_v53 }
 0x219   :  { %4655 = vrsqrt.f32 %v470_v33 }
 0x21a   :  { %v454_v42 = vpop.xlane.xlu1 %453  ;;  %v451_v44 = vpop.xlane.xlu0 %450 }
 0x21b   :  { %v4648_v45 = vpop.eup %4647  ;;  %v472_v46 = vmax.f32 %v454_v42, 1e-24  ;;  %v471_v34 = vmax.f32 %v451_v44, 1e-24  ;;  %v468_v44 = vmax.f32 %v442_v22, 1e-24 }
 0x21c   :  { %v494_v49 = vmul.f32 %v4648_v45, %v5204_v47  ;;  %v4650_v52 = vpop.eup %4649  ;;  %v469_v45 = vmax.f32 %v5350_v11, 1e-24 }
 0x21d   :  { %4657 = vrsqrt.f32 %v472_v46  ;;  %v4652_v14 = vpop.eup %4651  ;;  %v497_v16 = vmul.f32 %v4650_v52, %v5208_v50  ;;  %v289_v46 = vsel %vm249_vm1, %v5296_v10, 0.0 }
 0x21e   :  { %4659 = vrsqrt.f32 %v471_v34  ;;  %v534_v12 = vpack.c.bf16 %v495_v51, %v494_v49  ;;  %v4654_v18 = vpop.eup %4653  ;;  %v499_v17 = vmul.f32 %v4652_v14, %v5232_v59 }
 0x21f   :  { %4661 = vrsqrt.f32 %v473_v48  ;;  %v535_v19 = vpack.c.bf16 %v497_v16, %v496_v13  ;;  %v498_v20 = vmul.f32 %v4654_v18, %v5222_v57 }
 0x220   :  { %651 = vrot.lane.b32.xlu0 %v534_v12, %s5018_s3  ;;  %4663 = vrsqrt.f32 %v468_v44 }
 0x221   :  { %v536_v24 = vpack.c.bf16 %v499_v17, %v498_v20  ;;  %4665 = vrsqrt.f32 %v469_v45 }
 0x223   :  { %v4656_v21 = vpop.eup %4655 }
 0x224   :  { %701 = vrot.lane.b32.xlu0 %v535_v19, %s5018_s3  ;;  %v502_v27 = vmul.f32 %v4656_v21, %v5256_v1  ;;  %v5466_v21 = vstv %s506_s28 }
 0x227   :  { %v4658_v25 = vpop.eup %4657 }
 0x228   :  { %v4660_v26 = vpop.eup %4659  ;;  %751 = vrot.lane.b32.xlu0 %v536_v24, %s5018_s3  ;;  %v504_v36 = vmul.f32 %v4658_v25, %v5272_v5 }
 0x229   :  { %v503_v28 = vmul.f32 %v4660_v26, %v5284_v8  ;;  %v4662_v31 = vpop.eup %4661 }
 0x22a   :  { %v505_v38 = vmul.f32 %v4662_v31, %v5260_v2  ;;  %v4664_v34 = vpop.eup %4663 }
 0x22b   :  { %v538_v33 = vpack.c.bf16 %v503_v28, %v502_v27  ;;  %v4666_v11 = vpop.eup %4665  ;;  %v500_v22 = vmul.f32 %v4664_v34, %v5246_v62 }
 0x22c   :  { %v539_v42 = vpack.c.bf16 %v505_v38, %v504_v36  ;;  %v501_v48 = vmul.f32 %v4666_v11, %v5248_v63 }
 0x22d   :  { %851 = vrot.lane.b32.xlu0 %v538_v33, %s5018_s3 }
 0x22e   :  { %v537_v49 = vpack.c.bf16 %v501_v48, %v500_v22 }
 0x231   :  { %901 = vrot.lane.b32.xlu0 %v539_v42, %s5018_s3 }
 0x235   :  { %1662 = vrot.lane.b32.xlu0 %v5188_v40, %s5021_s6 }
 0x239   :  { %1664 = vrot.lane.b32.xlu0 %v5200_v43, %s5021_s6 }
 0x23c   :  { %290 = vadd.xlane.f32.xlu1 %v289_v46 }
 0x23d   :  { %1668 = vrot.lane.b32.xlu0 %v5196_v41, %s5021_s6 }
 0x241   :  { %1520 = vrot.lane.b32.xlu0 %v5200_v43, %s5022_s27  ;;  %v267_v43 = vpop.xlane.xlu0 %266 }
 0x242   :  { %v303_v19 = vmax.f32 %v267_v43, 1e-24 }
 0x245   :  { %1522 = vrot.lane.b32.xlu0 %v5182_v37, %s5022_s27 }
 0x249   :  { %1670 = vrot.lane.b32.xlu0 %v5214_v54, %s5021_s6 }
 0x24d   :  { %1676 = vrot.lane.b32.xlu0 %v5220_v56, %s5021_s6  ;;  %801 = vrot.lane.b32.xlu1 %v537_v49, %s5018_s3 }
 0x251   :  { %1528 = vrot.lane.b32.xlu0 %v5236_v60, %s5022_s27  ;;  %1666 = vrot.lane.b32.xlu1 %v5182_v37, %s5021_s6  ;;  %v5421_v37 = vpop.xlane.xlu0 %272 }
 0x252   :  { %v305_v36 = vmax.f32 %v5421_v37, 1e-24 }
 0x255   :  { %1530 = vrot.lane.b32.xlu0 %v5230_v58, %s5022_s27  ;;  %1518 = vrot.lane.b32.xlu1 %v5188_v40, %s5022_s27  ;;  %v276_v40 = vpop.xlane.xlu0 %275 }
 0x259   :  { %1678 = vrot.lane.b32.xlu0 %v5242_v61, %s5021_s6  ;;  %1524 = vrot.lane.b32.xlu1 %v5196_v41, %s5022_s27  ;;  %v252_v41 = vpop.xlane.xlu1 %251 }
 0x25d   :  { %1684 = vrot.lane.b32.xlu0 %v5268_v4, %s5021_s6  ;;  %1672 = vrot.lane.b32.xlu1 %v5236_v60, %s5021_s6  ;;  %v298_v60 = vmax.f32 %v252_v41, 1e-24 }
 0x25f   :  { %4667 = vrsqrt.f32 %v298_v60 }
 0x261   :  { %1536 = vrot.lane.b32.xlu0 %v5252_v0, %s5022_s27  ;;  %1674 = vrot.lane.b32.xlu1 %v5230_v58, %s5021_s6  ;;  %v279_v58 = vpop.xlane.xlu0 %278 }
 0x262   :  { %v307_v16 = vmax.f32 %v279_v58, 1e-24 }
 0x265   :  { %1538 = vrot.lane.b32.xlu0 %v5264_v3, %s5022_s27  ;;  %1526 = vrot.lane.b32.xlu1 %v5214_v54, %s5022_s27  ;;  %v258_v54 = vpop.xlane.xlu1 %257 }
 0x269   :  { %1686 = vrot.lane.b32.xlu0 %v5276_v6, %s5021_s6  ;;  %1532 = vrot.lane.b32.xlu1 %v5220_v56, %s5022_s27  ;;  %v5443_v56 = vpop.xlane.xlu0 %281  ;;  %v264_v51 = vpop.xlane.xlu1 %263 }
 0x26a   :  { %v302_v14 = vmax.f32 %v264_v51, 1e-24 }
 0x26d   :  { %1692 = vrot.lane.b32.xlu0 %v5282_v7, %s5021_s6  ;;  %1680 = vrot.lane.b32.xlu1 %v5252_v0, %s5021_s6  ;;  %v299_v0 = vmax.f32 %v5359_v23, 1e-24  ;;  %v5448_v52 = vpop.xlane.xlu0 %284  ;;  %v270_v12 = vpop.xlane.xlu1 %269 }
 0x26e   :  { %v304_v28 = vmax.f32 %v270_v12, 1e-24 }
 0x26f   :  { %4669 = vrsqrt.f32 %v299_v0 }
 0x271   :  { %1544 = vrot.lane.b32.xlu0 %v5296_v10, %s5022_s27  ;;  %1682 = vrot.lane.b32.xlu1 %v5264_v3, %s5021_s6  ;;  %v300_v3 = vmax.f32 %v258_v54, 1e-24  ;;  %v5455_v13 = vpop.xlane.xlu0 %287 }
 0x273   :  { %4671 = vrsqrt.f32 %v300_v3 }
 0x275   :  { %1546 = vrot.lane.b32.xlu0 %v5290_v9, %s5022_s27  ;;  %1534 = vrot.lane.b32.xlu1 %v5242_v61, %s5022_s27  ;;  %v301_v61 = vmax.f32 %v5363_v30, 1e-24  ;;  %v5459_v18 = vpop.xlane.xlu0 %293  ;;  %v306_v30 = vmax.f32 %v276_v40, 1e-24 }
 0x277   :  { %4673 = vrsqrt.f32 %v301_v61 }
 0x278   :  { %4675 = vrsqrt.f32 %v302_v14 }
 0x279   :  { %1540 = vrot.lane.b32.xlu1 %v5268_v4, %s5022_s27  ;;  %v4668_v4 = vpop.eup %4667  ;;  %4677 = vrsqrt.f32 %v307_v16  ;;  %v5470_v26 = vpop.xlane.xlu0 %296 }
 0x27a   :  { %4679 = vrsqrt.f32 %v303_v19 }
 0x27b   :  { %4681 = vrsqrt.f32 %v306_v30 }
 0x27c   :  { %4683 = vrsqrt.f32 %v304_v28 }
 0x27d   :  { %1688 = vrot.lane.b32.xlu1 %v5296_v10, %s5021_s6  ;;  %v4670_v10 = vpop.eup %4669  ;;  %4685 = vrsqrt.f32 %v305_v36 }
 0x27e   :  { %v602_v23 = vpop.permute.xlu1 %601  ;;  %v331_v20 = vmul.f32 %v4670_v10, %v5184_v39  ;;  %v4672_v25 = vpop.eup %4671 }
 0x27f   :  { %v332_v33 = vmul.f32 %v4672_v25, %v5174_v29  ;;  %v607_v44 = vsel %vm249_vm1, %v602_v23, 0 }
 0x281   :  { %1690 = vrot.lane.b32.xlu1 %v5290_v9, %s5021_s6  ;;  %v330_v9 = vmul.f32 %v4668_v4, %v5176_v32  ;;  %v4674_v27 = vpop.eup %4673  ;;  %v510_v46 = vmul.f32 %v5466_v21, %v332_v33 }
 0x282   :  { %v333_v42 = vmul.f32 %v4674_v27, %v5178_v35  ;;  %v4676_v45 = vpop.eup %4675 }
 0x283   :  { %v508_v24 = vmul.f32 %v5466_v21, %v330_v9  ;;  %v4678_v34 = vpop.eup %4677  ;;  %v334_v43 = vmul.f32 %v4676_v45, %v5204_v47  ;;  %v308_v45 = vmax.f32 %v5443_v56, 1e-24 }
 0x284   :  { %v4680_v22 = vpop.eup %4679  ;;  %v511_v48 = vmul.f32 %v5466_v21, %v333_v42  ;;  %v339_v37 = vmul.f32 %v4678_v34, %v5232_v59  ;;  %v313_v34 = vmax.f32 %v5470_v26, 1e-24 }
 0x285   :  { %1542 = vrot.lane.b32.xlu1 %v5276_v6, %s5022_s27  ;;  %v4682_v49 = vpop.eup %4681  ;;  %v335_v58 = vmul.f32 %v4680_v22, %v5216_v55  ;;  %v512_v3 = vmul.f32 %v5466_v21, %v334_v43  ;;  %v312_v22 = vmax.f32 %v5459_v18, 1e-24 }
 0x286   :  { %v525_v40 = vpack.c.bf16 %v511_v48, %v510_v46  ;;  %v338_v54 = vmul.f32 %v4682_v49, %v5222_v57  ;;  %v517_v51 = vmul.f32 %v5466_v21, %v339_v37  ;;  %v4684_v61 = vpop.eup %4683 }
 0x287   :  { %v513_v23 = vmul.f32 %v5466_v21, %v335_v58  ;;  %v4686_v14 = vpop.eup %4685  ;;  %v336_v16 = vmul.f32 %v4684_v61, %v5210_v53 }
 0x288   :  { %v516_v12 = vmul.f32 %v5466_v21, %v338_v54  ;;  %v337_v9 = vmul.f32 %v4686_v14, %v5208_v50 }
 0x289   :  { %1548 = vrot.lane.b32.xlu1 %v5282_v7, %s5022_s27  ;;  %v509_v7 = vmul.f32 %v5466_v21, %v331_v20  ;;  %v526_v19 = vpack.c.bf16 %v513_v23, %v512_v3 }
 0x28a   :  { %v552_v17 = vpop.permute.xlu1 %551  ;;  %v528_v10 = vpack.c.bf16 %v517_v51, %v516_v12  ;;  %v515_v25 = vmul.f32 %v5466_v21, %v337_v9 }
 0x28b   :  { %v557_v6 = vsel %vm249_vm1, %v552_v17, 0  ;;  %v524_v31 = vpack.c.bf16 %v509_v7, %v508_v24 }
 0x28c   :  { %4305 = vmatpush3.bf16.xpose.msra.mxu1 %v557_v6  ;;  %v514_v6 = vmul.f32 %v5466_v21, %v336_v16 }
 0x28d   :  { %4310 = vmatprep.subr.bf16.mxu1 %v7173_v15 }
 0x28e   :  { %v527_v27 = vpack.c.bf16 %v515_v25, %v514_v6 }
 0x292   :  { %v652_v38 = vpop.permute.xlu0 %651 }
 0x293   :  { %4307 = vmatmul.mubr.msk.bf16.vlgmr.msra.gmra.mrb[8].mxu1 %vm249_vm1, %v524_v31  ;;  %v657_v60 = vsel %vm249_vm1, %v652_v38, 0 }
 0x294   :  { %4311 = vmatpush3.bf16.xpose.msra.mxu1 %v607_v44  ;;  %4312 = vmatprep.mubr.msk.bf16.mxu1 %vm5020_vm2, %v7173_v15  ;;  %v309_v44 = vmax.f32 %v5448_v52, 1e-24 }
 0x295   :  { %4316 = vmatprep.subr.bf16.mxu1 %v7173_v15 }
 0x296   :  { %v702_v11 = vpop.permute.xlu0 %701  ;;  %4687 = vrsqrt.f32 %v309_v44 }
 0x297   :  { %v707_v30 = vsel %vm249_vm1, %v702_v11, 0  ;;  %4689 = vrsqrt.f32 %v308_v45  ;;  %v310_v11 = vmax.f32 %v5455_v13, 1e-24 }
 0x298   :  { %4691 = vrsqrt.f32 %v313_v34 }
 0x299   :  { %4693 = vrsqrt.f32 %v310_v11 }
 0x29a   :  { %v752_v41 = vpop.permute.xlu0 %751  ;;  %4695 = vrsqrt.f32 %v312_v22 }
 0x29b   :  { %v757_v0 = vsel %vm249_vm1, %v752_v41, 0  ;;  %4313 = vmatmul.mubr.msk.bf16.vlgmr.msra.gmra.mrb[12].mxu1 %vm249_vm1, %v525_v40 }
 0x29c   :  { %4317 = vmatpush3.bf16.xpose.msra.mxu1 %v657_v60  ;;  %4329 = vmatpush3.bf16.xpose.msra.mxu0 %v757_v0 }
 0x29d   :  { %4318 = vmatprep.mubr.msk.bf16.mxu1 %vm5020_vm2, %v7173_v15  ;;  %4322 = vmatprep.subr.bf16.mxu1 %v7173_v15 }
 0x29e   :  { %4340 = vmatprep.subr.bf16.mxu0 %v7173_v15 }
 0x29f   :  { %v852_v4 = vpop.permute.xlu0 %851 }
 0x2a0   :  { %v857_v17 = vsel %vm249_vm1, %v852_v4, 0  ;;  %v4688_v49 = vpop.eup %4687 }
 0x2a1   :  { %v4690_v40 = vpop.eup %4689  ;;  %v341_v56 = vmul.f32 %v4688_v49, %v5248_v63 }
 0x2a2   :  { %v340_v58 = vmul.f32 %v4690_v40, %v5246_v62  ;;  %v4692_v18 = vpop.eup %4691 }
 0x2a3   :  { %v5502_v20 = vpop.permute.xlu0 %901  ;;  %4319 = vmatmul.mubr.msk.bf16.vlgmr.msra.gmra.mrb[16].mxu1 %vm249_vm1, %v526_v19  ;;  %4331 = vmatmul.mubr.msk.bf16.vlgmr.msra.gmra.mrb[8].mxu0 %vm249_vm1, %v528_v10  ;;  %v519_v13 = vmul.f32 %v5466_v21, %v341_v56  ;;  %v4694_v0 = vpop.eup %4693  ;;  %v345_v12 = vmul.f32 %v4692_v18, %v5260_v2 }
 0x2a4   :  { %4323 = vmatpush3.bf16.xpose.msra.mxu1 %v707_v30  ;;  %4341 = vmatpush3.bf16.xpose.msra.mxu0 %v857_v17  ;;  %v518_v3 = vmul.f32 %v5466_v21, %v340_v58  ;;  %v4696_v61 = vpop.eup %4695  ;;  %v342_v23 = vmul.f32 %v4694_v0, %v5256_v1  ;;  %v907_v19 = vsel %vm249_vm1, %v5502_v20, 0 }
 0x2a5   :  { %4324 = vmatprep.mubr.msk.bf16.mxu1 %vm5020_vm2, %v7173_v15  ;;  %4334 = vmatprep.subr.bf16.mxu1 %v7173_v15  ;;  %v344_v16 = vmul.f32 %v4696_v61, %v5272_v5  ;;  %v523_v6 = vmul.f32 %v5466_v21, %v345_v12 }
 0x2a6   :  { %4342 = vmatprep.mubr.msk.bf16.mxu0 %vm5020_vm2, %v7173_v15  ;;  %4352 = vmatprep.subr.bf16.mxu0 %v7173_v15  ;;  %v529_v4 = vpack.c.bf16 %v519_v13, %v518_v3  ;;  %v520_v25 = vmul.f32 %v5466_v21, %v342_v23 }
 0x2a7   :  { %v1663_v24 = vpop.permute.xlu0 %1662 }
 0x2a8   :  { %v1710_v7 = vsel %vm249_vm1, %v1663_v24, 0.0 }
 0x2a9   :  { %1711 = vadd.xlane.f32.xlu0 %v1710_v7 }
 0x2ab   :  { %v1665_v28 = vpop.permute.xlu0 %1664  ;;  %4325 = vmatmul.mubr.msk.bf16.vlgmr.msra.gmra.mrb[20].mxu1 %vm249_vm1, %v527_v27 }
 0x2ac   :  { %v1713_v31 = vsel %vm249_vm1, %v1665_v28, 0.0  ;;  %4336 = vmatprep.mubr.msk.bf16.mxu1 %vm5020_vm2, %v7173_v15  ;;  %v522_v28 = vmul.f32 %v5466_v21, %v344_v16 }
 0x2ad   :  { %1714 = vadd.xlane.f32.xlu1 %v1713_v31 }
 0x2af   :  { %v1669_v33 = vpop.permute.xlu0 %1668 }
 0x2b0   :  { %v1719_v36 = vsel %vm249_vm1, %v1669_v33, 0.0  ;;  %v531_v33 = vpack.c.bf16 %v523_v6, %v522_v28  ;;  %v5582_v28 = vpack.c.bf16 %v5178_v35, %v5174_v29 }
 0x2b1   :  { %1720 = vadd.xlane.f32.xlu1 %v1719_v36 }
 0x2b2   :  { %7211 = vst [vmem:[#allocation14_spill] sm:$0xff] %v5582_v28 }
 0x2b3   :  { %v1521_v38 = vpop.permute.xlu0 %1520 }
 0x2b4   :  { %v1569_v42 = vsel %vm249_vm1, %v1521_v38, 0.0 }
 0x2b5   :  { %1570 = vadd.xlane.f32.xlu1 %v1569_v42 }
 0x2b7   :  { %v1523_v46 = vpop.permute.xlu0 %1522 }
 0x2b8   :  { %v1572_v7 = vsel %vm249_vm1, %v1523_v46, 0.0 }
 0x2bb   :  { %v1671_v48 = vpop.permute.xlu0 %1670 }
 0x2bc   :  { %v1722_v42 = vsel %vm249_vm1, %v1671_v48, 0.0 }
 0x2bf   :  { %v1677_v52 = vpop.permute.xlu0 %1676 }
 0x2c0   :  { %v1731_v45 = vsel %vm249_vm1, %v1677_v52, 0.0 }
 0x2c3   :  { %v1529_v54 = vpop.permute.xlu0 %1528 }
 0x2c4   :  { %v1581_v22 = vsel %vm249_vm1, %v1529_v54, 0.0 }
 0x2c7   :  { %v1531_v30 = vpop.permute.xlu0 %1530 }
 0x2c9   :  { %v291_v43 = vpop.xlane.xlu1 %290 }
 0x2ca   :  { %v311_v37 = vmax.f32 %v291_v43, 1e-24 }
 0x2cb   :  { %v1679_v36 = vpop.permute.xlu0 %1678 }
 0x2cc   :  { %4697 = vrsqrt.f32 %v311_v37  ;;  %v1584_v37 = vsel %vm249_vm1, %v1531_v30, 0.0  ;;  %v1734_v56 = vsel %vm249_vm1, %v1679_v36, 0.0  ;;  %v5600_v36 = vpack.c.bf16 %v5232_v59, %v5222_v57 }
 0x2cd   :  { %v802_v41 = vpop.permute.xlu1 %801 }
 0x2ce   :  { %v807_v26 = vsel %vm249_vm1, %v802_v41, 0  ;;  %7214 = vst [vmem:[#allocation17_spill] sm:$0xff] %v5600_v36 }
 0x2cf   :  { %4335 = vmatpush3.bf16.xpose.msra.mxu1 %v807_v26  ;;  %v1685_v34 = vpop.permute.xlu0 %1684 }
 0x2d0   :  { %4346 = vmatprep.subr.bf16.mxu1 %v7173_v15  ;;  %v1743_v13 = vsel %vm249_vm1, %v1685_v34, 0.0  ;;  %v5623_v34 = vld [vmem:[%s7158_s1] sm:$0xff] }
 0x2d1   :  { %v1667_v60 = vpop.permute.xlu1 %1666 }
 0x2d2   :  { %v1716_v51 = vsel %vm249_vm1, %v1667_v60, 0.0 }
 0x2d3   :  { %1717 = vadd.xlane.f32.xlu0 %v1716_v51  ;;  %v1537_v49 = vpop.permute.xlu0 %1536 }
 0x2d4   :  { %v1593_v0 = vsel %vm249_vm1, %v1537_v49, 0.0 }
 0x2d5   :  { %v1519_v14 = vpop.permute.xlu1 %1518 }
 0x2d6   :  { %v4698_v10 = vpop.eup %4697  ;;  %4337 = vmatmul.mubr.msk.bf16.vlgmr.msra.gmra.mrb[24].mxu1 %vm249_vm1, %v529_v4  ;;  %v1566_v9 = vsel %vm249_vm1, %v1519_v14, 0.0 }
 0x2d7   :  { %v343_v17 = vmul.f32 %v4698_v10, %v5284_v8  ;;  %4347 = vmatpush3.bf16.xpose.msra.mxu1 %v907_v19  ;;  %1567 = vadd.xlane.f32.xlu0 %v1566_v9  ;;  %v1539_v58 = vpop.permute.xlu0 %1538 }
 0x2d8   :  { %4348 = vmatprep.mubr.msk.bf16.mxu1 %vm5020_vm2, %v7173_v15  ;;  %4358 = vmatprep.subr.bf16.mxu1 %v7173_v15  ;;  %v1596_v61 = vsel %vm249_vm1, %v1539_v58, 0.0 }
 0x2d9   :  { %v1525_v24 = vpop.permute.xlu1 %1524  ;;  %v521_v20 = vmul.f32 %v5466_v21, %v343_v17 }
 0x2da   :  { %v1575_v27 = vsel %vm249_vm1, %v1525_v24, 0.0 }
 0x2db   :  { %1573 = vadd.xlane.f32.xlu0 %v1572_v7  ;;  %1576 = vadd.xlane.f32.xlu1 %v1575_v27  ;;  %v530_v31 = vpack.c.bf16 %v521_v20, %v520_v25  ;;  %v1687_v54 = vpop.permute.xlu0 %1686 }
 0x2dc   :  { %v1746_v14 = vsel %vm249_vm1, %v1687_v54, 0.0 }
 0x2dd   :  { %4343 = vmatmul.mubr.msk.bf16.vlgmr.msra.gmra.mrb[12].mxu0 %vm249_vm1, %v530_v31  ;;  %v1673_v38 = vpop.permute.xlu1 %1672  ;;  %v5588_v31 = vpack.c.bf16 %v5216_v55, %v5204_v47 }
 0x2de   :  { %4349 = vmatmul.mubr.msk.bf16.vlgmr.msra.gmra.mrb[28].mxu1 %vm249_vm1, %v531_v33  ;;  %v1725_v44 = vsel %vm249_vm1, %v1673_v38, 0.0  ;;  %4354 = vmatprep.mubr.msk.bf16.mxu0 %vm5020_vm2, %v7173_v15  ;;  %v5592_v33 = vpack.c.bf16 %v5184_v39, %v5176_v32  ;;  %v5604_v38 = vpack.c.bf16 %v5208_v50, %v5210_v53 }
 0x2df   :  { %1723 = vadd.xlane.f32.xlu0 %v1722_v42  ;;  %1726 = vadd.xlane.f32.xlu1 %v1725_v44  ;;  %v1693_v4 = vpop.permute.xlu0 %1692  ;;  %7212 = vst [vmem:[#allocation15_spill] sm:$0xff] %v5588_v31 }
 0x2e0   :  { %4360 = vmatprep.mubr.msk.bf16.mxu1 %vm5020_vm2, %v7173_v15  ;;  %v1755_v9 = vsel %vm249_vm1, %v1693_v4, 0.0  ;;  %7213 = vst [vmem:[#allocation16_spill] sm:$0xff] %v5592_v33  ;;  %7215 = vst [vmem:[#allocation18_spill] sm:$0xff] %v5604_v38 }
 0x2e1   :  { %v1675_v21 = vpop.permute.xlu1 %1674 }
 0x2e2   :  { %v1728_v46 = vsel %vm249_vm1, %v1675_v21, 0.0 }
 0x2e3   :  { %1732 = vadd.xlane.f32.xlu1 %v1731_v45  ;;  %1729 = vadd.xlane.f32.xlu0 %v1728_v46  ;;  %v1545_v16 = vpop.permute.xlu0 %1544 }
 0x2e4   :  { %v1605_v6 = vsel %vm249_vm1, %v1545_v16, 0.0 }
 0x2e5   :  { %v1527_v11 = vpop.permute.xlu1 %1526 }
 0x2e6   :  { %v1578_v48 = vsel %vm249_vm1, %v1527_v11, 0.0 }
 0x2e7   :  { %1582 = vadd.xlane.f32.xlu1 %v1581_v22  ;;  %1579 = vadd.xlane.f32.xlu0 %v1578_v48  ;;  %v1547_v25 = vpop.permute.xlu0 %1546  ;;  %v5630_v48 = vld [vmem:[%s7158_s1 + $0x8] sm:$0xff] }
 0x2e8   :  { %v1608_v7 = vsel %vm249_vm1, %v1547_v25, 0.0 }
 0x2e9   :  { %v1533_v43 = vpop.permute.xlu1 %1532 }
 0x2ea   :  { %v1587_v40 = vsel %vm249_vm1, %v1533_v43, 0.0 }
 0x2eb   :  { %1585 = vadd.xlane.f32.xlu0 %v1584_v37  ;;  %1588 = vadd.xlane.f32.xlu1 %v1587_v40 }
 0x2ed   :  { %v1681_v52 = vpop.permute.xlu1 %1680 }
 0x2ee   :  { %v1737_v41 = vsel %vm249_vm1, %v1681_v52, 0.0 }
 0x2ef   :  { %1735 = vadd.xlane.f32.xlu0 %v1734_v56  ;;  %1738 = vadd.xlane.f32.xlu1 %v1737_v41 }
 0x2f1   :  { %v1683_v26 = vpop.permute.xlu1 %1682 }
 0x2f2   :  { %v1740_v18 = vsel %vm249_vm1, %v1683_v26, 0.0 }
 0x2f3   :  { %1744 = vadd.xlane.f32.xlu1 %v1743_v13  ;;  %1741 = vadd.xlane.f32.xlu0 %v1740_v18 }
 0x2f5   :  { %v1535_v60 = vpop.permute.xlu1 %1534 }
 0x2f6   :  { %v1590_v51 = vsel %vm249_vm1, %v1535_v60, 0.0 }
 0x2f7   :  { %1594 = vadd.xlane.f32.xlu1 %v1593_v0  ;;  %1591 = vadd.xlane.f32.xlu0 %v1590_v51 }
 0x2f9   :  { %v1541_v3 = vpop.permute.xlu1 %1540 }
 0x2fa   :  { %v1599_v12 = vsel %vm249_vm1, %v1541_v3, 0.0 }
 0x2fb   :  { %1597 = vadd.xlane.f32.xlu0 %v1596_v61  ;;  %1600 = vadd.xlane.f32.xlu1 %v1599_v12 }
 0x2fd   :  { %v1689_v23 = vpop.permute.xlu1 %1688 }
 0x2fe   :  { %v1749_v10 = vsel %vm249_vm1, %v1689_v23, 0.0 }
 0x2ff   :  { %1747 = vadd.xlane.f32.xlu0 %v1746_v14  ;;  %1750 = vadd.xlane.f32.xlu1 %v1749_v10 }
 0x301   :  { %v1691_v19 = vpop.permute.xlu1 %1690 }
 0x302   :  { %v1752_v30 = vsel %vm249_vm1, %v1691_v19, 0.0 }
 0x303   :  { %1756 = vadd.xlane.f32.xlu1 %v1755_v9  ;;  %1753 = vadd.xlane.f32.xlu0 %v1752_v30 }
 0x305   :  { %v1543_v17 = vpop.permute.xlu1 %1542 }
 0x306   :  { %v1602_v24 = vsel %vm249_vm1, %v1543_v17, 0.0 }
 0x307   :  { %1606 = vadd.xlane.f32.xlu1 %v1605_v6  ;;  %1603 = vadd.xlane.f32.xlu0 %v1602_v24 }
 0x309   :  { %v1549_v20 = vpop.permute.xlu1 %1548 }
 0x30a   :  { %v1611_v27 = vsel %vm249_vm1, %v1549_v20, 0.0 }
 0x30b   :  { %1609 = vadd.xlane.f32.xlu0 %v1608_v7  ;;  %1612 = vadd.xlane.f32.xlu1 %v1611_v27 }
 0x31c   :  { %1183 = vrot.lane.b32.xlu1 %v5582_v28, %s5023_s29 }
 0x320   :  { %1231 = vrot.lane.b32.xlu1 %v5588_v31, %s5023_s29  ;;  %v7221_v31 = vmov 0.0  }
 0x321   :  { %1135 = vrot.lane.b32.xlu0 %v5592_v33, %s5023_s29 }
 0x324   :  { %1327 = vrot.lane.b32.xlu1 %v5600_v36, %s5023_s29 }
 0x325   :  { %1279 = vrot.lane.b32.xlu0 %v5604_v38, %s5023_s29 }
 0x336   :  { %v5612_v44 = vpop.xlane.xlu0 %1711 }
 0x33a   :  { %v5610_v42 = vpop.xlane.xlu1 %1714 }
 0x33e   :  { %v5614_v21 = vpop.xlane.xlu1 %1720 }
 0x342   :  { %v5625_v11 = vpop.xlane.xlu1 %1570 }
 0x360   :  { %v5616_v45 = vpop.xlane.xlu0 %1717 }
 0x364   :  { %v5618_v46 = vpop.xlane.xlu0 %1567 }
 0x366   :  { %v593_v22 = vpop.f32.mrb[8].mxu1 }
 0x367   :  { %v5633_v49 = vadd.f32 %v593_v22, %v5623_v34  ;;  %v4308_v43 = vpop.f32.mrb[9].mxu1 }
 0x368   :  { %v596_v37 = vpop.f32.mrb[10].mxu1  ;;  %v5635_v40 = vpop.xlane.xlu0 %1573 }
 0x369   :  { %v5638_v52 = vadd.f32 %v596_v37, %v5630_v48  ;;  %v5640_v56 = vpop.xlane.xlu1 %1576  ;;  %v4309_v41 = vpop.f32.mrb[11].mxu1  ;;  %v950_v58 = vsel %vm249_vm1, %v5633_v49, -inf }
 0x36a   :  { %951 = vmax.xlane.f32.xlu1 %v950_v58 }
 0x36b   :  { %v953_v26 = vsel %vm249_vm1, %v5638_v52, -inf }
 0x36c   :  { %v5646_v13 = vpop.xlane.xlu0 %1723  ;;  %954 = vmax.xlane.f32.xlu0 %v953_v26 }
 0x36d   :  { %v5648_v18 = vpop.xlane.xlu1 %1726 }
 0x36e   :  { %v643_v54 = vpop.f32.mrb[12].mxu1 }
 0x36f   :  { %v4314_v60 = vpop.f32.mrb[13].mxu1  ;;  %v5662_v17 = vadd.f32 %v643_v54, %v5623_v34 }
 0x370   :  { %v646_v0 = vpop.f32.mrb[14].mxu1  ;;  %v5650_v51 = vpop.xlane.xlu0 %1729 }
 0x371   :  { %v5652_v3 = vpop.xlane.xlu1 %1732  ;;  %v4315_v61 = vpop.f32.mrb[15].mxu1  ;;  %v5674_v22 = vadd.f32 %v646_v0, %v5630_v48  ;;  %v956_v58 = vsel %vm249_vm1, %v5662_v17, -inf }
 0x373   :  { %v959_v60 = vsel %vm249_vm1, %v5674_v22, -inf }
 0x374   :  { %v5654_v12 = vpop.xlane.xlu0 %1579 }
 0x375   :  { %v5656_v4 = vpop.xlane.xlu1 %1582 }
 0x376   :  { %v693_v23 = vpop.f32.mrb[16].mxu1  ;;  %v793_v14 = vpop.f32.mrb[8].mxu0 }
 0x377   :  { %v5659_v10 = vadd.f32 %v793_v14, %v5623_v34  ;;  %v4320_v16 = vpop.f32.mrb[17].mxu1  ;;  %v4332_v19 = vpop.f32.mrb[9].mxu0 }
 0x378   :  { %v696_v9 = vpop.f32.mrb[18].mxu1  ;;  %v796_v30 = vpop.f32.mrb[10].mxu0 }
 0x379   :  { %v5665_v6 = vadd.f32 %v796_v30, %v5630_v48  ;;  %v5667_v24 = vpop.xlane.xlu0 %1585  ;;  %v5669_v25 = vpop.xlane.xlu1 %1588  ;;  %v974_v20 = vsel %vm249_vm1, %v5659_v10, -inf }
 0x37a   :  { %v4321_v7 = vpop.f32.mrb[19].mxu1  ;;  %v4333_v27 = vpop.f32.mrb[11].mxu0  ;;  %975 = vmax.xlane.f32.xlu1 %v974_v20 }
 0x37b   :  { %v977_v43 = vsel %vm249_vm1, %v5665_v6, -inf }
 0x37c   :  { %978 = vmax.xlane.f32.xlu0 %v977_v43 }
 0x37d   :  { %v5678_v37 = vpop.xlane.xlu0 %1735  ;;  %v5680_v41 = vpop.xlane.xlu1 %1738 }
 0x37e   :  { %v743_v26 = vpop.f32.mrb[20].mxu1  ;;  %957 = vmax.xlane.f32.xlu1 %v956_v58 }
 0x37f   :  { %v4326_v54 = vpop.f32.mrb[21].mxu1 }
 0x380   :  { %v746_v61 = vpop.f32.mrb[22].mxu1  ;;  %960 = vmax.xlane.f32.xlu0 %v959_v60 }
 0x381   :  { %v5686_v0 = vpop.xlane.xlu0 %1741  ;;  %v5688_v14 = vpop.xlane.xlu1 %1744 }
 0x382   :  { %v4327_v16 = vpop.f32.mrb[23].mxu1 }
 0x385   :  { %v5690_v19 = vpop.xlane.xlu0 %1591  ;;  %v5692_v30 = vpop.xlane.xlu1 %1594 }
 0x389   :  { %v5694_v20 = vpop.xlane.xlu0 %1597  ;;  %v5696_v7 = vpop.xlane.xlu1 %1600 }
 0x38d   :  { %v5698_v27 = vpop.xlane.xlu0 %1747  ;;  %v5700_v43 = vpop.xlane.xlu1 %1750 }
 0x38e   :  { %7216 = vst [vmem:[#allocation19_spill] sm:$0xff] %v5700_v43  ;;  %v5720_v43 = vadd.f32 %v693_v23, %v5623_v34  ;;  %v5738_v23 = vadd.f32 %v746_v61, %v5630_v48 }
 0x391   :  { %v5702_v58 = vpop.xlane.xlu0 %1753  ;;  %v5704_v54 = vpop.xlane.xlu1 %1756 }
 0x392   :  { %7217 = vst [vmem:[#allocation20_spill] sm:$0xff] %v5702_v58  ;;  %7218 = vst [vmem:[#allocation21_spill] sm:$0xff] %v5704_v54 }
 0x395   :  { %v5706_v60 = vpop.xlane.xlu0 %1603  ;;  %v5708_v15 = vpop.xlane.xlu1 %1606 }
 0x399   :  { %v5710_v16 = vpop.xlane.xlu0 %1609  ;;  %v5712_v38 = vpop.xlane.xlu1 %1612 }
 0x39a   :  { %7219 = vst [vmem:[#allocation22_spill] sm:$0xff] %v5710_v16  ;;  %7220 = vst [vmem:[#allocation23_spill] sm:$0xff] %v5712_v38 }
 0x39d   :  { %v1136_v36 = vpop.permute.xlu0 %1135  ;;  %v1184_v33 = vpop.permute.xlu1 %1183 }
 0x39e   :  { %4353 = vmatpush3.bf16.msra.mxu0 %v1136_v36  ;;  %4359 = vmatpush3.bf16.msra.mxu1 %v1184_v33 }
 0x39f   :  { %4364 = vmatprep.subr.bf16.mxu0 %v7221_v31  ;;  %4370 = vmatprep.subr.bf16.mxu1 %v7221_v31 }
 0x3a9   :  { %v843_v28 = vpop.f32.mrb[24].mxu1 }
 0x3aa   :  { %v4338_v59 = vpop.f32.mrb[25].mxu1 }
 0x3ab   :  { %v846_v57 = vpop.f32.mrb[26].mxu1 }
 0x3ac   :  { %v4339_v50 = vpop.f32.mrb[27].mxu1 }
 0x3b0   :  { %v893_v53 = vpop.f32.mrb[12].mxu0 }
 0x3b1   :  { %v5717_v54 = vadd.f32 %v893_v53, %v5623_v34  ;;  %v4344_v58 = vpop.f32.mrb[13].mxu0  ;;  %v943_v16 = vpop.f32.mrb[28].mxu1  ;;  %v5728_v53 = vadd.f32 %v696_v9, %v5630_v48  ;;  %v5743_v9 = vadd.f32 %v843_v28, %v5623_v34 }
 0x3b2   :  { %v896_v55 = vpop.f32.mrb[14].mxu0  ;;  %v4350_v38 = vpop.f32.mrb[29].mxu1  ;;  %v5753_v61 = vadd.f32 %v943_v16, %v5623_v34 }
 0x3b3   :  { %v5723_v33 = vadd.f32 %v896_v55, %v5630_v48  ;;  %v4345_v36 = vpop.f32.mrb[15].mxu0  ;;  %v946_v31 = vpop.f32.mrb[30].mxu1  ;;  %v986_v59 = vsel %vm249_vm1, %v5717_v54, -inf  ;;  %v5733_v38 = vadd.f32 %v743_v26, %v5623_v34  ;;  %v962_v55 = vsel %vm249_vm1, %v5720_v43, -inf }
 0x3b4   :  { %v4351_v50 = vpop.f32.mrb[31].mxu1  ;;  %987 = vmax.xlane.f32.xlu1 %v986_v59  ;;  %v965_v36 = vsel %vm249_vm1, %v5728_v53, -inf  ;;  %v5748_v26 = vadd.f32 %v846_v57, %v5630_v48  ;;  %v5758_v28 = vadd.f32 %v946_v31, %v5630_v48  ;;  %v992_v57 = vsel %vm249_vm1, %v5753_v61, -inf  ;;  %v5778_v48 = vpop.permute.xlu1 %1231 }
 0x3b5   :  { %v989_v58 = vsel %vm249_vm1, %v5723_v33, -inf  ;;  %v968_v59 = vsel %vm249_vm1, %v5733_v38, -inf  ;;  %v971_v50 = vsel %vm249_vm1, %v5738_v23, -inf  ;;  %v5768_v34 = vpack.c.bf16 %v5284_v8, %v5256_v1 }
 0x3b6   :  { %990 = vmax.xlane.f32.xlu0 %v989_v58  ;;  %v980_v58 = vsel %vm249_vm1, %v5743_v9, -inf  ;;  %v5774_v31 = vpack.c.bf16 %v5248_v63, %v5246_v62 }
 0x3b7   :  { %7222 = vst [vmem:[#allocation24_spill] sm:$0xff] %v5768_v34 }
 0x3b8   :  { %963 = vmax.xlane.f32.xlu1 %v962_v55  ;;  %v983_v55 = vsel %vm249_vm1, %v5748_v26, -inf  ;;  %7223 = vst [vmem:[#allocation25_spill] sm:$0xff] %v5774_v31  ;;  %v5780_v16 = vpop.permute.xlu1 %1327 }
 0x3b9   :  { %7224 = vst [vmem:[#allocation26_spill] sm:$0xff] %v5780_v16 }
 0x3ba   :  { %966 = vmax.xlane.f32.xlu0 %v965_v36  ;;  %v995_v36 = vsel %vm249_vm1, %v5758_v28, -inf }
 0x3bc   :  { %969 = vmax.xlane.f32.xlu1 %v968_v59  ;;  %v5782_v59 = vpop.permute.xlu0 %1279 }
 0x3bd   :  { %7225 = vst [vmem:[#allocation27_spill] sm:$0xff] %v5782_v59 }
 0x3be   :  { %972 = vmax.xlane.f32.xlu0 %v971_v50 }
 0x3c0   :  { %981 = vmax.xlane.f32.xlu1 %v980_v58 }
 0x3c2   :  { %984 = vmax.xlane.f32.xlu0 %v983_v55 }
 0x3c4   :  { %993 = vmax.xlane.f32.xlu1 %v992_v57 }
 0x3c6   :  { %996 = vmax.xlane.f32.xlu0 %v995_v36 }
 0x3d5   :  { %1423 = vrot.lane.b32.xlu1 %v5768_v34, %s5023_s29 }
 0x3dc   :  { %1375 = vrot.lane.b32.xlu0 %v5774_v31, %s5023_s29 }
 0x3f7   :  { %v952_v50 = vpop.xlane.xlu1 %951 }
 0x3f8   :  { %v998_v58 = vsub.f32 %v5633_v49, %v952_v50 }
 0x3f9   :  { %v955_v55 = vpop.xlane.xlu0 %954 }
 0x3fa   :  { %v1014_v57 = vmul.f32 1.442695, %v998_v58  ;;  %v999_v36 = vsub.f32 %v5638_v52, %v955_v55 }
 0x3fc   :  { %4699 = vpow2.f32 %v1014_v57  ;;  %v1016_v34 = vmul.f32 1.442695, %v999_v36 }
 0x3fe   :  { %4701 = vpow2.f32 %v1016_v34 }
 0x406   :  { %v5786_v8 = vpop.eup %4699 }
 0x407   :  { %v976_v1 = vpop.xlane.xlu1 %975  ;;  %v1046_v31 = vsel %vm249_vm1, %v5786_v8, 0.0 }
 0x408   :  { %v5790_v63 = vpop.eup %4701  ;;  %v1006_v16 = vsub.f32 %v5659_v10, %v976_v1  ;;  %1047 = vadd.xlane.f32.xlu0 %v1046_v31 }
 0x409   :  { %v979_v59 = vpop.xlane.xlu0 %978  ;;  %v1049_v49 = vsel %vm249_vm1, %v5790_v63, 0.0 }
 0x40a   :  { %v1030_v50 = vmul.f32 1.442695, %v1006_v16  ;;  %v1007_v52 = vsub.f32 %v5665_v6, %v979_v59  ;;  %1050 = vadd.xlane.f32.xlu1 %v1049_v49 }
 0x40b   :  { %v958_v34 = vpop.xlane.xlu1 %957 }
 0x40c   :  { %4703 = vpow2.f32 %v1030_v50  ;;  %v1032_v58 = vmul.f32 1.442695, %v1007_v52  ;;  %v1000_v55 = vsub.f32 %v5662_v17, %v958_v34 }
 0x40d   :  { %v961_v57 = vpop.xlane.xlu0 %960 }
 0x40e   :  { %4705 = vpow2.f32 %v1032_v58  ;;  %v1018_v36 = vmul.f32 1.442695, %v1000_v55  ;;  %v1001_v62 = vsub.f32 %v5674_v22, %v961_v57 }
 0x410   :  { %4707 = vpow2.f32 %v1018_v36  ;;  %v1020_v1 = vmul.f32 1.442695, %v1001_v62 }
 0x412   :  { %4709 = vpow2.f32 %v1020_v1 }
 0x416   :  { %v5798_v10 = vpop.eup %4703 }
 0x417   :  { %7226 = vst [vmem:[#allocation28_spill] sm:$0xff] %v5798_v10  ;;  %v1070_v31 = vsel %vm249_vm1, %v5798_v10, 0.0 }
 0x418   :  { %v5802_v6 = vpop.eup %4705  ;;  %1071 = vadd.xlane.f32.xlu0 %v1070_v31 }
 0x419   :  { %v1073_v16 = vsel %vm249_vm1, %v5802_v6, 0.0 }
 0x41a   :  { %v5806_v17 = vpop.eup %4707  ;;  %1074 = vadd.xlane.f32.xlu1 %v1073_v16 }
 0x41b   :  { %v1052_v22 = vsel %vm249_vm1, %v5806_v17, 0.0 }
 0x41c   :  { %v5810_v59 = vpop.eup %4709  ;;  %1053 = vadd.xlane.f32.xlu0 %v1052_v22 }
 0x41d   :  { %v1055_v62 = vsel %vm249_vm1, %v5810_v59, 0.0 }
 0x41e   :  { %1056 = vadd.xlane.f32.xlu1 %v1055_v62 }
 0x441   :  { %v988_v49 = vpop.xlane.xlu1 %987 }
 0x442   :  { %v1010_v50 = vsub.f32 %v5717_v54, %v988_v49 }
 0x443   :  { %v991_v52 = vpop.xlane.xlu0 %990 }
 0x444   :  { %v1038_v34 = vmul.f32 1.442695, %v1010_v50  ;;  %v1011_v58 = vsub.f32 %v5723_v33, %v991_v52 }
 0x445   :  { %v964_v55 = vpop.xlane.xlu1 %963 }
 0x446   :  { %4711 = vpow2.f32 %v1038_v34  ;;  %v1040_v57 = vmul.f32 1.442695, %v1011_v58  ;;  %v1002_v36 = vsub.f32 %v5720_v43, %v964_v55 }
 0x447   :  { %v967_v1 = vpop.xlane.xlu0 %966 }
 0x448   :  { %4713 = vpow2.f32 %v1040_v57  ;;  %v1022_v31 = vmul.f32 1.442695, %v1002_v36  ;;  %v1003_v16 = vsub.f32 %v5728_v53, %v967_v1 }
 0x449   :  { %v970_v22 = vpop.xlane.xlu1 %969 }
 0x44a   :  { %4715 = vpow2.f32 %v1022_v31  ;;  %v1024_v62 = vmul.f32 1.442695, %v1003_v16  ;;  %v1004_v10 = vsub.f32 %v5733_v38, %v970_v22 }
 0x44b   :  { %v973_v54 = vpop.xlane.xlu0 %972 }
 0x44c   :  { %4717 = vpow2.f32 %v1024_v62  ;;  %v1026_v49 = vmul.f32 1.442695, %v1004_v10  ;;  %v1005_v33 = vsub.f32 %v5738_v23, %v973_v54  ;;  %v1759_v62 = vmax.f32 %v5610_v42, 1e-24 }
 0x44d   :  { %v982_v50 = vpop.xlane.xlu1 %981 }
 0x44e   :  { %4719 = vpow2.f32 %v1026_v49  ;;  %v1028_v52 = vmul.f32 1.442695, %v1005_v33  ;;  %v1008_v43 = vsub.f32 %v5743_v9, %v982_v50  ;;  %v1758_v33 = vmax.f32 %v5612_v44, 1e-24 }
 0x44f   :  { %v985_v34 = vpop.xlane.xlu0 %984 }
 0x450   :  { %v5821_v58 = vpop.eup %4711  ;;  %4721 = vpow2.f32 %v1028_v52  ;;  %v1034_v53 = vmul.f32 1.442695, %v1008_v43  ;;  %v1009_v55 = vsub.f32 %v5748_v26, %v985_v34 }
 0x451   :  { %v1082_v38 = vsel %vm249_vm1, %v5821_v58, 0.0 }
 0x452   :  { %v5826_v57 = vpop.eup %4713  ;;  %4723 = vpow2.f32 %v1034_v53  ;;  %v1036_v10 = vmul.f32 1.442695, %v1009_v55  ;;  %1083 = vadd.xlane.f32.xlu0 %v1082_v38  ;;  %v5861_v38 = vpack.c.bf16 %v5260_v2, %v5272_v5 }
 0x453   :  { %v1085_v23 = vsel %vm249_vm1, %v5826_v57, 0.0 }
 0x454   :  { %v5830_v36 = vpop.eup %4715  ;;  %4725 = vpow2.f32 %v1036_v10  ;;  %1086 = vadd.xlane.f32.xlu1 %v1085_v23  ;;  %v994_v10 = vpop.xlane.xlu1 %993 }
 0x455   :  { %v1058_v9 = vsel %vm249_vm1, %v5830_v36, 0.0  ;;  %4727 = vrsqrt.f32 %v1759_v62  ;;  %v997_v23 = vpop.xlane.xlu0 %996 }
 0x456   :  { %v5834_v1 = vpop.eup %4717  ;;  %1059 = vadd.xlane.f32.xlu0 %v1058_v9  ;;  %4729 = vrsqrt.f32 %v1758_v33  ;;  %v1012_v9 = vsub.f32 %v5753_v61, %v994_v10  ;;  %v1615_v33 = vmax.f32 %v5625_v11, 1e-24  ;;  %v1760_v61 = vmax.f32 %v5616_v45, 1e-24 }
 0x457   :  { %v1061_v26 = vsel %vm249_vm1, %v5834_v1, 0.0  ;;  %v1619_v45 = vmax.f32 %v5656_v4, 1e-24  ;;  %v1621_v4 = vmax.f32 %v5669_v25, 1e-24 }
 0x458   :  { %v5838_v31 = vpop.eup %4719  ;;  %1062 = vadd.xlane.f32.xlu1 %v1061_v26  ;;  %v1013_v26 = vsub.f32 %v5758_v28, %v997_v23  ;;  %v1762_v28 = vmax.f32 %v5646_v13, 1e-24  ;;  %v1767_v25 = vmax.f32 %v5680_v41, 1e-24 }
 0x459   :  { %v1064_v16 = vsel %vm249_vm1, %v5838_v31, 0.0  ;;  %v5880_v11 = vpop.permute.xlu0 %1375 }
 0x45a   :  { %v5842_v22 = vpop.eup %4721  ;;  %1065 = vadd.xlane.f32.xlu0 %v1064_v16  ;;  %v1042_v16 = vmul.f32 1.442695, %v1012_v9  ;;  %v1044_v62 = vmul.f32 1.442695, %v1013_v26  ;;  %v1765_v9 = vmax.f32 %v5652_v3, 1e-24 }
 0x45b   :  { %v1067_v54 = vsel %vm249_vm1, %v5842_v22, 0.0 }
 0x45c   :  { %v5847_v49 = vpop.eup %4723  ;;  %1068 = vadd.xlane.f32.xlu1 %v1067_v54  ;;  %4731 = vpow2.f32 %v1042_v16  ;;  %v1761_v54 = vmax.f32 %v5614_v21, 1e-24  ;;  %v1763_v21 = vmax.f32 %v5648_v18, 1e-24  ;;  %v1764_v18 = vmax.f32 %v5650_v51, 1e-24 }
 0x45d   :  { %v1076_v50 = vsel %vm249_vm1, %v5847_v49, 0.0  ;;  %4733 = vpow2.f32 %v1044_v62  ;;  %v1622_v51 = vmax.f32 %v5690_v19, 1e-24  ;;  %v1623_v62 = vmax.f32 %v5692_v30, 1e-24 }
 0x45e   :  { %v5852_v52 = vpop.eup %4725  ;;  %1077 = vadd.xlane.f32.xlu0 %v1076_v50  ;;  %v1614_v50 = vmax.f32 %v5618_v46, 1e-24  ;;  %4735 = vrsqrt.f32 %v1761_v54  ;;  %v1618_v46 = vmax.f32 %v5654_v12, 1e-24  ;;  %v5900_v19 = vstv %s4120_s2 }
 0x45f   :  { %v1079_v43 = vsel %vm249_vm1, %v5852_v52, 0.0  ;;  %v4728_v42 = vpop.eup %4727  ;;  %4737 = vrsqrt.f32 %v1615_v33 }
 0x460   :  { %1080 = vadd.xlane.f32.xlu1 %v1079_v43  ;;  %v4730_v34 = vpop.eup %4729  ;;  %v1791_v53 = vmul.f32 %v4728_v42, %v5184_v39  ;;  %v1616_v43 = vmax.f32 %v5635_v40, 1e-24  ;;  %v1617_v42 = vmax.f32 %v5640_v56, 1e-24  ;;  %4739 = vrsqrt.f32 %v1614_v50  ;;  %v5885_v56 = vpop.permute.xlu1 %1423 }
 0x461   :  { %v1790_v55 = vmul.f32 %v4730_v34, %v5176_v32 }
 0x462   :  { %4741 = vrsqrt.f32 %v1616_v43 }
 0x463   :  { %v1832_v44 = vpack.c.bf16 %v1791_v53, %v1790_v55  ;;  %4743 = vrsqrt.f32 %v1617_v42  ;;  %v1620_v55 = vmax.f32 %v5667_v24, 1e-24  ;;  %v1766_v24 = vmax.f32 %v5678_v37, 1e-24 }
 0x464   :  { %4745 = vrsqrt.f32 %v1760_v61  ;;  %v1768_v42 = vmax.f32 %v5686_v0, 1e-24  ;;  %v1624_v37 = vmax.f32 %v5694_v20, 1e-24  ;;  %v1769_v0 = vmax.f32 %v5688_v14, 1e-24 }
 0x465   :  { %4747 = vrsqrt.f32 %v1762_v28  ;;  %v1770_v20 = vmax.f32 %v5698_v27, 1e-24 }
 0x466   :  { %v5873_v34 = vpop.eup %4731  ;;  %4749 = vrsqrt.f32 %v1763_v21 }
 0x467   :  { %v5877_v53 = vpop.eup %4733  ;;  %v1088_v40 = vsel %vm249_vm1, %v5873_v34, 0.0  ;;  %4751 = vrsqrt.f32 %v1618_v46 }
 0x468   :  { %v1091_v13 = vsel %vm249_vm1, %v5877_v53, 0.0 }
 0x471   :  { %1847 = vrot.lane.b32.xlu1 %v1832_v44, %s5021_s6  ;;  %v4736_v44 = vpop.eup %4735 }
 0x472   :  { %v4738_v23 = vpop.eup %4737 }
 0x473   :  { %v4740_v26 = vpop.eup %4739  ;;  %v1647_v3 = vmul.f32 %v4738_v23, %v5184_v39  ;;  %v1793_v39 = vmul.f32 %v4736_v44, %v5178_v35  ;;  %v1627_v44 = vmax.f32 %v5708_v15, 1e-24 }
 0x474   :  { %1471 = vrot.lane.b32.xlu0 %v5861_v38, %s5023_s29  ;;  %v4742_v16 = vpop.eup %4741  ;;  %v1646_v50 = vmul.f32 %v4740_v26, %v5176_v32  ;;  %v1625_v32 = vmax.f32 %v5696_v7, 1e-24  ;;  %v7228_v26 = vld [vmem:[#allocation7_spill] sm:$0xff] }
 0x475   :  { %v4744_v54 = vpop.eup %4743  ;;  %v1648_v30 = vmul.f32 %v4742_v16, %v5174_v29  ;;  %v7229_v16 = vld [vmem:[#allocation20_spill] sm:$0xff] }
 0x476   :  { %v4746_v33 = vpop.eup %4745  ;;  %v1649_v28 = vmul.f32 %v4744_v54, %v5178_v35  ;;  %v1808_v46 = vmul.f32 %v5900_v19, %v1646_v50  ;;  %v1626_v35 = vmax.f32 %v5706_v60, 1e-24  ;;  %v7230_v50 = vld [vmem:[#allocation21_spill] sm:$0xff] }
 0x477   :  { %v4748_v43 = vpop.eup %4747 }
 0x478   :  { %v4750_v61 = vpop.eup %4749  ;;  %v1811_v7 = vmul.f32 %v5900_v19, %v1649_v28 }
 0x479   :  { %v4752_v21 = vpop.eup %4751  ;;  %v1795_v15 = vmul.f32 %v4750_v61, %v7228_v26  ;;  %v7232_v61 = vld [vmem:[#allocation5_spill] sm:$0xff] }
 0x47a   :  { %v1650_v14 = vmul.f32 %v4752_v21, %v5204_v47 }
 0x493   :  { %1089 = vadd.xlane.f32.xlu0 %v1088_v40  ;;  %v1809_v40 = vmul.f32 %v5900_v19, %v1647_v3  ;;  %v1773_v3 = vmax.f32 %v7230_v50, 1e-24  ;;  %v7239_v50 = vld [vmem:[#allocation11_spill] sm:$0xff] }
 0x495   :  { %1092 = vadd.xlane.f32.xlu1 %v1091_v13  ;;  %v1048_v12 = vpop.xlane.xlu0 %1047  ;;  %v1792_v13 = vmul.f32 %v4746_v33, %v5174_v29  ;;  %v7227_v29 = vld [vmem:[#allocation19_spill] sm:$0xff] }
 0x496   :  { %4753 = vrcp.f32 %v1048_v12  ;;  %v1771_v23 = vmax.f32 %v7227_v29, 1e-24 }
 0x497   :  { %4755 = vrsqrt.f32 %v1619_v45  ;;  %v1051_v10 = vpop.xlane.xlu1 %1050 }
 0x498   :  { %4757 = vrcp.f32 %v1051_v10 }
 0x499   :  { %4759 = vrsqrt.f32 %v1764_v18  ;;  %v1810_v18 = vmul.f32 %v5900_v19, %v1648_v30 }
 0x49a   :  { %4761 = vrsqrt.f32 %v1620_v55 }
 0x49b   :  { %4763 = vrsqrt.f32 %v1621_v4  ;;  %v1825_v30 = vpack.c.bf16 %v1811_v7, %v1810_v18 }
 0x49c   :  { %4765 = vrsqrt.f32 %v1765_v9  ;;  %v1824_v9 = vpack.c.bf16 %v1809_v40, %v1808_v46 }
 0x49d   :  { %4767 = vrsqrt.f32 %v1622_v51 }
 0x49e   :  { %4769 = vrsqrt.f32 %v1623_v62  ;;  %v1772_v62 = vmax.f32 %v7229_v16, 1e-24 }
 0x49f   :  { %4771 = vrsqrt.f32 %v1766_v24 }
 0x4a0   :  { %v4754_v41 = vpop.eup %4753  ;;  %4773 = vrsqrt.f32 %v1767_v25 }
 0x4a1   :  { %v4756_v45 = vpop.eup %4755  ;;  %4775 = vrsqrt.f32 %v1768_v42  ;;  %v1110_v4 = vmul.f32 %v4754_v41, %v5786_v8  ;;  %v1833_v8 = vpack.c.bf16 %v1793_v39, %v1792_v13  ;;  %v7233_v39 = vmov 0.0  }
 0x4a2   :  { %v4758_v12 = vpop.eup %4757  ;;  %4777 = vrsqrt.f32 %v1624_v37  ;;  %v1651_v51 = vmul.f32 %v4756_v45, %v7228_v26  ;;  %v1812_v37 = vmul.f32 %v5900_v19, %v1650_v14  ;;  %v7236_v14 = vld [vmem:[#allocation8_spill] sm:$0xff] }
 0x4a3   :  { %v4760_v55 = vpop.eup %4759  ;;  %4779 = vrsqrt.f32 %v1625_v32  ;;  %v1111_v27 = vmul.f32 %v4758_v12, %v5790_v63  ;;  %v1794_v63 = vmul.f32 %v4748_v43, %v5204_v47  ;;  %v7231_v47 = vld [vmem:[#allocation6_spill] sm:$0xff] }
 0x4a4   :  { %v4762_v10 = vpop.eup %4761  ;;  %4781 = vrsqrt.f32 %v1769_v0  ;;  %v1813_v21 = vmul.f32 %v5900_v19, %v1651_v51  ;;  %v7234_v0 = vld [vmem:[#allocation22_spill] sm:$0xff]  ;;  %v1796_v13 = vmul.f32 %v4760_v55, %v7231_v47 }
 0x4a5   :  { %v4764_v60 = vpop.eup %4763  ;;  %4783 = vrsqrt.f32 %v1770_v20  ;;  %v5922_v54 = vpop.xlane.xlu0 %1071  ;;  %v1126_v24 = vpack.c.bf16 %v1111_v27, %v1110_v4  ;;  %v1652_v43 = vmul.f32 %v4762_v10, %v7231_v47  ;;  %v1628_v46 = vmax.f32 %v7234_v0, 1e-24  ;;  %v7237_v4 = vld [vmem:[#allocation9_spill] sm:$0xff] }
 0x4a6   :  { %v4766_v33 = vpop.eup %4765  ;;  %4785 = vrsqrt.f32 %v1626_v35  ;;  %1844 = vrot.lane.b32.xlu1 %v1824_v9, %s5022_s27  ;;  %v1653_v32 = vmul.f32 %v4764_v60, %v7232_v61  ;;  %v1834_v7 = vpack.c.bf16 %v1795_v15, %v1794_v63  ;;  %v1826_v29 = vpack.c.bf16 %v1813_v21, %v1812_v37  ;;  %v7238_v15 = vld [vmem:[#allocation10_spill] sm:$0xff] }
 0x4a7   :  { %v4768_v25 = vpop.eup %4767  ;;  %4787 = vrsqrt.f32 %v1627_v44  ;;  %4355 = vmatmul.mubr.msk.bf16.vlgmr.msra.gmra.mrb[16].mxu0 %vm249_vm1, %v1126_v24  ;;  %v5929_v42 = vpop.xlane.xlu1 %1074  ;;  %v1797_v18 = vmul.f32 %v4766_v33, %v7232_v61 }
 0x4a8   :  { %v4770_v28 = vpop.eup %4769  ;;  %4789 = vrsqrt.f32 %v1771_v23  ;;  %4365 = vmatpush3.bf16.msra.mxu0 %v5778_v48  ;;  %4366 = vmatprep.mubr.msk.bf16.mxu0 %vm5020_vm2, %v7233_v39  ;;  %v7235_v48 = vld [vmem:[#allocation23_spill] sm:$0xff]  ;;  %v1654_v44 = vmul.f32 %v4768_v25, %v7236_v14  ;;  %v1814_v23 = vmul.f32 %v5900_v19, %v1652_v43  ;;  %v1815_v9 = vmul.f32 %v5900_v19, %v1653_v32 }
 0x4a9   :  { %v4772_v41 = vpop.eup %4771  ;;  %4791 = vrsqrt.f32 %v1772_v62  ;;  %v1054_v40 = vpop.xlane.xlu0 %1053  ;;  %1900 = vrot.lane.b32.xlu0 %v1833_v8, %s5021_s6  ;;  %4376 = vmatprep.subr.bf16.mxu0 %v7233_v39  ;;  %v1629_v20 = vmax.f32 %v7235_v48, 1e-24  ;;  %v1655_v27 = vmul.f32 %v4770_v28, %v7237_v4  ;;  %v1835_v51 = vpack.c.bf16 %v1797_v18, %v1796_v13 }
 0x4aa   :  { %v4774_v45 = vpop.eup %4773  ;;  %4793 = vrcp.f32 %v1054_v40  ;;  %1897 = vrot.lane.b32.xlu1 %v1825_v30, %s5022_s27  ;;  %v1798_v16 = vmul.f32 %v4772_v41, %v7236_v14  ;;  %v1816_v24 = vmul.f32 %v5900_v19, %v1654_v44  ;;  %v1827_v63 = vpack.c.bf16 %v1815_v9, %v1814_v23 }
 0x4ab   :  { %v4776_v12 = vpop.eup %4775  ;;  %4795 = vrsqrt.f32 %v1773_v3  ;;  %v1057_v35 = vpop.xlane.xlu1 %1056  ;;  %v1799_v62 = vmul.f32 %v4774_v45, %v7237_v4  ;;  %v1817_v33 = vmul.f32 %v5900_v19, %v1655_v27  ;;  %v7241_v45 = vld [vmem:[#allocation13_spill] sm:$0xff] }
 0x4ac   :  { %v4778_v10 = vpop.eup %4777  ;;  %4797 = vrcp.f32 %v1057_v35  ;;  %v1800_v43 = vmul.f32 %v4776_v12, %v7238_v15 }
 0x4ad   :  { %v4780_v26 = vpop.eup %4779  ;;  %4799 = vrsqrt.f32 %v1628_v46  ;;  %1953 = vrot.lane.b32.xlu0 %v1834_v7, %s5021_s6  ;;  %v1656_v25 = vmul.f32 %v4778_v10, %v7238_v15  ;;  %v1836_v21 = vpack.c.bf16 %v1799_v62, %v1798_v16  ;;  %v1828_v47 = vpack.c.bf16 %v1817_v33, %v1816_v24  ;;  %v7240_v46 = vld [vmem:[#allocation12_spill] sm:$0xff]  ;;  %v7244_v33 = vld [vmem:[#allocation15_spill] sm:$0xff] }
 0x4ae   :  { %v4782_v55 = vpop.eup %4781  ;;  %4801 = vrsqrt.f32 %v1629_v20  ;;  %1950 = vrot.lane.b32.xlu1 %v1826_v29, %s5022_s27  ;;  %v1657_v3 = vmul.f32 %v4780_v26, %v7239_v50 }
 0x4af   :  { %v4784_v60 = vpop.eup %4783  ;;  %v1801_v61 = vmul.f32 %v4782_v55, %v7239_v50  ;;  %v1818_v41 = vmul.f32 %v5900_v19, %v1656_v25 }
 0x4b0   :  { %v4786_v8 = vpop.eup %4785  ;;  %v1819_v0 = vmul.f32 %v5900_v19, %v1657_v3  ;;  %v1802_v18 = vmul.f32 %v4784_v60, %v7240_v46 }
 0x4b1   :  { %v4788_v30 = vpop.eup %4787  ;;  %2006 = vrot.lane.b32.xlu0 %v1835_v51, %s5021_s6  ;;  %v1658_v40 = vmul.f32 %v4786_v8, %v7240_v46  ;;  %v1837_v44 = vpack.c.bf16 %v1801_v61, %v1800_v43  ;;  %v7242_v51 = vld [vmem:[#allocation27_spill] sm:$0xff]  ;;  %v7245_v8 = vld [vmem:[#allocation16_spill] sm:$0xff] }
 0x4b2   :  { %v4790_v37 = vpop.eup %4789  ;;  %2003 = vrot.lane.b32.xlu1 %v1827_v63, %s5022_s27  ;;  %v1659_v48 = vmul.f32 %v4788_v30, %v7241_v45  ;;  %v1829_v27 = vpack.c.bf16 %v1819_v0, %v1818_v41 }
 0x4b3   :  { %v4792_v28 = vpop.eup %4791  ;;  %v1803_v12 = vmul.f32 %v4790_v37, %v7241_v45  ;;  %v1820_v10 = vmul.f32 %v5900_v19, %v1658_v40  ;;  %v7246_v40 = vld [vmem:[#allocation26_spill] sm:$0xff] }
 0x4b4   :  { %v4794_v32 = vpop.eup %4793  ;;  %v1821_v29 = vmul.f32 %v5900_v19, %v1659_v48  ;;  %v1804_v26 = vmul.f32 %v4792_v28, %v5272_v5  ;;  %v7247_v48 = vld [vmem:[#allocation28_spill] sm:$0xff] }
 0x4b5   :  { %v4796_v20 = vpop.eup %4795  ;;  %2059 = vrot.lane.b32.xlu0 %v1836_v21, %s5021_s6  ;;  %v1112_v7 = vmul.f32 %v4794_v32, %v5806_v17  ;;  %v1838_v9 = vpack.c.bf16 %v1803_v12, %v1802_v18 }
 0x4b6   :  { %v4798_v13 = vpop.eup %4797  ;;  %2056 = vrot.lane.b32.xlu1 %v1828_v47, %s5022_s27  ;;  %v1805_v17 = vmul.f32 %v4796_v20, %v5260_v2  ;;  %v1830_v60 = vpack.c.bf16 %v1821_v29, %v1820_v10 }
 0x4b7   :  { %v4800_v35 = vpop.eup %4799  ;;  %v1113_v14 = vmul.f32 %v4798_v13, %v5810_v59 }
 0x4b8   :  { %v4802_v4 = vpop.eup %4801  ;;  %v1660_v59 = vmul.f32 %v4800_v35, %v5272_v5  ;;  %v1839_v16 = vpack.c.bf16 %v1805_v17, %v1804_v26 }
 0x4b9   :  { %2112 = vrot.lane.b32.xlu0 %v1837_v44, %s5021_s6  ;;  %v1127_v23 = vpack.c.bf16 %v1113_v14, %v1112_v7  ;;  %v1661_v55 = vmul.f32 %v4802_v4, %v5260_v2  ;;  %v7243_v2 = vld [vmem:[#allocation14_spill] sm:$0xff] }
 0x4ba   :  { %2109 = vrot.lane.b32.xlu1 %v1829_v27, %s5022_s27  ;;  %v1822_v62 = vmul.f32 %v5900_v19, %v1660_v59 }
 0x4bb   :  { %4361 = vmatmul.mubr.msk.bf16.vlgmr.msra.gmra.mrb[32].mxu1 %vm249_vm1, %v1127_v23  ;;  %v1823_v24 = vmul.f32 %v5900_v19, %v1661_v55 }
 0x4bc   :  { %4371 = vmatpush3.bf16.msra.mxu1 %v7242_v51  ;;  %4372 = vmatprep.mubr.msk.bf16.mxu1 %vm5020_vm2, %v7233_v39 }
 0x4bd   :  { %2165 = vrot.lane.b32.xlu0 %v1838_v9, %s5021_s6  ;;  %4382 = vmatprep.subr.bf16.mxu1 %v7233_v39  ;;  %v1831_v5 = vpack.c.bf16 %v1823_v24, %v1822_v62 }
 0x4be   :  { %2162 = vrot.lane.b32.xlu1 %v1830_v60, %s5022_s27 }
 0x4c1   :  { %2218 = vrot.lane.b32.xlu0 %v1839_v16, %s5021_s6 }
 0x4c2   :  { %2498 = vrot.lane.b32.xlu1 %v7243_v2, %s5024_s19 }
 0x4c5   :  { %2215 = vrot.lane.b32.xlu0 %v1831_v5, %s5022_s27 }
 0x4c6   :  { %2545 = vrot.lane.b32.xlu1 %v7244_v33, %s5024_s19 }
 0x4c9   :  { %2451 = vrot.lane.b32.xlu0 %v7245_v8, %s5024_s19 }
 0x4df   :  { %v1084_v63 = vpop.xlane.xlu0 %1083 }
 0x4e1   :  { %v1087_v15 = vpop.xlane.xlu1 %1086 }
 0x4e3   :  { %v1060_v25 = vpop.xlane.xlu0 %1059 }
 0x4e4   :  { %4803 = vrcp.f32 %v1060_v25 }
 0x4e5   :  { %v1063_v19 = vpop.xlane.xlu1 %1062 }
 0x4e6   :  { %4805 = vrcp.f32 %v1063_v19 }
 0x4e7   :  { %v1066_v50 = vpop.xlane.xlu0 %1065 }
 0x4e8   :  { %4807 = vrcp.f32 %v1066_v50 }
 0x4e9   :  { %4809 = vrcp.f32 %v5929_v42  ;;  %v1069_v3 = vpop.xlane.xlu1 %1068 }
 0x4ea   :  { %4811 = vrcp.f32 %v1069_v3 }
 0x4eb   :  { %4813 = vrcp.f32 %v5922_v54  ;;  %v1078_v30 = vpop.xlane.xlu0 %1077 }
 0x4ed   :  { %v1081_v37 = vpop.xlane.xlu1 %1080 }
 0x4ee   :  { %v4804_v28 = vpop.eup %4803  ;;  %4815 = vrcp.f32 %v1081_v37 }
 0x4ef   :  { %4817 = vrcp.f32 %v1078_v30  ;;  %v1114_v47 = vmul.f32 %v4804_v28, %v5830_v36  ;;  %v1472_v7 = vpop.permute.xlu0 %1471 }
 0x4f0   :  { %v4806_v21 = vpop.eup %4805  ;;  %4819 = vrcp.f32 %v1087_v15 }
 0x4f1   :  { %v1115_v43 = vmul.f32 %v4806_v21, %v5834_v1  ;;  %4821 = vrcp.f32 %v1084_v63 }
 0x4f2   :  { %v4808_v61 = vpop.eup %4807 }
 0x4f3   :  { %v4810_v32 = vpop.eup %4809  ;;  %v1128_v41 = vpack.c.bf16 %v1115_v43, %v1114_v47  ;;  %v1116_v42 = vmul.f32 %v4808_v61, %v5838_v31 }
 0x4f4   :  { %v4812_v0 = vpop.eup %4811  ;;  %v1119_v36 = vmul.f32 %v4810_v32, %v5802_v6 }
 0x4f5   :  { %v1117_v54 = vmul.f32 %v4812_v0, %v5842_v22  ;;  %4367 = vmatmul.mubr.msk.bf16.vlgmr.msra.gmra.mrb[20].mxu0 %vm249_vm1, %v1128_v41  ;;  %v4814_v46 = vpop.eup %4813 }
 0x4f6   :  { %4377 = vmatpush3.bf16.msra.mxu0 %v7246_v40  ;;  %4378 = vmatprep.mubr.msk.bf16.mxu0 %vm5020_vm2, %v7233_v39  ;;  %v1118_v20 = vmul.f32 %v4814_v46, %v7247_v48 }
 0x4f7   :  { %v1129_v1 = vpack.c.bf16 %v1117_v54, %v1116_v42  ;;  %4388 = vmatprep.subr.bf16.mxu0 %v7233_v39 }
 0x4f8   :  { %v4816_v45 = vpop.eup %4815  ;;  %v1130_v13 = vpack.c.bf16 %v1119_v36, %v1118_v20 }
 0x4f9   :  { %4373 = vmatmul.mubr.msk.bf16.vlgmr.msra.gmra.mrb[36].mxu1 %vm249_vm1, %v1129_v1  ;;  %v4818_v31 = vpop.eup %4817  ;;  %v1121_v22 = vmul.f32 %v4816_v45, %v5852_v52 }
 0x4fa   :  { %4383 = vmatpush3.bf16.msra.mxu1 %v5880_v11  ;;  %4384 = vmatprep.mubr.msk.bf16.mxu1 %vm5020_vm2, %v7233_v39  ;;  %v4820_v6 = vpop.eup %4819  ;;  %v1120_v18 = vmul.f32 %v4818_v31, %v5847_v49  ;;  %v1848_v49 = vpop.permute.xlu1 %1847 }
 0x4fb   :  { %4394 = vmatprep.subr.bf16.mxu1 %v7233_v39  ;;  %v4822_v12 = vpop.eup %4821  ;;  %v1123_v11 = vmul.f32 %v4820_v6, %v5826_v57  ;;  %v1853_v57 = vsel %vm249_vm1, %v1848_v49, 0  ;;  %v6108_v49 = vld [vmem:[%s7158_s1 + $0x10] sm:$0xff] }
 0x4fc   :  { %v1131_v35 = vpack.c.bf16 %v1121_v22, %v1120_v18  ;;  %v1122_v52 = vmul.f32 %v4822_v12, %v5821_v58 }
 0x4fd   :  { %4379 = vmatmul.mubr.msk.bf16.vlgmr.msra.gmra.mrb[24].mxu0 %vm249_vm1, %v1130_v13 }
 0x4fe   :  { %4389 = vmatpush3.bf16.msra.mxu0 %v5885_v56  ;;  %4390 = vmatprep.mubr.msk.bf16.mxu0 %vm5020_vm2, %v7233_v39  ;;  %v1132_v14 = vpack.c.bf16 %v1123_v11, %v1122_v52 }
 0x4ff   :  { %4400 = vmatprep.subr.bf16.mxu0 %v7233_v39 }
 0x501   :  { %4385 = vmatmul.mubr.msk.bf16.vlgmr.msra.gmra.mrb[40].mxu1 %vm249_vm1, %v1131_v35 }
 0x502   :  { %4395 = vmatpush3.bf16.msra.mxu1 %v1472_v7  ;;  %4396 = vmatprep.mubr.msk.bf16.mxu1 %vm5020_vm2, %v7233_v39 }
 0x503   :  { %4406 = vmatprep.subr.bf16.mxu1 %v7233_v39 }
 0x505   :  { %4391 = vmatmul.mubr.msk.bf16.vlgmr.msra.gmra.mrb[28].mxu0 %vm249_vm1, %v1132_v14 }
 0x506   :  { %4402 = vmatprep.mubr.msk.bf16.mxu0 %vm5020_vm2, %v7233_v39 }
 0x507   :  { %4401 = vmatpush3.bf16.xpose.msra.mxu0 %v1853_v57  ;;  %v6113_v57 = vld [vmem:[%s7158_s1 + $0x18] sm:$0xff] }
 0x508   :  { %4412 = vmatprep.subr.bf16.mxu0 %v7233_v39 }
 0x520   :  { %v1090_v58 = vpop.xlane.xlu0 %1089 }
 0x521   :  { %4823 = vrcp.f32 %v1090_v58 }
 0x522   :  { %v1093_v56 = vpop.xlane.xlu1 %1092 }
 0x523   :  { %4825 = vrcp.f32 %v1093_v56 }
 0x524   :  { %v1901_v44 = vpop.permute.xlu0 %1900 }
 0x525   :  { %v1906_v62 = vsel %vm249_vm1, %v1901_v44, 0 }
 0x526   :  { %v1845_v4 = vpop.permute.xlu1 %1844 }
 0x527   :  { %4403 = vmatmul.mubr.msk.bf16.vlgmr.msra.gmra.mrb[32].mxu0 %vm249_vm1, %v1845_v4 }
 0x528   :  { %v1954_v27 = vpop.permute.xlu0 %1953  ;;  %4414 = vmatprep.mubr.msk.bf16.mxu0 %vm5020_vm2, %v7233_v39 }
 0x529   :  { %v1959_v10 = vsel %vm249_vm1, %v1954_v27, 0 }
 0x52a   :  { %4413 = vmatpush3.bf16.xpose.msra.mxu0 %v1959_v10  ;;  %v1898_v29 = vpop.permute.xlu1 %1897 }
 0x52b   :  { %v4824_v23 = vpop.eup %4823  ;;  %4424 = vmatprep.subr.bf16.mxu0 %v7233_v39 }
 0x52c   :  { %v2007_v9 = vpop.permute.xlu0 %2006  ;;  %v1124_v17 = vmul.f32 %v4824_v23, %v5873_v34 }
 0x52d   :  { %v4826_v26 = vpop.eup %4825  ;;  %v2012_v33 = vsel %vm249_vm1, %v2007_v9, 0 }
 0x52e   :  { %v1125_v59 = vmul.f32 %v4826_v26, %v5877_v53  ;;  %v1951_v55 = vpop.permute.xlu1 %1950 }
 0x530   :  { %v2060_v51 = vpop.permute.xlu0 %2059  ;;  %v1133_v60 = vpack.c.bf16 %v1125_v59, %v1124_v17 }
 0x531   :  { %v2065_v16 = vsel %vm249_vm1, %v2060_v51, 0  ;;  %4415 = vmatmul.mubr.msk.bf16.vlgmr.msra.gmra.mrb[36].mxu0 %vm249_vm1, %v1951_v55 }
 0x532   :  { %4397 = vmatmul.mubr.msk.bf16.vlgmr.msra.gmra.mrb[44].mxu1 %vm249_vm1, %v1133_v60  ;;  %4425 = vmatpush3.bf16.xpose.msra.mxu0 %v2065_v16  ;;  %v2004_v24 = vpop.permute.xlu1 %2003 }
 0x533   :  { %4407 = vmatpush3.bf16.xpose.msra.mxu1 %v1906_v62  ;;  %4426 = vmatprep.mubr.msk.bf16.mxu0 %vm5020_vm2, %v7233_v39 }
 0x534   :  { %v2113_v34 = vpop.permute.xlu0 %2112  ;;  %4408 = vmatprep.mubr.msk.bf16.mxu1 %vm5020_vm2, %v7233_v39  ;;  %4418 = vmatprep.subr.bf16.mxu1 %v7233_v39 }
 0x535   :  { %4436 = vmatprep.subr.bf16.mxu0 %v7233_v39  ;;  %v2118_v19 = vsel %vm249_vm1, %v2113_v34, 0 }
 0x536   :  { %v2057_v53 = vpop.permute.xlu1 %2056 }
 0x538   :  { %v2166_v2 = vpop.permute.xlu0 %2165 }
 0x539   :  { %v2171_v5 = vsel %vm249_vm1, %v2166_v2, 0  ;;  %4427 = vmatmul.mubr.msk.bf16.vlgmr.msra.gmra.mrb[40].mxu0 %vm249_vm1, %v2057_v53 }
 0x53a   :  { %4409 = vmatmul.mubr.msk.bf16.vlgmr.msra.gmra.mrb[48].mxu1 %vm249_vm1, %v1898_v29  ;;  %4437 = vmatpush3.bf16.xpose.msra.mxu0 %v2171_v5  ;;  %v2110_v8 = vpop.permute.xlu1 %2109 }
 0x53b   :  { %4419 = vmatpush3.bf16.xpose.msra.mxu1 %v2012_v33  ;;  %4438 = vmatprep.mubr.msk.bf16.mxu0 %vm5020_vm2, %v7233_v39 }
 0x53c   :  { %v2219_v63 = vpop.permute.xlu0 %2218  ;;  %4420 = vmatprep.mubr.msk.bf16.mxu1 %vm5020_vm2, %v7233_v39  ;;  %4430 = vmatprep.subr.bf16.mxu1 %v7233_v39 }
 0x53d   :  { %4448 = vmatprep.subr.bf16.mxu0 %v7233_v39  ;;  %v2224_v3 = vsel %vm249_vm1, %v2219_v63, 0 }
 0x53e   :  { %v2163_v15 = vpop.permute.xlu1 %2162 }
 0x540   :  { %v2216_v25 = vpop.permute.xlu0 %2215 }
 0x541   :  { %4439 = vmatmul.mubr.msk.bf16.vlgmr.msra.gmra.mrb[44].mxu0 %vm249_vm1, %v2163_v15 }
 0x542   :  { %4421 = vmatmul.mubr.msk.bf16.vlgmr.msra.gmra.mrb[52].mxu1 %vm249_vm1, %v2004_v24  ;;  %4450 = vmatprep.mubr.msk.bf16.mxu0 %vm5020_vm2, %v7233_v39  ;;  %v2499_v30 = vpop.permute.xlu1 %2498 }
 0x543   :  { %4431 = vmatpush3.bf16.xpose.msra.mxu1 %v2118_v19  ;;  %4432 = vmatprep.mubr.msk.bf16.mxu1 %vm5020_vm2, %v7233_v39 }
 0x544   :  { %v2452_v50 = vpop.permute.xlu0 %2451  ;;  %4442 = vmatprep.subr.bf16.mxu1 %v7233_v39 }
 0x545   :  { %4449 = vmatpush3.bf16.msra.mxu0 %v2452_v50 }
 0x546   :  { %4460 = vmatprep.subr.bf16.mxu0 %v7233_v39 }
 0x54a   :  { %4433 = vmatmul.mubr.msk.bf16.vlgmr.msra.gmra.mrb[56].mxu1 %vm249_vm1, %v2110_v8 }
 0x54b   :  { %4443 = vmatpush3.bf16.xpose.msra.mxu1 %v2224_v3  ;;  %4444 = vmatprep.mubr.msk.bf16.mxu1 %vm5020_vm2, %v7233_v39 }
 0x54c   :  { %4454 = vmatprep.subr.bf16.mxu1 %v7233_v39 }
 0x552   :  { %4445 = vmatmul.mubr.msk.bf16.vlgmr.msra.gmra.mrb[60].mxu1 %vm249_vm1, %v2216_v25 }
 0x553   :  { %4455 = vmatpush3.bf16.msra.mxu1 %v2499_v30  ;;  %4456 = vmatprep.mubr.msk.bf16.mxu1 %vm5020_vm2, %v7233_v39 }
 0x554   :  { %4466 = vmatprep.subr.bf16.mxu1 %v7233_v39 }
 0x57a   :  { %v6077_v37 = vpop.f32.mrb[16].mxu0 }
 0x57b   :  { %v4356_v28 = vpop.f32.mrb[17].mxu0 }
 0x57c   :  { %v6079_v21 = vpop.f32.mrb[18].mxu0 }
 0x57d   :  { %v4357_v47 = vpop.f32.mrb[19].mxu0 }
 0x58e   :  { %v6081_v43 = vpop.f32.mrb[32].mxu1 }
 0x58f   :  { %v4362_v61 = vpop.f32.mrb[33].mxu1 }
 0x590   :  { %v6083_v32 = vpop.f32.mrb[34].mxu1 }
 0x591   :  { %v4363_v41 = vpop.f32.mrb[35].mxu1 }
 0x5c8   :  { %v6085_v0 = vpop.f32.mrb[20].mxu0 }
 0x5c9   :  { %v4368_v42 = vpop.f32.mrb[21].mxu0 }
 0x5ca   :  { %v6087_v54 = vpop.f32.mrb[22].mxu0 }
 0x5cb   :  { %v4369_v46 = vpop.f32.mrb[23].mxu0 }
 0x5cc   :  { %v6089_v40 = vpop.f32.mrb[36].mxu1 }
 0x5cd   :  { %v4374_v36 = vpop.f32.mrb[37].mxu1 }
 0x5ce   :  { %v6091_v1 = vpop.f32.mrb[38].mxu1 }
 0x5cf   :  { %v4375_v45 = vpop.f32.mrb[39].mxu1 }
 0x5d0   :  { %v6093_v48 = vpop.f32.mrb[24].mxu0 }
 0x5d1   :  { %v4380_v20 = vpop.f32.mrb[25].mxu0 }
 0x5d2   :  { %v6095_v31 = vpop.f32.mrb[26].mxu0 }
 0x5d3   :  { %v4381_v22 = vpop.f32.mrb[27].mxu0 }
 0x5d4   :  { %v6097_v13 = vpop.f32.mrb[40].mxu1 }
 0x5d5   :  { %v4386_v6 = vpop.f32.mrb[41].mxu1 }
 0x5d6   :  { %v6099_v18 = vpop.f32.mrb[42].mxu1 }
 0x5d7   :  { %v4387_v12 = vpop.f32.mrb[43].mxu1 }
 0x5d8   :  { %v6101_v11 = vpop.f32.mrb[28].mxu0 }
 0x5d9   :  { %v4392_v35 = vpop.f32.mrb[29].mxu0 }
 0x5da   :  { %v6103_v52 = vpop.f32.mrb[30].mxu0 }
 0x5db   :  { %v4393_v7 = vpop.f32.mrb[31].mxu0 }
 0x5fa   :  { %v1889_v14 = vpop.f32.mrb[32].mxu0 }
 0x5fb   :  { %v6116_v58 = vadd.f32 %v6108_v49, %v1889_v14  ;;  %v4404_v56 = vpop.f32.mrb[33].mxu0 }
 0x5fc   :  { %v1892_v44 = vpop.f32.mrb[34].mxu0 }
 0x5fd   :  { %v6119_v4 = vadd.f32 %v6113_v57, %v1892_v44  ;;  %v4405_v27 = vpop.f32.mrb[35].mxu0  ;;  %v2267_v10 = vsel %vm249_vm1, %v6116_v58, -inf }
 0x5fe   :  { %2268 = vmax.xlane.f32.xlu1 %v2267_v10 }
 0x5ff   :  { %v2270_v29 = vsel %vm249_vm1, %v6119_v4, -inf }
 0x600   :  { %2271 = vmax.xlane.f32.xlu0 %v2270_v29 }
 0x604   :  { %v1995_v23 = vpop.f32.mrb[36].mxu0 }
 0x605   :  { %v6125_v9 = vpop.f32.mrb[44].mxu1  ;;  %v4416_v26 = vpop.f32.mrb[37].mxu0  ;;  %v6133_v8 = vadd.f32 %v6108_v49, %v1995_v23 }
 0x606   :  { %v4398_v17 = vpop.f32.mrb[45].mxu1  ;;  %v1998_v59 = vpop.f32.mrb[38].mxu0 }
 0x607   :  { %v6127_v55 = vpop.f32.mrb[46].mxu1  ;;  %v4417_v51 = vpop.f32.mrb[39].mxu0  ;;  %v6141_v19 = vadd.f32 %v6113_v57, %v1998_v59  ;;  %v2279_v30 = vsel %vm249_vm1, %v6133_v8, -inf }
 0x608   :  { %v4399_v60 = vpop.f32.mrb[47].mxu1 }
 0x609   :  { %v2282_v46 = vsel %vm249_vm1, %v6141_v19, -inf }
 0x60c   :  { %v2101_v16 = vpop.f32.mrb[40].mxu0 }
 0x60d   :  { %v1942_v62 = vpop.f32.mrb[48].mxu1  ;;  %v4428_v24 = vpop.f32.mrb[41].mxu0  ;;  %v6153_v20 = vadd.f32 %v6108_v49, %v2101_v16 }
 0x60e   :  { %v6130_v34 = vadd.f32 %v6108_v49, %v1942_v62  ;;  %v4410_v53 = vpop.f32.mrb[49].mxu1  ;;  %v2104_v2 = vpop.f32.mrb[42].mxu0 }
 0x60f   :  { %v1945_v5 = vpop.f32.mrb[50].mxu1  ;;  %v4429_v33 = vpop.f32.mrb[43].mxu0  ;;  %v6161_v35 = vadd.f32 %v6113_v57, %v2104_v2  ;;  %v2291_v14 = vsel %vm249_vm1, %v6153_v20, -inf }
 0x610   :  { %v6136_v63 = vadd.f32 %v6113_v57, %v1945_v5  ;;  %v4411_v15 = vpop.f32.mrb[51].mxu1  ;;  %v2273_v25 = vsel %vm249_vm1, %v6130_v34, -inf }
 0x611   :  { %2274 = vmax.xlane.f32.xlu0 %v2273_v25  ;;  %v2294_v10 = vsel %vm249_vm1, %v6161_v35, -inf }
 0x612   :  { %v2276_v50 = vsel %vm249_vm1, %v6136_v63, -inf }
 0x613   :  { %2277 = vmax.xlane.f32.xlu1 %v2276_v50 }
 0x614   :  { %v2207_v3 = vpop.f32.mrb[44].mxu0 }
 0x615   :  { %2280 = vmax.xlane.f32.xlu0 %v2279_v30  ;;  %v2048_v28 = vpop.f32.mrb[52].mxu1  ;;  %v4440_v47 = vpop.f32.mrb[45].mxu0  ;;  %v6173_v23 = vadd.f32 %v6108_v49, %v2207_v3  ;;  %v7249_v3 = vld [vmem:[#allocation18_spill] sm:$0xff]  ;;  %v7250_v30 = vld [vmem:[#allocation25_spill] sm:$0xff] }
 0x616   :  { %v6148_v61 = vadd.f32 %v6108_v49, %v2048_v28  ;;  %v4422_v41 = vpop.f32.mrb[53].mxu1  ;;  %v2210_v42 = vpop.f32.mrb[46].mxu0 }
 0x617   :  { %2283 = vmax.xlane.f32.xlu1 %v2282_v46  ;;  %v2051_v36 = vpop.f32.mrb[54].mxu1  ;;  %v4441_v45 = vpop.f32.mrb[47].mxu0  ;;  %v6181_v51 = vadd.f32 %v6113_v57, %v2210_v42  ;;  %v2303_v16 = vsel %vm249_vm1, %v6173_v23, -inf }
 0x618   :  { %v6156_v22 = vadd.f32 %v6113_v57, %v2051_v36  ;;  %v4423_v6 = vpop.f32.mrb[55].mxu1  ;;  %v2285_v12 = vsel %vm249_vm1, %v6148_v61, -inf }
 0x619   :  { %2286 = vmax.xlane.f32.xlu0 %v2285_v12  ;;  %v2306_v2 = vsel %vm249_vm1, %v6181_v51, -inf }
 0x61a   :  { %v2288_v7 = vsel %vm249_vm1, %v6156_v22, -inf }
 0x61b   :  { %2289 = vmax.xlane.f32.xlu1 %v2288_v7 }
 0x61d   :  { %2292 = vmax.xlane.f32.xlu0 %v2291_v14  ;;  %v2154_v56 = vpop.f32.mrb[56].mxu1 }
 0x61e   :  { %v6168_v44 = vadd.f32 %v6108_v49, %v2154_v56  ;;  %v4434_v27 = vpop.f32.mrb[57].mxu1 }
 0x61f   :  { %2295 = vmax.xlane.f32.xlu1 %v2294_v10  ;;  %v2157_v29 = vpop.f32.mrb[58].mxu1 }
 0x620   :  { %v6176_v26 = vadd.f32 %v6113_v57, %v2157_v29  ;;  %v4435_v17 = vpop.f32.mrb[59].mxu1  ;;  %v2297_v59 = vsel %vm249_vm1, %v6168_v44, -inf }
 0x621   :  { %2298 = vmax.xlane.f32.xlu0 %v2297_v59 }
 0x622   :  { %v2300_v60 = vsel %vm249_vm1, %v6176_v26, -inf }
 0x623   :  { %2301 = vmax.xlane.f32.xlu1 %v2300_v60 }
 0x625   :  { %v2260_v62 = vpop.f32.mrb[60].mxu1  ;;  %2304 = vmax.xlane.f32.xlu0 %v2303_v16 }
 0x626   :  { %v6188_v24 = vadd.f32 %v6108_v49, %v2260_v62  ;;  %v4446_v53 = vpop.f32.mrb[61].mxu1  ;;  %v7248_v49 = vld [vmem:[#allocation17_spill] sm:$0xff] }
 0x627   :  { %v2263_v5 = vpop.f32.mrb[62].mxu1  ;;  %2307 = vmax.xlane.f32.xlu1 %v2306_v2 }
 0x628   :  { %v6193_v33 = vadd.f32 %v6113_v57, %v2263_v5  ;;  %v4447_v15 = vpop.f32.mrb[63].mxu1  ;;  %v2309_v25 = vsel %vm249_vm1, %v6188_v24, -inf  ;;  %v6205_v57 = vpop.permute.xlu1 %2545 }
 0x629   :  { %2310 = vmax.xlane.f32.xlu0 %v2309_v25 }
 0x62a   :  { %v2312_v50 = vsel %vm249_vm1, %v6193_v33, -inf }
 0x62b   :  { %2313 = vmax.xlane.f32.xlu1 %v2312_v50 }
 0x63c   :  { %2639 = vrot.lane.b32.xlu1 %v7248_v49, %s5024_s19 }
 0x63f   :  { %2592 = vrot.lane.b32.xlu0 %v7249_v3, %s5024_s19 }
 0x643   :  { %2686 = vrot.lane.b32.xlu0 %v7250_v30, %s5024_s19 }
 0x68b   :  { %v2269_v28 = vpop.xlane.xlu1 %2268 }
 0x68c   :  { %v2315_v47 = vsub.f32 %v6116_v58, %v2269_v28 }
 0x68d   :  { %v2272_v41 = vpop.xlane.xlu0 %2271 }
 0x68e   :  { %v2331_v42 = vmul.f32 1.442695, %v2315_v47  ;;  %v2316_v46 = vsub.f32 %v6119_v4, %v2272_v41 }
 0x690   :  { %4827 = vpow2.f32 %v2331_v42  ;;  %v2333_v36 = vmul.f32 1.442695, %v2316_v46 }
 0x692   :  { %4829 = vpow2.f32 %v2333_v36 }
 0x69a   :  { %v6209_v45 = vpop.eup %4827 }
 0x69b   :  { %v2363_v6 = vsel %vm249_vm1, %v6209_v45, 0.0 }
 0x69c   :  { %v6213_v12 = vpop.eup %4829  ;;  %2364 = vadd.xlane.f32.xlu0 %v2363_v6 }
 0x69d   :  { %v2366_v7 = vsel %vm249_vm1, %v6213_v12, 0.0 }
 0x69e   :  { %v2275_v14 = vpop.xlane.xlu0 %2274  ;;  %2367 = vadd.xlane.f32.xlu1 %v2366_v7 }
 0x69f   :  { %v2317_v58 = vsub.f32 %v6130_v34, %v2275_v14 }
 0x6a0   :  { %v2278_v56 = vpop.xlane.xlu1 %2277 }
 0x6a1   :  { %v2335_v4 = vmul.f32 1.442695, %v2317_v58  ;;  %v2318_v27 = vsub.f32 %v6136_v63, %v2278_v56 }
 0x6a2   :  { %v2281_v10 = vpop.xlane.xlu0 %2280 }
 0x6a3   :  { %4831 = vpow2.f32 %v2335_v4  ;;  %v2337_v29 = vmul.f32 1.442695, %v2318_v27  ;;  %v2319_v17 = vsub.f32 %v6133_v8, %v2281_v10 }
 0x6a4   :  { %v2284_v59 = vpop.xlane.xlu1 %2283 }
 0x6a5   :  { %4833 = vpow2.f32 %v2337_v29  ;;  %v2339_v60 = vmul.f32 1.442695, %v2319_v17  ;;  %v2320_v16 = vsub.f32 %v6141_v19, %v2284_v59 }
 0x6a6   :  { %v2287_v62 = vpop.xlane.xlu0 %2286 }
 0x6a7   :  { %4835 = vpow2.f32 %v2339_v60  ;;  %v2341_v53 = vmul.f32 1.442695, %v2320_v16  ;;  %v2321_v2 = vsub.f32 %v6148_v61, %v2287_v62 }
 0x6a8   :  { %v2290_v34 = vpop.xlane.xlu1 %2289 }
 0x6a9   :  { %4837 = vpow2.f32 %v2341_v53  ;;  %v2343_v5 = vmul.f32 1.442695, %v2321_v2  ;;  %v2322_v63 = vsub.f32 %v6156_v22, %v2290_v34 }
 0x6aa   :  { %v2293_v15 = vpop.xlane.xlu0 %2292 }
 0x6ab   :  { %4839 = vpow2.f32 %v2343_v5  ;;  %v2345_v25 = vmul.f32 1.442695, %v2322_v63  ;;  %v2323_v8 = vsub.f32 %v6153_v20, %v2293_v15 }
 0x6ac   :  { %v2296_v50 = vpop.xlane.xlu1 %2295 }
 0x6ad   :  { %v6224_v49 = vpop.eup %4831  ;;  %4841 = vpow2.f32 %v2345_v25  ;;  %v2347_v19 = vmul.f32 1.442695, %v2323_v8  ;;  %v2324_v3 = vsub.f32 %v6161_v35, %v2296_v50 }
 0x6ae   :  { %v2299_v30 = vpop.xlane.xlu0 %2298  ;;  %v2369_v61 = vsel %vm249_vm1, %v6224_v49, 0.0 }
 0x6af   :  { %v6229_v28 = vpop.eup %4833  ;;  %4843 = vpow2.f32 %v2347_v19  ;;  %v2349_v22 = vmul.f32 1.442695, %v2324_v3  ;;  %v2325_v47 = vsub.f32 %v6168_v44, %v2299_v30  ;;  %2370 = vadd.xlane.f32.xlu0 %v2369_v61 }
 0x6b0   :  { %v2302_v41 = vpop.xlane.xlu1 %2301  ;;  %v2372_v20 = vsel %vm249_vm1, %v6229_v28, 0.0 }
 0x6b1   :  { %v6234_v42 = vpop.eup %4835  ;;  %4845 = vpow2.f32 %v2349_v22  ;;  %v2351_v46 = vmul.f32 1.442695, %v2325_v47  ;;  %v2326_v35 = vsub.f32 %v6176_v26, %v2302_v41  ;;  %2373 = vadd.xlane.f32.xlu1 %v2372_v20  ;;  %v7251_v41 = vld [vmem:[#allocation24_spill] sm:$0xff] }
 0x6b2   :  { %v2305_v36 = vpop.xlane.xlu0 %2304  ;;  %v2375_v6 = vsel %vm249_vm1, %v6234_v42, 0.0 }
 0x6b3   :  { %v6239_v7 = vpop.eup %4837  ;;  %4847 = vpow2.f32 %v2351_v46  ;;  %v2353_v44 = vmul.f32 1.442695, %v2326_v35  ;;  %v2327_v14 = vsub.f32 %v6173_v23, %v2305_v36  ;;  %2376 = vadd.xlane.f32.xlu0 %v2375_v6 }
 0x6b4   :  { %v2308_v58 = vpop.xlane.xlu1 %2307  ;;  %v2378_v56 = vsel %vm249_vm1, %v6239_v7, 0.0 }
 0x6b5   :  { %v6244_v4 = vpop.eup %4839  ;;  %4849 = vpow2.f32 %v2353_v44  ;;  %v2355_v26 = vmul.f32 1.442695, %v2327_v14  ;;  %v2328_v27 = vsub.f32 %v6181_v51, %v2308_v58  ;;  %2379 = vadd.xlane.f32.xlu1 %v2378_v56 }
 0x6b6   :  { %v2311_v10 = vpop.xlane.xlu0 %2310  ;;  %v2381_v29 = vsel %vm249_vm1, %v6244_v4, 0.0 }
 0x6b7   :  { %v6249_v17 = vpop.eup %4841  ;;  %4851 = vpow2.f32 %v2355_v26  ;;  %v2357_v23 = vmul.f32 1.442695, %v2328_v27  ;;  %v2329_v59 = vsub.f32 %v6188_v24, %v2311_v10  ;;  %2382 = vadd.xlane.f32.xlu0 %v2381_v29 }
 0x6b8   :  { %v2314_v60 = vpop.xlane.xlu1 %2313  ;;  %v2384_v16 = vsel %vm249_vm1, %v6249_v17, 0.0 }
 0x6b9   :  { %v6254_v62 = vpop.eup %4843  ;;  %4853 = vpow2.f32 %v2357_v23  ;;  %v2359_v51 = vmul.f32 1.442695, %v2329_v59  ;;  %v2330_v53 = vsub.f32 %v6193_v33, %v2314_v60  ;;  %2385 = vadd.xlane.f32.xlu1 %v2384_v16 }
 0x6ba   :  { %v2387_v2 = vsel %vm249_vm1, %v6254_v62, 0.0  ;;  %v2593_v20 = vpop.permute.xlu0 %2592 }
 0x6bb   :  { %v6259_v34 = vpop.eup %4845  ;;  %4855 = vpow2.f32 %v2359_v51  ;;  %v2361_v5 = vmul.f32 1.442695, %v2330_v53  ;;  %2388 = vadd.xlane.f32.xlu0 %v2387_v2 }
 0x6bc   :  { %v2390_v24 = vsel %vm249_vm1, %v6259_v34, 0.0  ;;  %v2640_v35 = vpop.permute.xlu1 %2639 }
 0x6bd   :  { %v6263_v63 = vpop.eup %4847  ;;  %4857 = vpow2.f32 %v2361_v5  ;;  %2391 = vadd.xlane.f32.xlu1 %v2390_v24 }
 0x6be   :  { %v2393_v15 = vsel %vm249_vm1, %v6263_v63, 0.0  ;;  %v6291_v46 = vpop.permute.xlu0 %2686 }
 0x6bf   :  { %v6267_v33 = vpop.eup %4849  ;;  %2394 = vadd.xlane.f32.xlu0 %v2393_v15 }
 0x6c0   :  { %v2396_v25 = vsel %vm249_vm1, %v6267_v33, 0.0 }
 0x6c1   :  { %v6271_v8 = vpop.eup %4851  ;;  %2397 = vadd.xlane.f32.xlu1 %v2396_v25 }
 0x6c2   :  { %v2399_v50 = vsel %vm249_vm1, %v6271_v8, 0.0 }
 0x6c3   :  { %v6275_v19 = vpop.eup %4853  ;;  %2400 = vadd.xlane.f32.xlu0 %v2399_v50 }
 0x6c4   :  { %v2402_v3 = vsel %vm249_vm1, %v6275_v19, 0.0 }
 0x6c5   :  { %v6279_v30 = vpop.eup %4855  ;;  %2403 = vadd.xlane.f32.xlu1 %v2402_v3 }
 0x6c6   :  { %v2405_v61 = vsel %vm249_vm1, %v6279_v30, 0.0 }
 0x6c7   :  { %v6283_v22 = vpop.eup %4857  ;;  %2406 = vadd.xlane.f32.xlu0 %v2405_v61 }
 0x6c8   :  { %v2408_v47 = vsel %vm249_vm1, %v6283_v22, 0.0 }
 0x6c9   :  { %2409 = vadd.xlane.f32.xlu1 %v2408_v47 }
 0x6da   :  { %2733 = vrot.lane.b32.xlu1 %v7251_v41, %s5024_s19 }
 0x6dd   :  { %2780 = vrot.lane.b32.xlu0 %v5861_v38, %s5024_s19 }
 0x729   :  { %v2365_v36 = vpop.xlane.xlu0 %2364 }
 0x72a   :  { %4859 = vrcp.f32 %v2365_v36 }
 0x72b   :  { %v2368_v6 = vpop.xlane.xlu1 %2367 }
 0x72c   :  { %4861 = vrcp.f32 %v2368_v6 }
 0x734   :  { %v4860_v44 = vpop.eup %4859 }
 0x735   :  { %v2427_v58 = vmul.f32 %v4860_v44, %v6209_v45 }
 0x736   :  { %v4862_v14 = vpop.eup %4861 }
 0x737   :  { %v2428_v56 = vmul.f32 %v4862_v14, %v6213_v12 }
 0x739   :  { %v2443_v26 = vpack.c.bf16 %v2428_v56, %v2427_v58 }
 0x73b   :  { %4451 = vmatmul.mubr.msk.bf16.vlgmr.msra.gmra.mrb[48].mxu0 %vm249_vm1, %v2443_v26 }
 0x73c   :  { %4461 = vmatpush3.bf16.msra.mxu0 %v6205_v57  ;;  %v2371_v38 = vpop.xlane.xlu0 %2370  ;;  %4462 = vmatprep.mubr.msk.bf16.mxu0 %vm5020_vm2, %v7233_v39 }
 0x73d   :  { %4863 = vrcp.f32 %v2371_v38  ;;  %4472 = vmatprep.subr.bf16.mxu0 %v7233_v39 }
 0x73e   :  { %v2374_v27 = vpop.xlane.xlu1 %2373 }
 0x73f   :  { %4865 = vrcp.f32 %v2374_v27 }
 0x740   :  { %v2377_v10 = vpop.xlane.xlu0 %2376 }
 0x741   :  { %4867 = vrcp.f32 %v2377_v10 }
 0x742   :  { %v2380_v29 = vpop.xlane.xlu1 %2379 }
 0x743   :  { %4869 = vrcp.f32 %v2380_v29 }
 0x744   :  { %v2383_v45 = vpop.xlane.xlu0 %2382 }
 0x745   :  { %4871 = vrcp.f32 %v2383_v45 }
 0x746   :  { %v2386_v12 = vpop.xlane.xlu1 %2385 }
 0x747   :  { %v4864_v23 = vpop.eup %4863  ;;  %4873 = vrcp.f32 %v2386_v12 }
 0x748   :  { %v2389_v59 = vpop.xlane.xlu0 %2388  ;;  %v2429_v60 = vmul.f32 %v4864_v23, %v6224_v49 }
 0x749   :  { %v4866_v57 = vpop.eup %4865  ;;  %4875 = vrcp.f32 %v2389_v59 }
 0x74a   :  { %v2430_v16 = vmul.f32 %v4866_v57, %v6229_v28  ;;  %v2392_v51 = vpop.xlane.xlu1 %2391 }
 0x74b   :  { %v4868_v53 = vpop.eup %4867  ;;  %4877 = vrcp.f32 %v2392_v51 }
 0x74c   :  { %v2395_v2 = vpop.xlane.xlu0 %2394  ;;  %v2444_v5 = vpack.c.bf16 %v2430_v16, %v2429_v60  ;;  %v2431_v15 = vmul.f32 %v4868_v53, %v6234_v42 }
 0x74d   :  { %v4870_v24 = vpop.eup %4869  ;;  %4879 = vrcp.f32 %v2395_v2 }
 0x74e   :  { %v2432_v25 = vmul.f32 %v4870_v24, %v6239_v7  ;;  %4457 = vmatmul.mubr.msk.bf16.vlgmr.msra.gmra.mrb[64].mxu1 %vm249_vm1, %v2444_v5  ;;  %v2398_v50 = vpop.xlane.xlu1 %2397 }
 0x74f   :  { %v4872_v3 = vpop.eup %4871  ;;  %4467 = vmatpush3.bf16.msra.mxu1 %v2593_v20  ;;  %4881 = vrcp.f32 %v2398_v50  ;;  %4468 = vmatprep.mubr.msk.bf16.mxu1 %vm5020_vm2, %v7233_v39 }
 0x750   :  { %v2401_v49 = vpop.xlane.xlu0 %2400  ;;  %v2445_v28 = vpack.c.bf16 %v2432_v25, %v2431_v15  ;;  %4478 = vmatprep.subr.bf16.mxu1 %v7233_v39  ;;  %v2433_v47 = vmul.f32 %v4872_v3, %v6244_v4 }
 0x751   :  { %v4874_v61 = vpop.eup %4873  ;;  %4883 = vrcp.f32 %v2401_v49 }
 0x752   :  { %v2434_v42 = vmul.f32 %v4874_v61, %v6249_v17  ;;  %4463 = vmatmul.mubr.msk.bf16.vlgmr.msra.gmra.mrb[52].mxu0 %vm249_vm1, %v2445_v28  ;;  %v2404_v7 = vpop.xlane.xlu1 %2403 }
 0x753   :  { %v4876_v41 = vpop.eup %4875  ;;  %4473 = vmatpush3.bf16.msra.mxu0 %v2640_v35  ;;  %4885 = vrcp.f32 %v2404_v7  ;;  %4474 = vmatprep.mubr.msk.bf16.mxu0 %vm5020_vm2, %v7233_v39 }
 0x754   :  { %v2407_v20 = vpop.xlane.xlu0 %2406  ;;  %v2446_v36 = vpack.c.bf16 %v2434_v42, %v2433_v47  ;;  %4484 = vmatprep.subr.bf16.mxu0 %v7233_v39  ;;  %v2435_v44 = vmul.f32 %v4876_v41, %v6254_v62 }
 0x755   :  { %v4878_v6 = vpop.eup %4877  ;;  %4887 = vrcp.f32 %v2407_v20 }
 0x756   :  { %v2436_v4 = vmul.f32 %v4878_v6, %v6259_v34  ;;  %4469 = vmatmul.mubr.msk.bf16.vlgmr.msra.gmra.mrb[68].mxu1 %vm249_vm1, %v2446_v36  ;;  %v2410_v17 = vpop.xlane.xlu1 %2409 }
 0x757   :  { %v4880_v14 = vpop.eup %4879  ;;  %4479 = vmatpush3.bf16.msra.mxu1 %v6291_v46  ;;  %4889 = vrcp.f32 %v2410_v17  ;;  %4480 = vmatprep.mubr.msk.bf16.mxu1 %vm5020_vm2, %v7233_v39 }
 0x758   :  { %v2447_v35 = vpack.c.bf16 %v2436_v4, %v2435_v44  ;;  %4490 = vmatprep.subr.bf16.mxu1 %v7233_v39  ;;  %v2437_v56 = vmul.f32 %v4880_v14, %v6263_v63  ;;  %v2781_v29 = vpop.permute.xlu0 %2780 }
 0x759   :  { %v4882_v58 = vpop.eup %4881 }
 0x75a   :  { %v2438_v62 = vmul.f32 %v4882_v58, %v6267_v33  ;;  %4475 = vmatmul.mubr.msk.bf16.vlgmr.msra.gmra.mrb[56].mxu0 %vm249_vm1, %v2447_v35  ;;  %v2734_v34 = vpop.permute.xlu1 %2733 }
 0x75b   :  { %v4884_v26 = vpop.eup %4883  ;;  %4485 = vmatpush3.bf16.msra.mxu0 %v2734_v34  ;;  %4486 = vmatprep.mubr.msk.bf16.mxu0 %vm5020_vm2, %v7233_v39 }
 0x75c   :  { %v2448_v46 = vpack.c.bf16 %v2438_v62, %v2437_v56  ;;  %v2439_v27 = vmul.f32 %v4884_v26, %v6271_v8  ;;  %v4623_v8 = vld [vmem:[%s7161_s4] sm:$0xff]  }
 0x75d   :  { %v4886_v38 = vpop.eup %4885  ;;  %4496 = vmatprep.subr.bf16.mxu0 %v4623_v8 }
 0x75e   :  { %v2440_v10 = vmul.f32 %v4886_v38, %v6275_v19  ;;  %4481 = vmatmul.mubr.msk.bf16.vlgmr.msra.gmra.mrb[72].mxu1 %vm249_vm1, %v2448_v46 }
 0x75f   :  { %v4888_v63 = vpop.eup %4887  ;;  %4491 = vmatpush3.bf16.msra.mxu1 %v2781_v29  ;;  %4492 = vmatprep.mubr.msk.bf16.mxu1 %vm5020_vm2, %v7233_v39 }
 0x760   :  { %v2449_v33 = vpack.c.bf16 %v2440_v10, %v2439_v27  ;;  %v2441_v12 = vmul.f32 %v4888_v63, %v6279_v30  ;;  %v4624_v30 = vld [vmem:[%s7161_s4 + $0x8] sm:$0xff]  }
 0x761   :  { %v4890_v45 = vpop.eup %4889 }
 0x762   :  { %v2442_v23 = vmul.f32 %v4890_v45, %v6283_v22  ;;  %4487 = vmatmul.mubr.msk.bf16.vlgmr.msra.gmra.mrb[60].mxu0 %vm249_vm1, %v2449_v33 }
 0x763   :  { %4497 = vmatpush3.bf16.msra.mxu0 %v4623_v8 }
 0x764   :  { %v2450_v59 = vpack.c.bf16 %v2442_v23, %v2441_v12  ;;  %4498 = vmatprep.subr.bf16.mxu0 %v4624_v30 }
 0x766   :  { %4493 = vmatmul.mubr.msk.bf16.vlgmr.msra.gmra.mrb[76].mxu1 %vm249_vm1, %v2450_v59 }
 0x767   :  { %4499 = vmatpush3.bf16.msra.mxu0 %v4624_v30 }
 0x80e   :  { %v2491_v19 = vpop.f32.mrb[48].mxu0 }
 0x80f   :  { %v4452_v57 = vpop.f32.mrb[49].mxu0 }
 0x810   :  { %v2494_v39 = vpop.f32.mrb[50].mxu0 }
 0x811   :  { %v4581_v60 = vpack.i.bf16 %v2494_v39, %v2491_v19  ;;  %v4453_v16 = vpop.f32.mrb[51].mxu0 }
 0x813   :  { %4582 = vrot.lane.b32.xlu1 %v4581_v60, %s5025_s25 }
 0x821   :  { %v2538_v22 = vpop.f32.mrb[64].mxu1 }
 0x822   :  { %v4458_v51 = vpop.f32.mrb[65].mxu1 }
 0x823   :  { %v2541_v53 = vpop.f32.mrb[66].mxu1 }
 0x824   :  { %v4586_v2 = vpack.i.bf16 %v2541_v53, %v2538_v22  ;;  %v4459_v5 = vpop.f32.mrb[67].mxu1 }
 0x825   :  { %v2585_v24 = vpop.f32.mrb[52].mxu0 }
 0x826   :  { %4587 = vrot.lane.b32.xlu0 %v4586_v2, %s5025_s25  ;;  %v4464_v15 = vpop.f32.mrb[53].mxu0 }
 0x827   :  { %v2588_v25 = vpop.f32.mrb[54].mxu0 }
 0x828   :  { %v4591_v50 = vpack.i.bf16 %v2588_v25, %v2585_v24  ;;  %v4465_v3 = vpop.f32.mrb[55].mxu0 }
 0x829   :  { %v2632_v49 = vpop.f32.mrb[68].mxu1 }
 0x82a   :  { %4592 = vrot.lane.b32.xlu1 %v4591_v50, %s5025_s25  ;;  %v4470_v28 = vpop.f32.mrb[69].mxu1 }
 0x82b   :  { %v2635_v61 = vpop.f32.mrb[70].mxu1 }
 0x82c   :  { %v4596_v47 = vpack.i.bf16 %v2635_v61, %v2632_v49  ;;  %v4471_v42 = vpop.f32.mrb[71].mxu1 }
 0x82d   :  { %v2679_v7 = vpop.f32.mrb[56].mxu0 }
 0x82e   :  { %4597 = vrot.lane.b32.xlu0 %v4596_v47, %s5025_s25  ;;  %v4476_v41 = vpop.f32.mrb[57].mxu0 }
 0x82f   :  { %v2682_v20 = vpop.f32.mrb[58].mxu0 }
 0x830   :  { %v4601_v36 = vpack.i.bf16 %v2682_v20, %v2679_v7  ;;  %v4477_v6 = vpop.f32.mrb[59].mxu0 }
 0x831   :  { %v2726_v44 = vpop.f32.mrb[72].mxu1 }
 0x832   :  { %4602 = vrot.lane.b32.xlu1 %v4601_v36, %s5025_s25  ;;  %v4482_v4 = vpop.f32.mrb[73].mxu1 }
 0x833   :  { %v2729_v17 = vpop.f32.mrb[74].mxu1 }
 0x834   :  { %v4606_v14 = vpack.i.bf16 %v2729_v17, %v2726_v44  ;;  %v4483_v35 = vpop.f32.mrb[75].mxu1 }
 0x835   :  { %v2773_v58 = vpop.f32.mrb[60].mxu0 }
 0x836   :  { %4607 = vrot.lane.b32.xlu0 %v4606_v14, %s5025_s25  ;;  %v4488_v56 = vpop.f32.mrb[61].mxu0 }
 0x837   :  { %v2776_v62 = vpop.f32.mrb[62].mxu0 }
 0x838   :  { %v4611_v34 = vpack.i.bf16 %v2776_v62, %v2773_v58  ;;  %v4489_v26 = vpop.f32.mrb[63].mxu0 }
 0x839   :  { %v2820_v46 = vpop.f32.mrb[76].mxu1 }
 0x83a   :  { %v4494_v38 = vpop.f32.mrb[77].mxu1  ;;  %4612 = vrot.lane.b32.xlu1 %v4611_v34, %s5025_s25 }
 0x83b   :  { %v2823_v27 = vpop.f32.mrb[78].mxu1 }
 0x83c   :  { %v4616_v10 = vpack.i.bf16 %v2823_v27, %v2820_v46  ;;  %v4495_v29 = vpop.f32.mrb[79].mxu1 }
 0x83e   :  { %4617 = vrot.lane.b32.xlu0 %v4616_v10, %s5025_s25 }
 0x885   :  { %v4583_v63 = vpop.permute.xlu1 %4582 }
 0x886   :  { %v4585_v33 = vunpack.i.h.bf16 %v4583_v63  ;;  %v4584_v45 = vunpack.i.l.bf16 %v4583_v63 }
 0x888   :  { %v2892_v12 = vsel %vm249_vm1, %v6079_v21, %v4585_v33  ;;  %v2891_v23 = vsel %vm249_vm1, %v6077_v37, %v4584_v45 }
 0x889   :  { %v2907_v59 = vpack.c.bf16 %v2892_v12, %v2891_v23 }
 0x88b   :  { %4500 = vmatprep.mubr.msk.bf16.mxu0 %vm111_vm0, %v2907_v59 }
 0x898   :  { %v4588_v8 = vpop.permute.xlu0 %4587 }
 0x899   :  { %v4590_v19 = vunpack.i.h.bf16 %v4588_v8  ;;  %v4589_v57 = vunpack.i.l.bf16 %v4588_v8 }
 0x89b   :  { %v2894_v39 = vsel %vm249_vm1, %v6083_v32, %v4590_v19  ;;  %v2893_v60 = vsel %vm249_vm1, %v6081_v43, %v4589_v57 }
 0x89c   :  { %v2908_v16 = vpack.c.bf16 %v2894_v39, %v2893_v60  ;;  %v4593_v30 = vpop.permute.xlu1 %4592 }
 0x89d   :  { %v4595_v22 = vunpack.i.h.bf16 %v4593_v30  ;;  %v4594_v51 = vunpack.i.l.bf16 %v4593_v30 }
 0x89e   :  { %4501 = vmatmul.mubr.msk.bf16.vlgmr.msra.gmra.mrb[64].mxu0 %vm111_vm0, %v2908_v16 }
 0x89f   :  { %v2896_v37 = vsel %vm249_vm1, %v6087_v54, %v4595_v22  ;;  %v2895_v21 = vsel %vm249_vm1, %v6085_v0, %v4594_v51 }
 0x8a0   :  { %v2909_v53 = vpack.c.bf16 %v2896_v37, %v2895_v21  ;;  %v4598_v2 = vpop.permute.xlu0 %4597 }
 0x8a1   :  { %v4600_v5 = vunpack.i.h.bf16 %v4598_v2  ;;  %v4599_v24 = vunpack.i.l.bf16 %v4598_v2 }
 0x8a2   :  { %4504 = vmatprep.mubr.msk.bf16.mxu0 %vm111_vm0, %v2909_v53 }
 0x8a3   :  { %v2898_v43 = vsel %vm249_vm1, %v6091_v1, %v4600_v5  ;;  %v2897_v32 = vsel %vm249_vm1, %v6089_v40, %v4599_v24 }
 0x8a4   :  { %v2910_v15 = vpack.c.bf16 %v2898_v43, %v2897_v32  ;;  %v4603_v25 = vpop.permute.xlu1 %4602 }
 0x8a5   :  { %v4605_v50 = vunpack.i.h.bf16 %v4603_v25  ;;  %v4604_v3 = vunpack.i.l.bf16 %v4603_v25 }
 0x8a6   :  { %4505 = vmatmul.mubr.msk.bf16.gmra.mrb[68].mxu0 %vm111_vm0, %v2910_v15 }
 0x8a7   :  { %v2900_v0 = vsel %vm249_vm1, %v6095_v31, %v4605_v50  ;;  %v2899_v54 = vsel %vm249_vm1, %v6093_v48, %v4604_v3 }
 0x8a8   :  { %v2911_v49 = vpack.c.bf16 %v2900_v0, %v2899_v54  ;;  %v4608_v28 = vpop.permute.xlu0 %4607 }
 0x8a9   :  { %v4610_v61 = vunpack.i.h.bf16 %v4608_v28  ;;  %v4609_v47 = vunpack.i.l.bf16 %v4608_v28 }
 0x8aa   :  { %4508 = vmatprep.mubr.msk.bf16.mxu0 %vm111_vm0, %v2911_v49 }
 0x8ab   :  { %v2902_v40 = vsel %vm249_vm1, %v6099_v18, %v4610_v61  ;;  %v2901_v1 = vsel %vm249_vm1, %v6097_v13, %v4609_v47 }
 0x8ac   :  { %v2912_v42 = vpack.c.bf16 %v2902_v40, %v2901_v1  ;;  %v4613_v7 = vpop.permute.xlu1 %4612 }
 0x8ad   :  { %v4615_v41 = vunpack.i.h.bf16 %v4613_v7  ;;  %v4614_v20 = vunpack.i.l.bf16 %v4613_v7 }
 0x8ae   :  { %4509 = vmatmul.mubr.msk.bf16.gmra.mrb[72].mxu0 %vm111_vm0, %v2912_v42 }
 0x8af   :  { %v2904_v48 = vsel %vm249_vm1, %v6103_v52, %v4615_v41  ;;  %v2903_v31 = vsel %vm249_vm1, %v6101_v11, %v4614_v20  ;;  %v4139_v52 = vld [vmem:[%s7162_s5] ss:$0 sm:$0xff] }
 0x8b0   :  { %v2913_v36 = vpack.c.bf16 %v2904_v48, %v2903_v31  ;;  %v4618_v6 = vpop.permute.xlu0 %4617 }
 0x8b1   :  { %v4620_v44 = vunpack.i.h.bf16 %v4618_v6  ;;  %v4619_v4 = vunpack.i.l.bf16 %v4618_v6 }
 0x8b2   :  { %4512 = vmatprep.mubr.msk.bf16.mxu0 %vm111_vm0, %v2913_v36 }
 0x8b3   :  { %v2906_v13 = vsel %vm249_vm1, %v6127_v55, %v4620_v44  ;;  %v2905_v18 = vsel %vm249_vm1, %v6125_v9, %v4619_v4 }
 0x8b4   :  { %v2914_v17 = vpack.c.bf16 %v2906_v13, %v2905_v18 }
 0x8b6   :  { %4513 = vmatmul.mubr.msk.bf16.gmra.mrb[76].mxu0 %vm111_vm0, %v2914_v17 }
 0x971   :  { %v4502_v11 = vpop.f32.mrb[64].mxu0 }
 0x972   :  { %v2996_v14 = vpop.f32.mrb[65].mxu0  ;;  %v6400_v55 = vadd.f32 %v4502_v11, %v4139_v52 }
 0x973   :  { %v6392_v35 = vadd.f32 %v4139_v52, %v2996_v14  ;;  %v4503_v58 = vpop.f32.mrb[66].mxu0 }
 0x974   :  { %v2999_v56 = vpop.f32.mrb[67].mxu0  ;;  %v6394_v62 = vadd.f32 %v4503_v58, %v4139_v52  ;;  %v3067_v63 = vsel %vm111_vm0, %v6400_v55, 0.0 }
 0x975   :  { %v6396_v34 = vadd.f32 %v4139_v52, %v2999_v56  ;;  %v3061_v9 = vsel %vm111_vm0, %v6392_v35, 0.0 }
 0x976   :  { %3062 = vadd.xlane.f32.xlu1 %v3061_v9  ;;  %v3070_v38 = vsel %vm111_vm0, %v6394_v62, 0.0 }
 0x977   :  { %v3064_v26 = vsel %vm111_vm0, %v6396_v34, 0.0 }
 0x978   :  { %3065 = vadd.xlane.f32.xlu0 %v3064_v26 }
 0x979   :  { %v4506_v46 = vpop.f32.mrb[68].mxu0 }
 0x97a   :  { %v3012_v27 = vpop.f32.mrb[69].mxu0  ;;  %3071 = vadd.xlane.f32.xlu1 %v3070_v38  ;;  %v6412_v12 = vadd.f32 %v4506_v46, %v4139_v52 }
 0x97b   :  { %v6406_v10 = vadd.f32 %v4139_v52, %v3012_v27  ;;  %v4507_v29 = vpop.f32.mrb[70].mxu0 }
 0x97c   :  { %v3015_v33 = vpop.f32.mrb[71].mxu0  ;;  %3068 = vadd.xlane.f32.xlu0 %v3067_v63  ;;  %v6414_v23 = vadd.f32 %v4507_v29, %v4139_v52  ;;  %v3079_v16 = vsel %vm111_vm0, %v6412_v12, 0.0 }
 0x97d   :  { %v6410_v45 = vadd.f32 %v4139_v52, %v3015_v33  ;;  %v3073_v59 = vsel %vm111_vm0, %v6406_v10, 0.0 }
 0x97e   :  { %v3082_v30 = vsel %vm111_vm0, %v6414_v23, 0.0 }
 0x97f   :  { %v3076_v8 = vsel %vm111_vm0, %v6410_v45, 0.0 }
 0x980   :  { %3074 = vadd.xlane.f32.xlu0 %v3073_v59  ;;  %3077 = vadd.xlane.f32.xlu1 %v3076_v8 }
 0x981   :  { %v4510_v19 = vpop.f32.mrb[72].mxu0 }
 0x982   :  { %v3028_v57 = vpop.f32.mrb[73].mxu0  ;;  %v6428_v37 = vadd.f32 %v4510_v19, %v4139_v52 }
 0x983   :  { %v6420_v39 = vadd.f32 %v4139_v52, %v3028_v57  ;;  %v4511_v60 = vpop.f32.mrb[74].mxu0 }
 0x984   :  { %v3031_v22 = vpop.f32.mrb[75].mxu0  ;;  %3080 = vadd.xlane.f32.xlu0 %v3079_v16  ;;  %3083 = vadd.xlane.f32.xlu1 %v3082_v30  ;;  %v6430_v21 = vadd.f32 %v4511_v60, %v4139_v52  ;;  %v3091_v15 = vsel %vm111_vm0, %v6428_v37, 0.0 }
 0x985   :  { %v6426_v51 = vadd.f32 %v4139_v52, %v3031_v22  ;;  %v3085_v53 = vsel %vm111_vm0, %v6420_v39, 0.0 }
 0x986   :  { %v3094_v25 = vsel %vm111_vm0, %v6430_v21, 0.0 }
 0x987   :  { %v3088_v2 = vsel %vm111_vm0, %v6426_v51, 0.0 }
 0x988   :  { %3086 = vadd.xlane.f32.xlu0 %v3085_v53  ;;  %3089 = vadd.xlane.f32.xlu1 %v3088_v2 }
 0x989   :  { %v4514_v5 = vpop.f32.mrb[76].mxu0 }
 0x98a   :  { %v3044_v24 = vpop.f32.mrb[77].mxu0  ;;  %v6444_v0 = vadd.f32 %v4514_v5, %v4139_v52 }
 0x98b   :  { %v6436_v43 = vadd.f32 %v4139_v52, %v3044_v24  ;;  %v4515_v32 = vpop.f32.mrb[78].mxu0 }
 0x98c   :  { %v3047_v50 = vpop.f32.mrb[79].mxu0  ;;  %3092 = vadd.xlane.f32.xlu0 %v3091_v15  ;;  %3095 = vadd.xlane.f32.xlu1 %v3094_v25  ;;  %v6446_v54 = vadd.f32 %v4515_v32, %v4139_v52  ;;  %v3103_v61 = vsel %vm111_vm0, %v6444_v0, 0.0 }
 0x98d   :  { %v6442_v3 = vadd.f32 %v4139_v52, %v3047_v50  ;;  %v3097_v49 = vsel %vm111_vm0, %v6436_v43, 0.0 }
 0x98e   :  { %v3106_v47 = vsel %vm111_vm0, %v6446_v54, 0.0 }
 0x98f   :  { %v3100_v28 = vsel %vm111_vm0, %v6442_v3, 0.0 }
 0x990   :  { %3098 = vadd.xlane.f32.xlu0 %v3097_v49  ;;  %3101 = vadd.xlane.f32.xlu1 %v3100_v28 }
 0x994   :  { %3104 = vadd.xlane.f32.xlu0 %v3103_v61  ;;  %3107 = vadd.xlane.f32.xlu1 %v3106_v47 }
 0xa03   :  { %v3063_v40 = vpop.xlane.xlu1 %3062 }
 0xa04   :  { %v3110_v1 = vmul.f32 0.03125, %v3063_v40 }
 0xa05   :  { %v3066_v42 = vpop.xlane.xlu0 %3065 }
 0xa06   :  { %v6457_v7 = vsub.f32 %v6392_v35, %v3110_v1  ;;  %v3111_v41 = vmul.f32 0.03125, %v3066_v42 }
 0xa07   :  { %v3072_v20 = vpop.xlane.xlu1 %3071 }
 0xa08   :  { %v6460_v48 = vsub.f32 %v6396_v34, %v3111_v41  ;;  %v3113_v31 = vmul.f32 0.03125, %v3072_v20  ;;  %v3142_v36 = vmul.f32 %v6457_v7, %v6457_v7 }
 0xa09   :  { %v3069_v6 = vpop.xlane.xlu0 %3068 }
 0xa0a   :  { %v6465_v44 = vsub.f32 %v6394_v62, %v3113_v31  ;;  %v3112_v4 = vmul.f32 0.03125, %v3069_v6  ;;  %v3158_v13 = vsel %vm111_vm0, %v3142_v36, 0.0  ;;  %v3143_v18 = vmul.f32 %v6460_v48, %v6460_v48 }
 0xa0b   :  { %3159 = vadd.xlane.f32.xlu0 %v3158_v13 }
 0xa0c   :  { %v6471_v17 = vsub.f32 %v6400_v55, %v3112_v4  ;;  %v3161_v52 = vsel %vm111_vm0, %v3143_v18, 0.0  ;;  %v3145_v11 = vmul.f32 %v6465_v44, %v6465_v44 }
 0xa0d   :  { %v3075_v14 = vpop.xlane.xlu0 %3074  ;;  %3162 = vadd.xlane.f32.xlu1 %v3161_v52  ;;  %v3078_v35 = vpop.xlane.xlu1 %3077 }
 0xa0e   :  { %v3114_v58 = vmul.f32 0.03125, %v3075_v14  ;;  %v3115_v56 = vmul.f32 0.03125, %v3078_v35  ;;  %v3144_v62 = vmul.f32 %v6471_v17, %v6471_v17  ;;  %v3167_v26 = vsel %vm111_vm0, %v3145_v11, 0.0 }
 0xa10   :  { %v6479_v34 = vsub.f32 %v6406_v10, %v3114_v58  ;;  %v6482_v9 = vsub.f32 %v6410_v45, %v3115_v56  ;;  %v3164_v55 = vsel %vm111_vm0, %v3144_v62, 0.0  ;;  %v4626_v62 = vld [vmem:[%s7168_s11 + $0x8] sm:$0xff]  }
 0xa11   :  { %v3081_v46 = vpop.xlane.xlu0 %3080  ;;  %3165 = vadd.xlane.f32.xlu0 %v3164_v55  ;;  %3168 = vadd.xlane.f32.xlu1 %v3167_v26  ;;  %v3084_v38 = vpop.xlane.xlu1 %3083 }
 0xa12   :  { %v3116_v27 = vmul.f32 0.03125, %v3081_v46  ;;  %v3117_v29 = vmul.f32 0.03125, %v3084_v38  ;;  %v3146_v63 = vmul.f32 %v6479_v34, %v6479_v34  ;;  %v3147_v10 = vmul.f32 %v6482_v9, %v6482_v9 }
 0xa14   :  { %v6491_v33 = vsub.f32 %v6412_v12, %v3116_v27  ;;  %v6494_v45 = vsub.f32 %v6414_v23, %v3117_v29  ;;  %v3170_v59 = vsel %vm111_vm0, %v3146_v63, 0.0  ;;  %v3173_v8 = vsel %vm111_vm0, %v3147_v10, 0.0 }
 0xa15   :  { %v3087_v19 = vpop.xlane.xlu0 %3086  ;;  %3171 = vadd.xlane.f32.xlu0 %v3170_v59  ;;  %3174 = vadd.xlane.f32.xlu1 %v3173_v8  ;;  %v3090_v57 = vpop.xlane.xlu1 %3089 }
 0xa16   :  { %v3118_v60 = vmul.f32 0.03125, %v3087_v19  ;;  %v3119_v16 = vmul.f32 0.03125, %v3090_v57  ;;  %v3148_v30 = vmul.f32 %v6491_v33, %v6491_v33  ;;  %v3149_v12 = vmul.f32 %v6494_v45, %v6494_v45 }
 0xa18   :  { %v6503_v22 = vsub.f32 %v6420_v39, %v3118_v60  ;;  %v6506_v23 = vsub.f32 %v6426_v51, %v3119_v16  ;;  %v3176_v53 = vsel %vm111_vm0, %v3148_v30, 0.0  ;;  %v3179_v2 = vsel %vm111_vm0, %v3149_v12, 0.0 }
 0xa19   :  { %v3093_v5 = vpop.xlane.xlu0 %3092  ;;  %3177 = vadd.xlane.f32.xlu0 %v3176_v53  ;;  %3180 = vadd.xlane.f32.xlu1 %v3179_v2  ;;  %v3096_v24 = vpop.xlane.xlu1 %3095 }
 0xa1a   :  { %v3120_v32 = vmul.f32 0.03125, %v3093_v5  ;;  %v3121_v15 = vmul.f32 0.03125, %v3096_v24  ;;  %v3150_v25 = vmul.f32 %v6503_v22, %v6503_v22  ;;  %v3151_v39 = vmul.f32 %v6506_v23, %v6506_v23 }
 0xa1c   :  { %v6515_v50 = vsub.f32 %v6428_v37, %v3120_v32  ;;  %v6518_v51 = vsub.f32 %v6430_v21, %v3121_v15  ;;  %v3182_v49 = vsel %vm111_vm0, %v3150_v25, 0.0  ;;  %v3185_v28 = vsel %vm111_vm0, %v3151_v39, 0.0  ;;  %v6561_v15 = vld [vmem:[%s7164_s7] ss:$0 sm:$0xff] }
 0xa1d   :  { %v3099_v61 = vpop.xlane.xlu0 %3098  ;;  %3183 = vadd.xlane.f32.xlu0 %v3182_v49  ;;  %3186 = vadd.xlane.f32.xlu1 %v3185_v28  ;;  %v3102_v47 = vpop.xlane.xlu1 %3101 }
 0xa1e   :  { %v3122_v40 = vmul.f32 0.03125, %v3099_v61  ;;  %v3123_v1 = vmul.f32 0.03125, %v3102_v47  ;;  %v3152_v42 = vmul.f32 %v6515_v50, %v6515_v50  ;;  %v3153_v37 = vmul.f32 %v6518_v51, %v6518_v51 }
 0xa20   :  { %v6527_v41 = vsub.f32 %v6436_v43, %v3122_v40  ;;  %v6530_v21 = vsub.f32 %v6442_v3, %v3123_v1  ;;  %v3188_v20 = vsel %vm111_vm0, %v3152_v42, 0.0  ;;  %v3191_v31 = vsel %vm111_vm0, %v3153_v37, 0.0  ;;  %v6567_v40 = vld [vmem:[%s7165_s8] ss:$0 sm:$0xff] }
 0xa21   :  { %v3105_v36 = vpop.xlane.xlu0 %3104  ;;  %3189 = vadd.xlane.f32.xlu0 %v3188_v20  ;;  %3192 = vadd.xlane.f32.xlu1 %v3191_v31  ;;  %v3108_v6 = vpop.xlane.xlu1 %3107 }
 0xa22   :  { %v3124_v4 = vmul.f32 0.03125, %v3105_v36  ;;  %v3125_v13 = vmul.f32 0.03125, %v3108_v6  ;;  %v3154_v18 = vmul.f32 %v6527_v41, %v6527_v41  ;;  %v3155_v43 = vmul.f32 %v6530_v21, %v6530_v21 }
 0xa24   :  { %v6539_v52 = vsub.f32 %v6444_v0, %v3124_v4  ;;  %v6542_v3 = vsub.f32 %v6446_v54, %v3125_v13  ;;  %v3194_v11 = vsel %vm111_vm0, %v3154_v18, 0.0  ;;  %v3197_v14 = vsel %vm111_vm0, %v3155_v43, 0.0  ;;  %v4625_v54 = vld [vmem:[%s7168_s11] sm:$0xff]  }
 0xa25   :  { %3195 = vadd.xlane.f32.xlu0 %v3194_v11  ;;  %3198 = vadd.xlane.f32.xlu1 %v3197_v14 }
 0xa26   :  { %v3156_v35 = vmul.f32 %v6539_v52, %v6539_v52  ;;  %v3157_v58 = vmul.f32 %v6542_v3, %v6542_v3  ;;  %4516 = vmatprep.subr.bf16.mxu1 %v4625_v54 }
 0xa27   :  { %4517 = vmatpush3.bf16.msra.mxu1 %v4625_v54 }
 0xa28   :  { %v3200_v56 = vsel %vm111_vm0, %v3156_v35, 0.0  ;;  %v3203_v0 = vsel %vm111_vm0, %v3157_v58, 0.0  ;;  %4518 = vmatprep.subr.bf16.mxu1 %v4626_v62 }
 0xa29   :  { %3201 = vadd.xlane.f32.xlu0 %v3200_v56  ;;  %3204 = vadd.xlane.f32.xlu1 %v3203_v0 }
 0xa2b   :  { %4519 = vmatpush3.bf16.msra.mxu1 %v4626_v62  ;;  %v4987_v62 = vld [vmem:[%s7157_s0] sm:$0xff] }
 0xa98   :  { %v3160_v55 = vpop.xlane.xlu0 %3159 }
 0xa99   :  { %v3206_v26 = vmul.f32 0.03125, %v3160_v55 }
 0xa9a   :  { %v3163_v46 = vpop.xlane.xlu1 %3162 }
 0xa9b   :  { %v3222_v38 = vadd.f32 1e-05, %v3206_v26  ;;  %v3207_v27 = vmul.f32 0.03125, %v3163_v46 }
 0xa9d   :  { %4891 = vrsqrt.f32 %v3222_v38  ;;  %v3223_v29 = vadd.f32 1e-05, %v3207_v27 }
 0xa9e   :  { %v3166_v63 = vpop.xlane.xlu0 %3165  ;;  %v3169_v10 = vpop.xlane.xlu1 %3168 }
 0xa9f   :  { %4893 = vrsqrt.f32 %v3223_v29  ;;  %v3208_v59 = vmul.f32 0.03125, %v3166_v63  ;;  %v3209_v8 = vmul.f32 0.03125, %v3169_v10 }
 0xaa1   :  { %v3224_v19 = vadd.f32 1e-05, %v3208_v59  ;;  %v3225_v57 = vadd.f32 1e-05, %v3209_v8 }
 0xaa2   :  { %v3172_v60 = vpop.xlane.xlu0 %3171  ;;  %v3175_v16 = vpop.xlane.xlu1 %3174 }
 0xaa3   :  { %4895 = vrsqrt.f32 %v3224_v19  ;;  %v3210_v30 = vmul.f32 0.03125, %v3172_v60  ;;  %v3211_v12 = vmul.f32 0.03125, %v3175_v16 }
 0xaa4   :  { %4897 = vrsqrt.f32 %v3225_v57 }
 0xaa5   :  { %v3226_v53 = vadd.f32 1e-05, %v3210_v30  ;;  %v3227_v2 = vadd.f32 1e-05, %v3211_v12 }
 0xaa6   :  { %v3178_v5 = vpop.xlane.xlu0 %3177  ;;  %v3181_v24 = vpop.xlane.xlu1 %3180 }
 0xaa7   :  { %v4892_v32 = vpop.eup %4891  ;;  %4899 = vrsqrt.f32 %v3226_v53  ;;  %v3212_v25 = vmul.f32 0.03125, %v3178_v5  ;;  %v3213_v39 = vmul.f32 0.03125, %v3181_v24 }
 0xaa8   :  { %v3254_v49 = vmul.f32 %v4892_v32, %v6457_v7  ;;  %4901 = vrsqrt.f32 %v3227_v2 }
 0xaa9   :  { %v4894_v28 = vpop.eup %4893  ;;  %v3228_v61 = vadd.f32 1e-05, %v3212_v25  ;;  %v3229_v47 = vadd.f32 1e-05, %v3213_v39 }
 0xaaa   :  { %v3255_v1 = vmul.f32 %v4894_v28, %v6460_v48  ;;  %v3184_v42 = vpop.xlane.xlu0 %3183  ;;  %v3187_v37 = vpop.xlane.xlu1 %3186  ;;  %v3276_v20 = vmul.f32 %v6561_v15, %v3254_v49  ;;  %v4990_v28 = vld [vmem:[%s7157_s0 + $0x18] sm:$0xff] }
 0xaab   :  { %4903 = vrsqrt.f32 %v3228_v61  ;;  %v3214_v31 = vmul.f32 0.03125, %v3184_v42  ;;  %v3215_v36 = vmul.f32 0.03125, %v3187_v37 }
 0xaac   :  { %4905 = vrsqrt.f32 %v3229_v47  ;;  %v3277_v7 = vmul.f32 %v6561_v15, %v3255_v1  ;;  %v3298_v6 = vadd.f32 %v6567_v40, %v3276_v20 }
 0xaad   :  { %v4896_v4 = vpop.eup %4895  ;;  %v3230_v13 = vadd.f32 1e-05, %v3214_v31  ;;  %v3231_v18 = vadd.f32 1e-05, %v3215_v36  ;;  %v4991_v31 = vld [vmem:[%s7157_s0 + $0x20] sm:$0xff] }
 0xaae   :  { %v4898_v43 = vpop.eup %4897  ;;  %v3256_v11 = vmul.f32 %v4896_v4, %v6471_v17  ;;  %v3190_v14 = vpop.xlane.xlu0 %3189  ;;  %v3299_v35 = vadd.f32 %v6567_v40, %v3277_v7  ;;  %v6580_v55 = vadd.f32 %v4987_v62, %v3298_v6  ;;  %v4988_v17 = vld [vmem:[%s7157_s0 + $0x8] sm:$0xff] }
 0xaaf   :  { %v3193_v48 = vpop.xlane.xlu1 %3192  ;;  %v3257_v58 = vmul.f32 %v4898_v43, %v6465_v44  ;;  %4907 = vrsqrt.f32 %v3230_v13  ;;  %v3216_v56 = vmul.f32 0.03125, %v3190_v14 }
 0xab0   :  { %v3217_v0 = vmul.f32 0.03125, %v3193_v48  ;;  %v3278_v54 = vmul.f32 %v6561_v15, %v3256_v11  ;;  %4909 = vrsqrt.f32 %v3231_v18  ;;  %v6585_v26 = vadd.f32 %v4988_v17, %v3299_v35  ;;  %v4992_v11 = vld [vmem:[%s7157_s0 + $0x28] sm:$0xff] }
 0xab1   :  { %v4900_v46 = vpop.eup %4899  ;;  %v3279_v44 = vmul.f32 %v6561_v15, %v3257_v58  ;;  %v3232_v38 = vadd.f32 1e-05, %v3216_v56 }
 0xab2   :  { %v3233_v27 = vadd.f32 1e-05, %v3217_v0  ;;  %v4902_v29 = vpop.eup %4901  ;;  %v3258_v63 = vmul.f32 %v4900_v46, %v6479_v34  ;;  %v3196_v10 = vpop.xlane.xlu0 %3195  ;;  %v3330_v8 = vpack.c.bf16 %v6585_v26, %v6580_v55  ;;  %v3300_v19 = vadd.f32 %v6567_v40, %v3278_v54  ;;  %v4989_v34 = vld [vmem:[%s7157_s0 + $0x10] sm:$0xff] }
 0xab3   :  { %v3199_v59 = vpop.xlane.xlu1 %3198  ;;  %v3259_v57 = vmul.f32 %v4902_v29, %v6482_v9  ;;  %4911 = vrsqrt.f32 %v3232_v38  ;;  %v3218_v60 = vmul.f32 0.03125, %v3196_v10  ;;  %v3301_v30 = vadd.f32 %v6567_v40, %v3279_v44  ;;  %v4993_v54 = vld [vmem:[%s7157_s0 + $0x30] sm:$0xff] }
 0xab4   :  { %v3219_v16 = vmul.f32 0.03125, %v3199_v59  ;;  %4913 = vrsqrt.f32 %v3233_v27  ;;  %4520 = vmatprep.mubr.msk.bf16.mxu1 %vm111_vm0, %v3330_v8  ;;  %v6598_v12 = vadd.f32 %v4989_v34, %v3300_v19  ;;  %v3280_v53 = vmul.f32 %v6561_v15, %v3258_v63  ;;  %v4995_v59 = vld [vmem:[%s7157_s0 + $0x40] sm:$0xff] }
 0xab5   :  { %v4904_v2 = vpop.eup %4903  ;;  %v3234_v5 = vadd.f32 1e-05, %v3218_v60  ;;  %v3281_v9 = vmul.f32 %v6561_v15, %v3259_v57  ;;  %v6606_v61 = vadd.f32 %v4990_v28, %v3301_v30  ;;  %v4996_v57 = vld [vmem:[%s7157_s0 + $0x48] sm:$0xff] }
 0xab6   :  { %v3235_v24 = vadd.f32 1e-05, %v3219_v16  ;;  %v4906_v32 = vpop.eup %4905  ;;  %v3260_v25 = vmul.f32 %v4904_v2, %v6491_v33  ;;  %v3202_v39 = vpop.xlane.xlu0 %3201  ;;  %v3302_v47 = vadd.f32 %v6567_v40, %v3280_v53 }
 0xab7   :  { %v3205_v49 = vpop.xlane.xlu1 %3204  ;;  %v3261_v1 = vmul.f32 %v4906_v32, %v6494_v45  ;;  %4915 = vrsqrt.f32 %v3234_v5  ;;  %v3220_v42 = vmul.f32 0.03125, %v3202_v39  ;;  %v3331_v20 = vpack.c.bf16 %v6606_v61, %v6598_v12 }
 0xab8   :  { %v3221_v37 = vmul.f32 0.03125, %v3205_v49  ;;  %4917 = vrsqrt.f32 %v3235_v24  ;;  %v3303_v33 = vadd.f32 %v6567_v40, %v3281_v9  ;;  %v6616_v36 = vadd.f32 %v4991_v31, %v3302_v47  ;;  %v4997_v24 = vld [vmem:[%s7157_s0 + $0x50] sm:$0xff] }
 0xab9   :  { %v4908_v7 = vpop.eup %4907  ;;  %v3236_v6 = vadd.f32 1e-05, %v3220_v42  ;;  %v3282_v45 = vmul.f32 %v6561_v15, %v3260_v25  ;;  %v3283_v13 = vmul.f32 %v6561_v15, %v3261_v1  ;;  %4521 = vmatmul.mubr.msk.bf16.vlgmr.msra.gmra.mrb[80].mxu1 %vm111_vm0, %v3331_v20  ;;  %v4999_v20 = vld [vmem:[%s7157_s0 + $0x60] sm:$0xff] }
 0xaba   :  { %v3237_v4 = vadd.f32 1e-05, %v3221_v37  ;;  %v4910_v18 = vpop.eup %4909  ;;  %v3262_v43 = vmul.f32 %v4908_v7, %v6503_v22  ;;  %v6625_v14 = vadd.f32 %v4992_v11, %v3303_v33 }
 0xabb   :  { %v3263_v48 = vmul.f32 %v4910_v18, %v6506_v23  ;;  %4919 = vrsqrt.f32 %v3236_v6  ;;  %v3304_v35 = vadd.f32 %v6567_v40, %v3282_v45  ;;  %v3305_v58 = vadd.f32 %v6567_v40, %v3283_v13  ;;  %v4994_v23 = vld [vmem:[%s7157_s0 + $0x38] sm:$0xff]  ;;  %v5001_v13 = vld [vmem:[%s7157_s0 + $0x70] sm:$0xff] }
 0xabc   :  { %4921 = vrsqrt.f32 %v3237_v4  ;;  %v3332_v56 = vpack.c.bf16 %v6625_v14, %v6616_v36  ;;  %v3284_v22 = vmul.f32 %v6561_v15, %v3262_v43 }
 0xabd   :  { %v4912_v0 = vpop.eup %4911  ;;  %v6636_v62 = vadd.f32 %v4993_v54, %v3304_v35  ;;  %v6641_v17 = vadd.f32 %v4994_v23, %v3305_v58  ;;  %v3285_v46 = vmul.f32 %v6561_v15, %v3263_v48  ;;  %v4628_v48 = vld [vmem:[%s7170_s13 + $0x8] sm:$0xff]   ;;  %v4629_v35 = vld [vmem:[%s7170_s13 + $0x10] sm:$0xff]   ;;  %v4630_v58 = vld [vmem:[%s7170_s13 + $0x18] sm:$0xff]  }
 0xabe   :  { %v4914_v44 = vpop.eup %4913  ;;  %v3264_v38 = vmul.f32 %v4912_v0, %v6515_v50  ;;  %4524 = vmatprep.mubr.msk.bf16.mxu1 %vm111_vm0, %v3332_v56  ;;  %v3306_v27 = vadd.f32 %v6567_v40, %v3284_v22  ;;  %v4631_v56 = vld [vmem:[%s7170_s13 + $0x20] sm:$0xff]   ;;  %v4632_v22 = vld [vmem:[%s7170_s13 + $0x28] sm:$0xff]   ;;  %v4633_v0 = vld [vmem:[%s7170_s13 + $0x30] sm:$0xff]  }
 0xabf   :  { %v3265_v29 = vmul.f32 %v4914_v44, %v6518_v51  ;;  %v3333_v63 = vpack.c.bf16 %v6641_v17, %v6636_v62  ;;  %v3307_v10 = vadd.f32 %v6567_v40, %v3285_v46  ;;  %v4634_v54 = vld [vmem:[%s7170_s13 + $0x38] sm:$0xff]   ;;  %v6747_v23 = vld [vmem:[%s7169_s12] ss:$0 sm:$0xff] }
 0xac0   :  { %v6654_v8 = vadd.f32 %v4995_v59, %v3306_v27  ;;  %v3286_v19 = vmul.f32 %v6561_v15, %v3264_v38 }
 0xac1   :  { %v4916_v50 = vpop.eup %4915  ;;  %v6660_v60 = vadd.f32 %v4996_v57, %v3307_v10  ;;  %v3287_v51 = vmul.f32 %v6561_v15, %v3265_v29  ;;  %4525 = vmatmul.mubr.msk.bf16.gmra.mrb[84].mxu1 %vm111_vm0, %v3333_v63 }
 0xac2   :  { %v4918_v16 = vpop.eup %4917  ;;  %v3266_v30 = vmul.f32 %v4916_v50, %v6527_v41  ;;  %v3308_v34 = vadd.f32 %v6567_v40, %v3286_v19 }
 0xac3   :  { %v3267_v53 = vmul.f32 %v4918_v16, %v6530_v21  ;;  %v3334_v2 = vpack.c.bf16 %v6660_v60, %v6654_v8  ;;  %v3309_v5 = vadd.f32 %v6567_v40, %v3287_v51  ;;  %v4998_v21 = vld [vmem:[%s7157_s0 + $0x58] sm:$0xff] }
 0xac4   :  { %v6673_v9 = vadd.f32 %v4997_v24, %v3308_v34  ;;  %v3288_v32 = vmul.f32 %v6561_v15, %v3266_v30 }
 0xac5   :  { %v4920_v41 = vpop.eup %4919  ;;  %4528 = vmatprep.mubr.msk.bf16.mxu1 %vm111_vm0, %v3334_v2  ;;  %v6680_v25 = vadd.f32 %v4998_v21, %v3309_v5  ;;  %v3289_v39 = vmul.f32 %v6561_v15, %v3267_v53 }
 0xac6   :  { %v4922_v49 = vpop.eup %4921  ;;  %v3268_v28 = vmul.f32 %v4920_v41, %v6539_v52  ;;  %v3310_v47 = vadd.f32 %v6567_v40, %v3288_v32  ;;  %v5000_v52 = vld [vmem:[%s7157_s0 + $0x68] sm:$0xff] }
 0xac7   :  { %v3269_v1 = vmul.f32 %v4922_v49, %v6542_v3  ;;  %v3335_v42 = vpack.c.bf16 %v6680_v25, %v6673_v9  ;;  %v3311_v37 = vadd.f32 %v6567_v40, %v3289_v39 }
 0xac8   :  { %v6692_v33 = vadd.f32 %v4999_v20, %v3310_v47  ;;  %v3290_v31 = vmul.f32 %v6561_v15, %v3268_v28 }
 0xac9   :  { %v6698_v7 = vadd.f32 %v5000_v52, %v3311_v37  ;;  %v3291_v3 = vmul.f32 %v6561_v15, %v3269_v1  ;;  %4529 = vmatmul.mubr.msk.bf16.gmra.mrb[88].mxu1 %vm111_vm0, %v3335_v42  ;;  %v5002_v15 = vld [vmem:[%s7157_s0 + $0x78] sm:$0xff] }
 0xaca   :  { %v3312_v6 = vadd.f32 %v6567_v40, %v3290_v31 }
 0xacb   :  { %v3336_v4 = vpack.c.bf16 %v6698_v7, %v6692_v33  ;;  %v3313_v45 = vadd.f32 %v6567_v40, %v3291_v3  ;;  %v4627_v40 = vld [vmem:[%s7170_s13] sm:$0xff]  }
 0xacc   :  { %v6709_v18 = vadd.f32 %v5001_v13, %v3312_v6  ;;  %4536 = vmatprep.subr.bf16.mxu0 %v4627_v40 }
 0xacd   :  { %4532 = vmatprep.mubr.msk.bf16.mxu1 %vm111_vm0, %v3336_v4  ;;  %v6715_v43 = vadd.f32 %v5002_v15, %v3313_v45  ;;  %4537 = vmatpush3.bf16.msra.mxu0 %v4627_v40 }
 0xace   :  { %4538 = vmatprep.subr.bf16.mxu0 %v4628_v48 }
 0xacf   :  { %v3337_v11 = vpack.c.bf16 %v6715_v43, %v6709_v18 }
 0xad1   :  { %4533 = vmatmul.mubr.msk.bf16.gmra.mrb[92].mxu1 %vm111_vm0, %v3337_v11  ;;  %4539 = vmatpush3.bf16.msra.mxu0 %v4628_v48 }
 0xad2   :  { %4540 = vmatprep.subr.bf16.mxu0 %v4629_v35 }
 0xad5   :  { %4541 = vmatpush3.bf16.msra.mxu0 %v4629_v35 }
 0xad6   :  { %4542 = vmatprep.subr.bf16.mxu0 %v4630_v58 }
 0xad9   :  { %4543 = vmatpush3.bf16.msra.mxu0 %v4630_v58 }
 0xada   :  { %4544 = vmatprep.subr.bf16.mxu0 %v4631_v56 }
 0xadd   :  { %4545 = vmatpush3.bf16.msra.mxu0 %v4631_v56 }
 0xade   :  { %4546 = vmatprep.subr.bf16.mxu0 %v4632_v22 }
 0xae1   :  { %4547 = vmatpush3.bf16.msra.mxu0 %v4632_v22 }
 0xae2   :  { %4548 = vmatprep.subr.bf16.mxu0 %v4633_v0 }
 0xae5   :  { %4549 = vmatpush3.bf16.msra.mxu0 %v4633_v0 }
 0xae6   :  { %4550 = vmatprep.subr.bf16.mxu0 %v4634_v54 }
 0xae9   :  { %4551 = vmatpush3.bf16.msra.mxu0 %v4634_v54 }
 0xb8c   :  { %v4522_v46 = vpop.f32.mrb[80].mxu1 }
 0xb8d   :  { %v3428_v44 = vadd.f32 %v4522_v46, %v6747_v23  ;;  %v3419_v38 = vpop.f32.mrb[81].mxu1 }
 0xb8e   :  { %v3420_v27 = vadd.f32 %v6747_v23, %v3419_v38  ;;  %v4523_v29 = vpop.f32.mrb[82].mxu1 }
 0xb8f   :  { %v3500_v63 = vmul.f32 %v3428_v44, %v3428_v44  ;;  %v3431_v10 = vadd.f32 %v4523_v29, %v6747_v23  ;;  %v3422_v59 = vpop.f32.mrb[83].mxu1  ;;  %v6753_v32 = vmul.f32 0.5, %v3428_v44 }
 0xb90   :  { %v3498_v19 = vmul.f32 %v3420_v27, %v3420_v27  ;;  %v3423_v50 = vadd.f32 %v6747_v23, %v3422_v59  ;;  %v6759_v37 = vmul.f32 0.5, %v3420_v27 }
 0xb91   :  { %v3516_v57 = vmul.f32 %v3500_v63, %v3428_v44  ;;  %v3501_v51 = vmul.f32 %v3431_v10, %v3431_v10  ;;  %v6770_v22 = vmul.f32 0.5, %v3431_v10 }
 0xb92   :  { %v3514_v16 = vmul.f32 %v3498_v19, %v3420_v27  ;;  %v3499_v30 = vmul.f32 %v3423_v50, %v3423_v50 }
 0xb93   :  { %v3532_v34 = vmul.f32 0.044715, %v3516_v57  ;;  %v3517_v53 = vmul.f32 %v3501_v51, %v3431_v10 }
 0xb94   :  { %v3530_v2 = vmul.f32 0.044715, %v3514_v16  ;;  %v3515_v5 = vmul.f32 %v3499_v30, %v3423_v50  ;;  %v4526_v24 = vpop.f32.mrb[84].mxu1 }
 0xb95   :  { %v3548_v41 = vadd.f32 %v3532_v34, %v3428_v44  ;;  %v3533_v21 = vmul.f32 0.044715, %v3517_v53  ;;  %v6756_v39 = vadd.f32 %v4526_v24, %v6747_v23  ;;  %v3435_v49 = vpop.f32.mrb[85].mxu1 }
 0xb96   :  { %v3546_v28 = vadd.f32 %v3530_v2, %v3420_v27  ;;  %v3531_v47 = vmul.f32 0.044715, %v3515_v5  ;;  %v3436_v1 = vadd.f32 %v6747_v23, %v3435_v49  ;;  %v4527_v42 = vpop.f32.mrb[86].mxu1  ;;  %v6773_v27 = vmul.f32 0.5, %v3423_v50 }
 0xb97   :  { %v3564_v20 = vmul.f32 0.7978846, %v3548_v41  ;;  %v3549_v31 = vadd.f32 %v3533_v21, %v3431_v10  ;;  %v3504_v52 = vmul.f32 %v6756_v39, %v6756_v39  ;;  %v6764_v3 = vadd.f32 %v4527_v42, %v6747_v23  ;;  %v3438_v6 = vpop.f32.mrb[87].mxu1 }
 0xb98   :  { %v3562_v4 = vmul.f32 0.7978846, %v3546_v28  ;;  %v3547_v45 = vadd.f32 %v3531_v47, %v3423_v50  ;;  %v3502_v13 = vmul.f32 %v3436_v1, %v3436_v1  ;;  %v3439_v15 = vadd.f32 %v6747_v23, %v3438_v6 }
 0xb99   :  { %4923 = vtanh.f32 %v3564_v20  ;;  %v3565_v11 = vmul.f32 0.7978846, %v3549_v31  ;;  %v3520_v40 = vmul.f32 %v3504_v52, %v6756_v39  ;;  %v3505_v48 = vmul.f32 %v6764_v3, %v6764_v3 }
 0xb9a   :  { %4925 = vtanh.f32 %v3562_v4  ;;  %v3563_v35 = vmul.f32 0.7978846, %v3547_v45  ;;  %v3518_v58 = vmul.f32 %v3502_v13, %v3436_v1  ;;  %v3503_v56 = vmul.f32 %v3439_v15, %v3439_v15 }
 0xb9b   :  { %4927 = vtanh.f32 %v3565_v11  ;;  %v3536_v0 = vmul.f32 0.044715, %v3520_v40  ;;  %v3521_v54 = vmul.f32 %v3505_v48, %v6764_v3  ;;  %v6775_v29 = vmul.f32 0.5, %v3436_v1 }
 0xb9c   :  { %v3534_v46 = vmul.f32 0.044715, %v3518_v58  ;;  %v3519_v44 = vmul.f32 %v3503_v56, %v3439_v15  ;;  %v4530_v38 = vpop.f32.mrb[88].mxu1  ;;  %4929 = vtanh.f32 %v3563_v35  ;;  %v6784_v34 = vmul.f32 0.5, %v3439_v15 }
 0xb9d   :  { %v3552_v63 = vadd.f32 %v3536_v0, %v6756_v39  ;;  %v3537_v59 = vmul.f32 0.044715, %v3521_v54  ;;  %v6779_v19 = vadd.f32 %v4530_v38, %v6747_v23  ;;  %v3451_v10 = vpop.f32.mrb[89].mxu1  ;;  %v6805_v13 = vmul.f32 0.5, %v6756_v39 }
 0xb9e   :  { %v3550_v57 = vadd.f32 %v3534_v46, %v3436_v1  ;;  %v3535_v51 = vmul.f32 0.044715, %v3519_v44  ;;  %v6782_v16 = vadd.f32 %v6747_v23, %v3451_v10  ;;  %v4531_v30 = vpop.f32.mrb[90].mxu1 }
 0xb9f   :  { %v3568_v50 = vmul.f32 0.7978846, %v3552_v63  ;;  %v3553_v53 = vadd.f32 %v3537_v59, %v6764_v3  ;;  %v3508_v2 = vmul.f32 %v6779_v19, %v6779_v19  ;;  %v6790_v5 = vadd.f32 %v4531_v30, %v6747_v23  ;;  %v3454_v24 = vpop.f32.mrb[91].mxu1 }
 0xba0   :  { %v3566_v41 = vmul.f32 0.7978846, %v3550_v57  ;;  %v3551_v21 = vadd.f32 %v3535_v51, %v3439_v15  ;;  %v3506_v49 = vmul.f32 %v6782_v16, %v6782_v16  ;;  %v6795_v28 = vadd.f32 %v6747_v23, %v3454_v24 }
 0xba1   :  { %4931 = vtanh.f32 %v3568_v50  ;;  %v3569_v47 = vmul.f32 0.7978846, %v3553_v53  ;;  %v3524_v1 = vmul.f32 %v3508_v2, %v6779_v19  ;;  %v3509_v42 = vmul.f32 %v6790_v5, %v6790_v5 }
 0xba2   :  { %4933 = vtanh.f32 %v3566_v41  ;;  %v3567_v20 = vmul.f32 0.7978846, %v3551_v21  ;;  %v3522_v31 = vmul.f32 %v3506_v49, %v6782_v16  ;;  %v3507_v52 = vmul.f32 %v6795_v28, %v6795_v28 }
 0xba3   :  { %v4924_v6 = vpop.eup %4923  ;;  %4935 = vtanh.f32 %v3569_v47  ;;  %v3540_v4 = vmul.f32 0.044715, %v3524_v1  ;;  %v3525_v45 = vmul.f32 %v3509_v42, %v6790_v5 }
 0xba4   :  { %v4926_v15 = vpop.eup %4925  ;;  %v3596_v11 = vadd.f32 1.0, %v4924_v6  ;;  %4937 = vtanh.f32 %v3567_v20  ;;  %v3538_v40 = vmul.f32 0.044715, %v3522_v31  ;;  %v3523_v48 = vmul.f32 %v3507_v52, %v6795_v28  ;;  %v4534_v35 = vpop.f32.mrb[92].mxu1 }
 0xba5   :  { %v4928_v58 = vpop.eup %4927  ;;  %v3556_v56 = vadd.f32 %v3540_v4, %v6779_v19  ;;  %v3541_v0 = vmul.f32 0.044715, %v3525_v45  ;;  %v6810_v54 = vadd.f32 %v4534_v35, %v6747_v23  ;;  %v3467_v46 = vpop.f32.mrb[93].mxu1  ;;  %v3594_v44 = vadd.f32 1.0, %v4926_v15 }
 0xba6   :  { %v3612_v38 = vmul.f32 %v3596_v11, %v6753_v32  ;;  %v3597_v39 = vadd.f32 1.0, %v4928_v58  ;;  %v3554_v63 = vadd.f32 %v3538_v40, %v6782_v16  ;;  %v3539_v59 = vmul.f32 0.044715, %v3523_v48  ;;  %v4535_v10 = vpop.f32.mrb[94].mxu1  ;;  %v4930_v57 = vpop.eup %4929 }
 0xba7   :  { %v3572_v51 = vmul.f32 0.7978846, %v3556_v56  ;;  %v3557_v30 = vadd.f32 %v3541_v0, %v6790_v5  ;;  %v3512_v50 = vmul.f32 %v6810_v54, %v6810_v54  ;;  %v6818_v53 = vadd.f32 %v6747_v23, %v3467_v46  ;;  %v3470_v2 = vpop.f32.mrb[95].mxu1 }
 0xba8   :  { %v3613_v24 = vmul.f32 %v3597_v39, %v6770_v22  ;;  %v3570_v41 = vmul.f32 0.7978846, %v3554_v63  ;;  %v3555_v32 = vadd.f32 %v3539_v59, %v6795_v28  ;;  %v6823_v21 = vadd.f32 %v4535_v10, %v6747_v23 }
 0xba9   :  { %4939 = vtanh.f32 %v3572_v51  ;;  %v3573_v49 = vmul.f32 0.7978846, %v3557_v30  ;;  %v3528_v47 = vmul.f32 %v3512_v50, %v6810_v54  ;;  %v3510_v1 = vmul.f32 %v6818_v53, %v6818_v53 }
 0xbaa   :  { %4941 = vtanh.f32 %v3570_v41  ;;  %v3571_v42 = vmul.f32 0.7978846, %v3555_v32  ;;  %v3513_v20 = vmul.f32 %v6823_v21, %v6823_v21  ;;  %v6831_v22 = vadd.f32 %v6747_v23, %v3470_v2 }
 0xbab   :  { %v4932_v31 = vpop.eup %4931  ;;  %4943 = vtanh.f32 %v3573_v49  ;;  %v3544_v52 = vmul.f32 0.044715, %v3528_v47  ;;  %v3526_v6 = vmul.f32 %v3510_v1, %v6818_v53  ;;  %v3595_v4 = vadd.f32 1.0, %v4930_v57 }
 0xbac   :  { %v4934_v45 = vpop.eup %4933  ;;  %4945 = vtanh.f32 %v3571_v42  ;;  %v3529_v15 = vmul.f32 %v3513_v20, %v6823_v21  ;;  %v3511_v11 = vmul.f32 %v6831_v22, %v6831_v22  ;;  %v3610_v40 = vmul.f32 %v3594_v44, %v6759_v37 }
 0xbad   :  { %v4936_v48 = vpop.eup %4935  ;;  %v3560_v35 = vadd.f32 %v3544_v52, %v6810_v54  ;;  %v3542_v23 = vmul.f32 0.044715, %v3526_v6  ;;  %v3611_v58 = vmul.f32 %v3595_v4, %v6773_v27  ;;  %v3627_v56 = vpack.c.bf16 %v3613_v24, %v3612_v38 }
 0xbae   :  { %v4938_v0 = vpop.eup %4937  ;;  %v3545_v46 = vmul.f32 0.044715, %v3529_v15  ;;  %v3527_v39 = vmul.f32 %v3511_v11, %v6831_v22  ;;  %v3598_v63 = vadd.f32 1.0, %v4934_v45  ;;  %v3600_v59 = vadd.f32 1.0, %v4932_v31 }
 0xbaf   :  { %v3576_v10 = vmul.f32 0.7978846, %v3560_v35  ;;  %v3558_v57 = vadd.f32 %v3542_v23, %v6818_v53  ;;  %v3626_v51 = vpack.c.bf16 %v3611_v58, %v3610_v40  ;;  %v3599_v30 = vadd.f32 1.0, %v4938_v0 }
 0xbb0   :  { %v3561_v37 = vadd.f32 %v3545_v46, %v6823_v21  ;;  %v3543_v44 = vmul.f32 0.044715, %v3527_v39  ;;  %v3489_v50 = vmul.f32 0.5, %v6764_v3  ;;  %v3601_v2 = vadd.f32 1.0, %v4936_v48 }
 0xbb1   :  { %4947 = vtanh.f32 %v3576_v10  ;;  %v3574_v27 = vmul.f32 0.7978846, %v3558_v57  ;;  %4552 = vmatprep.mubr.bf16.mxu0 %v3626_v51  ;;  %v3614_v38 = vmul.f32 %v3598_v63, %v6775_v29  ;;  %v3615_v24 = vmul.f32 %v3599_v30, %v6784_v34 }
 0xbb2   :  { %v3577_v41 = vmul.f32 0.7978846, %v3561_v37  ;;  %v3559_v32 = vadd.f32 %v3543_v44, %v6831_v22  ;;  %4553 = vmatmul.mubr.bf16.vlgmr.msra.gmra.mrb[80].mxu0 %v3627_v56  ;;  %v3616_v49 = vmul.f32 %v3600_v59, %v6805_v13  ;;  %v3617_v47 = vmul.f32 %v3601_v2, %v3489_v50 }
 0xbb3   :  { %v4940_v1 = vpop.eup %4939  ;;  %4949 = vtanh.f32 %v3574_v27  ;;  %v3628_v42 = vpack.c.bf16 %v3615_v24, %v3614_v38  ;;  %v3492_v34 = vmul.f32 0.5, %v6779_v19  ;;  %v3493_v45 = vmul.f32 0.5, %v6790_v5 }
 0xbb4   :  { %v4942_v20 = vpop.eup %4941  ;;  %4951 = vtanh.f32 %v3577_v41  ;;  %v3575_v3 = vmul.f32 0.7978846, %v3559_v32  ;;  %v3629_v31 = vpack.c.bf16 %v3617_v47, %v3616_v49  ;;  %v3604_v52 = vadd.f32 1.0, %v4940_v1 }
 0xbb5   :  { %v4944_v6 = vpop.eup %4943  ;;  %4556 = vmatprep.mubr.bf16.mxu0 %v3628_v42  ;;  %v3602_v29 = vadd.f32 1.0, %v4942_v20  ;;  %v3490_v13 = vmul.f32 0.5, %v6782_v16  ;;  %v3491_v11 = vmul.f32 0.5, %v6795_v28  ;;  %v3496_v5 = vmul.f32 0.5, %v6810_v54  ;;  %v4163_v54 = vld [vmem:[%s7171_s14] ss:$0 sm:$0xff] }
 0xbb6   :  { %v4946_v4 = vpop.eup %4945  ;;  %4953 = vtanh.f32 %v3575_v3  ;;  %v3605_v15 = vadd.f32 1.0, %v4944_v6  ;;  %v3620_v48 = vmul.f32 %v3604_v52, %v3492_v34  ;;  %v3497_v16 = vmul.f32 0.5, %v6823_v21 }
 0xbb7   :  { %v3603_v40 = vadd.f32 1.0, %v4946_v4  ;;  %v3618_v23 = vmul.f32 %v3602_v29, %v3490_v13  ;;  %v3494_v57 = vmul.f32 0.5, %v6818_v53  ;;  %v3495_v51 = vmul.f32 0.5, %v6831_v22 }
 0xbb8   :  { %v3621_v35 = vmul.f32 %v3605_v15, %v3493_v45 }
 0xbb9   :  { %v3619_v58 = vmul.f32 %v3603_v40, %v3491_v11 }
 0xbba   :  { %4557 = vmatmul.mubr.bf16.gmra.mrb[84].mxu0 %v3629_v31  ;;  %v3631_v56 = vpack.c.bf16 %v3621_v35, %v3620_v48 }
 0xbbb   :  { %v4948_v0 = vpop.eup %4947  ;;  %v3630_v46 = vpack.c.bf16 %v3619_v58, %v3618_v23 }
 0xbbc   :  { %v3608_v63 = vadd.f32 1.0, %v4948_v0 }
 0xbbd   :  { %v4950_v39 = vpop.eup %4949  ;;  %4560 = vmatprep.mubr.bf16.mxu0 %v3630_v46 }
 0xbbe   :  { %v4952_v19 = vpop.eup %4951  ;;  %v3606_v59 = vadd.f32 1.0, %v4950_v39  ;;  %v3624_v37 = vmul.f32 %v3608_v63, %v3496_v5 }
 0xbbf   :  { %v3609_v10 = vadd.f32 1.0, %v4952_v19 }
 0xbc0   :  { %v4954_v28 = vpop.eup %4953  ;;  %v3622_v50 = vmul.f32 %v3606_v59, %v3494_v57 }
 0xbc1   :  { %v3607_v30 = vadd.f32 1.0, %v4954_v28  ;;  %v3625_v44 = vmul.f32 %v3609_v10, %v3497_v16 }
 0xbc2   :  { %4561 = vmatmul.mubr.bf16.gmra.mrb[88].mxu0 %v3631_v56 }
 0xbc3   :  { %v3623_v2 = vmul.f32 %v3607_v30, %v3495_v51  ;;  %v3633_v27 = vpack.c.bf16 %v3625_v44, %v3624_v37 }
 0xbc5   :  { %v3632_v38 = vpack.c.bf16 %v3623_v2, %v3622_v50 }
 0xbc7   :  { %4564 = vmatprep.mubr.bf16.mxu0 %v3632_v38 }
 0xbca   :  { %4565 = vmatmul.mubr.bf16.gmra.mrb[92].mxu0 %v3633_v27 }
 0xc85   :  { %v4554_v21 = vpop.f32.mrb[80].mxu0 }
 0xc86   :  { %v6859_v24 = vadd.f32 %v4554_v21, %v4163_v54  ;;  %v3739_v53 = vpop.f32.mrb[81].mxu0 }
 0xc87   :  { %v4555_v41 = vpop.f32.mrb[82].mxu0  ;;  %v6861_v22 = vadd.f32 %v4163_v54, %v3739_v53 }
 0xc88   :  { %v6863_v32 = vadd.f32 %v4555_v41, %v4163_v54  ;;  %v3742_v49 = vpop.f32.mrb[83].mxu0  ;;  %v3810_v47 = vsel %vm111_vm0, %v6859_v24, 0.0 }
 0xc89   :  { %3811 = vadd.xlane.f32.xlu0 %v3810_v47  ;;  %v6867_v1 = vadd.f32 %v4163_v54, %v3742_v49  ;;  %v3804_v20 = vsel %vm111_vm0, %v6861_v22, 0.0 }
 0xc8a   :  { %v3813_v42 = vsel %vm111_vm0, %v6863_v32, 0.0 }
 0xc8b   :  { %3814 = vadd.xlane.f32.xlu1 %v3813_v42  ;;  %v3807_v6 = vsel %vm111_vm0, %v6867_v1, 0.0 }
 0xc8d   :  { %3805 = vadd.xlane.f32.xlu0 %v3804_v20  ;;  %v4558_v3 = vpop.f32.mrb[84].mxu0 }
 0xc8e   :  { %v6873_v31 = vadd.f32 %v4558_v3, %v4163_v54  ;;  %v3755_v52 = vpop.f32.mrb[85].mxu0 }
 0xc8f   :  { %3808 = vadd.xlane.f32.xlu1 %v3807_v6  ;;  %v4559_v29 = vpop.f32.mrb[86].mxu0  ;;  %v6877_v4 = vadd.f32 %v4163_v54, %v3755_v52 }
 0xc90   :  { %v6879_v34 = vadd.f32 %v4559_v29, %v4163_v54  ;;  %v3758_v45 = vpop.f32.mrb[87].mxu0  ;;  %v3822_v15 = vsel %vm111_vm0, %v6873_v31, 0.0 }
 0xc91   :  { %3823 = vadd.xlane.f32.xlu0 %v3822_v15  ;;  %v6883_v13 = vadd.f32 %v4163_v54, %v3758_v45  ;;  %v3816_v40 = vsel %vm111_vm0, %v6877_v4, 0.0 }
 0xc92   :  { %v3825_v11 = vsel %vm111_vm0, %v6879_v34, 0.0 }
 0xc93   :  { %3826 = vadd.xlane.f32.xlu1 %v3825_v11  ;;  %v3819_v58 = vsel %vm111_vm0, %v6883_v13, 0.0 }
 0xc95   :  { %3817 = vadd.xlane.f32.xlu0 %v3816_v40  ;;  %v4562_v48 = vpop.f32.mrb[88].mxu0 }
 0xc96   :  { %v6889_v35 = vadd.f32 %v4562_v48, %v4163_v54  ;;  %v3771_v23 = vpop.f32.mrb[89].mxu0 }
 0xc97   :  { %3820 = vadd.xlane.f32.xlu1 %v3819_v58  ;;  %v4563_v56 = vpop.f32.mrb[90].mxu0  ;;  %v6893_v0 = vadd.f32 %v4163_v54, %v3771_v23 }
 0xc98   :  { %v6895_v46 = vadd.f32 %v4563_v56, %v4163_v54  ;;  %v3774_v39 = vpop.f32.mrb[91].mxu0  ;;  %v3834_v63 = vsel %vm111_vm0, %v6889_v35, 0.0 }
 0xc99   :  { %3835 = vadd.xlane.f32.xlu0 %v3834_v63  ;;  %v6899_v19 = vadd.f32 %v4163_v54, %v3774_v39  ;;  %v3828_v5 = vsel %vm111_vm0, %v6893_v0, 0.0 }
 0xc9a   :  { %v3837_v59 = vsel %vm111_vm0, %v6895_v46, 0.0 }
 0xc9b   :  { %3838 = vadd.xlane.f32.xlu1 %v3837_v59  ;;  %v3831_v28 = vsel %vm111_vm0, %v6899_v19, 0.0 }
 0xc9d   :  { %3829 = vadd.xlane.f32.xlu0 %v3828_v5  ;;  %v4566_v16 = vpop.f32.mrb[92].mxu0 }
 0xc9e   :  { %v3787_v10 = vpop.f32.mrb[93].mxu0  ;;  %v6909_v37 = vadd.f32 %v4566_v16, %v4163_v54 }
 0xc9f   :  { %v6907_v57 = vadd.f32 %v4163_v54, %v3787_v10  ;;  %3832 = vadd.xlane.f32.xlu1 %v3831_v28  ;;  %v4567_v51 = vpop.f32.mrb[94].mxu0 }
 0xca0   :  { %v3790_v30 = vpop.f32.mrb[95].mxu0  ;;  %v6915_v2 = vadd.f32 %v4567_v51, %v4163_v54  ;;  %v3846_v38 = vsel %vm111_vm0, %v6909_v37, 0.0 }
 0xca1   :  { %v6911_v44 = vadd.f32 %v4163_v54, %v3790_v30  ;;  %v3840_v50 = vsel %vm111_vm0, %v6907_v57, 0.0 }
 0xca2   :  { %3841 = vadd.xlane.f32.xlu0 %v3840_v50  ;;  %v3849_v21 = vsel %vm111_vm0, %v6915_v2, 0.0 }
 0xca3   :  { %v3843_v27 = vsel %vm111_vm0, %v6911_v44, 0.0 }
 0xca4   :  { %3844 = vadd.xlane.f32.xlu1 %v3843_v27 }
 0xca6   :  { %3847 = vadd.xlane.f32.xlu0 %v3846_v38 }
 0xca8   :  { %3850 = vadd.xlane.f32.xlu1 %v3849_v21 }
 0xd16   :  { %v3812_v53 = vpop.xlane.xlu0 %3811 }
 0xd17   :  { %v3854_v41 = vmul.f32 0.03125, %v3812_v53 }
 0xd18   :  { %v3815_v49 = vpop.xlane.xlu1 %3814 }
 0xd19   :  { %v6924_v47 = vsub.f32 %v6859_v24, %v3854_v41  ;;  %v3855_v54 = vmul.f32 0.03125, %v3815_v49 }
 0xd1a   :  { %v3806_v42 = vpop.xlane.xlu0 %3805 }
 0xd1b   :  { %v6927_v20 = vsub.f32 %v6863_v32, %v3855_v54  ;;  %v3852_v3 = vmul.f32 0.03125, %v3806_v42  ;;  %v3886_v52 = vmul.f32 %v6924_v47, %v6924_v47 }
 0xd1c   :  { %v3809_v6 = vpop.xlane.xlu1 %3808 }
 0xd1d   :  { %v6932_v29 = vsub.f32 %v6861_v22, %v3852_v3  ;;  %v3853_v45 = vmul.f32 0.03125, %v3809_v6  ;;  %v3906_v15 = vsel %vm111_vm0, %v3886_v52, 0.0  ;;  %v3887_v24 = vmul.f32 %v6927_v20, %v6927_v20 }
 0xd1e   :  { %v3824_v11 = vpop.xlane.xlu0 %3823  ;;  %3907 = vadd.xlane.f32.xlu0 %v3906_v15 }
 0xd1f   :  { %v6938_v40 = vsub.f32 %v6867_v1, %v3853_v45  ;;  %v3858_v32 = vmul.f32 0.03125, %v3824_v11  ;;  %v3909_v48 = vsel %vm111_vm0, %v3887_v24, 0.0  ;;  %v3884_v23 = vmul.f32 %v6932_v29, %v6932_v29 }
 0xd20   :  { %3910 = vadd.xlane.f32.xlu1 %v3909_v48  ;;  %v3827_v22 = vpop.xlane.xlu1 %3826 }
 0xd21   :  { %v6944_v58 = vsub.f32 %v6873_v31, %v3858_v32  ;;  %v3859_v56 = vmul.f32 0.03125, %v3827_v22  ;;  %v3900_v39 = vsel %vm111_vm0, %v3884_v23, 0.0  ;;  %v3885_v63 = vmul.f32 %v6938_v40, %v6938_v40 }
 0xd22   :  { %v3818_v59 = vpop.xlane.xlu0 %3817  ;;  %3901 = vadd.xlane.f32.xlu0 %v3900_v39 }
 0xd23   :  { %v6950_v1 = vsub.f32 %v6879_v34, %v3859_v56  ;;  %v3856_v5 = vmul.f32 0.03125, %v3818_v59  ;;  %v3903_v16 = vsel %vm111_vm0, %v3885_v63, 0.0  ;;  %v3890_v10 = vmul.f32 %v6944_v58, %v6944_v58 }
 0xd24   :  { %3904 = vadd.xlane.f32.xlu1 %v3903_v16  ;;  %v3821_v31 = vpop.xlane.xlu1 %3820 }
 0xd25   :  { %v6956_v28 = vsub.f32 %v6877_v4, %v3856_v5  ;;  %v3857_v51 = vmul.f32 0.03125, %v3821_v31  ;;  %v3918_v30 = vsel %vm111_vm0, %v3890_v10, 0.0  ;;  %v3891_v50 = vmul.f32 %v6950_v1, %v6950_v1 }
 0xd26   :  { %v3836_v27 = vpop.xlane.xlu0 %3835  ;;  %3919 = vadd.xlane.f32.xlu0 %v3918_v30 }
 0xd27   :  { %v6962_v34 = vsub.f32 %v6883_v13, %v3857_v51  ;;  %v3862_v38 = vmul.f32 0.03125, %v3836_v27  ;;  %v3921_v21 = vsel %vm111_vm0, %v3891_v50, 0.0  ;;  %v3888_v53 = vmul.f32 %v6956_v28, %v6956_v28 }
 0xd28   :  { %3922 = vadd.xlane.f32.xlu1 %v3921_v21  ;;  %v3839_v4 = vpop.xlane.xlu1 %3838 }
 0xd29   :  { %v6968_v41 = vsub.f32 %v6889_v35, %v3862_v38  ;;  %v3863_v49 = vmul.f32 0.03125, %v3839_v4  ;;  %v3912_v54 = vsel %vm111_vm0, %v3888_v53, 0.0  ;;  %v3889_v42 = vmul.f32 %v6962_v34, %v6962_v34 }
 0xd2a   :  { %v3830_v3 = vpop.xlane.xlu0 %3829  ;;  %3913 = vadd.xlane.f32.xlu0 %v3912_v54 }
 0xd2b   :  { %v6974_v13 = vsub.f32 %v6895_v46, %v3863_v49  ;;  %v3860_v52 = vmul.f32 0.03125, %v3830_v3  ;;  %v3915_v6 = vsel %vm111_vm0, %v3889_v42, 0.0  ;;  %v3894_v45 = vmul.f32 %v6968_v41, %v6968_v41 }
 0xd2c   :  { %3916 = vadd.xlane.f32.xlu1 %v3915_v6  ;;  %v3833_v35 = vpop.xlane.xlu1 %3832 }
 0xd2d   :  { %v6980_v15 = vsub.f32 %v6893_v0, %v3860_v52  ;;  %v3861_v24 = vmul.f32 0.03125, %v3833_v35  ;;  %v3930_v11 = vsel %vm111_vm0, %v3894_v45, 0.0  ;;  %v3895_v32 = vmul.f32 %v6974_v13, %v6974_v13 }
 0xd2e   :  { %3931 = vadd.xlane.f32.xlu0 %v3930_v11 }
 0xd2f   :  { %v6986_v46 = vsub.f32 %v6899_v19, %v3861_v24  ;;  %v3842_v48 = vpop.xlane.xlu0 %3841  ;;  %v3933_v23 = vsel %vm111_vm0, %v3895_v32, 0.0  ;;  %v3892_v22 = vmul.f32 %v6980_v15, %v6980_v15 }
 0xd30   :  { %v3864_v56 = vmul.f32 0.03125, %v3842_v48  ;;  %3934 = vadd.xlane.f32.xlu1 %v3933_v23 }
 0xd31   :  { %v3845_v0 = vpop.xlane.xlu1 %3844  ;;  %v3924_v39 = vsel %vm111_vm0, %v3892_v22, 0.0  ;;  %v3893_v63 = vmul.f32 %v6986_v46, %v6986_v46 }
 0xd32   :  { %v6995_v59 = vsub.f32 %v6907_v57, %v3864_v56  ;;  %v3865_v5 = vmul.f32 0.03125, %v3845_v0  ;;  %3925 = vadd.xlane.f32.xlu0 %v3924_v39 }
 0xd33   :  { %v3848_v19 = vpop.xlane.xlu0 %3847  ;;  %v3927_v16 = vsel %vm111_vm0, %v3893_v63, 0.0 }
 0xd34   :  { %v6999_v10 = vsub.f32 %v6911_v44, %v3865_v5  ;;  %v3866_v31 = vmul.f32 0.03125, %v3848_v19  ;;  %3928 = vadd.xlane.f32.xlu1 %v3927_v16  ;;  %v3896_v51 = vmul.f32 %v6995_v59, %v6995_v59 }
 0xd35   :  { %v3851_v30 = vpop.xlane.xlu1 %3850 }
 0xd36   :  { %v7004_v50 = vsub.f32 %v6909_v37, %v3866_v31  ;;  %v3867_v27 = vmul.f32 0.03125, %v3851_v30  ;;  %v3936_v57 = vsel %vm111_vm0, %v3896_v51, 0.0  ;;  %v3897_v38 = vmul.f32 %v6999_v10, %v6999_v10  ;;  %v7022_v51 = vld [vmem:[%s7166_s9] ss:$0 sm:$0xff] }
 0xd37   :  { %3937 = vadd.xlane.f32.xlu0 %v3936_v57 }
 0xd38   :  { %v7010_v21 = vsub.f32 %v6915_v2, %v3867_v27  ;;  %v3939_v44 = vsel %vm111_vm0, %v3897_v38, 0.0  ;;  %v3898_v53 = vmul.f32 %v7004_v50, %v7004_v50 }
 0xd39   :  { %3940 = vadd.xlane.f32.xlu1 %v3939_v44 }
 0xd3a   :  { %v3942_v4 = vsel %vm111_vm0, %v3898_v53, 0.0  ;;  %v3899_v37 = vmul.f32 %v7010_v21, %v7010_v21  ;;  %v7028_v53 = vld [vmem:[%s7167_s10] ss:$0 sm:$0xff] }
 0xd3b   :  { %3943 = vadd.xlane.f32.xlu0 %v3942_v4 }
 0xd3c   :  { %v3945_v49 = vsel %vm111_vm0, %v3899_v37, 0.0 }
 0xd3d   :  { %3946 = vadd.xlane.f32.xlu1 %v3945_v49 }
 0xdab   :  { %v3908_v54 = vpop.xlane.xlu0 %3907 }
 0xdac   :  { %v3950_v42 = vmul.f32 0.03125, %v3908_v54 }
 0xdad   :  { %v3911_v3 = vpop.xlane.xlu1 %3910 }
 0xdae   :  { %v3966_v2 = vadd.f32 1e-05, %v3950_v42  ;;  %v3951_v52 = vmul.f32 0.03125, %v3911_v3 }
 0xdaf   :  { %v3902_v6 = vpop.xlane.xlu0 %3901 }
 0xdb0   :  { %4955 = vrsqrt.f32 %v3966_v2  ;;  %v3967_v45 = vadd.f32 1e-05, %v3951_v52  ;;  %v3948_v35 = vmul.f32 0.03125, %v3902_v6 }
 0xdb1   :  { %v3905_v24 = vpop.xlane.xlu1 %3904 }
 0xdb2   :  { %4957 = vrsqrt.f32 %v3967_v45  ;;  %v3964_v11 = vadd.f32 1e-05, %v3948_v35  ;;  %v3949_v32 = vmul.f32 0.03125, %v3905_v24 }
 0xdb3   :  { %v3920_v48 = vpop.xlane.xlu0 %3919 }
 0xdb4   :  { %4959 = vrsqrt.f32 %v3964_v11  ;;  %v3965_v23 = vadd.f32 1e-05, %v3949_v32  ;;  %v3954_v22 = vmul.f32 0.03125, %v3920_v48 }
 0xdb5   :  { %v3923_v56 = vpop.xlane.xlu1 %3922 }
 0xdb6   :  { %4961 = vrsqrt.f32 %v3965_v23  ;;  %v3970_v0 = vadd.f32 1e-05, %v3954_v22  ;;  %v3955_v39 = vmul.f32 0.03125, %v3923_v56 }
 0xdb7   :  { %v3914_v63 = vpop.xlane.xlu0 %3913 }
 0xdb8   :  { %4963 = vrsqrt.f32 %v3970_v0  ;;  %v3971_v5 = vadd.f32 1e-05, %v3955_v39  ;;  %v3952_v19 = vmul.f32 0.03125, %v3914_v63 }
 0xdb9   :  { %v3917_v16 = vpop.xlane.xlu1 %3916 }
 0xdba   :  { %v4956_v31 = vpop.eup %4955  ;;  %4965 = vrsqrt.f32 %v3971_v5  ;;  %v3968_v30 = vadd.f32 1e-05, %v3952_v19  ;;  %v3953_v27 = vmul.f32 0.03125, %v3917_v16 }
 0xdbb   :  { %v3998_v57 = vmul.f32 %v4956_v31, %v6924_v47  ;;  %v3932_v38 = vpop.xlane.xlu0 %3931 }
 0xdbc   :  { %v4958_v44 = vpop.eup %4957  ;;  %4967 = vrsqrt.f32 %v3968_v30  ;;  %v3969_v4 = vadd.f32 1e-05, %v3953_v27  ;;  %v3958_v37 = vmul.f32 0.03125, %v3932_v38 }
 0xdbd   :  { %v4020_v49 = vmul.f32 %v7022_v51, %v3998_v57  ;;  %v3999_v54 = vmul.f32 %v4958_v44, %v6927_v20  ;;  %v3935_v42 = vpop.xlane.xlu1 %3934 }
 0xdbe   :  { %v4960_v3 = vpop.eup %4959  ;;  %4969 = vrsqrt.f32 %v3969_v4  ;;  %v3974_v2 = vadd.f32 1e-05, %v3958_v37  ;;  %v3959_v52 = vmul.f32 0.03125, %v3935_v42 }
 0xdbf   :  { %v4042_v47 = vadd.f32 %v7028_v53, %v4020_v49  ;;  %v4021_v6 = vmul.f32 %v7022_v51, %v3999_v54  ;;  %v3996_v45 = vmul.f32 %v4960_v3, %v6932_v29  ;;  %v3926_v35 = vpop.xlane.xlu0 %3925 }
 0xdc0   :  { %v4962_v24 = vpop.eup %4961  ;;  %4971 = vrsqrt.f32 %v3974_v2  ;;  %v3975_v11 = vadd.f32 1e-05, %v3959_v52  ;;  %v3956_v32 = vmul.f32 0.03125, %v3926_v35 }
 0xdc1   :  { %v4058_v48 = vadd.f32 %v4042_v47, %v6598_v12  ;;  %v4043_v20 = vadd.f32 %v7028_v53, %v4021_v6  ;;  %v4018_v23 = vmul.f32 %v7022_v51, %v3996_v45  ;;  %v3997_v22 = vmul.f32 %v4962_v24, %v6938_v40  ;;  %v3929_v56 = vpop.xlane.xlu1 %3928 }
 0xdc2   :  { %v4964_v0 = vpop.eup %4963  ;;  %4973 = vrsqrt.f32 %v3975_v11  ;;  %v3972_v39 = vadd.f32 1e-05, %v3956_v32  ;;  %v3957_v63 = vmul.f32 0.03125, %v3929_v56 }
 0xdc3   :  { %4074 = vst.msk [vmem:[%s7172_s15 + $0x10] sm:$0xff] %vm111_vm0, %v4058_v48  ;;  %v4059_v29 = vadd.f32 %v4043_v20, %v6606_v61  ;;  %v4040_v12 = vadd.f32 %v7028_v53, %v4018_v23  ;;  %v4019_v5 = vmul.f32 %v7022_v51, %v3997_v22  ;;  %v4002_v19 = vmul.f32 %v4964_v0, %v6944_v58 }
 0xdc4   :  { %v4966_v16 = vpop.eup %4965  ;;  %4975 = vrsqrt.f32 %v3972_v39  ;;  %v3973_v40 = vadd.f32 1e-05, %v3957_v63  ;;  %v3938_v31 = vpop.xlane.xlu0 %3937 }
 0xdc5   :  { %4075 = vst.msk [vmem:[%s7172_s15 + $0x18] sm:$0xff] %vm111_vm0, %v4059_v29  ;;  %v4056_v30 = vadd.f32 %v4040_v12, %v6580_v55  ;;  %v4041_v27 = vadd.f32 %v7028_v53, %v4019_v5  ;;  %v4024_v61 = vmul.f32 %v7022_v51, %v4002_v19  ;;  %v4003_v57 = vmul.f32 %v4966_v16, %v6950_v1 }
 0xdc6   :  { %v4968_v38 = vpop.eup %4967  ;;  %4977 = vrsqrt.f32 %v3973_v40  ;;  %v3960_v58 = vmul.f32 0.03125, %v3938_v31  ;;  %v3941_v44 = vpop.xlane.xlu1 %3940 }
 0xdc7   :  { %4072 = vst.msk [vmem:[%s7172_s15] sm:$0xff] %vm111_vm0, %v4056_v30  ;;  %v4057_v4 = vadd.f32 %v4041_v27, %v6585_v26  ;;  %v4046_v37 = vadd.f32 %v7028_v53, %v4024_v61  ;;  %v4025_v55 = vmul.f32 %v7022_v51, %v4003_v57  ;;  %v4000_v49 = vmul.f32 %v4968_v38, %v6956_v28 }
 0xdc8   :  { %v4970_v54 = vpop.eup %4969  ;;  %v3976_v42 = vadd.f32 1e-05, %v3960_v58  ;;  %v3961_v1 = vmul.f32 0.03125, %v3941_v44  ;;  %v3944_v3 = vpop.xlane.xlu0 %3943 }
 0xdc9   :  { %4073 = vst.msk [vmem:[%s7172_s15 + $0x8] sm:$0xff] %vm111_vm0, %v4057_v4  ;;  %v4062_v2 = vadd.f32 %v4046_v37, %v6636_v62  ;;  %v4047_v52 = vadd.f32 %v7028_v53, %v4025_v55  ;;  %v4022_v26 = vmul.f32 %v7022_v51, %v4000_v49  ;;  %v4001_v47 = vmul.f32 %v4970_v54, %v6962_v34 }
 0xdca   :  { %v4972_v6 = vpop.eup %4971  ;;  %4979 = vrsqrt.f32 %v3976_v42  ;;  %v3977_v28 = vadd.f32 1e-05, %v3961_v1  ;;  %v3962_v45 = vmul.f32 0.03125, %v3944_v3  ;;  %v3947_v35 = vpop.xlane.xlu1 %3946 }
 0xdcb   :  { %4078 = vst.msk [vmem:[%s7172_s15 + $0x30] sm:$0xff] %vm111_vm0, %v4062_v2  ;;  %v4063_v24 = vadd.f32 %v4047_v52, %v6641_v17  ;;  %v4044_v62 = vadd.f32 %v7028_v53, %v4022_v26  ;;  %v4023_v11 = vmul.f32 %v7022_v51, %v4001_v47  ;;  %v4006_v32 = vmul.f32 %v4972_v6, %v6968_v41 }
 0xdcc   :  { %v4974_v48 = vpop.eup %4973  ;;  %4981 = vrsqrt.f32 %v3977_v28  ;;  %v3978_v34 = vadd.f32 1e-05, %v3962_v45  ;;  %v3963_v20 = vmul.f32 0.03125, %v3947_v35 }
 0xdcd   :  { %4079 = vst.msk [vmem:[%s7172_s15 + $0x38] sm:$0xff] %vm111_vm0, %v4063_v24  ;;  %v4060_v23 = vadd.f32 %v4044_v62, %v6616_v36  ;;  %v4045_v22 = vadd.f32 %v7028_v53, %v4023_v11  ;;  %v4028_v17 = vmul.f32 %v7022_v51, %v4006_v32  ;;  %v4007_v56 = vmul.f32 %v4974_v48, %v6974_v13 }
 0xdce   :  { %v4976_v0 = vpop.eup %4975  ;;  %4983 = vrsqrt.f32 %v3978_v34  ;;  %v3979_v41 = vadd.f32 1e-05, %v3963_v20 }
 0xdcf   :  { %4076 = vst.msk [vmem:[%s7172_s15 + $0x20] sm:$0xff] %vm111_vm0, %v4060_v23  ;;  %v4061_v39 = vadd.f32 %v4045_v22, %v6625_v14  ;;  %v4050_v63 = vadd.f32 %v7028_v53, %v4028_v17  ;;  %v4029_v36 = vmul.f32 %v7022_v51, %v4007_v56  ;;  %v4004_v29 = vmul.f32 %v4976_v0, %v6980_v15 }
 0xdd0   :  { %v4978_v12 = vpop.eup %4977  ;;  %4985 = vrsqrt.f32 %v3979_v41 }
 0xdd1   :  { %4077 = vst.msk [vmem:[%s7172_s15 + $0x28] sm:$0xff] %vm111_vm0, %v4061_v39  ;;  %v4066_v13 = vadd.f32 %v4050_v63, %v6673_v9  ;;  %v4051_v5 = vadd.f32 %v7028_v53, %v4029_v36  ;;  %v4026_v19 = vmul.f32 %v7022_v51, %v4004_v29  ;;  %v4005_v14 = vmul.f32 %v4978_v12, %v6986_v46 }
 0xdd3   :  { %4082 = vst.msk [vmem:[%s7172_s15 + $0x50] sm:$0xff] %vm111_vm0, %v4066_v13  ;;  %v4067_v15 = vadd.f32 %v4051_v5, %v6680_v25  ;;  %v4048_v16 = vadd.f32 %v7028_v53, %v4026_v19  ;;  %v4027_v40 = vmul.f32 %v7022_v51, %v4005_v14 }
 0xdd4   :  { %v4980_v31 = vpop.eup %4979 }
 0xdd5   :  { %4083 = vst.msk [vmem:[%s7172_s15 + $0x58] sm:$0xff] %vm111_vm0, %v4067_v15  ;;  %v4064_v9 = vadd.f32 %v4048_v16, %v6654_v8  ;;  %v4049_v46 = vadd.f32 %v7028_v53, %v4027_v40  ;;  %v4008_v30 = vmul.f32 %v4980_v31, %v6995_v59 }
 0xdd6   :  { %v4982_v27 = vpop.eup %4981 }
 0xdd7   :  { %4080 = vst.msk [vmem:[%s7172_s15 + $0x40] sm:$0xff] %vm111_vm0, %v4064_v9  ;;  %v4065_v25 = vadd.f32 %v4049_v46, %v6660_v60  ;;  %v4030_v61 = vmul.f32 %v7022_v51, %v4008_v30  ;;  %v4009_v57 = vmul.f32 %v4982_v27, %v6999_v10 }
 0xdd8   :  { %v4984_v38 = vpop.eup %4983 }
 0xdd9   :  { %4081 = vst.msk [vmem:[%s7172_s15 + $0x48] sm:$0xff] %vm111_vm0, %v4065_v25  ;;  %v4052_v8 = vadd.f32 %v7028_v53, %v4030_v61  ;;  %v4031_v59 = vmul.f32 %v7022_v51, %v4009_v57  ;;  %v4010_v58 = vmul.f32 %v4984_v38, %v7004_v50 }
 0xdda   :  { %v4986_v44 = vpop.eup %4985 }
 0xddb   :  { %v4068_v4 = vadd.f32 %v4052_v8, %v6692_v33  ;;  %v4053_v60 = vadd.f32 %v7028_v53, %v4031_v59  ;;  %v4032_v37 = vmul.f32 %v7022_v51, %v4010_v58  ;;  %v4011_v10 = vmul.f32 %v4986_v44, %v7010_v21 }
 0xddd   :  { %4084 = vst.msk [vmem:[%s7172_s15 + $0x60] sm:$0xff] %vm111_vm0, %v4068_v4  ;;  %v4069_v55 = vadd.f32 %v4053_v60, %v6698_v7  ;;  %v4054_v49 = vadd.f32 %v7028_v53, %v4032_v37  ;;  %v4033_v50 = vmul.f32 %v7022_v51, %v4011_v10 }
 0xddf   :  { %4085 = vst.msk [vmem:[%s7172_s15 + $0x68] sm:$0xff] %vm111_vm0, %v4069_v55  ;;  %v4070_v33 = vadd.f32 %v4054_v49, %v6709_v18  ;;  %v4055_v21 = vadd.f32 %v7028_v53, %v4033_v50 }
 0xde1   :  { %4086 = vst.msk [vmem:[%s7172_s15 + $0x70] sm:$0xff] %vm111_vm0, %v4070_v33  ;;  %v4071_v7 = vadd.f32 %v4055_v21, %v6715_v43 }
 0xde3   :  { %4087 = vst.msk [vmem:[%s7172_s15 + $0x78] sm:$0xff] %vm111_vm0, %v4071_v7 }
 0xde4   :  { %4092 = vsyncpa [#allocation3], 1 }

</bundles_post_ra>
